<compile_context>
chip_gen: v5e
topology: v5e:2x2
jax: 0.10.0
libtpu: 0.0.40
codegen_flags: <defaults>
</compile_context>

<pallas_src>
import jax
import jax.numpy as jnp
from jax.experimental import pallas as pl
from jax.experimental.pallas import tpu as pltpu

C_IN, C_OUT, K = 3, 8, 3
NP = C_OUT // 2              # channel pairs packed per 128-lane vreg
MIN_V, MAX_V = 0.0, 0.5


def _pick_ht(hh):
    """Accumulator sub-tile height: 4 accs x (HT, 128) f32 <= 16 vregs at HT=32."""
    for t in (32, 16, 8):
        if hh % t == 0:
            return t
    return hh


def _pick_hsplit(n, h):
    """A 2-way H split only buys anything on a 2-TensorCore chip (v7x) with N==1;
    on v5e/v6e it is pure per-grid-step overhead for this tiny workload."""
    try:
        kind = jax.devices()[0].device_kind.lower()
    except Exception:
        return 1
    if "7" in kind and n == 1 and h % 16 == 0:
        return 2
    return 1


def _make_kernel(n_hsplit, H, W, HT):
    HH = H // n_hsplit

    def kernel(w_ref, b_ref, x_ref, o_ref, xp_ref):
        # w_ref : (27, NP, 2W)       VMEM  pre-broadcast flipped weights (tap, pair, lanes)
        # b_ref : (NP, 2W)           VMEM  pre-broadcast bias
        # x_ref : (C_IN, H, W)       VMEM  full input image (this batch element)
        # o_ref : (NP, HH, 2W)       VMEM  packed output rows of this H-(half)
        # xp_ref: (C_IN, HH+2, W+2)  VMEM  zero-padded input slab (row halo included)

        # ---- fused zero padding: halo rows only + padded interior rows built in regs ----
        zrow = jnp.zeros((C_IN, 1, W + 2), jnp.float32)
        if n_hsplit == 1:
            zc = jnp.zeros((C_IN, HH, 1), jnp.float32)
            xp_ref[:, 0:1, :] = zrow
            xp_ref[:, HH + 1:HH + 2, :] = zrow
            xp_ref[:, 1:HH + 1, :] = jnp.concatenate([zc, x_ref[...], zc], axis=-1)
        else:
            hb = pl.program_id(1)
            zc = jnp.zeros((C_IN, HH + 1, 1), jnp.float32)

            @pl.when(hb == 0)
            def _():   # top half: zero pad row above, input rows [0, HH] (incl. halo)
                xp_ref[:, 0:1, :] = zrow
                xp_ref[:, 1:HH + 2, :] = jnp.concatenate(
                    [zc, x_ref[:, 0:HH + 1, :], zc], axis=-1)

            @pl.when(hb == n_hsplit - 1)
            def _():   # bottom half: input rows [HH-1, H) (incl. halo), zero pad below
                xp_ref[:, HH + 1:HH + 2, :] = zrow
                xp_ref[:, 0:HH + 1, :] = jnp.concatenate(
                    [zc, x_ref[:, H - HH - 1:H, :], zc], axis=-1)

        # ---- conv + bias + clamp, HT-row accumulator sub-tiles ---------------------------
        for st in range(HH // HT):
            r0 = st * HT
            # acc[p] lanes [0,W) = out channel 2p, lanes [W,2W) = channel 2p+1
            accs = [jnp.broadcast_to(b_ref[p, :], (HT, 2 * W)) for p in range(NP)]
            for ic in range(C_IN):
                for kh in range(K):
                    # one padded-row slab per (ic, kh); kw shifts derived in-register
                    rows = xp_ref[ic, r0 + kh:r0 + kh + HT, :]          # (HT, W+2)
                    for kw in range(K):
                        slab = rows[:, kw:kw + W]                       # (HT, W)
                        slab2 = jnp.concatenate([slab, slab], axis=-1)  # (HT, 2W)
                        t = (ic * K + kh) * K + kw
                        for p in range(NP):
                            accs[p] = accs[p] + slab2 * w_ref[t, p, :]
            for p in range(NP):
                # clamp(min=0) then clamp_max(0.5)  ==  clip to [0, 0.5]
                o_ref[p, r0:r0 + HT, :] = jnp.clip(accs[p], MIN_V, MAX_V)

    return kernel


def make_deconv_clamp(weight, bias):
    """weight: (C_IN, C_OUT, K, K) (PyTorch ConvTranspose2d layout); bias: (C_OUT,).
    Returns a jitted fn mapping x:(N, C_IN, H, W) -> (N, C_OUT, H, W)."""
    # Setup-time (hoisted) weight transform: transpose-conv == regular conv with
    # in/out channels swapped and the kernel spatially flipped.
    wf = jnp.transpose(jnp.asarray(weight, jnp.float32), (1, 0, 2, 3))[:, :, ::-1, ::-1]
    # (C_OUT, C_IN, K, K) -> one row per tap t=(ic*K+kh)*K+kw, columns = out channels.
    w_taps = jnp.transpose(wf, (1, 2, 3, 0)).reshape(C_IN * K * K, C_OUT)
    b = jnp.asarray(bias, jnp.float32)

    @jax.jit
    def fwd(x):
        x = x.astype(jnp.float32)
        N, c_in, H, W = x.shape
        assert c_in == C_IN
        assert W % 64 == 0, "lane-dense channel pairing assumes W a multiple of 64"
        n_hsplit = _pick_hsplit(N, H)
        HH = H // n_hsplit
        HT = _pick_ht(HH)
        assert HH % HT == 0 and HH >= 2

        # Pre-broadcast weight / bias tables: lane halves = the two paired channels.
        w_tab = jnp.repeat(w_taps.reshape(C_IN * K * K, NP, 2), W, axis=-1)  # (27, NP, 2W)
        b_tab = jnp.repeat(b.reshape(NP, 2), W, axis=-1)                      # (NP, 2W)

        packed = pl.pallas_call(
            _make_kernel(n_hsplit, H, W, HT),
            out_shape=jax.ShapeDtypeStruct((N, NP, H, 2 * W), jnp.float32),
            grid=(N, n_hsplit),
            in_specs=[
                pl.BlockSpec((C_IN * K * K, NP, 2 * W), lambda n, hb: (0, 0, 0)),
                pl.BlockSpec((NP, 2 * W), lambda n, hb: (0, 0)),
                pl.BlockSpec((None, C_IN, H, W), lambda n, hb: (n, 0, 0, 0)),
            ],
            out_specs=pl.BlockSpec((None, NP, HH, 2 * W), lambda n, hb: (n, 0, hb, 0)),
            scratch_shapes=[pltpu.VMEM((C_IN, HH + 2, W + 2), jnp.float32)],
            compiler_params=pltpu.CompilerParams(
                dimension_semantics=("parallel", "parallel")),
        )(w_tab, b_tab, x)

        # Un-pack channel pairs: (N, NP, H, 2W) -> (N, C_OUT, H, W). Pure layout plumbing.
        y = packed.reshape(N, NP, H, 2, W)
        y = jnp.transpose(y, (0, 1, 3, 2, 4)).reshape(N, C_OUT, H, W)
        return y

    return fwd


def _reference(x, weight, bias):
    # Pure-JAX reference: equivalent regular conv with flipped, channel-swapped kernel.
    wf = jnp.transpose(weight, (1, 0, 2, 3))[:, :, ::-1, ::-1]  # OIHW
    y = jax.lax.conv_general_dilated(
        x, wf, window_strides=(1, 1), padding=((1, 1), (1, 1)),
        dimension_numbers=("NCHW", "OIHW", "NCHW"))
    y = y + bias[None, :, None, None]
    return jnp.clip(y, MIN_V, MAX_V)


if __name__ == "__main__":
    key = jax.random.PRNGKey(0)
    kx, kw, kb = jax.random.split(key, 3)

    N, H, W = 1, 64, 64
    x = jax.random.normal(kx, (N, C_IN, H, W), dtype=jnp.float32)

    # Deterministic parameter init (matches PyTorch uniform(-bound, bound) style).
    fan_in = C_OUT * K * K  # ConvTranspose2d fan-in convention
    bound = 1.0 / jnp.sqrt(fan_in)
    weight = jax.random.uniform(kw, (C_IN, C_OUT, K, K), jnp.float32, -bound, bound)
    bias = jax.random.uniform(kb, (C_OUT,), jnp.float32, -bound, bound)

    fwd = make_deconv_clamp(weight, bias)
    out = jax.block_until_ready(fwd(x))

    ref = _reference(x, weight, bias)
    assert out.shape == (N, C_OUT, H, W)
    assert jnp.allclose(out, ref, atol=1e-5, rtol=1e-5), "mismatch vs reference"

    print("KERNEL_OK")
</pallas_src>

<mosaic_0001>
module attributes {stable_mosaic.version = 11 : i64} {
  func.func @kernel(%arg0: i32, %arg1: i32, %arg2: memref<27x4x128xf32, #tpu.memory_space<vmem>>, %arg3: memref<4x128xf32, #tpu.memory_space<vmem>>, %arg4: memref<1x3x64x64xf32, #tpu.memory_space<vmem>>, %arg5: memref<1x4x64x128xf32, #tpu.memory_space<vmem>>, %arg6: memref<3x66x66xf32, #tpu.memory_space<vmem>>) attributes {dimension_semantics = [#tpu.dimension_semantics<parallel>, #tpu.dimension_semantics<parallel>], iteration_bounds = array<i64: 1, 1>, scalar_prefetch = 0 : i64, scratch_operands = 1 : i64, tpu.core_type = #tpu.core_type<tc>, window_params = [{pipeline_mode = #tpu.pipeline_mode<synchronous>, transform_indices = @transform_0, window_bounds = array<i64: 27, 4, 128>}, {pipeline_mode = #tpu.pipeline_mode<synchronous>, transform_indices = @transform_1, window_bounds = array<i64: 4, 128>}, {transform_indices = @transform_2, window_bounds = array<i64: 1, 3, 64, 64>}, {transform_indices = @transform_3, window_bounds = array<i64: 1, 4, 64, 128>}]} {
    %cst = arith.constant 0.000000e+00 : f32
    %0 = vector.broadcast %cst : f32 to vector<3x1x66xf32>
    %cst_0 = arith.constant 0.000000e+00 : f32
    %1 = vector.broadcast %cst_0 : f32 to vector<3x64x1xf32>
    %c0 = arith.constant 0 : index
    %c0_1 = arith.constant 0 : index
    %c0_2 = arith.constant 0 : index
    %2 = vector.load %arg6[%c0, %c0_1, %c0_2] : memref<3x66x66xf32, #tpu.memory_space<vmem>>, vector<3x1x66xf32>
    tpu.vector_store %arg6[%c0, %c0_1, %c0_2], %0 {strides = array<i32>} : memref<3x66x66xf32, #tpu.memory_space<vmem>>, vector<3x1x66xf32>,
    %c0_3 = arith.constant 0 : index
    %c65 = arith.constant 65 : index
    %c0_4 = arith.constant 0 : index
    %3 = vector.load %arg6[%c0_3, %c65, %c0_4] : memref<3x66x66xf32, #tpu.memory_space<vmem>>, vector<3x1x66xf32>
    tpu.vector_store %arg6[%c0_3, %c65, %c0_4], %0 {strides = array<i32>} : memref<3x66x66xf32, #tpu.memory_space<vmem>>, vector<3x1x66xf32>,
    %c0_5 = arith.constant 0 : index
    %c0_6 = arith.constant 0 : index
    %c0_7 = arith.constant 0 : index
    %c0_8 = arith.constant 0 : index
    %4 = vector.load %arg4[%c0_5, %c0_6, %c0_7, %c0_8] : memref<1x3x64x64xf32, #tpu.memory_space<vmem>>, vector<1x3x64x64xf32>
    %5 = vector.shape_cast %4 : vector<1x3x64x64xf32> to vector<3x64x64xf32>
    %6 = tpu.concatenate %1, %5, %1 in 2 : vector<3x64x1xf32>, vector<3x64x64xf32>, vector<3x64x1xf32> -> vector<3x64x66xf32>
    %c0_9 = arith.constant 0 : index
    %c1 = arith.constant 1 : index
    %c0_10 = arith.constant 0 : index
    %7 = vector.load %arg6[%c0_9, %c1, %c0_10] : memref<3x66x66xf32, #tpu.memory_space<vmem>>, vector<3x64x66xf32>
    tpu.vector_store %arg6[%c0_9, %c1, %c0_10], %6 {strides = array<i32>} : memref<3x66x66xf32, #tpu.memory_space<vmem>>, vector<3x64x66xf32>,
    %c0_11 = arith.constant 0 : index
    %c0_12 = arith.constant 0 : index
    %8 = vector.load %arg3[%c0_11, %c0_12] : memref<4x128xf32, #tpu.memory_space<vmem>>, vector<1x128xf32>
    %9 = vector.shape_cast %8 : vector<1x128xf32> to vector<128xf32>
    %10 = vector.shape_cast %9 : vector<128xf32> to vector<1x128xf32>
    %11 = vector.broadcast %10 : vector<1x128xf32> to vector<32x128xf32>
    %c1_13 = arith.constant 1 : index
    %c0_14 = arith.constant 0 : index
    %12 = vector.load %arg3[%c1_13, %c0_14] : memref<4x128xf32, #tpu.memory_space<vmem>>, vector<1x128xf32>
    %13 = vector.shape_cast %12 : vector<1x128xf32> to vector<128xf32>
    %14 = vector.shape_cast %13 : vector<128xf32> to vector<1x128xf32>
    %15 = vector.broadcast %14 : vector<1x128xf32> to vector<32x128xf32>
    %c2 = arith.constant 2 : index
    %c0_15 = arith.constant 0 : index
    %16 = vector.load %arg3[%c2, %c0_15] : memref<4x128xf32, #tpu.memory_space<vmem>>, vector<1x128xf32>
    %17 = vector.shape_cast %16 : vector<1x128xf32> to vector<128xf32>
    %18 = vector.shape_cast %17 : vector<128xf32> to vector<1x128xf32>
    %19 = vector.broadcast %18 : vector<1x128xf32> to vector<32x128xf32>
    %c3 = arith.constant 3 : index
    %c0_16 = arith.constant 0 : index
    %20 = vector.load %arg3[%c3, %c0_16] : memref<4x128xf32, #tpu.memory_space<vmem>>, vector<1x128xf32>
    %21 = vector.shape_cast %20 : vector<1x128xf32> to vector<128xf32>
    %22 = vector.shape_cast %21 : vector<128xf32> to vector<1x128xf32>
    %23 = vector.broadcast %22 : vector<1x128xf32> to vector<32x128xf32>
    %c0_17 = arith.constant 0 : index
    %c0_18 = arith.constant 0 : index
    %c0_19 = arith.constant 0 : index
    %24 = vector.load %arg6[%c0_17, %c0_18, %c0_19] : memref<3x66x66xf32, #tpu.memory_space<vmem>>, vector<1x32x66xf32>
    %25 = vector.shape_cast %24 : vector<1x32x66xf32> to vector<32x66xf32>
    %26 = vector.extract_strided_slice %25 {offsets = [0, 0], sizes = [32, 64], strides = [1, 1]} : vector<32x66xf32> to vector<32x64xf32>
    %27 = tpu.concatenate %26, %26 in 1 : vector<32x64xf32>, vector<32x64xf32> -> vector<32x128xf32>
    %c0_20 = arith.constant 0 : index
    %c0_21 = arith.constant 0 : index
    %c0_22 = arith.constant 0 : index
    %28 = vector.load %arg2[%c0_20, %c0_21, %c0_22] : memref<27x4x128xf32, #tpu.memory_space<vmem>>, vector<1x1x128xf32>
    %29 = vector.shape_cast %28 : vector<1x1x128xf32> to vector<128xf32>
    %30 = vector.shape_cast %29 : vector<128xf32> to vector<1x128xf32>
    %31 = vector.broadcast %30 : vector<1x128xf32> to vector<32x128xf32>
    %32 = arith.mulf %27, %31 : vector<32x128xf32>
    %33 = arith.addf %11, %32 : vector<32x128xf32>
    %c0_23 = arith.constant 0 : index
    %c1_24 = arith.constant 1 : index
    %c0_25 = arith.constant 0 : index
    %34 = vector.load %arg2[%c0_23, %c1_24, %c0_25] : memref<27x4x128xf32, #tpu.memory_space<vmem>>, vector<1x1x128xf32>
    %35 = vector.shape_cast %34 : vector<1x1x128xf32> to vector<128xf32>
    %36 = vector.shape_cast %35 : vector<128xf32> to vector<1x128xf32>
    %37 = vector.broadcast %36 : vector<1x128xf32> to vector<32x128xf32>
    %38 = arith.mulf %27, %37 : vector<32x128xf32>
    %39 = arith.addf %15, %38 : vector<32x128xf32>
    %c0_26 = arith.constant 0 : index
    %c2_27 = arith.constant 2 : index
    %c0_28 = arith.constant 0 : index
    %40 = vector.load %arg2[%c0_26, %c2_27, %c0_28] : memref<27x4x128xf32, #tpu.memory_space<vmem>>, vector<1x1x128xf32>
    %41 = vector.shape_cast %40 : vector<1x1x128xf32> to vector<128xf32>
    %42 = vector.shape_cast %41 : vector<128xf32> to vector<1x128xf32>
    %43 = vector.broadcast %42 : vector<1x128xf32> to vector<32x128xf32>
    %44 = arith.mulf %27, %43 : vector<32x128xf32>
    %45 = arith.addf %19, %44 : vector<32x128xf32>
    %c0_29 = arith.constant 0 : index
    %c3_30 = arith.constant 3 : index
    %c0_31 = arith.constant 0 : index
    %46 = vector.load %arg2[%c0_29, %c3_30, %c0_31] : memref<27x4x128xf32, #tpu.memory_space<vmem>>, vector<1x1x128xf32>
    %47 = vector.shape_cast %46 : vector<1x1x128xf32> to vector<128xf32>
    %48 = vector.shape_cast %47 : vector<128xf32> to vector<1x128xf32>
    %49 = vector.broadcast %48 : vector<1x128xf32> to vector<32x128xf32>
    %50 = arith.mulf %27, %49 : vector<32x128xf32>
    %51 = arith.addf %23, %50 : vector<32x128xf32>
    %52 = vector.extract_strided_slice %25 {offsets = [0, 1], sizes = [32, 64], strides = [1, 1]} : vector<32x66xf32> to vector<32x64xf32>
    %53 = tpu.concatenate %52, %52 in 1 : vector<32x64xf32>, vector<32x64xf32> -> vector<32x128xf32>
    %c1_32 = arith.constant 1 : index
    %c0_33 = arith.constant 0 : index
    %c0_34 = arith.constant 0 : index
    %54 = vector.load %arg2[%c1_32, %c0_33, %c0_34] : memref<27x4x128xf32, #tpu.memory_space<vmem>>, vector<1x1x128xf32>
    %55 = vector.shape_cast %54 : vector<1x1x128xf32> to vector<128xf32>
    %56 = vector.shape_cast %55 : vector<128xf32> to vector<1x128xf32>
    %57 = vector.broadcast %56 : vector<1x128xf32> to vector<32x128xf32>
    %58 = arith.mulf %53, %57 : vector<32x128xf32>
    %59 = arith.addf %33, %58 : vector<32x128xf32>
    %c1_35 = arith.constant 1 : index
    %c1_36 = arith.constant 1 : index
    %c0_37 = arith.constant 0 : index
    %60 = vector.load %arg2[%c1_35, %c1_36, %c0_37] : memref<27x4x128xf32, #tpu.memory_space<vmem>>, vector<1x1x128xf32>
    %61 = vector.shape_cast %60 : vector<1x1x128xf32> to vector<128xf32>
    %62 = vector.shape_cast %61 : vector<128xf32> to vector<1x128xf32>
    %63 = vector.broadcast %62 : vector<1x128xf32> to vector<32x128xf32>
    %64 = arith.mulf %53, %63 : vector<32x128xf32>
    %65 = arith.addf %39, %64 : vector<32x128xf32>
    %c1_38 = arith.constant 1 : index
    %c2_39 = arith.constant 2 : index
    %c0_40 = arith.constant 0 : index
    %66 = vector.load %arg2[%c1_38, %c2_39, %c0_40] : memref<27x4x128xf32, #tpu.memory_space<vmem>>, vector<1x1x128xf32>
    %67 = vector.shape_cast %66 : vector<1x1x128xf32> to vector<128xf32>
    %68 = vector.shape_cast %67 : vector<128xf32> to vector<1x128xf32>
    %69 = vector.broadcast %68 : vector<1x128xf32> to vector<32x128xf32>
    %70 = arith.mulf %53, %69 : vector<32x128xf32>
    %71 = arith.addf %45, %70 : vector<32x128xf32>
    %c1_41 = arith.constant 1 : index
    %c3_42 = arith.constant 3 : index
    %c0_43 = arith.constant 0 : index
    %72 = vector.load %arg2[%c1_41, %c3_42, %c0_43] : memref<27x4x128xf32, #tpu.memory_space<vmem>>, vector<1x1x128xf32>
    %73 = vector.shape_cast %72 : vector<1x1x128xf32> to vector<128xf32>
    %74 = vector.shape_cast %73 : vector<128xf32> to vector<1x128xf32>
    %75 = vector.broadcast %74 : vector<1x128xf32> to vector<32x128xf32>
    %76 = arith.mulf %53, %75 : vector<32x128xf32>
    %77 = arith.addf %51, %76 : vector<32x128xf32>
    %78 = vector.extract_strided_slice %25 {offsets = [0, 2], sizes = [32, 64], strides = [1, 1]} : vector<32x66xf32> to vector<32x64xf32>
    %79 = tpu.concatenate %78, %78 in 1 : vector<32x64xf32>, vector<32x64xf32> -> vector<32x128xf32>
    %c2_44 = arith.constant 2 : index
    %c0_45 = arith.constant 0 : index
    %c0_46 = arith.constant 0 : index
    %80 = vector.load %arg2[%c2_44, %c0_45, %c0_46] : memref<27x4x128xf32, #tpu.memory_space<vmem>>, vector<1x1x128xf32>
    %81 = vector.shape_cast %80 : vector<1x1x128xf32> to vector<128xf32>
    %82 = vector.shape_cast %81 : vector<128xf32> to vector<1x128xf32>
    %83 = vector.broadcast %82 : vector<1x128xf32> to vector<32x128xf32>
    %84 = arith.mulf %79, %83 : vector<32x128xf32>
    %85 = arith.addf %59, %84 : vector<32x128xf32>
    %c2_47 = arith.constant 2 : index
    %c1_48 = arith.constant 1 : index
    %c0_49 = arith.constant 0 : index
    %86 = vector.load %arg2[%c2_47, %c1_48, %c0_49] : memref<27x4x128xf32, #tpu.memory_space<vmem>>, vector<1x1x128xf32>
    %87 = vector.shape_cast %86 : vector<1x1x128xf32> to vector<128xf32>
    %88 = vector.shape_cast %87 : vector<128xf32> to vector<1x128xf32>
    %89 = vector.broadcast %88 : vector<1x128xf32> to vector<32x128xf32>
    %90 = arith.mulf %79, %89 : vector<32x128xf32>
    %91 = arith.addf %65, %90 : vector<32x128xf32>
    %c2_50 = arith.constant 2 : index
    %c2_51 = arith.constant 2 : index
    %c0_52 = arith.constant 0 : index
    %92 = vector.load %arg2[%c2_50, %c2_51, %c0_52] : memref<27x4x128xf32, #tpu.memory_space<vmem>>, vector<1x1x128xf32>
    %93 = vector.shape_cast %92 : vector<1x1x128xf32> to vector<128xf32>
    %94 = vector.shape_cast %93 : vector<128xf32> to vector<1x128xf32>
    %95 = vector.broadcast %94 : vector<1x128xf32> to vector<32x128xf32>
    %96 = arith.mulf %79, %95 : vector<32x128xf32>
    %97 = arith.addf %71, %96 : vector<32x128xf32>
    %c2_53 = arith.constant 2 : index
    %c3_54 = arith.constant 3 : index
    %c0_55 = arith.constant 0 : index
    %98 = vector.load %arg2[%c2_53, %c3_54, %c0_55] : memref<27x4x128xf32, #tpu.memory_space<vmem>>, vector<1x1x128xf32>
    %99 = vector.shape_cast %98 : vector<1x1x128xf32> to vector<128xf32>
    %100 = vector.shape_cast %99 : vector<128xf32> to vector<1x128xf32>
    %101 = vector.broadcast %100 : vector<1x128xf32> to vector<32x128xf32>
    %102 = arith.mulf %79, %101 : vector<32x128xf32>
    %103 = arith.addf %77, %102 : vector<32x128xf32>
    %c0_56 = arith.constant 0 : index
    %c1_57 = arith.constant 1 : index
    %c0_58 = arith.constant 0 : index
    %104 = vector.load %arg6[%c0_56, %c1_57, %c0_58] : memref<3x66x66xf32, #tpu.memory_space<vmem>>, vector<1x32x66xf32>
    %105 = vector.shape_cast %104 : vector<1x32x66xf32> to vector<32x66xf32>
    %106 = vector.extract_strided_slice %105 {offsets = [0, 0], sizes = [32, 64], strides = [1, 1]} : vector<32x66xf32> to vector<32x64xf32>
    %107 = tpu.concatenate %106, %106 in 1 : vector<32x64xf32>, vector<32x64xf32> -> vector<32x128xf32>
    %c3_59 = arith.constant 3 : index
    %c0_60 = arith.constant 0 : index
    %c0_61 = arith.constant 0 : index
    %108 = vector.load %arg2[%c3_59, %c0_60, %c0_61] : memref<27x4x128xf32, #tpu.memory_space<vmem>>, vector<1x1x128xf32>
    %109 = vector.shape_cast %108 : vector<1x1x128xf32> to vector<128xf32>
    %110 = vector.shape_cast %109 : vector<128xf32> to vector<1x128xf32>
    %111 = vector.broadcast %110 : vector<1x128xf32> to vector<32x128xf32>
    %112 = arith.mulf %107, %111 : vector<32x128xf32>
    %113 = arith.addf %85, %112 : vector<32x128xf32>
    %c3_62 = arith.constant 3 : index
    %c1_63 = arith.constant 1 : index
    %c0_64 = arith.constant 0 : index
    %114 = vector.load %arg2[%c3_62, %c1_63, %c0_64] : memref<27x4x128xf32, #tpu.memory_space<vmem>>, vector<1x1x128xf32>
    %115 = vector.shape_cast %114 : vector<1x1x128xf32> to vector<128xf32>
    %116 = vector.shape_cast %115 : vector<128xf32> to vector<1x128xf32>
    %117 = vector.broadcast %116 : vector<1x128xf32> to vector<32x128xf32>
    %118 = arith.mulf %107, %117 : vector<32x128xf32>
    %119 = arith.addf %91, %118 : vector<32x128xf32>
    %c3_65 = arith.constant 3 : index
    %c2_66 = arith.constant 2 : index
    %c0_67 = arith.constant 0 : index
    %120 = vector.load %arg2[%c3_65, %c2_66, %c0_67] : memref<27x4x128xf32, #tpu.memory_space<vmem>>, vector<1x1x128xf32>
    %121 = vector.shape_cast %120 : vector<1x1x128xf32> to vector<128xf32>
    %122 = vector.shape_cast %121 : vector<128xf32> to vector<1x128xf32>
    %123 = vector.broadcast %122 : vector<1x128xf32> to vector<32x128xf32>
    %124 = arith.mulf %107, %123 : vector<32x128xf32>
    %125 = arith.addf %97, %124 : vector<32x128xf32>
    %c3_68 = arith.constant 3 : index
    %c3_69 = arith.constant 3 : index
    %c0_70 = arith.constant 0 : index
    %126 = vector.load %arg2[%c3_68, %c3_69, %c0_70] : memref<27x4x128xf32, #tpu.memory_space<vmem>>, vector<1x1x128xf32>
    %127 = vector.shape_cast %126 : vector<1x1x128xf32> to vector<128xf32>
    %128 = vector.shape_cast %127 : vector<128xf32> to vector<1x128xf32>
    %129 = vector.broadcast %128 : vector<1x128xf32> to vector<32x128xf32>
    %130 = arith.mulf %107, %129 : vector<32x128xf32>
    %131 = arith.addf %103, %130 : vector<32x128xf32>
    %132 = vector.extract_strided_slice %105 {offsets = [0, 1], sizes = [32, 64], strides = [1, 1]} : vector<32x66xf32> to vector<32x64xf32>
    %133 = tpu.concatenate %132, %132 in 1 : vector<32x64xf32>, vector<32x64xf32> -> vector<32x128xf32>
    %c4 = arith.constant 4 : index
    %c0_71 = arith.constant 0 : index
    %c0_72 = arith.constant 0 : index
    %134 = vector.load %arg2[%c4, %c0_71, %c0_72] : memref<27x4x128xf32, #tpu.memory_space<vmem>>, vector<1x1x128xf32>
    %135 = vector.shape_cast %134 : vector<1x1x128xf32> to vector<128xf32>
    %136 = vector.shape_cast %135 : vector<128xf32> to vector<1x128xf32>
    %137 = vector.broadcast %136 : vector<1x128xf32> to vector<32x128xf32>
    %138 = arith.mulf %133, %137 : vector<32x128xf32>
    %139 = arith.addf %113, %138 : vector<32x128xf32>
    %c4_73 = arith.constant 4 : index
    %c1_74 = arith.constant 1 : index
    %c0_75 = arith.constant 0 : index
    %140 = vector.load %arg2[%c4_73, %c1_74, %c0_75] : memref<27x4x128xf32, #tpu.memory_space<vmem>>, vector<1x1x128xf32>
    %141 = vector.shape_cast %140 : vector<1x1x128xf32> to vector<128xf32>
    %142 = vector.shape_cast %141 : vector<128xf32> to vector<1x128xf32>
    %143 = vector.broadcast %142 : vector<1x128xf32> to vector<32x128xf32>
    %144 = arith.mulf %133, %143 : vector<32x128xf32>
    %145 = arith.addf %119, %144 : vector<32x128xf32>
    %c4_76 = arith.constant 4 : index
    %c2_77 = arith.constant 2 : index
    %c0_78 = arith.constant 0 : index
    %146 = vector.load %arg2[%c4_76, %c2_77, %c0_78] : memref<27x4x128xf32, #tpu.memory_space<vmem>>, vector<1x1x128xf32>
    %147 = vector.shape_cast %146 : vector<1x1x128xf32> to vector<128xf32>
    %148 = vector.shape_cast %147 : vector<128xf32> to vector<1x128xf32>
    %149 = vector.broadcast %148 : vector<1x128xf32> to vector<32x128xf32>
    %150 = arith.mulf %133, %149 : vector<32x128xf32>
    %151 = arith.addf %125, %150 : vector<32x128xf32>
    %c4_79 = arith.constant 4 : index
    %c3_80 = arith.constant 3 : index
    %c0_81 = arith.constant 0 : index
    %152 = vector.load %arg2[%c4_79, %c3_80, %c0_81] : memref<27x4x128xf32, #tpu.memory_space<vmem>>, vector<1x1x128xf32>
    %153 = vector.shape_cast %152 : vector<1x1x128xf32> to vector<128xf32>
    %154 = vector.shape_cast %153 : vector<128xf32> to vector<1x128xf32>
    %155 = vector.broadcast %154 : vector<1x128xf32> to vector<32x128xf32>
    %156 = arith.mulf %133, %155 : vector<32x128xf32>
    %157 = arith.addf %131, %156 : vector<32x128xf32>
    %158 = vector.extract_strided_slice %105 {offsets = [0, 2], sizes = [32, 64], strides = [1, 1]} : vector<32x66xf32> to vector<32x64xf32>
    %159 = tpu.concatenate %158, %158 in 1 : vector<32x64xf32>, vector<32x64xf32> -> vector<32x128xf32>
    %c5 = arith.constant 5 : index
    %c0_82 = arith.constant 0 : index
    %c0_83 = arith.constant 0 : index
    %160 = vector.load %arg2[%c5, %c0_82, %c0_83] : memref<27x4x128xf32, #tpu.memory_space<vmem>>, vector<1x1x128xf32>
    %161 = vector.shape_cast %160 : vector<1x1x128xf32> to vector<128xf32>
    %162 = vector.shape_cast %161 : vector<128xf32> to vector<1x128xf32>
    %163 = vector.broadcast %162 : vector<1x128xf32> to vector<32x128xf32>
    %164 = arith.mulf %159, %163 : vector<32x128xf32>
    %165 = arith.addf %139, %164 : vector<32x128xf32>
    %c5_84 = arith.constant 5 : index
    %c1_85 = arith.constant 1 : index
    %c0_86 = arith.constant 0 : index
    %166 = vector.load %arg2[%c5_84, %c1_85, %c0_86] : memref<27x4x128xf32, #tpu.memory_space<vmem>>, vector<1x1x128xf32>
    %167 = vector.shape_cast %166 : vector<1x1x128xf32> to vector<128xf32>
    %168 = vector.shape_cast %167 : vector<128xf32> to vector<1x128xf32>
    %169 = vector.broadcast %168 : vector<1x128xf32> to vector<32x128xf32>
    %170 = arith.mulf %159, %169 : vector<32x128xf32>
    %171 = arith.addf %145, %170 : vector<32x128xf32>
    %c5_87 = arith.constant 5 : index
    %c2_88 = arith.constant 2 : index
    %c0_89 = arith.constant 0 : index
    %172 = vector.load %arg2[%c5_87, %c2_88, %c0_89] : memref<27x4x128xf32, #tpu.memory_space<vmem>>, vector<1x1x128xf32>
    %173 = vector.shape_cast %172 : vector<1x1x128xf32> to vector<128xf32>
    %174 = vector.shape_cast %173 : vector<128xf32> to vector<1x128xf32>
    %175 = vector.broadcast %174 : vector<1x128xf32> to vector<32x128xf32>
    %176 = arith.mulf %159, %175 : vector<32x128xf32>
    %177 = arith.addf %151, %176 : vector<32x128xf32>
    %c5_90 = arith.constant 5 : index
    %c3_91 = arith.constant 3 : index
    %c0_92 = arith.constant 0 : index
    %178 = vector.load %arg2[%c5_90, %c3_91, %c0_92] : memref<27x4x128xf32, #tpu.memory_space<vmem>>, vector<1x1x128xf32>
    %179 = vector.shape_cast %178 : vector<1x1x128xf32> to vector<128xf32>
    %180 = vector.shape_cast %179 : vector<128xf32> to vector<1x128xf32>
    %181 = vector.broadcast %180 : vector<1x128xf32> to vector<32x128xf32>
    %182 = arith.mulf %159, %181 : vector<32x128xf32>
    %183 = arith.addf %157, %182 : vector<32x128xf32>
    %c0_93 = arith.constant 0 : index
    %c2_94 = arith.constant 2 : index
    %c0_95 = arith.constant 0 : index
    %184 = vector.load %arg6[%c0_93, %c2_94, %c0_95] : memref<3x66x66xf32, #tpu.memory_space<vmem>>, vector<1x32x66xf32>
    %185 = vector.shape_cast %184 : vector<1x32x66xf32> to vector<32x66xf32>
    %186 = vector.extract_strided_slice %185 {offsets = [0, 0], sizes = [32, 64], strides = [1, 1]} : vector<32x66xf32> to vector<32x64xf32>
    %187 = tpu.concatenate %186, %186 in 1 : vector<32x64xf32>, vector<32x64xf32> -> vector<32x128xf32>
    %c6 = arith.constant 6 : index
    %c0_96 = arith.constant 0 : index
    %c0_97 = arith.constant 0 : index
    %188 = vector.load %arg2[%c6, %c0_96, %c0_97] : memref<27x4x128xf32, #tpu.memory_space<vmem>>, vector<1x1x128xf32>
    %189 = vector.shape_cast %188 : vector<1x1x128xf32> to vector<128xf32>
    %190 = vector.shape_cast %189 : vector<128xf32> to vector<1x128xf32>
    %191 = vector.broadcast %190 : vector<1x128xf32> to vector<32x128xf32>
    %192 = arith.mulf %187, %191 : vector<32x128xf32>
    %193 = arith.addf %165, %192 : vector<32x128xf32>
    %c6_98 = arith.constant 6 : index
    %c1_99 = arith.constant 1 : index
    %c0_100 = arith.constant 0 : index
    %194 = vector.load %arg2[%c6_98, %c1_99, %c0_100] : memref<27x4x128xf32, #tpu.memory_space<vmem>>, vector<1x1x128xf32>
    %195 = vector.shape_cast %194 : vector<1x1x128xf32> to vector<128xf32>
    %196 = vector.shape_cast %195 : vector<128xf32> to vector<1x128xf32>
    %197 = vector.broadcast %196 : vector<1x128xf32> to vector<32x128xf32>
    %198 = arith.mulf %187, %197 : vector<32x128xf32>
    %199 = arith.addf %171, %198 : vector<32x128xf32>
    %c6_101 = arith.constant 6 : index
    %c2_102 = arith.constant 2 : index
    %c0_103 = arith.constant 0 : index
    %200 = vector.load %arg2[%c6_101, %c2_102, %c0_103] : memref<27x4x128xf32, #tpu.memory_space<vmem>>, vector<1x1x128xf32>
    %201 = vector.shape_cast %200 : vector<1x1x128xf32> to vector<128xf32>
    %202 = vector.shape_cast %201 : vector<128xf32> to vector<1x128xf32>
    %203 = vector.broadcast %202 : vector<1x128xf32> to vector<32x128xf32>
    %204 = arith.mulf %187, %203 : vector<32x128xf32>
    %205 = arith.addf %177, %204 : vector<32x128xf32>
    %c6_104 = arith.constant 6 : index
    %c3_105 = arith.constant 3 : index
    %c0_106 = arith.constant 0 : index
    %206 = vector.load %arg2[%c6_104, %c3_105, %c0_106] : memref<27x4x128xf32, #tpu.memory_space<vmem>>, vector<1x1x128xf32>
    %207 = vector.shape_cast %206 : vector<1x1x128xf32> to vector<128xf32>
    %208 = vector.shape_cast %207 : vector<128xf32> to vector<1x128xf32>
    %209 = vector.broadcast %208 : vector<1x128xf32> to vector<32x128xf32>
    %210 = arith.mulf %187, %209 : vector<32x128xf32>
    %211 = arith.addf %183, %210 : vector<32x128xf32>
    %212 = vector.extract_strided_slice %185 {offsets = [0, 1], sizes = [32, 64], strides = [1, 1]} : vector<32x66xf32> to vector<32x64xf32>
    %213 = tpu.concatenate %212, %212 in 1 : vector<32x64xf32>, vector<32x64xf32> -> vector<32x128xf32>
    %c7 = arith.constant 7 : index
    %c0_107 = arith.constant 0 : index
    %c0_108 = arith.constant 0 : index
    %214 = vector.load %arg2[%c7, %c0_107, %c0_108] : memref<27x4x128xf32, #tpu.memory_space<vmem>>, vector<1x1x128xf32>
    %215 = vector.shape_cast %214 : vector<1x1x128xf32> to vector<128xf32>
    %216 = vector.shape_cast %215 : vector<128xf32> to vector<1x128xf32>
    %217 = vector.broadcast %216 : vector<1x128xf32> to vector<32x128xf32>
    %218 = arith.mulf %213, %217 : vector<32x128xf32>
    %219 = arith.addf %193, %218 : vector<32x128xf32>
    %c7_109 = arith.constant 7 : index
    %c1_110 = arith.constant 1 : index
    %c0_111 = arith.constant 0 : index
    %220 = vector.load %arg2[%c7_109, %c1_110, %c0_111] : memref<27x4x128xf32, #tpu.memory_space<vmem>>, vector<1x1x128xf32>
    %221 = vector.shape_cast %220 : vector<1x1x128xf32> to vector<128xf32>
    %222 = vector.shape_cast %221 : vector<128xf32> to vector<1x128xf32>
    %223 = vector.broadcast %222 : vector<1x128xf32> to vector<32x128xf32>
    %224 = arith.mulf %213, %223 : vector<32x128xf32>
    %225 = arith.addf %199, %224 : vector<32x128xf32>
    %c7_112 = arith.constant 7 : index
    %c2_113 = arith.constant 2 : index
    %c0_114 = arith.constant 0 : index
    %226 = vector.load %arg2[%c7_112, %c2_113, %c0_114] : memref<27x4x128xf32, #tpu.memory_space<vmem>>, vector<1x1x128xf32>
    %227 = vector.shape_cast %226 : vector<1x1x128xf32> to vector<128xf32>
    %228 = vector.shape_cast %227 : vector<128xf32> to vector<1x128xf32>
    %229 = vector.broadcast %228 : vector<1x128xf32> to vector<32x128xf32>
    %230 = arith.mulf %213, %229 : vector<32x128xf32>
    %231 = arith.addf %205, %230 : vector<32x128xf32>
    %c7_115 = arith.constant 7 : index
    %c3_116 = arith.constant 3 : index
    %c0_117 = arith.constant 0 : index
    %232 = vector.load %arg2[%c7_115, %c3_116, %c0_117] : memref<27x4x128xf32, #tpu.memory_space<vmem>>, vector<1x1x128xf32>
    %233 = vector.shape_cast %232 : vector<1x1x128xf32> to vector<128xf32>
    %234 = vector.shape_cast %233 : vector<128xf32> to vector<1x128xf32>
    %235 = vector.broadcast %234 : vector<1x128xf32> to vector<32x128xf32>
    %236 = arith.mulf %213, %235 : vector<32x128xf32>
    %237 = arith.addf %211, %236 : vector<32x128xf32>
    %238 = vector.extract_strided_slice %185 {offsets = [0, 2], sizes = [32, 64], strides = [1, 1]} : vector<32x66xf32> to vector<32x64xf32>
    %239 = tpu.concatenate %238, %238 in 1 : vector<32x64xf32>, vector<32x64xf32> -> vector<32x128xf32>
    %c8 = arith.constant 8 : index
    %c0_118 = arith.constant 0 : index
    %c0_119 = arith.constant 0 : index
    %240 = vector.load %arg2[%c8, %c0_118, %c0_119] : memref<27x4x128xf32, #tpu.memory_space<vmem>>, vector<1x1x128xf32>
    %241 = vector.shape_cast %240 : vector<1x1x128xf32> to vector<128xf32>
    %242 = vector.shape_cast %241 : vector<128xf32> to vector<1x128xf32>
    %243 = vector.broadcast %242 : vector<1x128xf32> to vector<32x128xf32>
    %244 = arith.mulf %239, %243 : vector<32x128xf32>
    %245 = arith.addf %219, %244 : vector<32x128xf32>
    %c8_120 = arith.constant 8 : index
    %c1_121 = arith.constant 1 : index
    %c0_122 = arith.constant 0 : index
    %246 = vector.load %arg2[%c8_120, %c1_121, %c0_122] : memref<27x4x128xf32, #tpu.memory_space<vmem>>, vector<1x1x128xf32>
    %247 = vector.shape_cast %246 : vector<1x1x128xf32> to vector<128xf32>
    %248 = vector.shape_cast %247 : vector<128xf32> to vector<1x128xf32>
    %249 = vector.broadcast %248 : vector<1x128xf32> to vector<32x128xf32>
    %250 = arith.mulf %239, %249 : vector<32x128xf32>
    %251 = arith.addf %225, %250 : vector<32x128xf32>
    %c8_123 = arith.constant 8 : index
    %c2_124 = arith.constant 2 : index
    %c0_125 = arith.constant 0 : index
    %252 = vector.load %arg2[%c8_123, %c2_124, %c0_125] : memref<27x4x128xf32, #tpu.memory_space<vmem>>, vector<1x1x128xf32>
    %253 = vector.shape_cast %252 : vector<1x1x128xf32> to vector<128xf32>
    %254 = vector.shape_cast %253 : vector<128xf32> to vector<1x128xf32>
    %255 = vector.broadcast %254 : vector<1x128xf32> to vector<32x128xf32>
    %256 = arith.mulf %239, %255 : vector<32x128xf32>
    %257 = arith.addf %231, %256 : vector<32x128xf32>
    %c8_126 = arith.constant 8 : index
    %c3_127 = arith.constant 3 : index
    %c0_128 = arith.constant 0 : index
    %258 = vector.load %arg2[%c8_126, %c3_127, %c0_128] : memref<27x4x128xf32, #tpu.memory_space<vmem>>, vector<1x1x128xf32>
    %259 = vector.shape_cast %258 : vector<1x1x128xf32> to vector<128xf32>
    %260 = vector.shape_cast %259 : vector<128xf32> to vector<1x128xf32>
    %261 = vector.broadcast %260 : vector<1x128xf32> to vector<32x128xf32>
    %262 = arith.mulf %239, %261 : vector<32x128xf32>
    %263 = arith.addf %237, %262 : vector<32x128xf32>
    %c1_129 = arith.constant 1 : index
    %c0_130 = arith.constant 0 : index
    %c0_131 = arith.constant 0 : index
    %264 = vector.load %arg6[%c1_129, %c0_130, %c0_131] : memref<3x66x66xf32, #tpu.memory_space<vmem>>, vector<1x32x66xf32>
    %265 = vector.shape_cast %264 : vector<1x32x66xf32> to vector<32x66xf32>
    %266 = vector.extract_strided_slice %265 {offsets = [0, 0], sizes = [32, 64], strides = [1, 1]} : vector<32x66xf32> to vector<32x64xf32>
    %267 = tpu.concatenate %266, %266 in 1 : vector<32x64xf32>, vector<32x64xf32> -> vector<32x128xf32>
    %c9 = arith.constant 9 : index
    %c0_132 = arith.constant 0 : index
    %c0_133 = arith.constant 0 : index
    %268 = vector.load %arg2[%c9, %c0_132, %c0_133] : memref<27x4x128xf32, #tpu.memory_space<vmem>>, vector<1x1x128xf32>
    %269 = vector.shape_cast %268 : vector<1x1x128xf32> to vector<128xf32>
    %270 = vector.shape_cast %269 : vector<128xf32> to vector<1x128xf32>
    %271 = vector.broadcast %270 : vector<1x128xf32> to vector<32x128xf32>
    %272 = arith.mulf %267, %271 : vector<32x128xf32>
    %273 = arith.addf %245, %272 : vector<32x128xf32>
    %c9_134 = arith.constant 9 : index
    %c1_135 = arith.constant 1 : index
    %c0_136 = arith.constant 0 : index
    %274 = vector.load %arg2[%c9_134, %c1_135, %c0_136] : memref<27x4x128xf32, #tpu.memory_space<vmem>>, vector<1x1x128xf32>
    %275 = vector.shape_cast %274 : vector<1x1x128xf32> to vector<128xf32>
    %276 = vector.shape_cast %275 : vector<128xf32> to vector<1x128xf32>
    %277 = vector.broadcast %276 : vector<1x128xf32> to vector<32x128xf32>
    %278 = arith.mulf %267, %277 : vector<32x128xf32>
    %279 = arith.addf %251, %278 : vector<32x128xf32>
    %c9_137 = arith.constant 9 : index
    %c2_138 = arith.constant 2 : index
    %c0_139 = arith.constant 0 : index
    %280 = vector.load %arg2[%c9_137, %c2_138, %c0_139] : memref<27x4x128xf32, #tpu.memory_space<vmem>>, vector<1x1x128xf32>
    %281 = vector.shape_cast %280 : vector<1x1x128xf32> to vector<128xf32>
    %282 = vector.shape_cast %281 : vector<128xf32> to vector<1x128xf32>
    %283 = vector.broadcast %282 : vector<1x128xf32> to vector<32x128xf32>
    %284 = arith.mulf %267, %283 : vector<32x128xf32>
    %285 = arith.addf %257, %284 : vector<32x128xf32>
    %c9_140 = arith.constant 9 : index
    %c3_141 = arith.constant 3 : index
    %c0_142 = arith.constant 0 : index
    %286 = vector.load %arg2[%c9_140, %c3_141, %c0_142] : memref<27x4x128xf32, #tpu.memory_space<vmem>>, vector<1x1x128xf32>
    %287 = vector.shape_cast %286 : vector<1x1x128xf32> to vector<128xf32>
    %288 = vector.shape_cast %287 : vector<128xf32> to vector<1x128xf32>
    %289 = vector.broadcast %288 : vector<1x128xf32> to vector<32x128xf32>
    %290 = arith.mulf %267, %289 : vector<32x128xf32>
    %291 = arith.addf %263, %290 : vector<32x128xf32>
    %292 = vector.extract_strided_slice %265 {offsets = [0, 1], sizes = [32, 64], strides = [1, 1]} : vector<32x66xf32> to vector<32x64xf32>
    %293 = tpu.concatenate %292, %292 in 1 : vector<32x64xf32>, vector<32x64xf32> -> vector<32x128xf32>
    %c10 = arith.constant 10 : index
    %c0_143 = arith.constant 0 : index
    %c0_144 = arith.constant 0 : index
    %294 = vector.load %arg2[%c10, %c0_143, %c0_144] : memref<27x4x128xf32, #tpu.memory_space<vmem>>, vector<1x1x128xf32>
    %295 = vector.shape_cast %294 : vector<1x1x128xf32> to vector<128xf32>
    %296 = vector.shape_cast %295 : vector<128xf32> to vector<1x128xf32>
    %297 = vector.broadcast %296 : vector<1x128xf32> to vector<32x128xf32>
    %298 = arith.mulf %293, %297 : vector<32x128xf32>
    %299 = arith.addf %273, %298 : vector<32x128xf32>
    %c10_145 = arith.constant 10 : index
    %c1_146 = arith.constant 1 : index
    %c0_147 = arith.constant 0 : index
    %300 = vector.load %arg2[%c10_145, %c1_146, %c0_147] : memref<27x4x128xf32, #tpu.memory_space<vmem>>, vector<1x1x128xf32>
    %301 = vector.shape_cast %300 : vector<1x1x128xf32> to vector<128xf32>
    %302 = vector.shape_cast %301 : vector<128xf32> to vector<1x128xf32>
    %303 = vector.broadcast %302 : vector<1x128xf32> to vector<32x128xf32>
    %304 = arith.mulf %293, %303 : vector<32x128xf32>
    %305 = arith.addf %279, %304 : vector<32x128xf32>
    %c10_148 = arith.constant 10 : index
    %c2_149 = arith.constant 2 : index
    %c0_150 = arith.constant 0 : index
    %306 = vector.load %arg2[%c10_148, %c2_149, %c0_150] : memref<27x4x128xf32, #tpu.memory_space<vmem>>, vector<1x1x128xf32>
    %307 = vector.shape_cast %306 : vector<1x1x128xf32> to vector<128xf32>
    %308 = vector.shape_cast %307 : vector<128xf32> to vector<1x128xf32>
    %309 = vector.broadcast %308 : vector<1x128xf32> to vector<32x128xf32>
    %310 = arith.mulf %293, %309 : vector<32x128xf32>
    %311 = arith.addf %285, %310 : vector<32x128xf32>
    %c10_151 = arith.constant 10 : index
    %c3_152 = arith.constant 3 : index
    %c0_153 = arith.constant 0 : index
    %312 = vector.load %arg2[%c10_151, %c3_152, %c0_153] : memref<27x4x128xf32, #tpu.memory_space<vmem>>, vector<1x1x128xf32>
    %313 = vector.shape_cast %312 : vector<1x1x128xf32> to vector<128xf32>
    %314 = vector.shape_cast %313 : vector<128xf32> to vector<1x128xf32>
    %315 = vector.broadcast %314 : vector<1x128xf32> to vector<32x128xf32>
    %316 = arith.mulf %293, %315 : vector<32x128xf32>
    %317 = arith.addf %291, %316 : vector<32x128xf32>
    %318 = vector.extract_strided_slice %265 {offsets = [0, 2], sizes = [32, 64], strides = [1, 1]} : vector<32x66xf32> to vector<32x64xf32>
    %319 = tpu.concatenate %318, %318 in 1 : vector<32x64xf32>, vector<32x64xf32> -> vector<32x128xf32>
    %c11 = arith.constant 11 : index
    %c0_154 = arith.constant 0 : index
    %c0_155 = arith.constant 0 : index
    %320 = vector.load %arg2[%c11, %c0_154, %c0_155] : memref<27x4x128xf32, #tpu.memory_space<vmem>>, vector<1x1x128xf32>
    %321 = vector.shape_cast %320 : vector<1x1x128xf32> to vector<128xf32>
    %322 = vector.shape_cast %321 : vector<128xf32> to vector<1x128xf32>
    %323 = vector.broadcast %322 : vector<1x128xf32> to vector<32x128xf32>
    %324 = arith.mulf %319, %323 : vector<32x128xf32>
    %325 = arith.addf %299, %324 : vector<32x128xf32>
    %c11_156 = arith.constant 11 : index
    %c1_157 = arith.constant 1 : index
    %c0_158 = arith.constant 0 : index
    %326 = vector.load %arg2[%c11_156, %c1_157, %c0_158] : memref<27x4x128xf32, #tpu.memory_space<vmem>>, vector<1x1x128xf32>
    %327 = vector.shape_cast %326 : vector<1x1x128xf32> to vector<128xf32>
    %328 = vector.shape_cast %327 : vector<128xf32> to vector<1x128xf32>
    %329 = vector.broadcast %328 : vector<1x128xf32> to vector<32x128xf32>
    %330 = arith.mulf %319, %329 : vector<32x128xf32>
    %331 = arith.addf %305, %330 : vector<32x128xf32>
    %c11_159 = arith.constant 11 : index
    %c2_160 = arith.constant 2 : index
    %c0_161 = arith.constant 0 : index
    %332 = vector.load %arg2[%c11_159, %c2_160, %c0_161] : memref<27x4x128xf32, #tpu.memory_space<vmem>>, vector<1x1x128xf32>
    %333 = vector.shape_cast %332 : vector<1x1x128xf32> to vector<128xf32>
    %334 = vector.shape_cast %333 : vector<128xf32> to vector<1x128xf32>
    %335 = vector.broadcast %334 : vector<1x128xf32> to vector<32x128xf32>
    %336 = arith.mulf %319, %335 : vector<32x128xf32>
    %337 = arith.addf %311, %336 : vector<32x128xf32>
    %c11_162 = arith.constant 11 : index
    %c3_163 = arith.constant 3 : index
    %c0_164 = arith.constant 0 : index
    %338 = vector.load %arg2[%c11_162, %c3_163, %c0_164] : memref<27x4x128xf32, #tpu.memory_space<vmem>>, vector<1x1x128xf32>
    %339 = vector.shape_cast %338 : vector<1x1x128xf32> to vector<128xf32>
    %340 = vector.shape_cast %339 : vector<128xf32> to vector<1x128xf32>
    %341 = vector.broadcast %340 : vector<1x128xf32> to vector<32x128xf32>
    %342 = arith.mulf %319, %341 : vector<32x128xf32>
    %343 = arith.addf %317, %342 : vector<32x128xf32>
    %c1_165 = arith.constant 1 : index
    %c1_166 = arith.constant 1 : index
    %c0_167 = arith.constant 0 : index
    %344 = vector.load %arg6[%c1_165, %c1_166, %c0_167] : memref<3x66x66xf32, #tpu.memory_space<vmem>>, vector<1x32x66xf32>
    %345 = vector.shape_cast %344 : vector<1x32x66xf32> to vector<32x66xf32>
    %346 = vector.extract_strided_slice %345 {offsets = [0, 0], sizes = [32, 64], strides = [1, 1]} : vector<32x66xf32> to vector<32x64xf32>
    %347 = tpu.concatenate %346, %346 in 1 : vector<32x64xf32>, vector<32x64xf32> -> vector<32x128xf32>
    %c12 = arith.constant 12 : index
    %c0_168 = arith.constant 0 : index
    %c0_169 = arith.constant 0 : index
    %348 = vector.load %arg2[%c12, %c0_168, %c0_169] : memref<27x4x128xf32, #tpu.memory_space<vmem>>, vector<1x1x128xf32>
    %349 = vector.shape_cast %348 : vector<1x1x128xf32> to vector<128xf32>
    %350 = vector.shape_cast %349 : vector<128xf32> to vector<1x128xf32>
    %351 = vector.broadcast %350 : vector<1x128xf32> to vector<32x128xf32>
    %352 = arith.mulf %347, %351 : vector<32x128xf32>
    %353 = arith.addf %325, %352 : vector<32x128xf32>
    %c12_170 = arith.constant 12 : index
    %c1_171 = arith.constant 1 : index
    %c0_172 = arith.constant 0 : index
    %354 = vector.load %arg2[%c12_170, %c1_171, %c0_172] : memref<27x4x128xf32, #tpu.memory_space<vmem>>, vector<1x1x128xf32>
    %355 = vector.shape_cast %354 : vector<1x1x128xf32> to vector<128xf32>
    %356 = vector.shape_cast %355 : vector<128xf32> to vector<1x128xf32>
    %357 = vector.broadcast %356 : vector<1x128xf32> to vector<32x128xf32>
    %358 = arith.mulf %347, %357 : vector<32x128xf32>
    %359 = arith.addf %331, %358 : vector<32x128xf32>
    %c12_173 = arith.constant 12 : index
    %c2_174 = arith.constant 2 : index
    %c0_175 = arith.constant 0 : index
    %360 = vector.load %arg2[%c12_173, %c2_174, %c0_175] : memref<27x4x128xf32, #tpu.memory_space<vmem>>, vector<1x1x128xf32>
    %361 = vector.shape_cast %360 : vector<1x1x128xf32> to vector<128xf32>
    %362 = vector.shape_cast %361 : vector<128xf32> to vector<1x128xf32>
    %363 = vector.broadcast %362 : vector<1x128xf32> to vector<32x128xf32>
    %364 = arith.mulf %347, %363 : vector<32x128xf32>
    %365 = arith.addf %337, %364 : vector<32x128xf32>
    %c12_176 = arith.constant 12 : index
    %c3_177 = arith.constant 3 : index
    %c0_178 = arith.constant 0 : index
    %366 = vector.load %arg2[%c12_176, %c3_177, %c0_178] : memref<27x4x128xf32, #tpu.memory_space<vmem>>, vector<1x1x128xf32>
    %367 = vector.shape_cast %366 : vector<1x1x128xf32> to vector<128xf32>
    %368 = vector.shape_cast %367 : vector<128xf32> to vector<1x128xf32>
    %369 = vector.broadcast %368 : vector<1x128xf32> to vector<32x128xf32>
    %370 = arith.mulf %347, %369 : vector<32x128xf32>
    %371 = arith.addf %343, %370 : vector<32x128xf32>
    %372 = vector.extract_strided_slice %345 {offsets = [0, 1], sizes = [32, 64], strides = [1, 1]} : vector<32x66xf32> to vector<32x64xf32>
    %373 = tpu.concatenate %372, %372 in 1 : vector<32x64xf32>, vector<32x64xf32> -> vector<32x128xf32>
    %c13 = arith.constant 13 : index
    %c0_179 = arith.constant 0 : index
    %c0_180 = arith.constant 0 : index
    %374 = vector.load %arg2[%c13, %c0_179, %c0_180] : memref<27x4x128xf32, #tpu.memory_space<vmem>>, vector<1x1x128xf32>
    %375 = vector.shape_cast %374 : vector<1x1x128xf32> to vector<128xf32>
    %376 = vector.shape_cast %375 : vector<128xf32> to vector<1x128xf32>
    %377 = vector.broadcast %376 : vector<1x128xf32> to vector<32x128xf32>
    %378 = arith.mulf %373, %377 : vector<32x128xf32>
    %379 = arith.addf %353, %378 : vector<32x128xf32>
    %c13_181 = arith.constant 13 : index
    %c1_182 = arith.constant 1 : index
    %c0_183 = arith.constant 0 : index
    %380 = vector.load %arg2[%c13_181, %c1_182, %c0_183] : memref<27x4x128xf32, #tpu.memory_space<vmem>>, vector<1x1x128xf32>
    %381 = vector.shape_cast %380 : vector<1x1x128xf32> to vector<128xf32>
    %382 = vector.shape_cast %381 : vector<128xf32> to vector<1x128xf32>
    %383 = vector.broadcast %382 : vector<1x128xf32> to vector<32x128xf32>
    %384 = arith.mulf %373, %383 : vector<32x128xf32>
    %385 = arith.addf %359, %384 : vector<32x128xf32>
    %c13_184 = arith.constant 13 : index
    %c2_185 = arith.constant 2 : index
    %c0_186 = arith.constant 0 : index
    %386 = vector.load %arg2[%c13_184, %c2_185, %c0_186] : memref<27x4x128xf32, #tpu.memory_space<vmem>>, vector<1x1x128xf32>
    %387 = vector.shape_cast %386 : vector<1x1x128xf32> to vector<128xf32>
    %388 = vector.shape_cast %387 : vector<128xf32> to vector<1x128xf32>
    %389 = vector.broadcast %388 : vector<1x128xf32> to vector<32x128xf32>
    %390 = arith.mulf %373, %389 : vector<32x128xf32>
    %391 = arith.addf %365, %390 : vector<32x128xf32>
    %c13_187 = arith.constant 13 : index
    %c3_188 = arith.constant 3 : index
    %c0_189 = arith.constant 0 : index
    %392 = vector.load %arg2[%c13_187, %c3_188, %c0_189] : memref<27x4x128xf32, #tpu.memory_space<vmem>>, vector<1x1x128xf32>
    %393 = vector.shape_cast %392 : vector<1x1x128xf32> to vector<128xf32>
    %394 = vector.shape_cast %393 : vector<128xf32> to vector<1x128xf32>
    %395 = vector.broadcast %394 : vector<1x128xf32> to vector<32x128xf32>
    %396 = arith.mulf %373, %395 : vector<32x128xf32>
    %397 = arith.addf %371, %396 : vector<32x128xf32>
    %398 = vector.extract_strided_slice %345 {offsets = [0, 2], sizes = [32, 64], strides = [1, 1]} : vector<32x66xf32> to vector<32x64xf32>
    %399 = tpu.concatenate %398, %398 in 1 : vector<32x64xf32>, vector<32x64xf32> -> vector<32x128xf32>
    %c14 = arith.constant 14 : index
    %c0_190 = arith.constant 0 : index
    %c0_191 = arith.constant 0 : index
    %400 = vector.load %arg2[%c14, %c0_190, %c0_191] : memref<27x4x128xf32, #tpu.memory_space<vmem>>, vector<1x1x128xf32>
    %401 = vector.shape_cast %400 : vector<1x1x128xf32> to vector<128xf32>
    %402 = vector.shape_cast %401 : vector<128xf32> to vector<1x128xf32>
    %403 = vector.broadcast %402 : vector<1x128xf32> to vector<32x128xf32>
    %404 = arith.mulf %399, %403 : vector<32x128xf32>
    %405 = arith.addf %379, %404 : vector<32x128xf32>
    %c14_192 = arith.constant 14 : index
    %c1_193 = arith.constant 1 : index
    %c0_194 = arith.constant 0 : index
    %406 = vector.load %arg2[%c14_192, %c1_193, %c0_194] : memref<27x4x128xf32, #tpu.memory_space<vmem>>, vector<1x1x128xf32>
    %407 = vector.shape_cast %406 : vector<1x1x128xf32> to vector<128xf32>
    %408 = vector.shape_cast %407 : vector<128xf32> to vector<1x128xf32>
    %409 = vector.broadcast %408 : vector<1x128xf32> to vector<32x128xf32>
    %410 = arith.mulf %399, %409 : vector<32x128xf32>
    %411 = arith.addf %385, %410 : vector<32x128xf32>
    %c14_195 = arith.constant 14 : index
    %c2_196 = arith.constant 2 : index
    %c0_197 = arith.constant 0 : index
    %412 = vector.load %arg2[%c14_195, %c2_196, %c0_197] : memref<27x4x128xf32, #tpu.memory_space<vmem>>, vector<1x1x128xf32>
    %413 = vector.shape_cast %412 : vector<1x1x128xf32> to vector<128xf32>
    %414 = vector.shape_cast %413 : vector<128xf32> to vector<1x128xf32>
    %415 = vector.broadcast %414 : vector<1x128xf32> to vector<32x128xf32>
    %416 = arith.mulf %399, %415 : vector<32x128xf32>
    %417 = arith.addf %391, %416 : vector<32x128xf32>
    %c14_198 = arith.constant 14 : index
    %c3_199 = arith.constant 3 : index
    %c0_200 = arith.constant 0 : index
    %418 = vector.load %arg2[%c14_198, %c3_199, %c0_200] : memref<27x4x128xf32, #tpu.memory_space<vmem>>, vector<1x1x128xf32>
    %419 = vector.shape_cast %418 : vector<1x1x128xf32> to vector<128xf32>
    %420 = vector.shape_cast %419 : vector<128xf32> to vector<1x128xf32>
    %421 = vector.broadcast %420 : vector<1x128xf32> to vector<32x128xf32>
    %422 = arith.mulf %399, %421 : vector<32x128xf32>
    %423 = arith.addf %397, %422 : vector<32x128xf32>
    %c1_201 = arith.constant 1 : index
    %c2_202 = arith.constant 2 : index
    %c0_203 = arith.constant 0 : index
    %424 = vector.load %arg6[%c1_201, %c2_202, %c0_203] : memref<3x66x66xf32, #tpu.memory_space<vmem>>, vector<1x32x66xf32>
    %425 = vector.shape_cast %424 : vector<1x32x66xf32> to vector<32x66xf32>
    %426 = vector.extract_strided_slice %425 {offsets = [0, 0], sizes = [32, 64], strides = [1, 1]} : vector<32x66xf32> to vector<32x64xf32>
    %427 = tpu.concatenate %426, %426 in 1 : vector<32x64xf32>, vector<32x64xf32> -> vector<32x128xf32>
    %c15 = arith.constant 15 : index
    %c0_204 = arith.constant 0 : index
    %c0_205 = arith.constant 0 : index
    %428 = vector.load %arg2[%c15, %c0_204, %c0_205] : memref<27x4x128xf32, #tpu.memory_space<vmem>>, vector<1x1x128xf32>
    %429 = vector.shape_cast %428 : vector<1x1x128xf32> to vector<128xf32>
    %430 = vector.shape_cast %429 : vector<128xf32> to vector<1x128xf32>
    %431 = vector.broadcast %430 : vector<1x128xf32> to vector<32x128xf32>
    %432 = arith.mulf %427, %431 : vector<32x128xf32>
    %433 = arith.addf %405, %432 : vector<32x128xf32>
    %c15_206 = arith.constant 15 : index
    %c1_207 = arith.constant 1 : index
    %c0_208 = arith.constant 0 : index
    %434 = vector.load %arg2[%c15_206, %c1_207, %c0_208] : memref<27x4x128xf32, #tpu.memory_space<vmem>>, vector<1x1x128xf32>
    %435 = vector.shape_cast %434 : vector<1x1x128xf32> to vector<128xf32>
    %436 = vector.shape_cast %435 : vector<128xf32> to vector<1x128xf32>
    %437 = vector.broadcast %436 : vector<1x128xf32> to vector<32x128xf32>
    %438 = arith.mulf %427, %437 : vector<32x128xf32>
    %439 = arith.addf %411, %438 : vector<32x128xf32>
    %c15_209 = arith.constant 15 : index
    %c2_210 = arith.constant 2 : index
    %c0_211 = arith.constant 0 : index
    %440 = vector.load %arg2[%c15_209, %c2_210, %c0_211] : memref<27x4x128xf32, #tpu.memory_space<vmem>>, vector<1x1x128xf32>
    %441 = vector.shape_cast %440 : vector<1x1x128xf32> to vector<128xf32>
    %442 = vector.shape_cast %441 : vector<128xf32> to vector<1x128xf32>
    %443 = vector.broadcast %442 : vector<1x128xf32> to vector<32x128xf32>
    %444 = arith.mulf %427, %443 : vector<32x128xf32>
    %445 = arith.addf %417, %444 : vector<32x128xf32>
    %c15_212 = arith.constant 15 : index
    %c3_213 = arith.constant 3 : index
    %c0_214 = arith.constant 0 : index
    %446 = vector.load %arg2[%c15_212, %c3_213, %c0_214] : memref<27x4x128xf32, #tpu.memory_space<vmem>>, vector<1x1x128xf32>
    %447 = vector.shape_cast %446 : vector<1x1x128xf32> to vector<128xf32>
    %448 = vector.shape_cast %447 : vector<128xf32> to vector<1x128xf32>
    %449 = vector.broadcast %448 : vector<1x128xf32> to vector<32x128xf32>
    %450 = arith.mulf %427, %449 : vector<32x128xf32>
    %451 = arith.addf %423, %450 : vector<32x128xf32>
    %452 = vector.extract_strided_slice %425 {offsets = [0, 1], sizes = [32, 64], strides = [1, 1]} : vector<32x66xf32> to vector<32x64xf32>
    %453 = tpu.concatenate %452, %452 in 1 : vector<32x64xf32>, vector<32x64xf32> -> vector<32x128xf32>
    %c16 = arith.constant 16 : index
    %c0_215 = arith.constant 0 : index
    %c0_216 = arith.constant 0 : index
    %454 = vector.load %arg2[%c16, %c0_215, %c0_216] : memref<27x4x128xf32, #tpu.memory_space<vmem>>, vector<1x1x128xf32>
    %455 = vector.shape_cast %454 : vector<1x1x128xf32> to vector<128xf32>
    %456 = vector.shape_cast %455 : vector<128xf32> to vector<1x128xf32>
    %457 = vector.broadcast %456 : vector<1x128xf32> to vector<32x128xf32>
    %458 = arith.mulf %453, %457 : vector<32x128xf32>
    %459 = arith.addf %433, %458 : vector<32x128xf32>
    %c16_217 = arith.constant 16 : index
    %c1_218 = arith.constant 1 : index
    %c0_219 = arith.constant 0 : index
    %460 = vector.load %arg2[%c16_217, %c1_218, %c0_219] : memref<27x4x128xf32, #tpu.memory_space<vmem>>, vector<1x1x128xf32>
    %461 = vector.shape_cast %460 : vector<1x1x128xf32> to vector<128xf32>
    %462 = vector.shape_cast %461 : vector<128xf32> to vector<1x128xf32>
    %463 = vector.broadcast %462 : vector<1x128xf32> to vector<32x128xf32>
    %464 = arith.mulf %453, %463 : vector<32x128xf32>
    %465 = arith.addf %439, %464 : vector<32x128xf32>
    %c16_220 = arith.constant 16 : index
    %c2_221 = arith.constant 2 : index
    %c0_222 = arith.constant 0 : index
    %466 = vector.load %arg2[%c16_220, %c2_221, %c0_222] : memref<27x4x128xf32, #tpu.memory_space<vmem>>, vector<1x1x128xf32>
    %467 = vector.shape_cast %466 : vector<1x1x128xf32> to vector<128xf32>
    %468 = vector.shape_cast %467 : vector<128xf32> to vector<1x128xf32>
    %469 = vector.broadcast %468 : vector<1x128xf32> to vector<32x128xf32>
    %470 = arith.mulf %453, %469 : vector<32x128xf32>
    %471 = arith.addf %445, %470 : vector<32x128xf32>
    %c16_223 = arith.constant 16 : index
    %c3_224 = arith.constant 3 : index
    %c0_225 = arith.constant 0 : index
    %472 = vector.load %arg2[%c16_223, %c3_224, %c0_225] : memref<27x4x128xf32, #tpu.memory_space<vmem>>, vector<1x1x128xf32>
    %473 = vector.shape_cast %472 : vector<1x1x128xf32> to vector<128xf32>
    %474 = vector.shape_cast %473 : vector<128xf32> to vector<1x128xf32>
    %475 = vector.broadcast %474 : vector<1x128xf32> to vector<32x128xf32>
    %476 = arith.mulf %453, %475 : vector<32x128xf32>
    %477 = arith.addf %451, %476 : vector<32x128xf32>
    %478 = vector.extract_strided_slice %425 {offsets = [0, 2], sizes = [32, 64], strides = [1, 1]} : vector<32x66xf32> to vector<32x64xf32>
    %479 = tpu.concatenate %478, %478 in 1 : vector<32x64xf32>, vector<32x64xf32> -> vector<32x128xf32>
    %c17 = arith.constant 17 : index
    %c0_226 = arith.constant 0 : index
    %c0_227 = arith.constant 0 : index
    %480 = vector.load %arg2[%c17, %c0_226, %c0_227] : memref<27x4x128xf32, #tpu.memory_space<vmem>>, vector<1x1x128xf32>
    %481 = vector.shape_cast %480 : vector<1x1x128xf32> to vector<128xf32>
    %482 = vector.shape_cast %481 : vector<128xf32> to vector<1x128xf32>
    %483 = vector.broadcast %482 : vector<1x128xf32> to vector<32x128xf32>
    %484 = arith.mulf %479, %483 : vector<32x128xf32>
    %485 = arith.addf %459, %484 : vector<32x128xf32>
    %c17_228 = arith.constant 17 : index
    %c1_229 = arith.constant 1 : index
    %c0_230 = arith.constant 0 : index
    %486 = vector.load %arg2[%c17_228, %c1_229, %c0_230] : memref<27x4x128xf32, #tpu.memory_space<vmem>>, vector<1x1x128xf32>
    %487 = vector.shape_cast %486 : vector<1x1x128xf32> to vector<128xf32>
    %488 = vector.shape_cast %487 : vector<128xf32> to vector<1x128xf32>
    %489 = vector.broadcast %488 : vector<1x128xf32> to vector<32x128xf32>
    %490 = arith.mulf %479, %489 : vector<32x128xf32>
    %491 = arith.addf %465, %490 : vector<32x128xf32>
    %c17_231 = arith.constant 17 : index
    %c2_232 = arith.constant 2 : index
    %c0_233 = arith.constant 0 : index
    %492 = vector.load %arg2[%c17_231, %c2_232, %c0_233] : memref<27x4x128xf32, #tpu.memory_space<vmem>>, vector<1x1x128xf32>
    %493 = vector.shape_cast %492 : vector<1x1x128xf32> to vector<128xf32>
    %494 = vector.shape_cast %493 : vector<128xf32> to vector<1x128xf32>
    %495 = vector.broadcast %494 : vector<1x128xf32> to vector<32x128xf32>
    %496 = arith.mulf %479, %495 : vector<32x128xf32>
    %497 = arith.addf %471, %496 : vector<32x128xf32>
    %c17_234 = arith.constant 17 : index
    %c3_235 = arith.constant 3 : index
    %c0_236 = arith.constant 0 : index
    %498 = vector.load %arg2[%c17_234, %c3_235, %c0_236] : memref<27x4x128xf32, #tpu.memory_space<vmem>>, vector<1x1x128xf32>
    %499 = vector.shape_cast %498 : vector<1x1x128xf32> to vector<128xf32>
    %500 = vector.shape_cast %499 : vector<128xf32> to vector<1x128xf32>
    %501 = vector.broadcast %500 : vector<1x128xf32> to vector<32x128xf32>
    %502 = arith.mulf %479, %501 : vector<32x128xf32>
    %503 = arith.addf %477, %502 : vector<32x128xf32>
    %c2_237 = arith.constant 2 : index
    %c0_238 = arith.constant 0 : index
    %c0_239 = arith.constant 0 : index
    %504 = vector.load %arg6[%c2_237, %c0_238, %c0_239] : memref<3x66x66xf32, #tpu.memory_space<vmem>>, vector<1x32x66xf32>
    %505 = vector.shape_cast %504 : vector<1x32x66xf32> to vector<32x66xf32>
    %506 = vector.extract_strided_slice %505 {offsets = [0, 0], sizes = [32, 64], strides = [1, 1]} : vector<32x66xf32> to vector<32x64xf32>
    %507 = tpu.concatenate %506, %506 in 1 : vector<32x64xf32>, vector<32x64xf32> -> vector<32x128xf32>
    %c18 = arith.constant 18 : index
    %c0_240 = arith.constant 0 : index
    %c0_241 = arith.constant 0 : index
    %508 = vector.load %arg2[%c18, %c0_240, %c0_241] : memref<27x4x128xf32, #tpu.memory_space<vmem>>, vector<1x1x128xf32>
    %509 = vector.shape_cast %508 : vector<1x1x128xf32> to vector<128xf32>
    %510 = vector.shape_cast %509 : vector<128xf32> to vector<1x128xf32>
    %511 = vector.broadcast %510 : vector<1x128xf32> to vector<32x128xf32>
    %512 = arith.mulf %507, %511 : vector<32x128xf32>
    %513 = arith.addf %485, %512 : vector<32x128xf32>
    %c18_242 = arith.constant 18 : index
    %c1_243 = arith.constant 1 : index
    %c0_244 = arith.constant 0 : index
    %514 = vector.load %arg2[%c18_242, %c1_243, %c0_244] : memref<27x4x128xf32, #tpu.memory_space<vmem>>, vector<1x1x128xf32>
    %515 = vector.shape_cast %514 : vector<1x1x128xf32> to vector<128xf32>
    %516 = vector.shape_cast %515 : vector<128xf32> to vector<1x128xf32>
    %517 = vector.broadcast %516 : vector<1x128xf32> to vector<32x128xf32>
    %518 = arith.mulf %507, %517 : vector<32x128xf32>
    %519 = arith.addf %491, %518 : vector<32x128xf32>
    %c18_245 = arith.constant 18 : index
    %c2_246 = arith.constant 2 : index
    %c0_247 = arith.constant 0 : index
    %520 = vector.load %arg2[%c18_245, %c2_246, %c0_247] : memref<27x4x128xf32, #tpu.memory_space<vmem>>, vector<1x1x128xf32>
    %521 = vector.shape_cast %520 : vector<1x1x128xf32> to vector<128xf32>
    %522 = vector.shape_cast %521 : vector<128xf32> to vector<1x128xf32>
    %523 = vector.broadcast %522 : vector<1x128xf32> to vector<32x128xf32>
    %524 = arith.mulf %507, %523 : vector<32x128xf32>
    %525 = arith.addf %497, %524 : vector<32x128xf32>
    %c18_248 = arith.constant 18 : index
    %c3_249 = arith.constant 3 : index
    %c0_250 = arith.constant 0 : index
    %526 = vector.load %arg2[%c18_248, %c3_249, %c0_250] : memref<27x4x128xf32, #tpu.memory_space<vmem>>, vector<1x1x128xf32>
    %527 = vector.shape_cast %526 : vector<1x1x128xf32> to vector<128xf32>
    %528 = vector.shape_cast %527 : vector<128xf32> to vector<1x128xf32>
    %529 = vector.broadcast %528 : vector<1x128xf32> to vector<32x128xf32>
    %530 = arith.mulf %507, %529 : vector<32x128xf32>
    %531 = arith.addf %503, %530 : vector<32x128xf32>
    %532 = vector.extract_strided_slice %505 {offsets = [0, 1], sizes = [32, 64], strides = [1, 1]} : vector<32x66xf32> to vector<32x64xf32>
    %533 = tpu.concatenate %532, %532 in 1 : vector<32x64xf32>, vector<32x64xf32> -> vector<32x128xf32>
    %c19 = arith.constant 19 : index
    %c0_251 = arith.constant 0 : index
    %c0_252 = arith.constant 0 : index
    %534 = vector.load %arg2[%c19, %c0_251, %c0_252] : memref<27x4x128xf32, #tpu.memory_space<vmem>>, vector<1x1x128xf32>
    %535 = vector.shape_cast %534 : vector<1x1x128xf32> to vector<128xf32>
    %536 = vector.shape_cast %535 : vector<128xf32> to vector<1x128xf32>
    %537 = vector.broadcast %536 : vector<1x128xf32> to vector<32x128xf32>
    %538 = arith.mulf %533, %537 : vector<32x128xf32>
    %539 = arith.addf %513, %538 : vector<32x128xf32>
    %c19_253 = arith.constant 19 : index
    %c1_254 = arith.constant 1 : index
    %c0_255 = arith.constant 0 : index
    %540 = vector.load %arg2[%c19_253, %c1_254, %c0_255] : memref<27x4x128xf32, #tpu.memory_space<vmem>>, vector<1x1x128xf32>
    %541 = vector.shape_cast %540 : vector<1x1x128xf32> to vector<128xf32>
    %542 = vector.shape_cast %541 : vector<128xf32> to vector<1x128xf32>
    %543 = vector.broadcast %542 : vector<1x128xf32> to vector<32x128xf32>
    %544 = arith.mulf %533, %543 : vector<32x128xf32>
    %545 = arith.addf %519, %544 : vector<32x128xf32>
    %c19_256 = arith.constant 19 : index
    %c2_257 = arith.constant 2 : index
    %c0_258 = arith.constant 0 : index
    %546 = vector.load %arg2[%c19_256, %c2_257, %c0_258] : memref<27x4x128xf32, #tpu.memory_space<vmem>>, vector<1x1x128xf32>
    %547 = vector.shape_cast %546 : vector<1x1x128xf32> to vector<128xf32>
    %548 = vector.shape_cast %547 : vector<128xf32> to vector<1x128xf32>
    %549 = vector.broadcast %548 : vector<1x128xf32> to vector<32x128xf32>
    %550 = arith.mulf %533, %549 : vector<32x128xf32>
    %551 = arith.addf %525, %550 : vector<32x128xf32>
    %c19_259 = arith.constant 19 : index
    %c3_260 = arith.constant 3 : index
    %c0_261 = arith.constant 0 : index
    %552 = vector.load %arg2[%c19_259, %c3_260, %c0_261] : memref<27x4x128xf32, #tpu.memory_space<vmem>>, vector<1x1x128xf32>
    %553 = vector.shape_cast %552 : vector<1x1x128xf32> to vector<128xf32>
    %554 = vector.shape_cast %553 : vector<128xf32> to vector<1x128xf32>
    %555 = vector.broadcast %554 : vector<1x128xf32> to vector<32x128xf32>
    %556 = arith.mulf %533, %555 : vector<32x128xf32>
    %557 = arith.addf %531, %556 : vector<32x128xf32>
    %558 = vector.extract_strided_slice %505 {offsets = [0, 2], sizes = [32, 64], strides = [1, 1]} : vector<32x66xf32> to vector<32x64xf32>
    %559 = tpu.concatenate %558, %558 in 1 : vector<32x64xf32>, vector<32x64xf32> -> vector<32x128xf32>
    %c20 = arith.constant 20 : index
    %c0_262 = arith.constant 0 : index
    %c0_263 = arith.constant 0 : index
    %560 = vector.load %arg2[%c20, %c0_262, %c0_263] : memref<27x4x128xf32, #tpu.memory_space<vmem>>, vector<1x1x128xf32>
    %561 = vector.shape_cast %560 : vector<1x1x128xf32> to vector<128xf32>
    %562 = vector.shape_cast %561 : vector<128xf32> to vector<1x128xf32>
    %563 = vector.broadcast %562 : vector<1x128xf32> to vector<32x128xf32>
    %564 = arith.mulf %559, %563 : vector<32x128xf32>
    %565 = arith.addf %539, %564 : vector<32x128xf32>
    %c20_264 = arith.constant 20 : index
    %c1_265 = arith.constant 1 : index
    %c0_266 = arith.constant 0 : index
    %566 = vector.load %arg2[%c20_264, %c1_265, %c0_266] : memref<27x4x128xf32, #tpu.memory_space<vmem>>, vector<1x1x128xf32>
    %567 = vector.shape_cast %566 : vector<1x1x128xf32> to vector<128xf32>
    %568 = vector.shape_cast %567 : vector<128xf32> to vector<1x128xf32>
    %569 = vector.broadcast %568 : vector<1x128xf32> to vector<32x128xf32>
    %570 = arith.mulf %559, %569 : vector<32x128xf32>
    %571 = arith.addf %545, %570 : vector<32x128xf32>
    %c20_267 = arith.constant 20 : index
    %c2_268 = arith.constant 2 : index
    %c0_269 = arith.constant 0 : index
    %572 = vector.load %arg2[%c20_267, %c2_268, %c0_269] : memref<27x4x128xf32, #tpu.memory_space<vmem>>, vector<1x1x128xf32>
    %573 = vector.shape_cast %572 : vector<1x1x128xf32> to vector<128xf32>
    %574 = vector.shape_cast %573 : vector<128xf32> to vector<1x128xf32>
    %575 = vector.broadcast %574 : vector<1x128xf32> to vector<32x128xf32>
    %576 = arith.mulf %559, %575 : vector<32x128xf32>
    %577 = arith.addf %551, %576 : vector<32x128xf32>
    %c20_270 = arith.constant 20 : index
    %c3_271 = arith.constant 3 : index
    %c0_272 = arith.constant 0 : index
    %578 = vector.load %arg2[%c20_270, %c3_271, %c0_272] : memref<27x4x128xf32, #tpu.memory_space<vmem>>, vector<1x1x128xf32>
    %579 = vector.shape_cast %578 : vector<1x1x128xf32> to vector<128xf32>
    %580 = vector.shape_cast %579 : vector<128xf32> to vector<1x128xf32>
    %581 = vector.broadcast %580 : vector<1x128xf32> to vector<32x128xf32>
    %582 = arith.mulf %559, %581 : vector<32x128xf32>
    %583 = arith.addf %557, %582 : vector<32x128xf32>
    %c2_273 = arith.constant 2 : index
    %c1_274 = arith.constant 1 : index
    %c0_275 = arith.constant 0 : index
    %584 = vector.load %arg6[%c2_273, %c1_274, %c0_275] : memref<3x66x66xf32, #tpu.memory_space<vmem>>, vector<1x32x66xf32>
    %585 = vector.shape_cast %584 : vector<1x32x66xf32> to vector<32x66xf32>
    %586 = vector.extract_strided_slice %585 {offsets = [0, 0], sizes = [32, 64], strides = [1, 1]} : vector<32x66xf32> to vector<32x64xf32>
    %587 = tpu.concatenate %586, %586 in 1 : vector<32x64xf32>, vector<32x64xf32> -> vector<32x128xf32>
    %c21 = arith.constant 21 : index
    %c0_276 = arith.constant 0 : index
    %c0_277 = arith.constant 0 : index
    %588 = vector.load %arg2[%c21, %c0_276, %c0_277] : memref<27x4x128xf32, #tpu.memory_space<vmem>>, vector<1x1x128xf32>
    %589 = vector.shape_cast %588 : vector<1x1x128xf32> to vector<128xf32>
    %590 = vector.shape_cast %589 : vector<128xf32> to vector<1x128xf32>
    %591 = vector.broadcast %590 : vector<1x128xf32> to vector<32x128xf32>
    %592 = arith.mulf %587, %591 : vector<32x128xf32>
    %593 = arith.addf %565, %592 : vector<32x128xf32>
    %c21_278 = arith.constant 21 : index
    %c1_279 = arith.constant 1 : index
    %c0_280 = arith.constant 0 : index
    %594 = vector.load %arg2[%c21_278, %c1_279, %c0_280] : memref<27x4x128xf32, #tpu.memory_space<vmem>>, vector<1x1x128xf32>
    %595 = vector.shape_cast %594 : vector<1x1x128xf32> to vector<128xf32>
    %596 = vector.shape_cast %595 : vector<128xf32> to vector<1x128xf32>
    %597 = vector.broadcast %596 : vector<1x128xf32> to vector<32x128xf32>
    %598 = arith.mulf %587, %597 : vector<32x128xf32>
    %599 = arith.addf %571, %598 : vector<32x128xf32>
    %c21_281 = arith.constant 21 : index
    %c2_282 = arith.constant 2 : index
    %c0_283 = arith.constant 0 : index
    %600 = vector.load %arg2[%c21_281, %c2_282, %c0_283] : memref<27x4x128xf32, #tpu.memory_space<vmem>>, vector<1x1x128xf32>
    %601 = vector.shape_cast %600 : vector<1x1x128xf32> to vector<128xf32>
    %602 = vector.shape_cast %601 : vector<128xf32> to vector<1x128xf32>
    %603 = vector.broadcast %602 : vector<1x128xf32> to vector<32x128xf32>
    %604 = arith.mulf %587, %603 : vector<32x128xf32>
    %605 = arith.addf %577, %604 : vector<32x128xf32>
    %c21_284 = arith.constant 21 : index
    %c3_285 = arith.constant 3 : index
    %c0_286 = arith.constant 0 : index
    %606 = vector.load %arg2[%c21_284, %c3_285, %c0_286] : memref<27x4x128xf32, #tpu.memory_space<vmem>>, vector<1x1x128xf32>
    %607 = vector.shape_cast %606 : vector<1x1x128xf32> to vector<128xf32>
    %608 = vector.shape_cast %607 : vector<128xf32> to vector<1x128xf32>
    %609 = vector.broadcast %608 : vector<1x128xf32> to vector<32x128xf32>
    %610 = arith.mulf %587, %609 : vector<32x128xf32>
    %611 = arith.addf %583, %610 : vector<32x128xf32>
    %612 = vector.extract_strided_slice %585 {offsets = [0, 1], sizes = [32, 64], strides = [1, 1]} : vector<32x66xf32> to vector<32x64xf32>
    %613 = tpu.concatenate %612, %612 in 1 : vector<32x64xf32>, vector<32x64xf32> -> vector<32x128xf32>
    %c22 = arith.constant 22 : index
    %c0_287 = arith.constant 0 : index
    %c0_288 = arith.constant 0 : index
    %614 = vector.load %arg2[%c22, %c0_287, %c0_288] : memref<27x4x128xf32, #tpu.memory_space<vmem>>, vector<1x1x128xf32>
    %615 = vector.shape_cast %614 : vector<1x1x128xf32> to vector<128xf32>
    %616 = vector.shape_cast %615 : vector<128xf32> to vector<1x128xf32>
    %617 = vector.broadcast %616 : vector<1x128xf32> to vector<32x128xf32>
    %618 = arith.mulf %613, %617 : vector<32x128xf32>
    %619 = arith.addf %593, %618 : vector<32x128xf32>
    %c22_289 = arith.constant 22 : index
    %c1_290 = arith.constant 1 : index
    %c0_291 = arith.constant 0 : index
    %620 = vector.load %arg2[%c22_289, %c1_290, %c0_291] : memref<27x4x128xf32, #tpu.memory_space<vmem>>, vector<1x1x128xf32>
    %621 = vector.shape_cast %620 : vector<1x1x128xf32> to vector<128xf32>
    %622 = vector.shape_cast %621 : vector<128xf32> to vector<1x128xf32>
    %623 = vector.broadcast %622 : vector<1x128xf32> to vector<32x128xf32>
    %624 = arith.mulf %613, %623 : vector<32x128xf32>
    %625 = arith.addf %599, %624 : vector<32x128xf32>
    %c22_292 = arith.constant 22 : index
    %c2_293 = arith.constant 2 : index
    %c0_294 = arith.constant 0 : index
    %626 = vector.load %arg2[%c22_292, %c2_293, %c0_294] : memref<27x4x128xf32, #tpu.memory_space<vmem>>, vector<1x1x128xf32>
    %627 = vector.shape_cast %626 : vector<1x1x128xf32> to vector<128xf32>
    %628 = vector.shape_cast %627 : vector<128xf32> to vector<1x128xf32>
    %629 = vector.broadcast %628 : vector<1x128xf32> to vector<32x128xf32>
    %630 = arith.mulf %613, %629 : vector<32x128xf32>
    %631 = arith.addf %605, %630 : vector<32x128xf32>
    %c22_295 = arith.constant 22 : index
    %c3_296 = arith.constant 3 : index
    %c0_297 = arith.constant 0 : index
    %632 = vector.load %arg2[%c22_295, %c3_296, %c0_297] : memref<27x4x128xf32, #tpu.memory_space<vmem>>, vector<1x1x128xf32>
    %633 = vector.shape_cast %632 : vector<1x1x128xf32> to vector<128xf32>
    %634 = vector.shape_cast %633 : vector<128xf32> to vector<1x128xf32>
    %635 = vector.broadcast %634 : vector<1x128xf32> to vector<32x128xf32>
    %636 = arith.mulf %613, %635 : vector<32x128xf32>
    %637 = arith.addf %611, %636 : vector<32x128xf32>
    %638 = vector.extract_strided_slice %585 {offsets = [0, 2], sizes = [32, 64], strides = [1, 1]} : vector<32x66xf32> to vector<32x64xf32>
    %639 = tpu.concatenate %638, %638 in 1 : vector<32x64xf32>, vector<32x64xf32> -> vector<32x128xf32>
    %c23 = arith.constant 23 : index
    %c0_298 = arith.constant 0 : index
    %c0_299 = arith.constant 0 : index
    %640 = vector.load %arg2[%c23, %c0_298, %c0_299] : memref<27x4x128xf32, #tpu.memory_space<vmem>>, vector<1x1x128xf32>
    %641 = vector.shape_cast %640 : vector<1x1x128xf32> to vector<128xf32>
    %642 = vector.shape_cast %641 : vector<128xf32> to vector<1x128xf32>
    %643 = vector.broadcast %642 : vector<1x128xf32> to vector<32x128xf32>
    %644 = arith.mulf %639, %643 : vector<32x128xf32>
    %645 = arith.addf %619, %644 : vector<32x128xf32>
    %c23_300 = arith.constant 23 : index
    %c1_301 = arith.constant 1 : index
    %c0_302 = arith.constant 0 : index
    %646 = vector.load %arg2[%c23_300, %c1_301, %c0_302] : memref<27x4x128xf32, #tpu.memory_space<vmem>>, vector<1x1x128xf32>
    %647 = vector.shape_cast %646 : vector<1x1x128xf32> to vector<128xf32>
    %648 = vector.shape_cast %647 : vector<128xf32> to vector<1x128xf32>
    %649 = vector.broadcast %648 : vector<1x128xf32> to vector<32x128xf32>
    %650 = arith.mulf %639, %649 : vector<32x128xf32>
    %651 = arith.addf %625, %650 : vector<32x128xf32>
    %c23_303 = arith.constant 23 : index
    %c2_304 = arith.constant 2 : index
    %c0_305 = arith.constant 0 : index
    %652 = vector.load %arg2[%c23_303, %c2_304, %c0_305] : memref<27x4x128xf32, #tpu.memory_space<vmem>>, vector<1x1x128xf32>
    %653 = vector.shape_cast %652 : vector<1x1x128xf32> to vector<128xf32>
    %654 = vector.shape_cast %653 : vector<128xf32> to vector<1x128xf32>
    %655 = vector.broadcast %654 : vector<1x128xf32> to vector<32x128xf32>
    %656 = arith.mulf %639, %655 : vector<32x128xf32>
    %657 = arith.addf %631, %656 : vector<32x128xf32>
    %c23_306 = arith.constant 23 : index
    %c3_307 = arith.constant 3 : index
    %c0_308 = arith.constant 0 : index
    %658 = vector.load %arg2[%c23_306, %c3_307, %c0_308] : memref<27x4x128xf32, #tpu.memory_space<vmem>>, vector<1x1x128xf32>
    %659 = vector.shape_cast %658 : vector<1x1x128xf32> to vector<128xf32>
    %660 = vector.shape_cast %659 : vector<128xf32> to vector<1x128xf32>
    %661 = vector.broadcast %660 : vector<1x128xf32> to vector<32x128xf32>
    %662 = arith.mulf %639, %661 : vector<32x128xf32>
    %663 = arith.addf %637, %662 : vector<32x128xf32>
    %c2_309 = arith.constant 2 : index
    %c2_310 = arith.constant 2 : index
    %c0_311 = arith.constant 0 : index
    %664 = vector.load %arg6[%c2_309, %c2_310, %c0_311] : memref<3x66x66xf32, #tpu.memory_space<vmem>>, vector<1x32x66xf32>
    %665 = vector.shape_cast %664 : vector<1x32x66xf32> to vector<32x66xf32>
    %666 = vector.extract_strided_slice %665 {offsets = [0, 0], sizes = [32, 64], strides = [1, 1]} : vector<32x66xf32> to vector<32x64xf32>
    %667 = tpu.concatenate %666, %666 in 1 : vector<32x64xf32>, vector<32x64xf32> -> vector<32x128xf32>
    %c24 = arith.constant 24 : index
    %c0_312 = arith.constant 0 : index
    %c0_313 = arith.constant 0 : index
    %668 = vector.load %arg2[%c24, %c0_312, %c0_313] : memref<27x4x128xf32, #tpu.memory_space<vmem>>, vector<1x1x128xf32>
    %669 = vector.shape_cast %668 : vector<1x1x128xf32> to vector<128xf32>
    %670 = vector.shape_cast %669 : vector<128xf32> to vector<1x128xf32>
    %671 = vector.broadcast %670 : vector<1x128xf32> to vector<32x128xf32>
    %672 = arith.mulf %667, %671 : vector<32x128xf32>
    %673 = arith.addf %645, %672 : vector<32x128xf32>
    %c24_314 = arith.constant 24 : index
    %c1_315 = arith.constant 1 : index
    %c0_316 = arith.constant 0 : index
    %674 = vector.load %arg2[%c24_314, %c1_315, %c0_316] : memref<27x4x128xf32, #tpu.memory_space<vmem>>, vector<1x1x128xf32>
    %675 = vector.shape_cast %674 : vector<1x1x128xf32> to vector<128xf32>
    %676 = vector.shape_cast %675 : vector<128xf32> to vector<1x128xf32>
    %677 = vector.broadcast %676 : vector<1x128xf32> to vector<32x128xf32>
    %678 = arith.mulf %667, %677 : vector<32x128xf32>
    %679 = arith.addf %651, %678 : vector<32x128xf32>
    %c24_317 = arith.constant 24 : index
    %c2_318 = arith.constant 2 : index
    %c0_319 = arith.constant 0 : index
    %680 = vector.load %arg2[%c24_317, %c2_318, %c0_319] : memref<27x4x128xf32, #tpu.memory_space<vmem>>, vector<1x1x128xf32>
    %681 = vector.shape_cast %680 : vector<1x1x128xf32> to vector<128xf32>
    %682 = vector.shape_cast %681 : vector<128xf32> to vector<1x128xf32>
    %683 = vector.broadcast %682 : vector<1x128xf32> to vector<32x128xf32>
    %684 = arith.mulf %667, %683 : vector<32x128xf32>
    %685 = arith.addf %657, %684 : vector<32x128xf32>
    %c24_320 = arith.constant 24 : index
    %c3_321 = arith.constant 3 : index
    %c0_322 = arith.constant 0 : index
    %686 = vector.load %arg2[%c24_320, %c3_321, %c0_322] : memref<27x4x128xf32, #tpu.memory_space<vmem>>, vector<1x1x128xf32>
    %687 = vector.shape_cast %686 : vector<1x1x128xf32> to vector<128xf32>
    %688 = vector.shape_cast %687 : vector<128xf32> to vector<1x128xf32>
    %689 = vector.broadcast %688 : vector<1x128xf32> to vector<32x128xf32>
    %690 = arith.mulf %667, %689 : vector<32x128xf32>
    %691 = arith.addf %663, %690 : vector<32x128xf32>
    %692 = vector.extract_strided_slice %665 {offsets = [0, 1], sizes = [32, 64], strides = [1, 1]} : vector<32x66xf32> to vector<32x64xf32>
    %693 = tpu.concatenate %692, %692 in 1 : vector<32x64xf32>, vector<32x64xf32> -> vector<32x128xf32>
    %c25 = arith.constant 25 : index
    %c0_323 = arith.constant 0 : index
    %c0_324 = arith.constant 0 : index
    %694 = vector.load %arg2[%c25, %c0_323, %c0_324] : memref<27x4x128xf32, #tpu.memory_space<vmem>>, vector<1x1x128xf32>
    %695 = vector.shape_cast %694 : vector<1x1x128xf32> to vector<128xf32>
    %696 = vector.shape_cast %695 : vector<128xf32> to vector<1x128xf32>
    %697 = vector.broadcast %696 : vector<1x128xf32> to vector<32x128xf32>
    %698 = arith.mulf %693, %697 : vector<32x128xf32>
    %699 = arith.addf %673, %698 : vector<32x128xf32>
    %c25_325 = arith.constant 25 : index
    %c1_326 = arith.constant 1 : index
    %c0_327 = arith.constant 0 : index
    %700 = vector.load %arg2[%c25_325, %c1_326, %c0_327] : memref<27x4x128xf32, #tpu.memory_space<vmem>>, vector<1x1x128xf32>
    %701 = vector.shape_cast %700 : vector<1x1x128xf32> to vector<128xf32>
    %702 = vector.shape_cast %701 : vector<128xf32> to vector<1x128xf32>
    %703 = vector.broadcast %702 : vector<1x128xf32> to vector<32x128xf32>
    %704 = arith.mulf %693, %703 : vector<32x128xf32>
    %705 = arith.addf %679, %704 : vector<32x128xf32>
    %c25_328 = arith.constant 25 : index
    %c2_329 = arith.constant 2 : index
    %c0_330 = arith.constant 0 : index
    %706 = vector.load %arg2[%c25_328, %c2_329, %c0_330] : memref<27x4x128xf32, #tpu.memory_space<vmem>>, vector<1x1x128xf32>
    %707 = vector.shape_cast %706 : vector<1x1x128xf32> to vector<128xf32>
    %708 = vector.shape_cast %707 : vector<128xf32> to vector<1x128xf32>
    %709 = vector.broadcast %708 : vector<1x128xf32> to vector<32x128xf32>
    %710 = arith.mulf %693, %709 : vector<32x128xf32>
    %711 = arith.addf %685, %710 : vector<32x128xf32>
    %c25_331 = arith.constant 25 : index
    %c3_332 = arith.constant 3 : index
    %c0_333 = arith.constant 0 : index
    %712 = vector.load %arg2[%c25_331, %c3_332, %c0_333] : memref<27x4x128xf32, #tpu.memory_space<vmem>>, vector<1x1x128xf32>
    %713 = vector.shape_cast %712 : vector<1x1x128xf32> to vector<128xf32>
    %714 = vector.shape_cast %713 : vector<128xf32> to vector<1x128xf32>
    %715 = vector.broadcast %714 : vector<1x128xf32> to vector<32x128xf32>
    %716 = arith.mulf %693, %715 : vector<32x128xf32>
    %717 = arith.addf %691, %716 : vector<32x128xf32>
    %718 = vector.extract_strided_slice %665 {offsets = [0, 2], sizes = [32, 64], strides = [1, 1]} : vector<32x66xf32> to vector<32x64xf32>
    %719 = tpu.concatenate %718, %718 in 1 : vector<32x64xf32>, vector<32x64xf32> -> vector<32x128xf32>
    %c26 = arith.constant 26 : index
    %c0_334 = arith.constant 0 : index
    %c0_335 = arith.constant 0 : index
    %720 = vector.load %arg2[%c26, %c0_334, %c0_335] : memref<27x4x128xf32, #tpu.memory_space<vmem>>, vector<1x1x128xf32>
    %721 = vector.shape_cast %720 : vector<1x1x128xf32> to vector<128xf32>
    %722 = vector.shape_cast %721 : vector<128xf32> to vector<1x128xf32>
    %723 = vector.broadcast %722 : vector<1x128xf32> to vector<32x128xf32>
    %724 = arith.mulf %719, %723 : vector<32x128xf32>
    %725 = arith.addf %699, %724 : vector<32x128xf32>
    %c26_336 = arith.constant 26 : index
    %c1_337 = arith.constant 1 : index
    %c0_338 = arith.constant 0 : index
    %726 = vector.load %arg2[%c26_336, %c1_337, %c0_338] : memref<27x4x128xf32, #tpu.memory_space<vmem>>, vector<1x1x128xf32>
    %727 = vector.shape_cast %726 : vector<1x1x128xf32> to vector<128xf32>
    %728 = vector.shape_cast %727 : vector<128xf32> to vector<1x128xf32>
    %729 = vector.broadcast %728 : vector<1x128xf32> to vector<32x128xf32>
    %730 = arith.mulf %719, %729 : vector<32x128xf32>
    %731 = arith.addf %705, %730 : vector<32x128xf32>
    %c26_339 = arith.constant 26 : index
    %c2_340 = arith.constant 2 : index
    %c0_341 = arith.constant 0 : index
    %732 = vector.load %arg2[%c26_339, %c2_340, %c0_341] : memref<27x4x128xf32, #tpu.memory_space<vmem>>, vector<1x1x128xf32>
    %733 = vector.shape_cast %732 : vector<1x1x128xf32> to vector<128xf32>
    %734 = vector.shape_cast %733 : vector<128xf32> to vector<1x128xf32>
    %735 = vector.broadcast %734 : vector<1x128xf32> to vector<32x128xf32>
    %736 = arith.mulf %719, %735 : vector<32x128xf32>
    %737 = arith.addf %711, %736 : vector<32x128xf32>
    %c26_342 = arith.constant 26 : index
    %c3_343 = arith.constant 3 : index
    %c0_344 = arith.constant 0 : index
    %738 = vector.load %arg2[%c26_342, %c3_343, %c0_344] : memref<27x4x128xf32, #tpu.memory_space<vmem>>, vector<1x1x128xf32>
    %739 = vector.shape_cast %738 : vector<1x1x128xf32> to vector<128xf32>
    %740 = vector.shape_cast %739 : vector<128xf32> to vector<1x128xf32>
    %741 = vector.broadcast %740 : vector<1x128xf32> to vector<32x128xf32>
    %742 = arith.mulf %719, %741 : vector<32x128xf32>
    %743 = arith.addf %717, %742 : vector<32x128xf32>
    %cst_345 = arith.constant 0.000000e+00 : f32
    %cst_346 = arith.constant 5.000000e-01 : f32
    %744 = vector.broadcast %cst_345 : f32 to vector<32x128xf32>
    %745 = arith.maximumf %744, %725 : vector<32x128xf32>
    %746 = vector.broadcast %cst_346 : f32 to vector<32x128xf32>
    %747 = arith.minimumf %746, %745 : vector<32x128xf32>
    %c0_347 = arith.constant 0 : index
    %c0_348 = arith.constant 0 : index
    %c0_349 = arith.constant 0 : index
    %c0_350 = arith.constant 0 : index
    %748 = vector.load %arg5[%c0_347, %c0_348, %c0_349, %c0_350] : memref<1x4x64x128xf32, #tpu.memory_space<vmem>>, vector<1x1x32x128xf32>
    %749 = vector.shape_cast %748 : vector<1x1x32x128xf32> to vector<32x128xf32>
    %750 = vector.shape_cast %747 : vector<32x128xf32> to vector<1x1x32x128xf32>
    tpu.vector_store %arg5[%c0_347, %c0_348, %c0_349, %c0_350], %750 {strides = array<i32>} : memref<1x4x64x128xf32, #tpu.memory_space<vmem>>, vector<1x1x32x128xf32>,
    %cst_351 = arith.constant 0.000000e+00 : f32
    %cst_352 = arith.constant 5.000000e-01 : f32
    %751 = vector.broadcast %cst_351 : f32 to vector<32x128xf32>
    %752 = arith.maximumf %751, %731 : vector<32x128xf32>
    %753 = vector.broadcast %cst_352 : f32 to vector<32x128xf32>
    %754 = arith.minimumf %753, %752 : vector<32x128xf32>
    %c0_353 = arith.constant 0 : index
    %c1_354 = arith.constant 1 : index
    %c0_355 = arith.constant 0 : index
    %c0_356 = arith.constant 0 : index
    %755 = vector.load %arg5[%c0_353, %c1_354, %c0_355, %c0_356] : memref<1x4x64x128xf32, #tpu.memory_space<vmem>>, vector<1x1x32x128xf32>
    %756 = vector.shape_cast %755 : vector<1x1x32x128xf32> to vector<32x128xf32>
    %757 = vector.shape_cast %754 : vector<32x128xf32> to vector<1x1x32x128xf32>
    tpu.vector_store %arg5[%c0_353, %c1_354, %c0_355, %c0_356], %757 {strides = array<i32>} : memref<1x4x64x128xf32, #tpu.memory_space<vmem>>, vector<1x1x32x128xf32>,
    %cst_357 = arith.constant 0.000000e+00 : f32
    %cst_358 = arith.constant 5.000000e-01 : f32
    %758 = vector.broadcast %cst_357 : f32 to vector<32x128xf32>
    %759 = arith.maximumf %758, %737 : vector<32x128xf32>
    %760 = vector.broadcast %cst_358 : f32 to vector<32x128xf32>
    %761 = arith.minimumf %760, %759 : vector<32x128xf32>
    %c0_359 = arith.constant 0 : index
    %c2_360 = arith.constant 2 : index
    %c0_361 = arith.constant 0 : index
    %c0_362 = arith.constant 0 : index
    %762 = vector.load %arg5[%c0_359, %c2_360, %c0_361, %c0_362] : memref<1x4x64x128xf32, #tpu.memory_space<vmem>>, vector<1x1x32x128xf32>
    %763 = vector.shape_cast %762 : vector<1x1x32x128xf32> to vector<32x128xf32>
    %764 = vector.shape_cast %761 : vector<32x128xf32> to vector<1x1x32x128xf32>
    tpu.vector_store %arg5[%c0_359, %c2_360, %c0_361, %c0_362], %764 {strides = array<i32>} : memref<1x4x64x128xf32, #tpu.memory_space<vmem>>, vector<1x1x32x128xf32>,
    %cst_363 = arith.constant 0.000000e+00 : f32
    %cst_364 = arith.constant 5.000000e-01 : f32
    %765 = vector.broadcast %cst_363 : f32 to vector<32x128xf32>
    %766 = arith.maximumf %765, %743 : vector<32x128xf32>
    %767 = vector.broadcast %cst_364 : f32 to vector<32x128xf32>
    %768 = arith.minimumf %767, %766 : vector<32x128xf32>
    %c0_365 = arith.constant 0 : index
    %c3_366 = arith.constant 3 : index
    %c0_367 = arith.constant 0 : index
    %c0_368 = arith.constant 0 : index
    %769 = vector.load %arg5[%c0_365, %c3_366, %c0_367, %c0_368] : memref<1x4x64x128xf32, #tpu.memory_space<vmem>>, vector<1x1x32x128xf32>
    %770 = vector.shape_cast %769 : vector<1x1x32x128xf32> to vector<32x128xf32>
    %771 = vector.shape_cast %768 : vector<32x128xf32> to vector<1x1x32x128xf32>
    tpu.vector_store %arg5[%c0_365, %c3_366, %c0_367, %c0_368], %771 {strides = array<i32>} : memref<1x4x64x128xf32, #tpu.memory_space<vmem>>, vector<1x1x32x128xf32>,
    %c0_369 = arith.constant 0 : index
    %c0_370 = arith.constant 0 : index
    %772 = vector.load %arg3[%c0_369, %c0_370] : memref<4x128xf32, #tpu.memory_space<vmem>>, vector<1x128xf32>
    %773 = vector.shape_cast %772 : vector<1x128xf32> to vector<128xf32>
    %774 = vector.shape_cast %773 : vector<128xf32> to vector<1x128xf32>
    %775 = vector.broadcast %774 : vector<1x128xf32> to vector<32x128xf32>
    %c1_371 = arith.constant 1 : index
    %c0_372 = arith.constant 0 : index
    %776 = vector.load %arg3[%c1_371, %c0_372] : memref<4x128xf32, #tpu.memory_space<vmem>>, vector<1x128xf32>
    %777 = vector.shape_cast %776 : vector<1x128xf32> to vector<128xf32>
    %778 = vector.shape_cast %777 : vector<128xf32> to vector<1x128xf32>
    %779 = vector.broadcast %778 : vector<1x128xf32> to vector<32x128xf32>
    %c2_373 = arith.constant 2 : index
    %c0_374 = arith.constant 0 : index
    %780 = vector.load %arg3[%c2_373, %c0_374] : memref<4x128xf32, #tpu.memory_space<vmem>>, vector<1x128xf32>
    %781 = vector.shape_cast %780 : vector<1x128xf32> to vector<128xf32>
    %782 = vector.shape_cast %781 : vector<128xf32> to vector<1x128xf32>
    %783 = vector.broadcast %782 : vector<1x128xf32> to vector<32x128xf32>
    %c3_375 = arith.constant 3 : index
    %c0_376 = arith.constant 0 : index
    %784 = vector.load %arg3[%c3_375, %c0_376] : memref<4x128xf32, #tpu.memory_space<vmem>>, vector<1x128xf32>
    %785 = vector.shape_cast %784 : vector<1x128xf32> to vector<128xf32>
    %786 = vector.shape_cast %785 : vector<128xf32> to vector<1x128xf32>
    %787 = vector.broadcast %786 : vector<1x128xf32> to vector<32x128xf32>
    %c0_377 = arith.constant 0 : index
    %c32 = arith.constant 32 : index
    %c0_378 = arith.constant 0 : index
    %788 = vector.load %arg6[%c0_377, %c32, %c0_378] : memref<3x66x66xf32, #tpu.memory_space<vmem>>, vector<1x32x66xf32>
    %789 = vector.shape_cast %788 : vector<1x32x66xf32> to vector<32x66xf32>
    %790 = vector.extract_strided_slice %789 {offsets = [0, 0], sizes = [32, 64], strides = [1, 1]} : vector<32x66xf32> to vector<32x64xf32>
    %791 = tpu.concatenate %790, %790 in 1 : vector<32x64xf32>, vector<32x64xf32> -> vector<32x128xf32>
    %c0_379 = arith.constant 0 : index
    %c0_380 = arith.constant 0 : index
    %c0_381 = arith.constant 0 : index
    %792 = vector.load %arg2[%c0_379, %c0_380, %c0_381] : memref<27x4x128xf32, #tpu.memory_space<vmem>>, vector<1x1x128xf32>
    %793 = vector.shape_cast %792 : vector<1x1x128xf32> to vector<128xf32>
    %794 = vector.shape_cast %793 : vector<128xf32> to vector<1x128xf32>
    %795 = vector.broadcast %794 : vector<1x128xf32> to vector<32x128xf32>
    %796 = arith.mulf %791, %795 : vector<32x128xf32>
    %797 = arith.addf %775, %796 : vector<32x128xf32>
    %c0_382 = arith.constant 0 : index
    %c1_383 = arith.constant 1 : index
    %c0_384 = arith.constant 0 : index
    %798 = vector.load %arg2[%c0_382, %c1_383, %c0_384] : memref<27x4x128xf32, #tpu.memory_space<vmem>>, vector<1x1x128xf32>
    %799 = vector.shape_cast %798 : vector<1x1x128xf32> to vector<128xf32>
    %800 = vector.shape_cast %799 : vector<128xf32> to vector<1x128xf32>
    %801 = vector.broadcast %800 : vector<1x128xf32> to vector<32x128xf32>
    %802 = arith.mulf %791, %801 : vector<32x128xf32>
    %803 = arith.addf %779, %802 : vector<32x128xf32>
    %c0_385 = arith.constant 0 : index
    %c2_386 = arith.constant 2 : index
    %c0_387 = arith.constant 0 : index
    %804 = vector.load %arg2[%c0_385, %c2_386, %c0_387] : memref<27x4x128xf32, #tpu.memory_space<vmem>>, vector<1x1x128xf32>
    %805 = vector.shape_cast %804 : vector<1x1x128xf32> to vector<128xf32>
    %806 = vector.shape_cast %805 : vector<128xf32> to vector<1x128xf32>
    %807 = vector.broadcast %806 : vector<1x128xf32> to vector<32x128xf32>
    %808 = arith.mulf %791, %807 : vector<32x128xf32>
    %809 = arith.addf %783, %808 : vector<32x128xf32>
    %c0_388 = arith.constant 0 : index
    %c3_389 = arith.constant 3 : index
    %c0_390 = arith.constant 0 : index
    %810 = vector.load %arg2[%c0_388, %c3_389, %c0_390] : memref<27x4x128xf32, #tpu.memory_space<vmem>>, vector<1x1x128xf32>
    %811 = vector.shape_cast %810 : vector<1x1x128xf32> to vector<128xf32>
    %812 = vector.shape_cast %811 : vector<128xf32> to vector<1x128xf32>
    %813 = vector.broadcast %812 : vector<1x128xf32> to vector<32x128xf32>
    %814 = arith.mulf %791, %813 : vector<32x128xf32>
    %815 = arith.addf %787, %814 : vector<32x128xf32>
    %816 = vector.extract_strided_slice %789 {offsets = [0, 1], sizes = [32, 64], strides = [1, 1]} : vector<32x66xf32> to vector<32x64xf32>
    %817 = tpu.concatenate %816, %816 in 1 : vector<32x64xf32>, vector<32x64xf32> -> vector<32x128xf32>
    %c1_391 = arith.constant 1 : index
    %c0_392 = arith.constant 0 : index
    %c0_393 = arith.constant 0 : index
    %818 = vector.load %arg2[%c1_391, %c0_392, %c0_393] : memref<27x4x128xf32, #tpu.memory_space<vmem>>, vector<1x1x128xf32>
    %819 = vector.shape_cast %818 : vector<1x1x128xf32> to vector<128xf32>
    %820 = vector.shape_cast %819 : vector<128xf32> to vector<1x128xf32>
    %821 = vector.broadcast %820 : vector<1x128xf32> to vector<32x128xf32>
    %822 = arith.mulf %817, %821 : vector<32x128xf32>
    %823 = arith.addf %797, %822 : vector<32x128xf32>
    %c1_394 = arith.constant 1 : index
    %c1_395 = arith.constant 1 : index
    %c0_396 = arith.constant 0 : index
    %824 = vector.load %arg2[%c1_394, %c1_395, %c0_396] : memref<27x4x128xf32, #tpu.memory_space<vmem>>, vector<1x1x128xf32>
    %825 = vector.shape_cast %824 : vector<1x1x128xf32> to vector<128xf32>
    %826 = vector.shape_cast %825 : vector<128xf32> to vector<1x128xf32>
    %827 = vector.broadcast %826 : vector<1x128xf32> to vector<32x128xf32>
    %828 = arith.mulf %817, %827 : vector<32x128xf32>
    %829 = arith.addf %803, %828 : vector<32x128xf32>
    %c1_397 = arith.constant 1 : index
    %c2_398 = arith.constant 2 : index
    %c0_399 = arith.constant 0 : index
    %830 = vector.load %arg2[%c1_397, %c2_398, %c0_399] : memref<27x4x128xf32, #tpu.memory_space<vmem>>, vector<1x1x128xf32>
    %831 = vector.shape_cast %830 : vector<1x1x128xf32> to vector<128xf32>
    %832 = vector.shape_cast %831 : vector<128xf32> to vector<1x128xf32>
    %833 = vector.broadcast %832 : vector<1x128xf32> to vector<32x128xf32>
    %834 = arith.mulf %817, %833 : vector<32x128xf32>
    %835 = arith.addf %809, %834 : vector<32x128xf32>
    %c1_400 = arith.constant 1 : index
    %c3_401 = arith.constant 3 : index
    %c0_402 = arith.constant 0 : index
    %836 = vector.load %arg2[%c1_400, %c3_401, %c0_402] : memref<27x4x128xf32, #tpu.memory_space<vmem>>, vector<1x1x128xf32>
    %837 = vector.shape_cast %836 : vector<1x1x128xf32> to vector<128xf32>
    %838 = vector.shape_cast %837 : vector<128xf32> to vector<1x128xf32>
    %839 = vector.broadcast %838 : vector<1x128xf32> to vector<32x128xf32>
    %840 = arith.mulf %817, %839 : vector<32x128xf32>
    %841 = arith.addf %815, %840 : vector<32x128xf32>
    %842 = vector.extract_strided_slice %789 {offsets = [0, 2], sizes = [32, 64], strides = [1, 1]} : vector<32x66xf32> to vector<32x64xf32>
    %843 = tpu.concatenate %842, %842 in 1 : vector<32x64xf32>, vector<32x64xf32> -> vector<32x128xf32>
    %c2_403 = arith.constant 2 : index
    %c0_404 = arith.constant 0 : index
    %c0_405 = arith.constant 0 : index
    %844 = vector.load %arg2[%c2_403, %c0_404, %c0_405] : memref<27x4x128xf32, #tpu.memory_space<vmem>>, vector<1x1x128xf32>
    %845 = vector.shape_cast %844 : vector<1x1x128xf32> to vector<128xf32>
    %846 = vector.shape_cast %845 : vector<128xf32> to vector<1x128xf32>
    %847 = vector.broadcast %846 : vector<1x128xf32> to vector<32x128xf32>
    %848 = arith.mulf %843, %847 : vector<32x128xf32>
    %849 = arith.addf %823, %848 : vector<32x128xf32>
    %c2_406 = arith.constant 2 : index
    %c1_407 = arith.constant 1 : index
    %c0_408 = arith.constant 0 : index
    %850 = vector.load %arg2[%c2_406, %c1_407, %c0_408] : memref<27x4x128xf32, #tpu.memory_space<vmem>>, vector<1x1x128xf32>
    %851 = vector.shape_cast %850 : vector<1x1x128xf32> to vector<128xf32>
    %852 = vector.shape_cast %851 : vector<128xf32> to vector<1x128xf32>
    %853 = vector.broadcast %852 : vector<1x128xf32> to vector<32x128xf32>
    %854 = arith.mulf %843, %853 : vector<32x128xf32>
    %855 = arith.addf %829, %854 : vector<32x128xf32>
    %c2_409 = arith.constant 2 : index
    %c2_410 = arith.constant 2 : index
    %c0_411 = arith.constant 0 : index
    %856 = vector.load %arg2[%c2_409, %c2_410, %c0_411] : memref<27x4x128xf32, #tpu.memory_space<vmem>>, vector<1x1x128xf32>
    %857 = vector.shape_cast %856 : vector<1x1x128xf32> to vector<128xf32>
    %858 = vector.shape_cast %857 : vector<128xf32> to vector<1x128xf32>
    %859 = vector.broadcast %858 : vector<1x128xf32> to vector<32x128xf32>
    %860 = arith.mulf %843, %859 : vector<32x128xf32>
    %861 = arith.addf %835, %860 : vector<32x128xf32>
    %c2_412 = arith.constant 2 : index
    %c3_413 = arith.constant 3 : index
    %c0_414 = arith.constant 0 : index
    %862 = vector.load %arg2[%c2_412, %c3_413, %c0_414] : memref<27x4x128xf32, #tpu.memory_space<vmem>>, vector<1x1x128xf32>
    %863 = vector.shape_cast %862 : vector<1x1x128xf32> to vector<128xf32>
    %864 = vector.shape_cast %863 : vector<128xf32> to vector<1x128xf32>
    %865 = vector.broadcast %864 : vector<1x128xf32> to vector<32x128xf32>
    %866 = arith.mulf %843, %865 : vector<32x128xf32>
    %867 = arith.addf %841, %866 : vector<32x128xf32>
    %c0_415 = arith.constant 0 : index
    %c33 = arith.constant 33 : index
    %c0_416 = arith.constant 0 : index
    %868 = vector.load %arg6[%c0_415, %c33, %c0_416] : memref<3x66x66xf32, #tpu.memory_space<vmem>>, vector<1x32x66xf32>
    %869 = vector.shape_cast %868 : vector<1x32x66xf32> to vector<32x66xf32>
    %870 = vector.extract_strided_slice %869 {offsets = [0, 0], sizes = [32, 64], strides = [1, 1]} : vector<32x66xf32> to vector<32x64xf32>
    %871 = tpu.concatenate %870, %870 in 1 : vector<32x64xf32>, vector<32x64xf32> -> vector<32x128xf32>
    %c3_417 = arith.constant 3 : index
    %c0_418 = arith.constant 0 : index
    %c0_419 = arith.constant 0 : index
    %872 = vector.load %arg2[%c3_417, %c0_418, %c0_419] : memref<27x4x128xf32, #tpu.memory_space<vmem>>, vector<1x1x128xf32>
    %873 = vector.shape_cast %872 : vector<1x1x128xf32> to vector<128xf32>
    %874 = vector.shape_cast %873 : vector<128xf32> to vector<1x128xf32>
    %875 = vector.broadcast %874 : vector<1x128xf32> to vector<32x128xf32>
    %876 = arith.mulf %871, %875 : vector<32x128xf32>
    %877 = arith.addf %849, %876 : vector<32x128xf32>
    %c3_420 = arith.constant 3 : index
    %c1_421 = arith.constant 1 : index
    %c0_422 = arith.constant 0 : index
    %878 = vector.load %arg2[%c3_420, %c1_421, %c0_422] : memref<27x4x128xf32, #tpu.memory_space<vmem>>, vector<1x1x128xf32>
    %879 = vector.shape_cast %878 : vector<1x1x128xf32> to vector<128xf32>
    %880 = vector.shape_cast %879 : vector<128xf32> to vector<1x128xf32>
    %881 = vector.broadcast %880 : vector<1x128xf32> to vector<32x128xf32>
    %882 = arith.mulf %871, %881 : vector<32x128xf32>
    %883 = arith.addf %855, %882 : vector<32x128xf32>
    %c3_423 = arith.constant 3 : index
    %c2_424 = arith.constant 2 : index
    %c0_425 = arith.constant 0 : index
    %884 = vector.load %arg2[%c3_423, %c2_424, %c0_425] : memref<27x4x128xf32, #tpu.memory_space<vmem>>, vector<1x1x128xf32>
    %885 = vector.shape_cast %884 : vector<1x1x128xf32> to vector<128xf32>
    %886 = vector.shape_cast %885 : vector<128xf32> to vector<1x128xf32>
    %887 = vector.broadcast %886 : vector<1x128xf32> to vector<32x128xf32>
    %888 = arith.mulf %871, %887 : vector<32x128xf32>
    %889 = arith.addf %861, %888 : vector<32x128xf32>
    %c3_426 = arith.constant 3 : index
    %c3_427 = arith.constant 3 : index
    %c0_428 = arith.constant 0 : index
    %890 = vector.load %arg2[%c3_426, %c3_427, %c0_428] : memref<27x4x128xf32, #tpu.memory_space<vmem>>, vector<1x1x128xf32>
    %891 = vector.shape_cast %890 : vector<1x1x128xf32> to vector<128xf32>
    %892 = vector.shape_cast %891 : vector<128xf32> to vector<1x128xf32>
    %893 = vector.broadcast %892 : vector<1x128xf32> to vector<32x128xf32>
    %894 = arith.mulf %871, %893 : vector<32x128xf32>
    %895 = arith.addf %867, %894 : vector<32x128xf32>
    %896 = vector.extract_strided_slice %869 {offsets = [0, 1], sizes = [32, 64], strides = [1, 1]} : vector<32x66xf32> to vector<32x64xf32>
    %897 = tpu.concatenate %896, %896 in 1 : vector<32x64xf32>, vector<32x64xf32> -> vector<32x128xf32>
    %c4_429 = arith.constant 4 : index
    %c0_430 = arith.constant 0 : index
    %c0_431 = arith.constant 0 : index
    %898 = vector.load %arg2[%c4_429, %c0_430, %c0_431] : memref<27x4x128xf32, #tpu.memory_space<vmem>>, vector<1x1x128xf32>
    %899 = vector.shape_cast %898 : vector<1x1x128xf32> to vector<128xf32>
    %900 = vector.shape_cast %899 : vector<128xf32> to vector<1x128xf32>
    %901 = vector.broadcast %900 : vector<1x128xf32> to vector<32x128xf32>
    %902 = arith.mulf %897, %901 : vector<32x128xf32>
    %903 = arith.addf %877, %902 : vector<32x128xf32>
    %c4_432 = arith.constant 4 : index
    %c1_433 = arith.constant 1 : index
    %c0_434 = arith.constant 0 : index
    %904 = vector.load %arg2[%c4_432, %c1_433, %c0_434] : memref<27x4x128xf32, #tpu.memory_space<vmem>>, vector<1x1x128xf32>
    %905 = vector.shape_cast %904 : vector<1x1x128xf32> to vector<128xf32>
    %906 = vector.shape_cast %905 : vector<128xf32> to vector<1x128xf32>
    %907 = vector.broadcast %906 : vector<1x128xf32> to vector<32x128xf32>
    %908 = arith.mulf %897, %907 : vector<32x128xf32>
    %909 = arith.addf %883, %908 : vector<32x128xf32>
    %c4_435 = arith.constant 4 : index
    %c2_436 = arith.constant 2 : index
    %c0_437 = arith.constant 0 : index
    %910 = vector.load %arg2[%c4_435, %c2_436, %c0_437] : memref<27x4x128xf32, #tpu.memory_space<vmem>>, vector<1x1x128xf32>
    %911 = vector.shape_cast %910 : vector<1x1x128xf32> to vector<128xf32>
    %912 = vector.shape_cast %911 : vector<128xf32> to vector<1x128xf32>
    %913 = vector.broadcast %912 : vector<1x128xf32> to vector<32x128xf32>
    %914 = arith.mulf %897, %913 : vector<32x128xf32>
    %915 = arith.addf %889, %914 : vector<32x128xf32>
    %c4_438 = arith.constant 4 : index
    %c3_439 = arith.constant 3 : index
    %c0_440 = arith.constant 0 : index
    %916 = vector.load %arg2[%c4_438, %c3_439, %c0_440] : memref<27x4x128xf32, #tpu.memory_space<vmem>>, vector<1x1x128xf32>
    %917 = vector.shape_cast %916 : vector<1x1x128xf32> to vector<128xf32>
    %918 = vector.shape_cast %917 : vector<128xf32> to vector<1x128xf32>
    %919 = vector.broadcast %918 : vector<1x128xf32> to vector<32x128xf32>
    %920 = arith.mulf %897, %919 : vector<32x128xf32>
    %921 = arith.addf %895, %920 : vector<32x128xf32>
    %922 = vector.extract_strided_slice %869 {offsets = [0, 2], sizes = [32, 64], strides = [1, 1]} : vector<32x66xf32> to vector<32x64xf32>
    %923 = tpu.concatenate %922, %922 in 1 : vector<32x64xf32>, vector<32x64xf32> -> vector<32x128xf32>
    %c5_441 = arith.constant 5 : index
    %c0_442 = arith.constant 0 : index
    %c0_443 = arith.constant 0 : index
    %924 = vector.load %arg2[%c5_441, %c0_442, %c0_443] : memref<27x4x128xf32, #tpu.memory_space<vmem>>, vector<1x1x128xf32>
    %925 = vector.shape_cast %924 : vector<1x1x128xf32> to vector<128xf32>
    %926 = vector.shape_cast %925 : vector<128xf32> to vector<1x128xf32>
    %927 = vector.broadcast %926 : vector<1x128xf32> to vector<32x128xf32>
    %928 = arith.mulf %923, %927 : vector<32x128xf32>
    %929 = arith.addf %903, %928 : vector<32x128xf32>
    %c5_444 = arith.constant 5 : index
    %c1_445 = arith.constant 1 : index
    %c0_446 = arith.constant 0 : index
    %930 = vector.load %arg2[%c5_444, %c1_445, %c0_446] : memref<27x4x128xf32, #tpu.memory_space<vmem>>, vector<1x1x128xf32>
    %931 = vector.shape_cast %930 : vector<1x1x128xf32> to vector<128xf32>
    %932 = vector.shape_cast %931 : vector<128xf32> to vector<1x128xf32>
    %933 = vector.broadcast %932 : vector<1x128xf32> to vector<32x128xf32>
    %934 = arith.mulf %923, %933 : vector<32x128xf32>
    %935 = arith.addf %909, %934 : vector<32x128xf32>
    %c5_447 = arith.constant 5 : index
    %c2_448 = arith.constant 2 : index
    %c0_449 = arith.constant 0 : index
    %936 = vector.load %arg2[%c5_447, %c2_448, %c0_449] : memref<27x4x128xf32, #tpu.memory_space<vmem>>, vector<1x1x128xf32>
    %937 = vector.shape_cast %936 : vector<1x1x128xf32> to vector<128xf32>
    %938 = vector.shape_cast %937 : vector<128xf32> to vector<1x128xf32>
    %939 = vector.broadcast %938 : vector<1x128xf32> to vector<32x128xf32>
    %940 = arith.mulf %923, %939 : vector<32x128xf32>
    %941 = arith.addf %915, %940 : vector<32x128xf32>
    %c5_450 = arith.constant 5 : index
    %c3_451 = arith.constant 3 : index
    %c0_452 = arith.constant 0 : index
    %942 = vector.load %arg2[%c5_450, %c3_451, %c0_452] : memref<27x4x128xf32, #tpu.memory_space<vmem>>, vector<1x1x128xf32>
    %943 = vector.shape_cast %942 : vector<1x1x128xf32> to vector<128xf32>
    %944 = vector.shape_cast %943 : vector<128xf32> to vector<1x128xf32>
    %945 = vector.broadcast %944 : vector<1x128xf32> to vector<32x128xf32>
    %946 = arith.mulf %923, %945 : vector<32x128xf32>
    %947 = arith.addf %921, %946 : vector<32x128xf32>
    %c0_453 = arith.constant 0 : index
    %c34 = arith.constant 34 : index
    %c0_454 = arith.constant 0 : index
    %948 = vector.load %arg6[%c0_453, %c34, %c0_454] : memref<3x66x66xf32, #tpu.memory_space<vmem>>, vector<1x32x66xf32>
    %949 = vector.shape_cast %948 : vector<1x32x66xf32> to vector<32x66xf32>
    %950 = vector.extract_strided_slice %949 {offsets = [0, 0], sizes = [32, 64], strides = [1, 1]} : vector<32x66xf32> to vector<32x64xf32>
    %951 = tpu.concatenate %950, %950 in 1 : vector<32x64xf32>, vector<32x64xf32> -> vector<32x128xf32>
    %c6_455 = arith.constant 6 : index
    %c0_456 = arith.constant 0 : index
    %c0_457 = arith.constant 0 : index
    %952 = vector.load %arg2[%c6_455, %c0_456, %c0_457] : memref<27x4x128xf32, #tpu.memory_space<vmem>>, vector<1x1x128xf32>
    %953 = vector.shape_cast %952 : vector<1x1x128xf32> to vector<128xf32>
    %954 = vector.shape_cast %953 : vector<128xf32> to vector<1x128xf32>
    %955 = vector.broadcast %954 : vector<1x128xf32> to vector<32x128xf32>
    %956 = arith.mulf %951, %955 : vector<32x128xf32>
    %957 = arith.addf %929, %956 : vector<32x128xf32>
    %c6_458 = arith.constant 6 : index
    %c1_459 = arith.constant 1 : index
    %c0_460 = arith.constant 0 : index
    %958 = vector.load %arg2[%c6_458, %c1_459, %c0_460] : memref<27x4x128xf32, #tpu.memory_space<vmem>>, vector<1x1x128xf32>
    %959 = vector.shape_cast %958 : vector<1x1x128xf32> to vector<128xf32>
    %960 = vector.shape_cast %959 : vector<128xf32> to vector<1x128xf32>
    %961 = vector.broadcast %960 : vector<1x128xf32> to vector<32x128xf32>
    %962 = arith.mulf %951, %961 : vector<32x128xf32>
    %963 = arith.addf %935, %962 : vector<32x128xf32>
    %c6_461 = arith.constant 6 : index
    %c2_462 = arith.constant 2 : index
    %c0_463 = arith.constant 0 : index
    %964 = vector.load %arg2[%c6_461, %c2_462, %c0_463] : memref<27x4x128xf32, #tpu.memory_space<vmem>>, vector<1x1x128xf32>
    %965 = vector.shape_cast %964 : vector<1x1x128xf32> to vector<128xf32>
    %966 = vector.shape_cast %965 : vector<128xf32> to vector<1x128xf32>
    %967 = vector.broadcast %966 : vector<1x128xf32> to vector<32x128xf32>
    %968 = arith.mulf %951, %967 : vector<32x128xf32>
    %969 = arith.addf %941, %968 : vector<32x128xf32>
    %c6_464 = arith.constant 6 : index
    %c3_465 = arith.constant 3 : index
    %c0_466 = arith.constant 0 : index
    %970 = vector.load %arg2[%c6_464, %c3_465, %c0_466] : memref<27x4x128xf32, #tpu.memory_space<vmem>>, vector<1x1x128xf32>
    %971 = vector.shape_cast %970 : vector<1x1x128xf32> to vector<128xf32>
    %972 = vector.shape_cast %971 : vector<128xf32> to vector<1x128xf32>
    %973 = vector.broadcast %972 : vector<1x128xf32> to vector<32x128xf32>
    %974 = arith.mulf %951, %973 : vector<32x128xf32>
    %975 = arith.addf %947, %974 : vector<32x128xf32>
    %976 = vector.extract_strided_slice %949 {offsets = [0, 1], sizes = [32, 64], strides = [1, 1]} : vector<32x66xf32> to vector<32x64xf32>
    %977 = tpu.concatenate %976, %976 in 1 : vector<32x64xf32>, vector<32x64xf32> -> vector<32x128xf32>
    %c7_467 = arith.constant 7 : index
    %c0_468 = arith.constant 0 : index
    %c0_469 = arith.constant 0 : index
    %978 = vector.load %arg2[%c7_467, %c0_468, %c0_469] : memref<27x4x128xf32, #tpu.memory_space<vmem>>, vector<1x1x128xf32>
    %979 = vector.shape_cast %978 : vector<1x1x128xf32> to vector<128xf32>
    %980 = vector.shape_cast %979 : vector<128xf32> to vector<1x128xf32>
    %981 = vector.broadcast %980 : vector<1x128xf32> to vector<32x128xf32>
    %982 = arith.mulf %977, %981 : vector<32x128xf32>
    %983 = arith.addf %957, %982 : vector<32x128xf32>
    %c7_470 = arith.constant 7 : index
    %c1_471 = arith.constant 1 : index
    %c0_472 = arith.constant 0 : index
    %984 = vector.load %arg2[%c7_470, %c1_471, %c0_472] : memref<27x4x128xf32, #tpu.memory_space<vmem>>, vector<1x1x128xf32>
    %985 = vector.shape_cast %984 : vector<1x1x128xf32> to vector<128xf32>
    %986 = vector.shape_cast %985 : vector<128xf32> to vector<1x128xf32>
    %987 = vector.broadcast %986 : vector<1x128xf32> to vector<32x128xf32>
    %988 = arith.mulf %977, %987 : vector<32x128xf32>
    %989 = arith.addf %963, %988 : vector<32x128xf32>
    %c7_473 = arith.constant 7 : index
    %c2_474 = arith.constant 2 : index
    %c0_475 = arith.constant 0 : index
    %990 = vector.load %arg2[%c7_473, %c2_474, %c0_475] : memref<27x4x128xf32, #tpu.memory_space<vmem>>, vector<1x1x128xf32>
    %991 = vector.shape_cast %990 : vector<1x1x128xf32> to vector<128xf32>
    %992 = vector.shape_cast %991 : vector<128xf32> to vector<1x128xf32>
    %993 = vector.broadcast %992 : vector<1x128xf32> to vector<32x128xf32>
    %994 = arith.mulf %977, %993 : vector<32x128xf32>
    %995 = arith.addf %969, %994 : vector<32x128xf32>
    %c7_476 = arith.constant 7 : index
    %c3_477 = arith.constant 3 : index
    %c0_478 = arith.constant 0 : index
    %996 = vector.load %arg2[%c7_476, %c3_477, %c0_478] : memref<27x4x128xf32, #tpu.memory_space<vmem>>, vector<1x1x128xf32>
    %997 = vector.shape_cast %996 : vector<1x1x128xf32> to vector<128xf32>
    %998 = vector.shape_cast %997 : vector<128xf32> to vector<1x128xf32>
    %999 = vector.broadcast %998 : vector<1x128xf32> to vector<32x128xf32>
    %1000 = arith.mulf %977, %999 : vector<32x128xf32>
    %1001 = arith.addf %975, %1000 : vector<32x128xf32>
    %1002 = vector.extract_strided_slice %949 {offsets = [0, 2], sizes = [32, 64], strides = [1, 1]} : vector<32x66xf32> to vector<32x64xf32>
    %1003 = tpu.concatenate %1002, %1002 in 1 : vector<32x64xf32>, vector<32x64xf32> -> vector<32x128xf32>
    %c8_479 = arith.constant 8 : index
    %c0_480 = arith.constant 0 : index
    %c0_481 = arith.constant 0 : index
    %1004 = vector.load %arg2[%c8_479, %c0_480, %c0_481] : memref<27x4x128xf32, #tpu.memory_space<vmem>>, vector<1x1x128xf32>
    %1005 = vector.shape_cast %1004 : vector<1x1x128xf32> to vector<128xf32>
    %1006 = vector.shape_cast %1005 : vector<128xf32> to vector<1x128xf32>
    %1007 = vector.broadcast %1006 : vector<1x128xf32> to vector<32x128xf32>
    %1008 = arith.mulf %1003, %1007 : vector<32x128xf32>
    %1009 = arith.addf %983, %1008 : vector<32x128xf32>
    %c8_482 = arith.constant 8 : index
    %c1_483 = arith.constant 1 : index
    %c0_484 = arith.constant 0 : index
    %1010 = vector.load %arg2[%c8_482, %c1_483, %c0_484] : memref<27x4x128xf32, #tpu.memory_space<vmem>>, vector<1x1x128xf32>
    %1011 = vector.shape_cast %1010 : vector<1x1x128xf32> to vector<128xf32>
    %1012 = vector.shape_cast %1011 : vector<128xf32> to vector<1x128xf32>
    %1013 = vector.broadcast %1012 : vector<1x128xf32> to vector<32x128xf32>
    %1014 = arith.mulf %1003, %1013 : vector<32x128xf32>
    %1015 = arith.addf %989, %1014 : vector<32x128xf32>
    %c8_485 = arith.constant 8 : index
    %c2_486 = arith.constant 2 : index
    %c0_487 = arith.constant 0 : index
    %1016 = vector.load %arg2[%c8_485, %c2_486, %c0_487] : memref<27x4x128xf32, #tpu.memory_space<vmem>>, vector<1x1x128xf32>
    %1017 = vector.shape_cast %1016 : vector<1x1x128xf32> to vector<128xf32>
    %1018 = vector.shape_cast %1017 : vector<128xf32> to vector<1x128xf32>
    %1019 = vector.broadcast %1018 : vector<1x128xf32> to vector<32x128xf32>
    %1020 = arith.mulf %1003, %1019 : vector<32x128xf32>
    %1021 = arith.addf %995, %1020 : vector<32x128xf32>
    %c8_488 = arith.constant 8 : index
    %c3_489 = arith.constant 3 : index
    %c0_490 = arith.constant 0 : index
    %1022 = vector.load %arg2[%c8_488, %c3_489, %c0_490] : memref<27x4x128xf32, #tpu.memory_space<vmem>>, vector<1x1x128xf32>
    %1023 = vector.shape_cast %1022 : vector<1x1x128xf32> to vector<128xf32>
    %1024 = vector.shape_cast %1023 : vector<128xf32> to vector<1x128xf32>
    %1025 = vector.broadcast %1024 : vector<1x128xf32> to vector<32x128xf32>
    %1026 = arith.mulf %1003, %1025 : vector<32x128xf32>
    %1027 = arith.addf %1001, %1026 : vector<32x128xf32>
    %c1_491 = arith.constant 1 : index
    %c32_492 = arith.constant 32 : index
    %c0_493 = arith.constant 0 : index
    %1028 = vector.load %arg6[%c1_491, %c32_492, %c0_493] : memref<3x66x66xf32, #tpu.memory_space<vmem>>, vector<1x32x66xf32>
    %1029 = vector.shape_cast %1028 : vector<1x32x66xf32> to vector<32x66xf32>
    %1030 = vector.extract_strided_slice %1029 {offsets = [0, 0], sizes = [32, 64], strides = [1, 1]} : vector<32x66xf32> to vector<32x64xf32>
    %1031 = tpu.concatenate %1030, %1030 in 1 : vector<32x64xf32>, vector<32x64xf32> -> vector<32x128xf32>
    %c9_494 = arith.constant 9 : index
    %c0_495 = arith.constant 0 : index
    %c0_496 = arith.constant 0 : index
    %1032 = vector.load %arg2[%c9_494, %c0_495, %c0_496] : memref<27x4x128xf32, #tpu.memory_space<vmem>>, vector<1x1x128xf32>
    %1033 = vector.shape_cast %1032 : vector<1x1x128xf32> to vector<128xf32>
    %1034 = vector.shape_cast %1033 : vector<128xf32> to vector<1x128xf32>
    %1035 = vector.broadcast %1034 : vector<1x128xf32> to vector<32x128xf32>
    %1036 = arith.mulf %1031, %1035 : vector<32x128xf32>
    %1037 = arith.addf %1009, %1036 : vector<32x128xf32>
    %c9_497 = arith.constant 9 : index
    %c1_498 = arith.constant 1 : index
    %c0_499 = arith.constant 0 : index
    %1038 = vector.load %arg2[%c9_497, %c1_498, %c0_499] : memref<27x4x128xf32, #tpu.memory_space<vmem>>, vector<1x1x128xf32>
    %1039 = vector.shape_cast %1038 : vector<1x1x128xf32> to vector<128xf32>
    %1040 = vector.shape_cast %1039 : vector<128xf32> to vector<1x128xf32>
    %1041 = vector.broadcast %1040 : vector<1x128xf32> to vector<32x128xf32>
    %1042 = arith.mulf %1031, %1041 : vector<32x128xf32>
    %1043 = arith.addf %1015, %1042 : vector<32x128xf32>
    %c9_500 = arith.constant 9 : index
    %c2_501 = arith.constant 2 : index
    %c0_502 = arith.constant 0 : index
    %1044 = vector.load %arg2[%c9_500, %c2_501, %c0_502] : memref<27x4x128xf32, #tpu.memory_space<vmem>>, vector<1x1x128xf32>
    %1045 = vector.shape_cast %1044 : vector<1x1x128xf32> to vector<128xf32>
    %1046 = vector.shape_cast %1045 : vector<128xf32> to vector<1x128xf32>
    %1047 = vector.broadcast %1046 : vector<1x128xf32> to vector<32x128xf32>
    %1048 = arith.mulf %1031, %1047 : vector<32x128xf32>
    %1049 = arith.addf %1021, %1048 : vector<32x128xf32>
    %c9_503 = arith.constant 9 : index
    %c3_504 = arith.constant 3 : index
    %c0_505 = arith.constant 0 : index
    %1050 = vector.load %arg2[%c9_503, %c3_504, %c0_505] : memref<27x4x128xf32, #tpu.memory_space<vmem>>, vector<1x1x128xf32>
    %1051 = vector.shape_cast %1050 : vector<1x1x128xf32> to vector<128xf32>
    %1052 = vector.shape_cast %1051 : vector<128xf32> to vector<1x128xf32>
    %1053 = vector.broadcast %1052 : vector<1x128xf32> to vector<32x128xf32>
    %1054 = arith.mulf %1031, %1053 : vector<32x128xf32>
    %1055 = arith.addf %1027, %1054 : vector<32x128xf32>
    %1056 = vector.extract_strided_slice %1029 {offsets = [0, 1], sizes = [32, 64], strides = [1, 1]} : vector<32x66xf32> to vector<32x64xf32>
    %1057 = tpu.concatenate %1056, %1056 in 1 : vector<32x64xf32>, vector<32x64xf32> -> vector<32x128xf32>
    %c10_506 = arith.constant 10 : index
    %c0_507 = arith.constant 0 : index
    %c0_508 = arith.constant 0 : index
    %1058 = vector.load %arg2[%c10_506, %c0_507, %c0_508] : memref<27x4x128xf32, #tpu.memory_space<vmem>>, vector<1x1x128xf32>
    %1059 = vector.shape_cast %1058 : vector<1x1x128xf32> to vector<128xf32>
    %1060 = vector.shape_cast %1059 : vector<128xf32> to vector<1x128xf32>
    %1061 = vector.broadcast %1060 : vector<1x128xf32> to vector<32x128xf32>
    %1062 = arith.mulf %1057, %1061 : vector<32x128xf32>
    %1063 = arith.addf %1037, %1062 : vector<32x128xf32>
    %c10_509 = arith.constant 10 : index
    %c1_510 = arith.constant 1 : index
    %c0_511 = arith.constant 0 : index
    %1064 = vector.load %arg2[%c10_509, %c1_510, %c0_511] : memref<27x4x128xf32, #tpu.memory_space<vmem>>, vector<1x1x128xf32>
    %1065 = vector.shape_cast %1064 : vector<1x1x128xf32> to vector<128xf32>
    %1066 = vector.shape_cast %1065 : vector<128xf32> to vector<1x128xf32>
    %1067 = vector.broadcast %1066 : vector<1x128xf32> to vector<32x128xf32>
    %1068 = arith.mulf %1057, %1067 : vector<32x128xf32>
    %1069 = arith.addf %1043, %1068 : vector<32x128xf32>
    %c10_512 = arith.constant 10 : index
    %c2_513 = arith.constant 2 : index
    %c0_514 = arith.constant 0 : index
    %1070 = vector.load %arg2[%c10_512, %c2_513, %c0_514] : memref<27x4x128xf32, #tpu.memory_space<vmem>>, vector<1x1x128xf32>
    %1071 = vector.shape_cast %1070 : vector<1x1x128xf32> to vector<128xf32>
    %1072 = vector.shape_cast %1071 : vector<128xf32> to vector<1x128xf32>
    %1073 = vector.broadcast %1072 : vector<1x128xf32> to vector<32x128xf32>
    %1074 = arith.mulf %1057, %1073 : vector<32x128xf32>
    %1075 = arith.addf %1049, %1074 : vector<32x128xf32>
    %c10_515 = arith.constant 10 : index
    %c3_516 = arith.constant 3 : index
    %c0_517 = arith.constant 0 : index
    %1076 = vector.load %arg2[%c10_515, %c3_516, %c0_517] : memref<27x4x128xf32, #tpu.memory_space<vmem>>, vector<1x1x128xf32>
    %1077 = vector.shape_cast %1076 : vector<1x1x128xf32> to vector<128xf32>
    %1078 = vector.shape_cast %1077 : vector<128xf32> to vector<1x128xf32>
    %1079 = vector.broadcast %1078 : vector<1x128xf32> to vector<32x128xf32>
    %1080 = arith.mulf %1057, %1079 : vector<32x128xf32>
    %1081 = arith.addf %1055, %1080 : vector<32x128xf32>
    %1082 = vector.extract_strided_slice %1029 {offsets = [0, 2], sizes = [32, 64], strides = [1, 1]} : vector<32x66xf32> to vector<32x64xf32>
    %1083 = tpu.concatenate %1082, %1082 in 1 : vector<32x64xf32>, vector<32x64xf32> -> vector<32x128xf32>
    %c11_518 = arith.constant 11 : index
    %c0_519 = arith.constant 0 : index
    %c0_520 = arith.constant 0 : index
    %1084 = vector.load %arg2[%c11_518, %c0_519, %c0_520] : memref<27x4x128xf32, #tpu.memory_space<vmem>>, vector<1x1x128xf32>
    %1085 = vector.shape_cast %1084 : vector<1x1x128xf32> to vector<128xf32>
    %1086 = vector.shape_cast %1085 : vector<128xf32> to vector<1x128xf32>
    %1087 = vector.broadcast %1086 : vector<1x128xf32> to vector<32x128xf32>
    %1088 = arith.mulf %1083, %1087 : vector<32x128xf32>
    %1089 = arith.addf %1063, %1088 : vector<32x128xf32>
    %c11_521 = arith.constant 11 : index
    %c1_522 = arith.constant 1 : index
    %c0_523 = arith.constant 0 : index
    %1090 = vector.load %arg2[%c11_521, %c1_522, %c0_523] : memref<27x4x128xf32, #tpu.memory_space<vmem>>, vector<1x1x128xf32>
    %1091 = vector.shape_cast %1090 : vector<1x1x128xf32> to vector<128xf32>
    %1092 = vector.shape_cast %1091 : vector<128xf32> to vector<1x128xf32>
    %1093 = vector.broadcast %1092 : vector<1x128xf32> to vector<32x128xf32>
    %1094 = arith.mulf %1083, %1093 : vector<32x128xf32>
    %1095 = arith.addf %1069, %1094 : vector<32x128xf32>
    %c11_524 = arith.constant 11 : index
    %c2_525 = arith.constant 2 : index
    %c0_526 = arith.constant 0 : index
    %1096 = vector.load %arg2[%c11_524, %c2_525, %c0_526] : memref<27x4x128xf32, #tpu.memory_space<vmem>>, vector<1x1x128xf32>
    %1097 = vector.shape_cast %1096 : vector<1x1x128xf32> to vector<128xf32>
    %1098 = vector.shape_cast %1097 : vector<128xf32> to vector<1x128xf32>
    %1099 = vector.broadcast %1098 : vector<1x128xf32> to vector<32x128xf32>
    %1100 = arith.mulf %1083, %1099 : vector<32x128xf32>
    %1101 = arith.addf %1075, %1100 : vector<32x128xf32>
    %c11_527 = arith.constant 11 : index
    %c3_528 = arith.constant 3 : index
    %c0_529 = arith.constant 0 : index
    %1102 = vector.load %arg2[%c11_527, %c3_528, %c0_529] : memref<27x4x128xf32, #tpu.memory_space<vmem>>, vector<1x1x128xf32>
    %1103 = vector.shape_cast %1102 : vector<1x1x128xf32> to vector<128xf32>
    %1104 = vector.shape_cast %1103 : vector<128xf32> to vector<1x128xf32>
    %1105 = vector.broadcast %1104 : vector<1x128xf32> to vector<32x128xf32>
    %1106 = arith.mulf %1083, %1105 : vector<32x128xf32>
    %1107 = arith.addf %1081, %1106 : vector<32x128xf32>
    %c1_530 = arith.constant 1 : index
    %c33_531 = arith.constant 33 : index
    %c0_532 = arith.constant 0 : index
    %1108 = vector.load %arg6[%c1_530, %c33_531, %c0_532] : memref<3x66x66xf32, #tpu.memory_space<vmem>>, vector<1x32x66xf32>
    %1109 = vector.shape_cast %1108 : vector<1x32x66xf32> to vector<32x66xf32>
    %1110 = vector.extract_strided_slice %1109 {offsets = [0, 0], sizes = [32, 64], strides = [1, 1]} : vector<32x66xf32> to vector<32x64xf32>
    %1111 = tpu.concatenate %1110, %1110 in 1 : vector<32x64xf32>, vector<32x64xf32> -> vector<32x128xf32>
    %c12_533 = arith.constant 12 : index
    %c0_534 = arith.constant 0 : index
    %c0_535 = arith.constant 0 : index
    %1112 = vector.load %arg2[%c12_533, %c0_534, %c0_535] : memref<27x4x128xf32, #tpu.memory_space<vmem>>, vector<1x1x128xf32>
    %1113 = vector.shape_cast %1112 : vector<1x1x128xf32> to vector<128xf32>
    %1114 = vector.shape_cast %1113 : vector<128xf32> to vector<1x128xf32>
    %1115 = vector.broadcast %1114 : vector<1x128xf32> to vector<32x128xf32>
    %1116 = arith.mulf %1111, %1115 : vector<32x128xf32>
    %1117 = arith.addf %1089, %1116 : vector<32x128xf32>
    %c12_536 = arith.constant 12 : index
    %c1_537 = arith.constant 1 : index
    %c0_538 = arith.constant 0 : index
    %1118 = vector.load %arg2[%c12_536, %c1_537, %c0_538] : memref<27x4x128xf32, #tpu.memory_space<vmem>>, vector<1x1x128xf32>
    %1119 = vector.shape_cast %1118 : vector<1x1x128xf32> to vector<128xf32>
    %1120 = vector.shape_cast %1119 : vector<128xf32> to vector<1x128xf32>
    %1121 = vector.broadcast %1120 : vector<1x128xf32> to vector<32x128xf32>
    %1122 = arith.mulf %1111, %1121 : vector<32x128xf32>
    %1123 = arith.addf %1095, %1122 : vector<32x128xf32>
    %c12_539 = arith.constant 12 : index
    %c2_540 = arith.constant 2 : index
    %c0_541 = arith.constant 0 : index
    %1124 = vector.load %arg2[%c12_539, %c2_540, %c0_541] : memref<27x4x128xf32, #tpu.memory_space<vmem>>, vector<1x1x128xf32>
    %1125 = vector.shape_cast %1124 : vector<1x1x128xf32> to vector<128xf32>
    %1126 = vector.shape_cast %1125 : vector<128xf32> to vector<1x128xf32>
    %1127 = vector.broadcast %1126 : vector<1x128xf32> to vector<32x128xf32>
    %1128 = arith.mulf %1111, %1127 : vector<32x128xf32>
    %1129 = arith.addf %1101, %1128 : vector<32x128xf32>
    %c12_542 = arith.constant 12 : index
    %c3_543 = arith.constant 3 : index
    %c0_544 = arith.constant 0 : index
    %1130 = vector.load %arg2[%c12_542, %c3_543, %c0_544] : memref<27x4x128xf32, #tpu.memory_space<vmem>>, vector<1x1x128xf32>
    %1131 = vector.shape_cast %1130 : vector<1x1x128xf32> to vector<128xf32>
    %1132 = vector.shape_cast %1131 : vector<128xf32> to vector<1x128xf32>
    %1133 = vector.broadcast %1132 : vector<1x128xf32> to vector<32x128xf32>
    %1134 = arith.mulf %1111, %1133 : vector<32x128xf32>
    %1135 = arith.addf %1107, %1134 : vector<32x128xf32>
    %1136 = vector.extract_strided_slice %1109 {offsets = [0, 1], sizes = [32, 64], strides = [1, 1]} : vector<32x66xf32> to vector<32x64xf32>
    %1137 = tpu.concatenate %1136, %1136 in 1 : vector<32x64xf32>, vector<32x64xf32> -> vector<32x128xf32>
    %c13_545 = arith.constant 13 : index
    %c0_546 = arith.constant 0 : index
    %c0_547 = arith.constant 0 : index
    %1138 = vector.load %arg2[%c13_545, %c0_546, %c0_547] : memref<27x4x128xf32, #tpu.memory_space<vmem>>, vector<1x1x128xf32>
    %1139 = vector.shape_cast %1138 : vector<1x1x128xf32> to vector<128xf32>
    %1140 = vector.shape_cast %1139 : vector<128xf32> to vector<1x128xf32>
    %1141 = vector.broadcast %1140 : vector<1x128xf32> to vector<32x128xf32>
    %1142 = arith.mulf %1137, %1141 : vector<32x128xf32>
    %1143 = arith.addf %1117, %1142 : vector<32x128xf32>
    %c13_548 = arith.constant 13 : index
    %c1_549 = arith.constant 1 : index
    %c0_550 = arith.constant 0 : index
    %1144 = vector.load %arg2[%c13_548, %c1_549, %c0_550] : memref<27x4x128xf32, #tpu.memory_space<vmem>>, vector<1x1x128xf32>
    %1145 = vector.shape_cast %1144 : vector<1x1x128xf32> to vector<128xf32>
    %1146 = vector.shape_cast %1145 : vector<128xf32> to vector<1x128xf32>
    %1147 = vector.broadcast %1146 : vector<1x128xf32> to vector<32x128xf32>
    %1148 = arith.mulf %1137, %1147 : vector<32x128xf32>
    %1149 = arith.addf %1123, %1148 : vector<32x128xf32>
    %c13_551 = arith.constant 13 : index
    %c2_552 = arith.constant 2 : index
    %c0_553 = arith.constant 0 : index
    %1150 = vector.load %arg2[%c13_551, %c2_552, %c0_553] : memref<27x4x128xf32, #tpu.memory_space<vmem>>, vector<1x1x128xf32>
    %1151 = vector.shape_cast %1150 : vector<1x1x128xf32> to vector<128xf32>
    %1152 = vector.shape_cast %1151 : vector<128xf32> to vector<1x128xf32>
    %1153 = vector.broadcast %1152 : vector<1x128xf32> to vector<32x128xf32>
    %1154 = arith.mulf %1137, %1153 : vector<32x128xf32>
    %1155 = arith.addf %1129, %1154 : vector<32x128xf32>
    %c13_554 = arith.constant 13 : index
    %c3_555 = arith.constant 3 : index
    %c0_556 = arith.constant 0 : index
    %1156 = vector.load %arg2[%c13_554, %c3_555, %c0_556] : memref<27x4x128xf32, #tpu.memory_space<vmem>>, vector<1x1x128xf32>
    %1157 = vector.shape_cast %1156 : vector<1x1x128xf32> to vector<128xf32>
    %1158 = vector.shape_cast %1157 : vector<128xf32> to vector<1x128xf32>
    %1159 = vector.broadcast %1158 : vector<1x128xf32> to vector<32x128xf32>
    %1160 = arith.mulf %1137, %1159 : vector<32x128xf32>
    %1161 = arith.addf %1135, %1160 : vector<32x128xf32>
    %1162 = vector.extract_strided_slice %1109 {offsets = [0, 2], sizes = [32, 64], strides = [1, 1]} : vector<32x66xf32> to vector<32x64xf32>
    %1163 = tpu.concatenate %1162, %1162 in 1 : vector<32x64xf32>, vector<32x64xf32> -> vector<32x128xf32>
    %c14_557 = arith.constant 14 : index
    %c0_558 = arith.constant 0 : index
    %c0_559 = arith.constant 0 : index
    %1164 = vector.load %arg2[%c14_557, %c0_558, %c0_559] : memref<27x4x128xf32, #tpu.memory_space<vmem>>, vector<1x1x128xf32>
    %1165 = vector.shape_cast %1164 : vector<1x1x128xf32> to vector<128xf32>
    %1166 = vector.shape_cast %1165 : vector<128xf32> to vector<1x128xf32>
    %1167 = vector.broadcast %1166 : vector<1x128xf32> to vector<32x128xf32>
    %1168 = arith.mulf %1163, %1167 : vector<32x128xf32>
    %1169 = arith.addf %1143, %1168 : vector<32x128xf32>
    %c14_560 = arith.constant 14 : index
    %c1_561 = arith.constant 1 : index
    %c0_562 = arith.constant 0 : index
    %1170 = vector.load %arg2[%c14_560, %c1_561, %c0_562] : memref<27x4x128xf32, #tpu.memory_space<vmem>>, vector<1x1x128xf32>
    %1171 = vector.shape_cast %1170 : vector<1x1x128xf32> to vector<128xf32>
    %1172 = vector.shape_cast %1171 : vector<128xf32> to vector<1x128xf32>
    %1173 = vector.broadcast %1172 : vector<1x128xf32> to vector<32x128xf32>
    %1174 = arith.mulf %1163, %1173 : vector<32x128xf32>
    %1175 = arith.addf %1149, %1174 : vector<32x128xf32>
    %c14_563 = arith.constant 14 : index
    %c2_564 = arith.constant 2 : index
    %c0_565 = arith.constant 0 : index
    %1176 = vector.load %arg2[%c14_563, %c2_564, %c0_565] : memref<27x4x128xf32, #tpu.memory_space<vmem>>, vector<1x1x128xf32>
    %1177 = vector.shape_cast %1176 : vector<1x1x128xf32> to vector<128xf32>
    %1178 = vector.shape_cast %1177 : vector<128xf32> to vector<1x128xf32>
    %1179 = vector.broadcast %1178 : vector<1x128xf32> to vector<32x128xf32>
    %1180 = arith.mulf %1163, %1179 : vector<32x128xf32>
    %1181 = arith.addf %1155, %1180 : vector<32x128xf32>
    %c14_566 = arith.constant 14 : index
    %c3_567 = arith.constant 3 : index
    %c0_568 = arith.constant 0 : index
    %1182 = vector.load %arg2[%c14_566, %c3_567, %c0_568] : memref<27x4x128xf32, #tpu.memory_space<vmem>>, vector<1x1x128xf32>
    %1183 = vector.shape_cast %1182 : vector<1x1x128xf32> to vector<128xf32>
    %1184 = vector.shape_cast %1183 : vector<128xf32> to vector<1x128xf32>
    %1185 = vector.broadcast %1184 : vector<1x128xf32> to vector<32x128xf32>
    %1186 = arith.mulf %1163, %1185 : vector<32x128xf32>
    %1187 = arith.addf %1161, %1186 : vector<32x128xf32>
    %c1_569 = arith.constant 1 : index
    %c34_570 = arith.constant 34 : index
    %c0_571 = arith.constant 0 : index
    %1188 = vector.load %arg6[%c1_569, %c34_570, %c0_571] : memref<3x66x66xf32, #tpu.memory_space<vmem>>, vector<1x32x66xf32>
    %1189 = vector.shape_cast %1188 : vector<1x32x66xf32> to vector<32x66xf32>
    %1190 = vector.extract_strided_slice %1189 {offsets = [0, 0], sizes = [32, 64], strides = [1, 1]} : vector<32x66xf32> to vector<32x64xf32>
    %1191 = tpu.concatenate %1190, %1190 in 1 : vector<32x64xf32>, vector<32x64xf32> -> vector<32x128xf32>
    %c15_572 = arith.constant 15 : index
    %c0_573 = arith.constant 0 : index
    %c0_574 = arith.constant 0 : index
    %1192 = vector.load %arg2[%c15_572, %c0_573, %c0_574] : memref<27x4x128xf32, #tpu.memory_space<vmem>>, vector<1x1x128xf32>
    %1193 = vector.shape_cast %1192 : vector<1x1x128xf32> to vector<128xf32>
    %1194 = vector.shape_cast %1193 : vector<128xf32> to vector<1x128xf32>
    %1195 = vector.broadcast %1194 : vector<1x128xf32> to vector<32x128xf32>
    %1196 = arith.mulf %1191, %1195 : vector<32x128xf32>
    %1197 = arith.addf %1169, %1196 : vector<32x128xf32>
    %c15_575 = arith.constant 15 : index
    %c1_576 = arith.constant 1 : index
    %c0_577 = arith.constant 0 : index
    %1198 = vector.load %arg2[%c15_575, %c1_576, %c0_577] : memref<27x4x128xf32, #tpu.memory_space<vmem>>, vector<1x1x128xf32>
    %1199 = vector.shape_cast %1198 : vector<1x1x128xf32> to vector<128xf32>
    %1200 = vector.shape_cast %1199 : vector<128xf32> to vector<1x128xf32>
    %1201 = vector.broadcast %1200 : vector<1x128xf32> to vector<32x128xf32>
    %1202 = arith.mulf %1191, %1201 : vector<32x128xf32>
    %1203 = arith.addf %1175, %1202 : vector<32x128xf32>
    %c15_578 = arith.constant 15 : index
    %c2_579 = arith.constant 2 : index
    %c0_580 = arith.constant 0 : index
    %1204 = vector.load %arg2[%c15_578, %c2_579, %c0_580] : memref<27x4x128xf32, #tpu.memory_space<vmem>>, vector<1x1x128xf32>
    %1205 = vector.shape_cast %1204 : vector<1x1x128xf32> to vector<128xf32>
    %1206 = vector.shape_cast %1205 : vector<128xf32> to vector<1x128xf32>
    %1207 = vector.broadcast %1206 : vector<1x128xf32> to vector<32x128xf32>
    %1208 = arith.mulf %1191, %1207 : vector<32x128xf32>
    %1209 = arith.addf %1181, %1208 : vector<32x128xf32>
    %c15_581 = arith.constant 15 : index
    %c3_582 = arith.constant 3 : index
    %c0_583 = arith.constant 0 : index
    %1210 = vector.load %arg2[%c15_581, %c3_582, %c0_583] : memref<27x4x128xf32, #tpu.memory_space<vmem>>, vector<1x1x128xf32>
    %1211 = vector.shape_cast %1210 : vector<1x1x128xf32> to vector<128xf32>
    %1212 = vector.shape_cast %1211 : vector<128xf32> to vector<1x128xf32>
    %1213 = vector.broadcast %1212 : vector<1x128xf32> to vector<32x128xf32>
    %1214 = arith.mulf %1191, %1213 : vector<32x128xf32>
    %1215 = arith.addf %1187, %1214 : vector<32x128xf32>
    %1216 = vector.extract_strided_slice %1189 {offsets = [0, 1], sizes = [32, 64], strides = [1, 1]} : vector<32x66xf32> to vector<32x64xf32>
    %1217 = tpu.concatenate %1216, %1216 in 1 : vector<32x64xf32>, vector<32x64xf32> -> vector<32x128xf32>
    %c16_584 = arith.constant 16 : index
    %c0_585 = arith.constant 0 : index
    %c0_586 = arith.constant 0 : index
    %1218 = vector.load %arg2[%c16_584, %c0_585, %c0_586] : memref<27x4x128xf32, #tpu.memory_space<vmem>>, vector<1x1x128xf32>
    %1219 = vector.shape_cast %1218 : vector<1x1x128xf32> to vector<128xf32>
    %1220 = vector.shape_cast %1219 : vector<128xf32> to vector<1x128xf32>
    %1221 = vector.broadcast %1220 : vector<1x128xf32> to vector<32x128xf32>
    %1222 = arith.mulf %1217, %1221 : vector<32x128xf32>
    %1223 = arith.addf %1197, %1222 : vector<32x128xf32>
    %c16_587 = arith.constant 16 : index
    %c1_588 = arith.constant 1 : index
    %c0_589 = arith.constant 0 : index
    %1224 = vector.load %arg2[%c16_587, %c1_588, %c0_589] : memref<27x4x128xf32, #tpu.memory_space<vmem>>, vector<1x1x128xf32>
    %1225 = vector.shape_cast %1224 : vector<1x1x128xf32> to vector<128xf32>
    %1226 = vector.shape_cast %1225 : vector<128xf32> to vector<1x128xf32>
    %1227 = vector.broadcast %1226 : vector<1x128xf32> to vector<32x128xf32>
    %1228 = arith.mulf %1217, %1227 : vector<32x128xf32>
    %1229 = arith.addf %1203, %1228 : vector<32x128xf32>
    %c16_590 = arith.constant 16 : index
    %c2_591 = arith.constant 2 : index
    %c0_592 = arith.constant 0 : index
    %1230 = vector.load %arg2[%c16_590, %c2_591, %c0_592] : memref<27x4x128xf32, #tpu.memory_space<vmem>>, vector<1x1x128xf32>
    %1231 = vector.shape_cast %1230 : vector<1x1x128xf32> to vector<128xf32>
    %1232 = vector.shape_cast %1231 : vector<128xf32> to vector<1x128xf32>
    %1233 = vector.broadcast %1232 : vector<1x128xf32> to vector<32x128xf32>
    %1234 = arith.mulf %1217, %1233 : vector<32x128xf32>
    %1235 = arith.addf %1209, %1234 : vector<32x128xf32>
    %c16_593 = arith.constant 16 : index
    %c3_594 = arith.constant 3 : index
    %c0_595 = arith.constant 0 : index
    %1236 = vector.load %arg2[%c16_593, %c3_594, %c0_595] : memref<27x4x128xf32, #tpu.memory_space<vmem>>, vector<1x1x128xf32>
    %1237 = vector.shape_cast %1236 : vector<1x1x128xf32> to vector<128xf32>
    %1238 = vector.shape_cast %1237 : vector<128xf32> to vector<1x128xf32>
    %1239 = vector.broadcast %1238 : vector<1x128xf32> to vector<32x128xf32>
    %1240 = arith.mulf %1217, %1239 : vector<32x128xf32>
    %1241 = arith.addf %1215, %1240 : vector<32x128xf32>
    %1242 = vector.extract_strided_slice %1189 {offsets = [0, 2], sizes = [32, 64], strides = [1, 1]} : vector<32x66xf32> to vector<32x64xf32>
    %1243 = tpu.concatenate %1242, %1242 in 1 : vector<32x64xf32>, vector<32x64xf32> -> vector<32x128xf32>
    %c17_596 = arith.constant 17 : index
    %c0_597 = arith.constant 0 : index
    %c0_598 = arith.constant 0 : index
    %1244 = vector.load %arg2[%c17_596, %c0_597, %c0_598] : memref<27x4x128xf32, #tpu.memory_space<vmem>>, vector<1x1x128xf32>
    %1245 = vector.shape_cast %1244 : vector<1x1x128xf32> to vector<128xf32>
    %1246 = vector.shape_cast %1245 : vector<128xf32> to vector<1x128xf32>
    %1247 = vector.broadcast %1246 : vector<1x128xf32> to vector<32x128xf32>
    %1248 = arith.mulf %1243, %1247 : vector<32x128xf32>
    %1249 = arith.addf %1223, %1248 : vector<32x128xf32>
    %c17_599 = arith.constant 17 : index
    %c1_600 = arith.constant 1 : index
    %c0_601 = arith.constant 0 : index
    %1250 = vector.load %arg2[%c17_599, %c1_600, %c0_601] : memref<27x4x128xf32, #tpu.memory_space<vmem>>, vector<1x1x128xf32>
    %1251 = vector.shape_cast %1250 : vector<1x1x128xf32> to vector<128xf32>
    %1252 = vector.shape_cast %1251 : vector<128xf32> to vector<1x128xf32>
    %1253 = vector.broadcast %1252 : vector<1x128xf32> to vector<32x128xf32>
    %1254 = arith.mulf %1243, %1253 : vector<32x128xf32>
    %1255 = arith.addf %1229, %1254 : vector<32x128xf32>
    %c17_602 = arith.constant 17 : index
    %c2_603 = arith.constant 2 : index
    %c0_604 = arith.constant 0 : index
    %1256 = vector.load %arg2[%c17_602, %c2_603, %c0_604] : memref<27x4x128xf32, #tpu.memory_space<vmem>>, vector<1x1x128xf32>
    %1257 = vector.shape_cast %1256 : vector<1x1x128xf32> to vector<128xf32>
    %1258 = vector.shape_cast %1257 : vector<128xf32> to vector<1x128xf32>
    %1259 = vector.broadcast %1258 : vector<1x128xf32> to vector<32x128xf32>
    %1260 = arith.mulf %1243, %1259 : vector<32x128xf32>
    %1261 = arith.addf %1235, %1260 : vector<32x128xf32>
    %c17_605 = arith.constant 17 : index
    %c3_606 = arith.constant 3 : index
    %c0_607 = arith.constant 0 : index
    %1262 = vector.load %arg2[%c17_605, %c3_606, %c0_607] : memref<27x4x128xf32, #tpu.memory_space<vmem>>, vector<1x1x128xf32>
    %1263 = vector.shape_cast %1262 : vector<1x1x128xf32> to vector<128xf32>
    %1264 = vector.shape_cast %1263 : vector<128xf32> to vector<1x128xf32>
    %1265 = vector.broadcast %1264 : vector<1x128xf32> to vector<32x128xf32>
    %1266 = arith.mulf %1243, %1265 : vector<32x128xf32>
    %1267 = arith.addf %1241, %1266 : vector<32x128xf32>
    %c2_608 = arith.constant 2 : index
    %c32_609 = arith.constant 32 : index
    %c0_610 = arith.constant 0 : index
    %1268 = vector.load %arg6[%c2_608, %c32_609, %c0_610] : memref<3x66x66xf32, #tpu.memory_space<vmem>>, vector<1x32x66xf32>
    %1269 = vector.shape_cast %1268 : vector<1x32x66xf32> to vector<32x66xf32>
    %1270 = vector.extract_strided_slice %1269 {offsets = [0, 0], sizes = [32, 64], strides = [1, 1]} : vector<32x66xf32> to vector<32x64xf32>
    %1271 = tpu.concatenate %1270, %1270 in 1 : vector<32x64xf32>, vector<32x64xf32> -> vector<32x128xf32>
    %c18_611 = arith.constant 18 : index
    %c0_612 = arith.constant 0 : index
    %c0_613 = arith.constant 0 : index
    %1272 = vector.load %arg2[%c18_611, %c0_612, %c0_613] : memref<27x4x128xf32, #tpu.memory_space<vmem>>, vector<1x1x128xf32>
    %1273 = vector.shape_cast %1272 : vector<1x1x128xf32> to vector<128xf32>
    %1274 = vector.shape_cast %1273 : vector<128xf32> to vector<1x128xf32>
    %1275 = vector.broadcast %1274 : vector<1x128xf32> to vector<32x128xf32>
    %1276 = arith.mulf %1271, %1275 : vector<32x128xf32>
    %1277 = arith.addf %1249, %1276 : vector<32x128xf32>
    %c18_614 = arith.constant 18 : index
    %c1_615 = arith.constant 1 : index
    %c0_616 = arith.constant 0 : index
    %1278 = vector.load %arg2[%c18_614, %c1_615, %c0_616] : memref<27x4x128xf32, #tpu.memory_space<vmem>>, vector<1x1x128xf32>
    %1279 = vector.shape_cast %1278 : vector<1x1x128xf32> to vector<128xf32>
    %1280 = vector.shape_cast %1279 : vector<128xf32> to vector<1x128xf32>
    %1281 = vector.broadcast %1280 : vector<1x128xf32> to vector<32x128xf32>
    %1282 = arith.mulf %1271, %1281 : vector<32x128xf32>
    %1283 = arith.addf %1255, %1282 : vector<32x128xf32>
    %c18_617 = arith.constant 18 : index
    %c2_618 = arith.constant 2 : index
    %c0_619 = arith.constant 0 : index
    %1284 = vector.load %arg2[%c18_617, %c2_618, %c0_619] : memref<27x4x128xf32, #tpu.memory_space<vmem>>, vector<1x1x128xf32>
    %1285 = vector.shape_cast %1284 : vector<1x1x128xf32> to vector<128xf32>
    %1286 = vector.shape_cast %1285 : vector<128xf32> to vector<1x128xf32>
    %1287 = vector.broadcast %1286 : vector<1x128xf32> to vector<32x128xf32>
    %1288 = arith.mulf %1271, %1287 : vector<32x128xf32>
    %1289 = arith.addf %1261, %1288 : vector<32x128xf32>
    %c18_620 = arith.constant 18 : index
    %c3_621 = arith.constant 3 : index
    %c0_622 = arith.constant 0 : index
    %1290 = vector.load %arg2[%c18_620, %c3_621, %c0_622] : memref<27x4x128xf32, #tpu.memory_space<vmem>>, vector<1x1x128xf32>
    %1291 = vector.shape_cast %1290 : vector<1x1x128xf32> to vector<128xf32>
    %1292 = vector.shape_cast %1291 : vector<128xf32> to vector<1x128xf32>
    %1293 = vector.broadcast %1292 : vector<1x128xf32> to vector<32x128xf32>
    %1294 = arith.mulf %1271, %1293 : vector<32x128xf32>
    %1295 = arith.addf %1267, %1294 : vector<32x128xf32>
    %1296 = vector.extract_strided_slice %1269 {offsets = [0, 1], sizes = [32, 64], strides = [1, 1]} : vector<32x66xf32> to vector<32x64xf32>
    %1297 = tpu.concatenate %1296, %1296 in 1 : vector<32x64xf32>, vector<32x64xf32> -> vector<32x128xf32>
    %c19_623 = arith.constant 19 : index
    %c0_624 = arith.constant 0 : index
    %c0_625 = arith.constant 0 : index
    %1298 = vector.load %arg2[%c19_623, %c0_624, %c0_625] : memref<27x4x128xf32, #tpu.memory_space<vmem>>, vector<1x1x128xf32>
    %1299 = vector.shape_cast %1298 : vector<1x1x128xf32> to vector<128xf32>
    %1300 = vector.shape_cast %1299 : vector<128xf32> to vector<1x128xf32>
    %1301 = vector.broadcast %1300 : vector<1x128xf32> to vector<32x128xf32>
    %1302 = arith.mulf %1297, %1301 : vector<32x128xf32>
    %1303 = arith.addf %1277, %1302 : vector<32x128xf32>
    %c19_626 = arith.constant 19 : index
    %c1_627 = arith.constant 1 : index
    %c0_628 = arith.constant 0 : index
    %1304 = vector.load %arg2[%c19_626, %c1_627, %c0_628] : memref<27x4x128xf32, #tpu.memory_space<vmem>>, vector<1x1x128xf32>
    %1305 = vector.shape_cast %1304 : vector<1x1x128xf32> to vector<128xf32>
    %1306 = vector.shape_cast %1305 : vector<128xf32> to vector<1x128xf32>
    %1307 = vector.broadcast %1306 : vector<1x128xf32> to vector<32x128xf32>
    %1308 = arith.mulf %1297, %1307 : vector<32x128xf32>
    %1309 = arith.addf %1283, %1308 : vector<32x128xf32>
    %c19_629 = arith.constant 19 : index
    %c2_630 = arith.constant 2 : index
    %c0_631 = arith.constant 0 : index
    %1310 = vector.load %arg2[%c19_629, %c2_630, %c0_631] : memref<27x4x128xf32, #tpu.memory_space<vmem>>, vector<1x1x128xf32>
    %1311 = vector.shape_cast %1310 : vector<1x1x128xf32> to vector<128xf32>
    %1312 = vector.shape_cast %1311 : vector<128xf32> to vector<1x128xf32>
    %1313 = vector.broadcast %1312 : vector<1x128xf32> to vector<32x128xf32>
    %1314 = arith.mulf %1297, %1313 : vector<32x128xf32>
    %1315 = arith.addf %1289, %1314 : vector<32x128xf32>
    %c19_632 = arith.constant 19 : index
    %c3_633 = arith.constant 3 : index
    %c0_634 = arith.constant 0 : index
    %1316 = vector.load %arg2[%c19_632, %c3_633, %c0_634] : memref<27x4x128xf32, #tpu.memory_space<vmem>>, vector<1x1x128xf32>
    %1317 = vector.shape_cast %1316 : vector<1x1x128xf32> to vector<128xf32>
    %1318 = vector.shape_cast %1317 : vector<128xf32> to vector<1x128xf32>
    %1319 = vector.broadcast %1318 : vector<1x128xf32> to vector<32x128xf32>
    %1320 = arith.mulf %1297, %1319 : vector<32x128xf32>
    %1321 = arith.addf %1295, %1320 : vector<32x128xf32>
    %1322 = vector.extract_strided_slice %1269 {offsets = [0, 2], sizes = [32, 64], strides = [1, 1]} : vector<32x66xf32> to vector<32x64xf32>
    %1323 = tpu.concatenate %1322, %1322 in 1 : vector<32x64xf32>, vector<32x64xf32> -> vector<32x128xf32>
    %c20_635 = arith.constant 20 : index
    %c0_636 = arith.constant 0 : index
    %c0_637 = arith.constant 0 : index
    %1324 = vector.load %arg2[%c20_635, %c0_636, %c0_637] : memref<27x4x128xf32, #tpu.memory_space<vmem>>, vector<1x1x128xf32>
    %1325 = vector.shape_cast %1324 : vector<1x1x128xf32> to vector<128xf32>
    %1326 = vector.shape_cast %1325 : vector<128xf32> to vector<1x128xf32>
    %1327 = vector.broadcast %1326 : vector<1x128xf32> to vector<32x128xf32>
    %1328 = arith.mulf %1323, %1327 : vector<32x128xf32>
    %1329 = arith.addf %1303, %1328 : vector<32x128xf32>
    %c20_638 = arith.constant 20 : index
    %c1_639 = arith.constant 1 : index
    %c0_640 = arith.constant 0 : index
    %1330 = vector.load %arg2[%c20_638, %c1_639, %c0_640] : memref<27x4x128xf32, #tpu.memory_space<vmem>>, vector<1x1x128xf32>
    %1331 = vector.shape_cast %1330 : vector<1x1x128xf32> to vector<128xf32>
    %1332 = vector.shape_cast %1331 : vector<128xf32> to vector<1x128xf32>
    %1333 = vector.broadcast %1332 : vector<1x128xf32> to vector<32x128xf32>
    %1334 = arith.mulf %1323, %1333 : vector<32x128xf32>
    %1335 = arith.addf %1309, %1334 : vector<32x128xf32>
    %c20_641 = arith.constant 20 : index
    %c2_642 = arith.constant 2 : index
    %c0_643 = arith.constant 0 : index
    %1336 = vector.load %arg2[%c20_641, %c2_642, %c0_643] : memref<27x4x128xf32, #tpu.memory_space<vmem>>, vector<1x1x128xf32>
    %1337 = vector.shape_cast %1336 : vector<1x1x128xf32> to vector<128xf32>
    %1338 = vector.shape_cast %1337 : vector<128xf32> to vector<1x128xf32>
    %1339 = vector.broadcast %1338 : vector<1x128xf32> to vector<32x128xf32>
    %1340 = arith.mulf %1323, %1339 : vector<32x128xf32>
    %1341 = arith.addf %1315, %1340 : vector<32x128xf32>
    %c20_644 = arith.constant 20 : index
    %c3_645 = arith.constant 3 : index
    %c0_646 = arith.constant 0 : index
    %1342 = vector.load %arg2[%c20_644, %c3_645, %c0_646] : memref<27x4x128xf32, #tpu.memory_space<vmem>>, vector<1x1x128xf32>
    %1343 = vector.shape_cast %1342 : vector<1x1x128xf32> to vector<128xf32>
    %1344 = vector.shape_cast %1343 : vector<128xf32> to vector<1x128xf32>
    %1345 = vector.broadcast %1344 : vector<1x128xf32> to vector<32x128xf32>
    %1346 = arith.mulf %1323, %1345 : vector<32x128xf32>
    %1347 = arith.addf %1321, %1346 : vector<32x128xf32>
    %c2_647 = arith.constant 2 : index
    %c33_648 = arith.constant 33 : index
    %c0_649 = arith.constant 0 : index
    %1348 = vector.load %arg6[%c2_647, %c33_648, %c0_649] : memref<3x66x66xf32, #tpu.memory_space<vmem>>, vector<1x32x66xf32>
    %1349 = vector.shape_cast %1348 : vector<1x32x66xf32> to vector<32x66xf32>
    %1350 = vector.extract_strided_slice %1349 {offsets = [0, 0], sizes = [32, 64], strides = [1, 1]} : vector<32x66xf32> to vector<32x64xf32>
    %1351 = tpu.concatenate %1350, %1350 in 1 : vector<32x64xf32>, vector<32x64xf32> -> vector<32x128xf32>
    %c21_650 = arith.constant 21 : index
    %c0_651 = arith.constant 0 : index
    %c0_652 = arith.constant 0 : index
    %1352 = vector.load %arg2[%c21_650, %c0_651, %c0_652] : memref<27x4x128xf32, #tpu.memory_space<vmem>>, vector<1x1x128xf32>
    %1353 = vector.shape_cast %1352 : vector<1x1x128xf32> to vector<128xf32>
    %1354 = vector.shape_cast %1353 : vector<128xf32> to vector<1x128xf32>
    %1355 = vector.broadcast %1354 : vector<1x128xf32> to vector<32x128xf32>
    %1356 = arith.mulf %1351, %1355 : vector<32x128xf32>
    %1357 = arith.addf %1329, %1356 : vector<32x128xf32>
    %c21_653 = arith.constant 21 : index
    %c1_654 = arith.constant 1 : index
    %c0_655 = arith.constant 0 : index
    %1358 = vector.load %arg2[%c21_653, %c1_654, %c0_655] : memref<27x4x128xf32, #tpu.memory_space<vmem>>, vector<1x1x128xf32>
    %1359 = vector.shape_cast %1358 : vector<1x1x128xf32> to vector<128xf32>
    %1360 = vector.shape_cast %1359 : vector<128xf32> to vector<1x128xf32>
    %1361 = vector.broadcast %1360 : vector<1x128xf32> to vector<32x128xf32>
    %1362 = arith.mulf %1351, %1361 : vector<32x128xf32>
    %1363 = arith.addf %1335, %1362 : vector<32x128xf32>
    %c21_656 = arith.constant 21 : index
    %c2_657 = arith.constant 2 : index
    %c0_658 = arith.constant 0 : index
    %1364 = vector.load %arg2[%c21_656, %c2_657, %c0_658] : memref<27x4x128xf32, #tpu.memory_space<vmem>>, vector<1x1x128xf32>
    %1365 = vector.shape_cast %1364 : vector<1x1x128xf32> to vector<128xf32>
    %1366 = vector.shape_cast %1365 : vector<128xf32> to vector<1x128xf32>
    %1367 = vector.broadcast %1366 : vector<1x128xf32> to vector<32x128xf32>
    %1368 = arith.mulf %1351, %1367 : vector<32x128xf32>
    %1369 = arith.addf %1341, %1368 : vector<32x128xf32>
    %c21_659 = arith.constant 21 : index
    %c3_660 = arith.constant 3 : index
    %c0_661 = arith.constant 0 : index
    %1370 = vector.load %arg2[%c21_659, %c3_660, %c0_661] : memref<27x4x128xf32, #tpu.memory_space<vmem>>, vector<1x1x128xf32>
    %1371 = vector.shape_cast %1370 : vector<1x1x128xf32> to vector<128xf32>
    %1372 = vector.shape_cast %1371 : vector<128xf32> to vector<1x128xf32>
    %1373 = vector.broadcast %1372 : vector<1x128xf32> to vector<32x128xf32>
    %1374 = arith.mulf %1351, %1373 : vector<32x128xf32>
    %1375 = arith.addf %1347, %1374 : vector<32x128xf32>
    %1376 = vector.extract_strided_slice %1349 {offsets = [0, 1], sizes = [32, 64], strides = [1, 1]} : vector<32x66xf32> to vector<32x64xf32>
    %1377 = tpu.concatenate %1376, %1376 in 1 : vector<32x64xf32>, vector<32x64xf32> -> vector<32x128xf32>
    %c22_662 = arith.constant 22 : index
    %c0_663 = arith.constant 0 : index
    %c0_664 = arith.constant 0 : index
    %1378 = vector.load %arg2[%c22_662, %c0_663, %c0_664] : memref<27x4x128xf32, #tpu.memory_space<vmem>>, vector<1x1x128xf32>
    %1379 = vector.shape_cast %1378 : vector<1x1x128xf32> to vector<128xf32>
    %1380 = vector.shape_cast %1379 : vector<128xf32> to vector<1x128xf32>
    %1381 = vector.broadcast %1380 : vector<1x128xf32> to vector<32x128xf32>
    %1382 = arith.mulf %1377, %1381 : vector<32x128xf32>
    %1383 = arith.addf %1357, %1382 : vector<32x128xf32>
    %c22_665 = arith.constant 22 : index
    %c1_666 = arith.constant 1 : index
    %c0_667 = arith.constant 0 : index
    %1384 = vector.load %arg2[%c22_665, %c1_666, %c0_667] : memref<27x4x128xf32, #tpu.memory_space<vmem>>, vector<1x1x128xf32>
    %1385 = vector.shape_cast %1384 : vector<1x1x128xf32> to vector<128xf32>
    %1386 = vector.shape_cast %1385 : vector<128xf32> to vector<1x128xf32>
    %1387 = vector.broadcast %1386 : vector<1x128xf32> to vector<32x128xf32>
    %1388 = arith.mulf %1377, %1387 : vector<32x128xf32>
    %1389 = arith.addf %1363, %1388 : vector<32x128xf32>
    %c22_668 = arith.constant 22 : index
    %c2_669 = arith.constant 2 : index
    %c0_670 = arith.constant 0 : index
    %1390 = vector.load %arg2[%c22_668, %c2_669, %c0_670] : memref<27x4x128xf32, #tpu.memory_space<vmem>>, vector<1x1x128xf32>
    %1391 = vector.shape_cast %1390 : vector<1x1x128xf32> to vector<128xf32>
    %1392 = vector.shape_cast %1391 : vector<128xf32> to vector<1x128xf32>
    %1393 = vector.broadcast %1392 : vector<1x128xf32> to vector<32x128xf32>
    %1394 = arith.mulf %1377, %1393 : vector<32x128xf32>
    %1395 = arith.addf %1369, %1394 : vector<32x128xf32>
    %c22_671 = arith.constant 22 : index
    %c3_672 = arith.constant 3 : index
    %c0_673 = arith.constant 0 : index
    %1396 = vector.load %arg2[%c22_671, %c3_672, %c0_673] : memref<27x4x128xf32, #tpu.memory_space<vmem>>, vector<1x1x128xf32>
    %1397 = vector.shape_cast %1396 : vector<1x1x128xf32> to vector<128xf32>
    %1398 = vector.shape_cast %1397 : vector<128xf32> to vector<1x128xf32>
    %1399 = vector.broadcast %1398 : vector<1x128xf32> to vector<32x128xf32>
    %1400 = arith.mulf %1377, %1399 : vector<32x128xf32>
    %1401 = arith.addf %1375, %1400 : vector<32x128xf32>
    %1402 = vector.extract_strided_slice %1349 {offsets = [0, 2], sizes = [32, 64], strides = [1, 1]} : vector<32x66xf32> to vector<32x64xf32>
    %1403 = tpu.concatenate %1402, %1402 in 1 : vector<32x64xf32>, vector<32x64xf32> -> vector<32x128xf32>
    %c23_674 = arith.constant 23 : index
    %c0_675 = arith.constant 0 : index
    %c0_676 = arith.constant 0 : index
    %1404 = vector.load %arg2[%c23_674, %c0_675, %c0_676] : memref<27x4x128xf32, #tpu.memory_space<vmem>>, vector<1x1x128xf32>
    %1405 = vector.shape_cast %1404 : vector<1x1x128xf32> to vector<128xf32>
    %1406 = vector.shape_cast %1405 : vector<128xf32> to vector<1x128xf32>
    %1407 = vector.broadcast %1406 : vector<1x128xf32> to vector<32x128xf32>
    %1408 = arith.mulf %1403, %1407 : vector<32x128xf32>
    %1409 = arith.addf %1383, %1408 : vector<32x128xf32>
    %c23_677 = arith.constant 23 : index
    %c1_678 = arith.constant 1 : index
    %c0_679 = arith.constant 0 : index
    %1410 = vector.load %arg2[%c23_677, %c1_678, %c0_679] : memref<27x4x128xf32, #tpu.memory_space<vmem>>, vector<1x1x128xf32>
    %1411 = vector.shape_cast %1410 : vector<1x1x128xf32> to vector<128xf32>
    %1412 = vector.shape_cast %1411 : vector<128xf32> to vector<1x128xf32>
    %1413 = vector.broadcast %1412 : vector<1x128xf32> to vector<32x128xf32>
    %1414 = arith.mulf %1403, %1413 : vector<32x128xf32>
    %1415 = arith.addf %1389, %1414 : vector<32x128xf32>
    %c23_680 = arith.constant 23 : index
    %c2_681 = arith.constant 2 : index
    %c0_682 = arith.constant 0 : index
    %1416 = vector.load %arg2[%c23_680, %c2_681, %c0_682] : memref<27x4x128xf32, #tpu.memory_space<vmem>>, vector<1x1x128xf32>
    %1417 = vector.shape_cast %1416 : vector<1x1x128xf32> to vector<128xf32>
    %1418 = vector.shape_cast %1417 : vector<128xf32> to vector<1x128xf32>
    %1419 = vector.broadcast %1418 : vector<1x128xf32> to vector<32x128xf32>
    %1420 = arith.mulf %1403, %1419 : vector<32x128xf32>
    %1421 = arith.addf %1395, %1420 : vector<32x128xf32>
    %c23_683 = arith.constant 23 : index
    %c3_684 = arith.constant 3 : index
    %c0_685 = arith.constant 0 : index
    %1422 = vector.load %arg2[%c23_683, %c3_684, %c0_685] : memref<27x4x128xf32, #tpu.memory_space<vmem>>, vector<1x1x128xf32>
    %1423 = vector.shape_cast %1422 : vector<1x1x128xf32> to vector<128xf32>
    %1424 = vector.shape_cast %1423 : vector<128xf32> to vector<1x128xf32>
    %1425 = vector.broadcast %1424 : vector<1x128xf32> to vector<32x128xf32>
    %1426 = arith.mulf %1403, %1425 : vector<32x128xf32>
    %1427 = arith.addf %1401, %1426 : vector<32x128xf32>
    %c2_686 = arith.constant 2 : index
    %c34_687 = arith.constant 34 : index
    %c0_688 = arith.constant 0 : index
    %1428 = vector.load %arg6[%c2_686, %c34_687, %c0_688] : memref<3x66x66xf32, #tpu.memory_space<vmem>>, vector<1x32x66xf32>
    %1429 = vector.shape_cast %1428 : vector<1x32x66xf32> to vector<32x66xf32>
    %1430 = vector.extract_strided_slice %1429 {offsets = [0, 0], sizes = [32, 64], strides = [1, 1]} : vector<32x66xf32> to vector<32x64xf32>
    %1431 = tpu.concatenate %1430, %1430 in 1 : vector<32x64xf32>, vector<32x64xf32> -> vector<32x128xf32>
    %c24_689 = arith.constant 24 : index
    %c0_690 = arith.constant 0 : index
    %c0_691 = arith.constant 0 : index
    %1432 = vector.load %arg2[%c24_689, %c0_690, %c0_691] : memref<27x4x128xf32, #tpu.memory_space<vmem>>, vector<1x1x128xf32>
    %1433 = vector.shape_cast %1432 : vector<1x1x128xf32> to vector<128xf32>
    %1434 = vector.shape_cast %1433 : vector<128xf32> to vector<1x128xf32>
    %1435 = vector.broadcast %1434 : vector<1x128xf32> to vector<32x128xf32>
    %1436 = arith.mulf %1431, %1435 : vector<32x128xf32>
    %1437 = arith.addf %1409, %1436 : vector<32x128xf32>
    %c24_692 = arith.constant 24 : index
    %c1_693 = arith.constant 1 : index
    %c0_694 = arith.constant 0 : index
    %1438 = vector.load %arg2[%c24_692, %c1_693, %c0_694] : memref<27x4x128xf32, #tpu.memory_space<vmem>>, vector<1x1x128xf32>
    %1439 = vector.shape_cast %1438 : vector<1x1x128xf32> to vector<128xf32>
    %1440 = vector.shape_cast %1439 : vector<128xf32> to vector<1x128xf32>
    %1441 = vector.broadcast %1440 : vector<1x128xf32> to vector<32x128xf32>
    %1442 = arith.mulf %1431, %1441 : vector<32x128xf32>
    %1443 = arith.addf %1415, %1442 : vector<32x128xf32>
    %c24_695 = arith.constant 24 : index
    %c2_696 = arith.constant 2 : index
    %c0_697 = arith.constant 0 : index
    %1444 = vector.load %arg2[%c24_695, %c2_696, %c0_697] : memref<27x4x128xf32, #tpu.memory_space<vmem>>, vector<1x1x128xf32>
    %1445 = vector.shape_cast %1444 : vector<1x1x128xf32> to vector<128xf32>
    %1446 = vector.shape_cast %1445 : vector<128xf32> to vector<1x128xf32>
    %1447 = vector.broadcast %1446 : vector<1x128xf32> to vector<32x128xf32>
    %1448 = arith.mulf %1431, %1447 : vector<32x128xf32>
    %1449 = arith.addf %1421, %1448 : vector<32x128xf32>
    %c24_698 = arith.constant 24 : index
    %c3_699 = arith.constant 3 : index
    %c0_700 = arith.constant 0 : index
    %1450 = vector.load %arg2[%c24_698, %c3_699, %c0_700] : memref<27x4x128xf32, #tpu.memory_space<vmem>>, vector<1x1x128xf32>
    %1451 = vector.shape_cast %1450 : vector<1x1x128xf32> to vector<128xf32>
    %1452 = vector.shape_cast %1451 : vector<128xf32> to vector<1x128xf32>
    %1453 = vector.broadcast %1452 : vector<1x128xf32> to vector<32x128xf32>
    %1454 = arith.mulf %1431, %1453 : vector<32x128xf32>
    %1455 = arith.addf %1427, %1454 : vector<32x128xf32>
    %1456 = vector.extract_strided_slice %1429 {offsets = [0, 1], sizes = [32, 64], strides = [1, 1]} : vector<32x66xf32> to vector<32x64xf32>
    %1457 = tpu.concatenate %1456, %1456 in 1 : vector<32x64xf32>, vector<32x64xf32> -> vector<32x128xf32>
    %c25_701 = arith.constant 25 : index
    %c0_702 = arith.constant 0 : index
    %c0_703 = arith.constant 0 : index
    %1458 = vector.load %arg2[%c25_701, %c0_702, %c0_703] : memref<27x4x128xf32, #tpu.memory_space<vmem>>, vector<1x1x128xf32>
    %1459 = vector.shape_cast %1458 : vector<1x1x128xf32> to vector<128xf32>
    %1460 = vector.shape_cast %1459 : vector<128xf32> to vector<1x128xf32>
    %1461 = vector.broadcast %1460 : vector<1x128xf32> to vector<32x128xf32>
    %1462 = arith.mulf %1457, %1461 : vector<32x128xf32>
    %1463 = arith.addf %1437, %1462 : vector<32x128xf32>
    %c25_704 = arith.constant 25 : index
    %c1_705 = arith.constant 1 : index
    %c0_706 = arith.constant 0 : index
    %1464 = vector.load %arg2[%c25_704, %c1_705, %c0_706] : memref<27x4x128xf32, #tpu.memory_space<vmem>>, vector<1x1x128xf32>
    %1465 = vector.shape_cast %1464 : vector<1x1x128xf32> to vector<128xf32>
    %1466 = vector.shape_cast %1465 : vector<128xf32> to vector<1x128xf32>
    %1467 = vector.broadcast %1466 : vector<1x128xf32> to vector<32x128xf32>
    %1468 = arith.mulf %1457, %1467 : vector<32x128xf32>
    %1469 = arith.addf %1443, %1468 : vector<32x128xf32>
    %c25_707 = arith.constant 25 : index
    %c2_708 = arith.constant 2 : index
    %c0_709 = arith.constant 0 : index
    %1470 = vector.load %arg2[%c25_707, %c2_708, %c0_709] : memref<27x4x128xf32, #tpu.memory_space<vmem>>, vector<1x1x128xf32>
    %1471 = vector.shape_cast %1470 : vector<1x1x128xf32> to vector<128xf32>
    %1472 = vector.shape_cast %1471 : vector<128xf32> to vector<1x128xf32>
    %1473 = vector.broadcast %1472 : vector<1x128xf32> to vector<32x128xf32>
    %1474 = arith.mulf %1457, %1473 : vector<32x128xf32>
    %1475 = arith.addf %1449, %1474 : vector<32x128xf32>
    %c25_710 = arith.constant 25 : index
    %c3_711 = arith.constant 3 : index
    %c0_712 = arith.constant 0 : index
    %1476 = vector.load %arg2[%c25_710, %c3_711, %c0_712] : memref<27x4x128xf32, #tpu.memory_space<vmem>>, vector<1x1x128xf32>
    %1477 = vector.shape_cast %1476 : vector<1x1x128xf32> to vector<128xf32>
    %1478 = vector.shape_cast %1477 : vector<128xf32> to vector<1x128xf32>
    %1479 = vector.broadcast %1478 : vector<1x128xf32> to vector<32x128xf32>
    %1480 = arith.mulf %1457, %1479 : vector<32x128xf32>
    %1481 = arith.addf %1455, %1480 : vector<32x128xf32>
    %1482 = vector.extract_strided_slice %1429 {offsets = [0, 2], sizes = [32, 64], strides = [1, 1]} : vector<32x66xf32> to vector<32x64xf32>
    %1483 = tpu.concatenate %1482, %1482 in 1 : vector<32x64xf32>, vector<32x64xf32> -> vector<32x128xf32>
    %c26_713 = arith.constant 26 : index
    %c0_714 = arith.constant 0 : index
    %c0_715 = arith.constant 0 : index
    %1484 = vector.load %arg2[%c26_713, %c0_714, %c0_715] : memref<27x4x128xf32, #tpu.memory_space<vmem>>, vector<1x1x128xf32>
    %1485 = vector.shape_cast %1484 : vector<1x1x128xf32> to vector<128xf32>
    %1486 = vector.shape_cast %1485 : vector<128xf32> to vector<1x128xf32>
    %1487 = vector.broadcast %1486 : vector<1x128xf32> to vector<32x128xf32>
    %1488 = arith.mulf %1483, %1487 : vector<32x128xf32>
    %1489 = arith.addf %1463, %1488 : vector<32x128xf32>
    %c26_716 = arith.constant 26 : index
    %c1_717 = arith.constant 1 : index
    %c0_718 = arith.constant 0 : index
    %1490 = vector.load %arg2[%c26_716, %c1_717, %c0_718] : memref<27x4x128xf32, #tpu.memory_space<vmem>>, vector<1x1x128xf32>
    %1491 = vector.shape_cast %1490 : vector<1x1x128xf32> to vector<128xf32>
    %1492 = vector.shape_cast %1491 : vector<128xf32> to vector<1x128xf32>
    %1493 = vector.broadcast %1492 : vector<1x128xf32> to vector<32x128xf32>
    %1494 = arith.mulf %1483, %1493 : vector<32x128xf32>
    %1495 = arith.addf %1469, %1494 : vector<32x128xf32>
    %c26_719 = arith.constant 26 : index
    %c2_720 = arith.constant 2 : index
    %c0_721 = arith.constant 0 : index
    %1496 = vector.load %arg2[%c26_719, %c2_720, %c0_721] : memref<27x4x128xf32, #tpu.memory_space<vmem>>, vector<1x1x128xf32>
    %1497 = vector.shape_cast %1496 : vector<1x1x128xf32> to vector<128xf32>
    %1498 = vector.shape_cast %1497 : vector<128xf32> to vector<1x128xf32>
    %1499 = vector.broadcast %1498 : vector<1x128xf32> to vector<32x128xf32>
    %1500 = arith.mulf %1483, %1499 : vector<32x128xf32>
    %1501 = arith.addf %1475, %1500 : vector<32x128xf32>
    %c26_722 = arith.constant 26 : index
    %c3_723 = arith.constant 3 : index
    %c0_724 = arith.constant 0 : index
    %1502 = vector.load %arg2[%c26_722, %c3_723, %c0_724] : memref<27x4x128xf32, #tpu.memory_space<vmem>>, vector<1x1x128xf32>
    %1503 = vector.shape_cast %1502 : vector<1x1x128xf32> to vector<128xf32>
    %1504 = vector.shape_cast %1503 : vector<128xf32> to vector<1x128xf32>
    %1505 = vector.broadcast %1504 : vector<1x128xf32> to vector<32x128xf32>
    %1506 = arith.mulf %1483, %1505 : vector<32x128xf32>
    %1507 = arith.addf %1481, %1506 : vector<32x128xf32>
    %cst_725 = arith.constant 0.000000e+00 : f32
    %cst_726 = arith.constant 5.000000e-01 : f32
    %1508 = vector.broadcast %cst_725 : f32 to vector<32x128xf32>
    %1509 = arith.maximumf %1508, %1489 : vector<32x128xf32>
    %1510 = vector.broadcast %cst_726 : f32 to vector<32x128xf32>
    %1511 = arith.minimumf %1510, %1509 : vector<32x128xf32>
    %c0_727 = arith.constant 0 : index
    %c0_728 = arith.constant 0 : index
    %c32_729 = arith.constant 32 : index
    %c0_730 = arith.constant 0 : index
    %1512 = vector.load %arg5[%c0_727, %c0_728, %c32_729, %c0_730] : memref<1x4x64x128xf32, #tpu.memory_space<vmem>>, vector<1x1x32x128xf32>
    %1513 = vector.shape_cast %1512 : vector<1x1x32x128xf32> to vector<32x128xf32>
    %1514 = vector.shape_cast %1511 : vector<32x128xf32> to vector<1x1x32x128xf32>
    tpu.vector_store %arg5[%c0_727, %c0_728, %c32_729, %c0_730], %1514 {strides = array<i32>} : memref<1x4x64x128xf32, #tpu.memory_space<vmem>>, vector<1x1x32x128xf32>,
    %cst_731 = arith.constant 0.000000e+00 : f32
    %cst_732 = arith.constant 5.000000e-01 : f32
    %1515 = vector.broadcast %cst_731 : f32 to vector<32x128xf32>
    %1516 = arith.maximumf %1515, %1495 : vector<32x128xf32>
    %1517 = vector.broadcast %cst_732 : f32 to vector<32x128xf32>
    %1518 = arith.minimumf %1517, %1516 : vector<32x128xf32>
    %c0_733 = arith.constant 0 : index
    %c1_734 = arith.constant 1 : index
    %c32_735 = arith.constant 32 : index
    %c0_736 = arith.constant 0 : index
    %1519 = vector.load %arg5[%c0_733, %c1_734, %c32_735, %c0_736] : memref<1x4x64x128xf32, #tpu.memory_space<vmem>>, vector<1x1x32x128xf32>
    %1520 = vector.shape_cast %1519 : vector<1x1x32x128xf32> to vector<32x128xf32>
    %1521 = vector.shape_cast %1518 : vector<32x128xf32> to vector<1x1x32x128xf32>
    tpu.vector_store %arg5[%c0_733, %c1_734, %c32_735, %c0_736], %1521 {strides = array<i32>} : memref<1x4x64x128xf32, #tpu.memory_space<vmem>>, vector<1x1x32x128xf32>,
    %cst_737 = arith.constant 0.000000e+00 : f32
    %cst_738 = arith.constant 5.000000e-01 : f32
    %1522 = vector.broadcast %cst_737 : f32 to vector<32x128xf32>
    %1523 = arith.maximumf %1522, %1501 : vector<32x128xf32>
    %1524 = vector.broadcast %cst_738 : f32 to vector<32x128xf32>
    %1525 = arith.minimumf %1524, %1523 : vector<32x128xf32>
    %c0_739 = arith.constant 0 : index
    %c2_740 = arith.constant 2 : index
    %c32_741 = arith.constant 32 : index
    %c0_742 = arith.constant 0 : index
    %1526 = vector.load %arg5[%c0_739, %c2_740, %c32_741, %c0_742] : memref<1x4x64x128xf32, #tpu.memory_space<vmem>>, vector<1x1x32x128xf32>
    %1527 = vector.shape_cast %1526 : vector<1x1x32x128xf32> to vector<32x128xf32>
    %1528 = vector.shape_cast %1525 : vector<32x128xf32> to vector<1x1x32x128xf32>
    tpu.vector_store %arg5[%c0_739, %c2_740, %c32_741, %c0_742], %1528 {strides = array<i32>} : memref<1x4x64x128xf32, #tpu.memory_space<vmem>>, vector<1x1x32x128xf32>,
    %cst_743 = arith.constant 0.000000e+00 : f32
    %cst_744 = arith.constant 5.000000e-01 : f32
    %1529 = vector.broadcast %cst_743 : f32 to vector<32x128xf32>
    %1530 = arith.maximumf %1529, %1507 : vector<32x128xf32>
    %1531 = vector.broadcast %cst_744 : f32 to vector<32x128xf32>
    %1532 = arith.minimumf %1531, %1530 : vector<32x128xf32>
    %c0_745 = arith.constant 0 : index
    %c3_746 = arith.constant 3 : index
    %c32_747 = arith.constant 32 : index
    %c0_748 = arith.constant 0 : index
    %1533 = vector.load %arg5[%c0_745, %c3_746, %c32_747, %c0_748] : memref<1x4x64x128xf32, #tpu.memory_space<vmem>>, vector<1x1x32x128xf32>
    %1534 = vector.shape_cast %1533 : vector<1x1x32x128xf32> to vector<32x128xf32>
    %1535 = vector.shape_cast %1532 : vector<32x128xf32> to vector<1x1x32x128xf32>
    tpu.vector_store %arg5[%c0_745, %c3_746, %c32_747, %c0_748], %1535 {strides = array<i32>} : memref<1x4x64x128xf32, #tpu.memory_space<vmem>>, vector<1x1x32x128xf32>,
    return
  }
  func.func @transform_0(%arg0: i32, %arg1: i32) -> (i32, i32, i32) {
    %c0_i32 = arith.constant 0 : i32
    %c0_i32_0 = arith.constant 0 : i32
    %c0_i32_1 = arith.constant 0 : i32
    %c0_i32_2 = arith.constant 0 : i32
    return %c0_i32, %c0_i32_0, %c0_i32_1 : i32, i32, i32
  }
  func.func @transform_1(%arg0: i32, %arg1: i32) -> (i32, i32) {
    %c0_i32 = arith.constant 0 : i32
    %c0_i32_0 = arith.constant 0 : i32
    %c0_i32_1 = arith.constant 0 : i32
    return %c0_i32, %c0_i32_0 : i32, i32
  }
  func.func @transform_2(%arg0: i32, %arg1: i32) -> (i32, i32, i32, i32) {
    %c0_i32 = arith.constant 0 : i32
    %c0_i32_0 = arith.constant 0 : i32
    %c0_i32_1 = arith.constant 0 : i32
    %c0_i32_2 = arith.constant 0 : i32
    return %arg0, %c0_i32, %c0_i32_0, %c0_i32_1 : i32, i32, i32, i32
  }
  func.func @transform_3(%arg0: i32, %arg1: i32) -> (i32, i32, i32, i32) {
    %c0_i32 = arith.constant 0 : i32
    %c0_i32_0 = arith.constant 0 : i32
    %c0_i32_1 = arith.constant 0 : i32
    return %arg0, %c0_i32, %arg1, %c0_i32_0 : i32, i32, i32, i32
  }
}

</mosaic_0001>

<bundles_post_ra>
// kernel: fwd.1
= control target key start
LH: loop header
LB: loop body
LE: loop exit
PB: predicated region body
PF: predicated region fallthrough
CT: control target
= control target key end

     0   :  { %s4457_s16 = smov 1   ;;  %vm14_vm0 = vcmask 532480   ;;  %v4458_v22 = vmov 0.0   ;;  %vm141_vm1 = vcmask 7168   ;;  %vm166_vm2 = vcmask 531456   ;;  %s4461_s8 = smov 63   ;;  %s8582_s2 = inlined_call_operand.vmem [shape: f32[1,3,64,64], index: 2, kind: input, shape index: {}]   ;;  %s8583_s1 = inlined_call_operand.vmem [shape: f32[4,128], index: 1, kind: input, shape index: {}]   ;;  %s8584_s0 = inlined_call_operand.vmem [shape: f32[27,4,128], index: 0, kind: input, shape index: {}]   ;;  %s8585_s3 = inlined_call_operand.vmem [shape: f32[1,4,64,128], index: 3, kind: output, shape index: {}]  }
   0x1   :  { %v23_v0 = vld [vmem:[%s8582_s2 + $0x10] sm:$0xff]  ;;  %v21_v1 = vld [vmem:[%s8582_s2] sm:$0xff]  ;;  %v24_v3 = vld [vmem:[%s8582_s2 + $0x18] sm:$0xff]  ;;  %15 = vst.msk [vmem:[#allocation2] sm:$0x1] %vm14_vm0, %v4458_v22  ;;  %vm191_vm3 = vcmask 539648  }
   0x2   :  { %73 = vrot.lane.b32.xlu1 %v23_v0, %s4457_s16  ;;  %69 = vrot.lane.b32.xlu0 %v21_v1, %s4457_s16  ;;  %v25_v2 = vld [vmem:[%s8582_s2 + $0x20] sm:$0xff]  ;;  %v22_v4 = vld [vmem:[%s8582_s2 + $0x8] sm:$0xff]  ;;  %16 = vst.msk [vmem:[#allocation2 + $0x48] sm:$0x1] %vm14_vm0, %v4458_v22  ;;  %s4462_s9 = smov 126   ;;  %s4463_s10 = smov 62  }
   0x3   :  { %77 = vrot.lane.b32.xlu2 %v25_v2, %s4457_s16  ;;  %v26_v5 = vld [vmem:[%s8582_s2 + $0x28] sm:$0xff]  ;;  %v27_v6 = vld [vmem:[%s8582_s2 + $0x30] sm:$0xff]  ;;  %v28_v7 = vld [vmem:[%s8582_s2 + $0x38] sm:$0xff]  ;;  %17 = vst.msk [vmem:[#allocation2 + $0x90] sm:$0x1] %vm14_vm0, %v4458_v22  ;;  %vm244_vm4 = vcmask 523264  }
   0x4   :  { %v29_v8 = vld [vmem:[%s8582_s2 + $0x40] sm:$0xff]  ;;  %v30_v9 = vld [vmem:[%s8582_s2 + $0x48] sm:$0xff]  ;;  %v31_v10 = vld [vmem:[%s8582_s2 + $0x50] sm:$0xff]  ;;  %18 = vst.msk [vmem:[#allocation2 + $0x41] sm:$0x1] %vm14_vm0, %v4458_v22 }
   0x5   :  { %v32_v11 = vld [vmem:[%s8582_s2 + $0x58] sm:$0xff]  ;;  %v33_v12 = vld [vmem:[%s8582_s2 + $0x60] sm:$0xff]  ;;  %v34_v13 = vld [vmem:[%s8582_s2 + $0x68] sm:$0xff]  ;;  %19 = vst.msk [vmem:[#allocation2 + $0x89] sm:$0x1] %vm14_vm0, %v4458_v22 }
   0x6   :  { %v35_v14 = vld [vmem:[%s8582_s2 + $0x70] sm:$0xff]  ;;  %v36_v15 = vld [vmem:[%s8582_s2 + $0x78] sm:$0xff]  ;;  %v37_v16 = vld [vmem:[%s8582_s2 + $0x80] sm:$0xff]  ;;  %20 = vst.msk [vmem:[#allocation2 + $0xd1] sm:$0x1] %vm14_vm0, %v4458_v22 }
   0x7   :  { %v38_v17 = vld [vmem:[%s8582_s2 + $0x88] sm:$0xff]  ;;  %v39_v18 = vld [vmem:[%s8582_s2 + $0x90] sm:$0xff]  ;;  %v41_v19 = vld [vmem:[%s8582_s2 + $0xa0] sm:$0xff] }
   0x8   :  { %v40_v20 = vld [vmem:[%s8582_s2 + $0x98] sm:$0xff]  ;;  %v42_v21 = vld [vmem:[%s8582_s2 + $0xa8] sm:$0xff]  ;;  %v43_v24 = vld [vmem:[%s8582_s2 + $0xb0] sm:$0xff] }
   0x9   :  { %v44_v23 = vld [vmem:[%s8582_s2 + $0xb8] sm:$0xff]  ;;  %s4459_s2 = smov 64  }
   0xa   :  { %75 = vrot.lane.b32.xlu1 %v24_v3, %s4457_s16  ;;  %71 = vrot.lane.b32.xlu0 %v22_v4, %s4457_s16 }
   0xb   :  { %79 = vrot.lane.b32.xlu2 %v26_v5, %s4457_s16 }
  0x12   :  { %81 = vrot.lane.b32.xlu0 %v27_v6, %s4457_s16  ;;  %83 = vrot.lane.b32.xlu1 %v28_v7, %s4457_s16 }
  0x13   :  { %85 = vrot.lane.b32.xlu2 %v29_v8, %s4457_s16 }
  0x1a   :  { %87 = vrot.lane.b32.xlu0 %v30_v9, %s4457_s16  ;;  %89 = vrot.lane.b32.xlu1 %v31_v10, %s4457_s16 }
  0x1b   :  { %91 = vrot.lane.b32.xlu2 %v32_v11, %s4457_s16 }
  0x22   :  { %93 = vrot.lane.b32.xlu0 %v33_v12, %s4457_s16  ;;  %95 = vrot.lane.b32.xlu1 %v34_v13, %s4457_s16 }
  0x23   :  { %97 = vrot.lane.b32.xlu2 %v35_v14, %s4457_s16 }
  0x2a   :  { %99 = vrot.lane.b32.xlu0 %v36_v15, %s4457_s16  ;;  %101 = vrot.lane.b32.xlu1 %v37_v16, %s4457_s16 }
  0x2b   :  { %103 = vrot.lane.b32.xlu2 %v38_v17, %s4457_s16 }
  0x32   :  { %105 = vrot.lane.b32.xlu0 %v39_v18, %s4457_s16  ;;  %107 = vrot.lane.b32.xlu1 %v40_v20, %s4457_s16 }
  0x33   :  { %109 = vrot.lane.b32.xlu2 %v41_v19, %s4457_s16 }
  0x3a   :  { %111 = vrot.lane.b32.xlu0 %v42_v21, %s4457_s16  ;;  %113 = vrot.lane.b32.xlu1 %v43_v24, %s4457_s16 }
  0x3b   :  { %115 = vrot.lane.b32.xlu2 %v44_v23, %s4457_s16  ;;  %s4460_s16 = smov 127  }
  0x5d   :  { %v78_v25 = vpop.permute.xlu2 %77 }
  0x5e   :  { %v146_v26 = vsel %vm141_vm1, 0.0, %v78_v25 }
  0x5f   :  { %v171_v27 = vsel %vm166_vm2, %v146_v26, 0.0 }
  0x60   :  { %196 = vst.msk [vmem:[#allocation2 + $0x21] sm:$0xff] %vm191_vm3, %v171_v27 }
  0x65   :  { %v80_v44 = vpop.permute.xlu2 %79 }
  0x66   :  { %v147_v45 = vsel %vm141_vm1, 0.0, %v80_v44 }
  0x67   :  { %v172_v46 = vsel %vm166_vm2, %v147_v45, 0.0 }
  0x68   :  { %197 = vst.msk [vmem:[#allocation2 + $0x29] sm:$0xff] %vm191_vm3, %v172_v46 }
  0x6d   :  { %v86_v47 = vpop.permute.xlu2 %85 }
  0x6e   :  { %v150_v48 = vsel %vm141_vm1, 0.0, %v86_v47 }
  0x6f   :  { %v175_v49 = vsel %vm166_vm2, %v150_v48, 0.0 }
  0x70   :  { %200 = vst.msk [vmem:[#allocation2 + $0x49] sm:$0xff] %vm191_vm3, %v175_v49 }
  0x74   :  { %v74_v28 = vpop.permute.xlu1 %73  ;;  %v70_v29 = vpop.permute.xlu0 %69 }
  0x75   :  { %v144_v30 = vsel %vm141_vm1, 0.0, %v74_v28  ;;  %v142_v31 = vsel %vm141_vm1, 0.0, %v70_v29  ;;  %v92_v50 = vpop.permute.xlu2 %91 }
  0x76   :  { %v169_v32 = vsel %vm166_vm2, %v144_v30, 0.0  ;;  %v167_v33 = vsel %vm166_vm2, %v142_v31, 0.0  ;;  %v153_v51 = vsel %vm141_vm1, 0.0, %v92_v50 }
  0x77   :  { %194 = vst.msk [vmem:[#allocation2 + $0x11] sm:$0xff] %vm191_vm3, %v169_v32  ;;  %v178_v52 = vsel %vm166_vm2, %v153_v51, 0.0 }
  0x78   :  { %192 = vst.msk [vmem:[#allocation2 + $0x1] sm:$0xff] %vm191_vm3, %v167_v33 }
  0x79   :  { %203 = vst.msk [vmem:[#allocation2 + $0x61] sm:$0xff] %vm191_vm3, %v178_v52 }
  0x7c   :  { %v76_v34 = vpop.permute.xlu1 %75  ;;  %v72_v35 = vpop.permute.xlu0 %71 }
  0x7d   :  { %v145_v36 = vsel %vm141_vm1, 0.0, %v76_v34  ;;  %v143_v37 = vsel %vm141_vm1, 0.0, %v72_v35  ;;  %v98_v53 = vpop.permute.xlu2 %97 }
  0x7e   :  { %v170_v38 = vsel %vm166_vm2, %v145_v36, 0.0  ;;  %v168_v39 = vsel %vm166_vm2, %v143_v37, 0.0  ;;  %v156_v55 = vsel %vm141_vm1, 0.0, %v98_v53  ;;  %v4699_v25 = vld [vmem:[#allocation2 + $0x11] sm:$0xff] }
  0x7f   :  { %195 = vst.msk [vmem:[#allocation2 + $0x19] sm:$0xff] %vm191_vm3, %v170_v38  ;;  %v4594_v40 = vld [vmem:[#allocation2] sm:$0xff]  ;;  %v181_v57 = vsel %vm166_vm2, %v156_v55, 0.0 }
  0x80   :  { %193 = vst.msk [vmem:[#allocation2 + $0x9] sm:$0xff] %vm191_vm3, %v168_v39  ;;  %232 = vrot.lane.b32.xlu0 %v4594_v40, %s4459_s2  ;;  %v4676_v14 = vld [vmem:[#allocation2 + $0x1] sm:$0xff] }
  0x81   :  { %206 = vst.msk [vmem:[#allocation2 + $0x79] sm:$0xff] %vm191_vm3, %v181_v57 }
  0x82   :  { %8603 = vst [vmem:[#allocation4_spill] sm:$0xff] %v4699_v25 }
  0x84   :  { %v82_v54 = vpop.permute.xlu0 %81  ;;  %v84_v60 = vpop.permute.xlu1 %83 }
  0x85   :  { %v148_v56 = vsel %vm141_vm1, 0.0, %v82_v54  ;;  %v104_v59 = vpop.permute.xlu2 %103  ;;  %v149_v62 = vsel %vm141_vm1, 0.0, %v84_v60 }
  0x86   :  { %v4599_v41 = vld [vmem:[#allocation2 + $0x18] sm:$0xff]  ;;  %v173_v58 = vsel %vm166_vm2, %v148_v56, 0.0  ;;  %v159_v61 = vsel %vm141_vm1, 0.0, %v104_v59  ;;  %v174_v1 = vsel %vm166_vm2, %v149_v62, 0.0 }
  0x87   :  { %v4601_v42 = vld [vmem:[#allocation2 + $0x10] sm:$0xff]  ;;  %v4603_v43 = vld [vmem:[#allocation2 + $0x8] sm:$0xff]  ;;  %198 = vst.msk [vmem:[#allocation2 + $0x31] sm:$0xff] %vm191_vm3, %v173_v58  ;;  %v184_v0 = vsel %vm166_vm2, %v159_v61, 0.0  ;;  %v4693_v24 = vld [vmem:[#allocation2 + $0x19] sm:$0xff] }
  0x88   :  { %238 = vrot.lane.b32.xlu0 %v4599_v41, %s4459_s2  ;;  %236 = vrot.lane.b32.xlu2 %v4601_v42, %s4459_s2  ;;  %209 = vst.msk [vmem:[#allocation2 + $0x99] sm:$0xff] %vm191_vm3, %v184_v0  ;;  %v4674_v13 = vld [vmem:[#allocation2 + $0x9] sm:$0xff]  ;;  %v4752_v47 = vld [vmem:[#allocation2 + $0x12] sm:$0xff]  ;;  %v4772_v52 = vld [vmem:[#allocation2 + $0x1a] sm:$0xff] }
  0x89   :  { %234 = vrot.lane.b32.xlu1 %v4603_v43, %s4459_s2  ;;  %199 = vst.msk [vmem:[#allocation2 + $0x39] sm:$0xff] %vm191_vm3, %v174_v1  ;;  %v4754_v48 = vld [vmem:[#allocation2 + $0xa] sm:$0xff]  ;;  %v4760_v49 = vld [vmem:[#allocation2 + $0x2] sm:$0xff] }
  0x8a   :  { %8602 = vst [vmem:[#allocation3_spill] sm:$0xff] %v4674_v13 }
  0x8b   :  { %8604 = vst [vmem:[#allocation5_spill] sm:$0xff] %v4752_v47 }
  0x8c   :  { %v88_v63 = vpop.permute.xlu0 %87  ;;  %v90_v4 = vpop.permute.xlu1 %89  ;;  %8605 = vst [vmem:[#allocation6_spill] sm:$0xff] %v4754_v48 }
  0x8d   :  { %v151_v2 = vsel %vm141_vm1, 0.0, %v88_v63  ;;  %v110_v5 = vpop.permute.xlu2 %109  ;;  %v152_v6 = vsel %vm141_vm1, 0.0, %v90_v4  ;;  %8606 = vst [vmem:[#allocation7_spill] sm:$0xff] %v4760_v49  ;;  %v834_v4 = vld [vmem:[#allocation2 + $0x48] sm:$0xff] }
  0x8e   :  { %v176_v3 = vsel %vm166_vm2, %v151_v2, 0.0  ;;  %v162_v8 = vsel %vm141_vm1, 0.0, %v110_v5  ;;  %v177_v9 = vsel %vm166_vm2, %v152_v6, 0.0  ;;  %8607 = vst [vmem:[#allocation8_spill] sm:$0xff] %v4772_v52 }
  0x8f   :  { %201 = vst.msk [vmem:[#allocation2 + $0x51] sm:$0xff] %vm191_vm3, %v176_v3  ;;  %v187_v11 = vsel %vm166_vm2, %v162_v8, 0.0 }
  0x90   :  { %293 = vrot.lane.b32.xlu0 %v4601_v42, %s4460_s16  ;;  %291 = vrot.lane.b32.xlu2 %v4603_v43, %s4460_s16  ;;  %202 = vst.msk [vmem:[#allocation2 + $0x59] sm:$0xff] %vm191_vm3, %v177_v9 }
  0x91   :  { %289 = vrot.lane.b32.xlu1 %v4594_v40, %s4460_s16  ;;  %212 = vst.msk [vmem:[#allocation2 + $0xb1] sm:$0xff] %vm191_vm3, %v187_v11 }
  0x94   :  { %v94_v7 = vpop.permute.xlu0 %93  ;;  %v96_v15 = vpop.permute.xlu1 %95 }
  0x95   :  { %v154_v10 = vsel %vm141_vm1, 0.0, %v94_v7  ;;  %v116_v16 = vpop.permute.xlu2 %115  ;;  %v155_v17 = vsel %vm141_vm1, 0.0, %v96_v15 }
  0x96   :  { %v179_v12 = vsel %vm166_vm2, %v154_v10, 0.0  ;;  %v165_v19 = vsel %vm141_vm1, 0.0, %v116_v16  ;;  %v180_v20 = vsel %vm166_vm2, %v155_v17, 0.0  ;;  %v835_v10 = vld [vmem:[#allocation2 + $0x50] sm:$0xff] }
  0x97   :  { %204 = vst.msk [vmem:[#allocation2 + $0x69] sm:$0xff] %vm191_vm3, %v179_v12  ;;  %v190_v22 = vsel %vm166_vm2, %v165_v19, 0.0  ;;  %v837_v8 = vld [vmem:[#allocation2 + $0x60] sm:$0xff]  ;;  %v836_v9 = vld [vmem:[#allocation2 + $0x58] sm:$0xff] }
  0x98   :  { %303 = vrot.lane.b32.xlu0 %v4603_v43, %s4461_s8  ;;  %301 = vrot.lane.b32.xlu2 %v4594_v40, %s4461_s8  ;;  %205 = vst.msk [vmem:[#allocation2 + $0x71] sm:$0xff] %vm191_vm3, %v180_v20 }
  0x99   :  { %295 = vrot.lane.b32.xlu1 %v4599_v41, %s4460_s16  ;;  %215 = vst.msk [vmem:[#allocation2 + $0xc9] sm:$0xff] %vm191_vm3, %v190_v22 }
  0x9c   :  { %v100_v18 = vpop.permute.xlu0 %99  ;;  %v102_v26 = vpop.permute.xlu1 %101 }
  0x9d   :  { %v157_v21 = vsel %vm141_vm1, 0.0, %v100_v18  ;;  %v158_v27 = vsel %vm141_vm1, 0.0, %v102_v26 }
  0x9e   :  { %v182_v23 = vsel %vm166_vm2, %v157_v21, 0.0  ;;  %v183_v28 = vsel %vm166_vm2, %v158_v27, 0.0 }
  0x9f   :  { %207 = vst.msk [vmem:[#allocation2 + $0x81] sm:$0xff] %vm191_vm3, %v182_v23 }
  0xa0   :  { %358 = vrot.lane.b32.xlu0 %v4594_v40, %s4462_s9  ;;  %307 = vrot.lane.b32.xlu2 %v4599_v41, %s4461_s8  ;;  %208 = vst.msk [vmem:[#allocation2 + $0x91] sm:$0xff] %vm191_vm3, %v183_v28 }
  0xa1   :  { %305 = vrot.lane.b32.xlu1 %v4601_v42, %s4461_s8 }
  0xa4   :  { %v106_v29 = vpop.permute.xlu0 %105  ;;  %v108_v32 = vpop.permute.xlu1 %107 }
  0xa5   :  { %v160_v30 = vsel %vm141_vm1, 0.0, %v106_v29  ;;  %v161_v33 = vsel %vm141_vm1, 0.0, %v108_v32 }
  0xa6   :  { %v185_v31 = vsel %vm166_vm2, %v160_v30, 0.0  ;;  %v186_v35 = vsel %vm166_vm2, %v161_v33, 0.0  ;;  %v1038_v33 = vld [vmem:[#allocation2 + $0x51] sm:$0xff] }
  0xa7   :  { %210 = vst.msk [vmem:[#allocation2 + $0xa1] sm:$0xff] %vm191_vm3, %v185_v31 }
  0xa8   :  { %364 = vrot.lane.b32.xlu0 %v4599_v41, %s4462_s9  ;;  %362 = vrot.lane.b32.xlu2 %v4601_v42, %s4462_s9  ;;  %211 = vst.msk [vmem:[#allocation2 + $0xa9] sm:$0xff] %vm191_vm3, %v186_v35 }
  0xa9   :  { %360 = vrot.lane.b32.xlu1 %v4603_v43, %s4462_s9 }
  0xac   :  { %v112_v34 = vpop.permute.xlu0 %111  ;;  %v114_v38 = vpop.permute.xlu1 %113 }
  0xad   :  { %v163_v36 = vsel %vm141_vm1, 0.0, %v112_v34  ;;  %v164_v39 = vsel %vm141_vm1, 0.0, %v114_v38  ;;  %v1037_v34 = vld [vmem:[#allocation2 + $0x49] sm:$0xff]  ;;  %v1040_v38 = vld [vmem:[#allocation2 + $0x61] sm:$0xff] }
  0xae   :  { %v188_v37 = vsel %vm166_vm2, %v163_v36, 0.0  ;;  %v189_v44 = vsel %vm166_vm2, %v164_v39, 0.0  ;;  %v1039_v39 = vld [vmem:[#allocation2 + $0x59] sm:$0xff] }
  0xaf   :  { %213 = vst.msk [vmem:[#allocation2 + $0xb9] sm:$0xff] %vm191_vm3, %v188_v37 }
  0xb0   :  { %374 = vrot.lane.b32.xlu0 %v4601_v42, %s4463_s10  ;;  %372 = vrot.lane.b32.xlu2 %v4603_v43, %s4463_s10  ;;  %214 = vst.msk [vmem:[#allocation2 + $0xc1] sm:$0xff] %vm191_vm3, %v189_v44 }
  0xb1   :  { %370 = vrot.lane.b32.xlu1 %v4594_v40, %s4463_s10 }
  0xb8   :  { %437 = vrot.lane.b32.xlu0 %v4674_v13, %s4459_s2  ;;  %435 = vrot.lane.b32.xlu2 %v4676_v14, %s4459_s2 }
  0xb9   :  { %376 = vrot.lane.b32.xlu1 %v4599_v41, %s4463_s10 }
  0xc0   :  { %492 = vrot.lane.b32.xlu0 %v4676_v14, %s4460_s16  ;;  %441 = vrot.lane.b32.xlu2 %v4693_v24, %s4459_s2 }
  0xc1   :  { %439 = vrot.lane.b32.xlu1 %v4699_v25, %s4459_s2 }
  0xc8   :  { %498 = vrot.lane.b32.xlu0 %v4693_v24, %s4460_s16  ;;  %496 = vrot.lane.b32.xlu2 %v4699_v25, %s4460_s16 }
  0xc9   :  { %494 = vrot.lane.b32.xlu1 %v4674_v13, %s4460_s16 }
  0xd0   :  { %508 = vrot.lane.b32.xlu0 %v4699_v25, %s4461_s8  ;;  %506 = vrot.lane.b32.xlu2 %v4674_v13, %s4461_s8 }
  0xd1   :  { %504 = vrot.lane.b32.xlu1 %v4676_v14, %s4461_s8 }
  0xd8   :  { %563 = vrot.lane.b32.xlu0 %v4674_v13, %s4462_s9  ;;  %561 = vrot.lane.b32.xlu2 %v4676_v14, %s4462_s9 }
  0xd9   :  { %510 = vrot.lane.b32.xlu1 %v4693_v24, %s4461_s8 }
  0xe0   :  { %573 = vrot.lane.b32.xlu0 %v4676_v14, %s4463_s10  ;;  %567 = vrot.lane.b32.xlu2 %v4693_v24, %s4462_s9 }
  0xe1   :  { %565 = vrot.lane.b32.xlu1 %v4699_v25, %s4462_s9 }
  0xe2   :  { %v4742_v45 = vpop.permute.xlu2 %236 }
  0xe8   :  { %579 = vrot.lane.b32.xlu0 %v4693_v24, %s4463_s10  ;;  %577 = vrot.lane.b32.xlu2 %v4699_v25, %s4463_s10 }
  0xe9   :  { %575 = vrot.lane.b32.xlu1 %v4674_v13, %s4463_s10 }
  0xea   :  { %v4750_v46 = vpop.permute.xlu2 %291 }
  0xf0   :  { %642 = vrot.lane.b32.xlu0 %v4752_v47, %s4459_s2  ;;  %640 = vrot.lane.b32.xlu2 %v4754_v48, %s4459_s2 }
  0xf1   :  { %638 = vrot.lane.b32.xlu1 %v4760_v49, %s4459_s2 }
  0xf2   :  { %v4764_v50 = vpop.permute.xlu2 %301  ;;  %v4766_v51 = vpop.permute.xlu0 %232 }
  0xf8   :  { %697 = vrot.lane.b32.xlu0 %v4754_v48, %s4460_s16  ;;  %695 = vrot.lane.b32.xlu2 %v4760_v49, %s4460_s16 }
  0xf9   :  { %644 = vrot.lane.b32.xlu1 %v4772_v52, %s4459_s2 }
  0xfa   :  { %v4776_v53 = vpop.permute.xlu2 %307  ;;  %v4778_v54 = vpop.permute.xlu0 %238 }
  0xfb   :  { %v4780_v55 = vpop.permute.xlu1 %234 }
 0x100   :  { %707 = vrot.lane.b32.xlu0 %v4760_v49, %s4461_s8  ;;  %701 = vrot.lane.b32.xlu2 %v4772_v52, %s4460_s16 }
 0x101   :  { %699 = vrot.lane.b32.xlu1 %v4752_v47, %s4460_s16 }
 0x102   :  { %v4788_v56 = vpop.permute.xlu2 %362  ;;  %v4790_v57 = vpop.permute.xlu0 %293 }
 0x103   :  { %v4792_v58 = vpop.permute.xlu1 %289 }
 0x108   :  { %713 = vrot.lane.b32.xlu0 %v4772_v52, %s4461_s8  ;;  %711 = vrot.lane.b32.xlu2 %v4752_v47, %s4461_s8 }
 0x109   :  { %709 = vrot.lane.b32.xlu1 %v4754_v48, %s4461_s8 }
 0x10a   :  { %v4800_v59 = vpop.permute.xlu2 %372  ;;  %v4802_v60 = vpop.permute.xlu0 %303 }
 0x10b   :  { %v4804_v61 = vpop.permute.xlu1 %295 }
 0x110   :  { %768 = vrot.lane.b32.xlu0 %v4752_v47, %s4462_s9  ;;  %766 = vrot.lane.b32.xlu2 %v4754_v48, %s4462_s9 }
 0x111   :  { %764 = vrot.lane.b32.xlu1 %v4760_v49, %s4462_s9 }
 0x112   :  { %v4812_v62 = vpop.permute.xlu2 %435  ;;  %v4814_v63 = vpop.permute.xlu0 %358 }
 0x113   :  { %v4816_v0 = vpop.permute.xlu1 %305 }
 0x118   :  { %778 = vrot.lane.b32.xlu0 %v4754_v48, %s4463_s10  ;;  %776 = vrot.lane.b32.xlu2 %v4760_v49, %s4463_s10  ;;  %v1240_v49 = vld [vmem:[#allocation2 + $0x4a] sm:$0xff] }
 0x119   :  { %770 = vrot.lane.b32.xlu1 %v4772_v52, %s4462_s9 }
 0x11a   :  { %v4824_v1 = vpop.permute.xlu2 %441  ;;  %v4826_v2 = vpop.permute.xlu0 %364 }
 0x11b   :  { %v4828_v3 = vpop.permute.xlu1 %360 }
 0x120   :  { %842 = vrot.lane.b32.xlu0 %v834_v4, %s4459_s2  ;;  %782 = vrot.lane.b32.xlu2 %v4772_v52, %s4463_s10 }
 0x121   :  { %780 = vrot.lane.b32.xlu1 %v4752_v47, %s4463_s10  ;;  %v4206_v47 = vld [vmem:[%s8583_s1 + $0x3] ss:$0 sm:$0xff] }
 0x122   :  { %v4835_v5 = vpop.permute.xlu2 %496  ;;  %v4837_v6 = vpop.permute.xlu0 %374 }
 0x123   :  { %8608 = vst [vmem:[#allocation9_spill] sm:$0xff] %v4835_v5  ;;  %v4839_v7 = vpop.permute.xlu1 %370 }
 0x128   :  { %848 = vrot.lane.b32.xlu0 %v837_v8, %s4459_s2  ;;  %846 = vrot.lane.b32.xlu2 %v836_v9, %s4459_s2 }
 0x129   :  { %844 = vrot.lane.b32.xlu1 %v835_v10, %s4459_s2 }
 0x12a   :  { %v4844_v11 = vpop.permute.xlu2 %506  ;;  %v4846_v12 = vpop.permute.xlu0 %437 }
 0x12b   :  { %8609 = vst [vmem:[#allocation10_spill] sm:$0xff] %v4844_v11  ;;  %v4848_v15 = vpop.permute.xlu1 %376 }
 0x130   :  { %903 = vrot.lane.b32.xlu0 %v836_v9, %s4460_s16  ;;  %901 = vrot.lane.b32.xlu2 %v835_v10, %s4460_s16 }
 0x131   :  { %899 = vrot.lane.b32.xlu1 %v834_v4, %s4460_s16 }
 0x132   :  { %v4853_v16 = vpop.permute.xlu2 %561  ;;  %v4855_v17 = vpop.permute.xlu0 %492 }
 0x133   :  { %8610 = vst [vmem:[#allocation11_spill] sm:$0xff] %v4853_v16  ;;  %v4857_v18 = vpop.permute.xlu1 %439 }
 0x134   :  { %8611 = vst [vmem:[#allocation12_spill] sm:$0xff] %v4855_v17 }
 0x135   :  { %8612 = vst [vmem:[#allocation13_spill] sm:$0xff] %v4857_v18 }
 0x138   :  { %913 = vrot.lane.b32.xlu0 %v835_v10, %s4461_s8  ;;  %911 = vrot.lane.b32.xlu2 %v834_v4, %s4461_s8 }
 0x139   :  { %905 = vrot.lane.b32.xlu1 %v837_v8, %s4460_s16 }
 0x13a   :  { %v4862_v19 = vpop.permute.xlu2 %567  ;;  %v4864_v20 = vpop.permute.xlu0 %498 }
 0x13b   :  { %8613 = vst [vmem:[#allocation14_spill] sm:$0xff] %v4862_v19  ;;  %v4866_v21 = vpop.permute.xlu1 %494 }
 0x13c   :  { %8614 = vst [vmem:[#allocation15_spill] sm:$0xff] %v4864_v20 }
 0x13d   :  { %8615 = vst [vmem:[#allocation16_spill] sm:$0xff] %v4866_v21 }
 0x140   :  { %968 = vrot.lane.b32.xlu0 %v834_v4, %s4462_s9  ;;  %917 = vrot.lane.b32.xlu2 %v837_v8, %s4461_s8 }
 0x141   :  { %915 = vrot.lane.b32.xlu1 %v836_v9, %s4461_s8 }
 0x142   :  { %v4871_v22 = vpop.permute.xlu2 %577  ;;  %v4873_v23 = vpop.permute.xlu0 %508 }
 0x143   :  { %8616 = vst [vmem:[#allocation17_spill] sm:$0xff] %v4871_v22  ;;  %v4875_v26 = vpop.permute.xlu1 %504 }
 0x144   :  { %8617 = vst [vmem:[#allocation18_spill] sm:$0xff] %v4873_v23 }
 0x145   :  { %8618 = vst [vmem:[#allocation19_spill] sm:$0xff] %v4875_v26 }
 0x148   :  { %974 = vrot.lane.b32.xlu0 %v837_v8, %s4462_s9  ;;  %972 = vrot.lane.b32.xlu2 %v836_v9, %s4462_s9 }
 0x149   :  { %970 = vrot.lane.b32.xlu1 %v835_v10, %s4462_s9 }
 0x14a   :  { %v4880_v27 = vpop.permute.xlu2 %640  ;;  %v4882_v28 = vpop.permute.xlu0 %563 }
 0x14b   :  { %8619 = vst [vmem:[#allocation20_spill] sm:$0xff] %v4880_v27  ;;  %v4884_v29 = vpop.permute.xlu1 %510 }
 0x14c   :  { %8620 = vst [vmem:[#allocation21_spill] sm:$0xff] %v4882_v28 }
 0x14d   :  { %8621 = vst [vmem:[#allocation22_spill] sm:$0xff] %v4884_v29 }
 0x150   :  { %984 = vrot.lane.b32.xlu0 %v836_v9, %s4463_s10  ;;  %982 = vrot.lane.b32.xlu2 %v835_v10, %s4463_s10 }
 0x151   :  { %980 = vrot.lane.b32.xlu1 %v834_v4, %s4463_s10 }
 0x152   :  { %v4889_v30 = vpop.permute.xlu2 %695  ;;  %v4891_v31 = vpop.permute.xlu0 %573 }
 0x153   :  { %8622 = vst [vmem:[#allocation23_spill] sm:$0xff] %v4889_v30  ;;  %v4893_v32 = vpop.permute.xlu1 %565 }
 0x154   :  { %8623 = vst [vmem:[#allocation24_spill] sm:$0xff] %v4891_v31 }
 0x155   :  { %8624 = vst [vmem:[#allocation25_spill] sm:$0xff] %v4893_v32 }
 0x158   :  { %1047 = vrot.lane.b32.xlu0 %v1038_v33, %s4459_s2  ;;  %1045 = vrot.lane.b32.xlu2 %v1037_v34, %s4459_s2 }
 0x159   :  { %986 = vrot.lane.b32.xlu1 %v837_v8, %s4463_s10 }
 0x15a   :  { %v4898_v35 = vpop.permute.xlu2 %701  ;;  %v4900_v36 = vpop.permute.xlu0 %579 }
 0x15b   :  { %8625 = vst [vmem:[#allocation26_spill] sm:$0xff] %v4898_v35  ;;  %v4902_v37 = vpop.permute.xlu1 %575 }
 0x15c   :  { %8626 = vst [vmem:[#allocation27_spill] sm:$0xff] %v4900_v36 }
 0x15d   :  { %8627 = vst [vmem:[#allocation28_spill] sm:$0xff] %v4902_v37 }
 0x160   :  { %1102 = vrot.lane.b32.xlu0 %v1037_v34, %s4460_s16  ;;  %1051 = vrot.lane.b32.xlu2 %v1040_v38, %s4459_s2 }
 0x161   :  { %1049 = vrot.lane.b32.xlu1 %v1039_v39, %s4459_s2 }
 0x162   :  { %v4907_v44 = vpop.permute.xlu2 %711  ;;  %v4909_v4 = vpop.permute.xlu0 %642 }
 0x163   :  { %8628 = vst [vmem:[#allocation29_spill] sm:$0xff] %v4907_v44  ;;  %v4911_v9 = vpop.permute.xlu1 %638 }
 0x164   :  { %8629 = vst [vmem:[#allocation30_spill] sm:$0xff] %v4909_v4 }
 0x165   :  { %8630 = vst [vmem:[#allocation31_spill] sm:$0xff] %v4911_v9  ;;  %v4205_v9 = vld [vmem:[%s8583_s1 + $0x2] ss:$0 sm:$0xff] }
 0x168   :  { %1108 = vrot.lane.b32.xlu0 %v1040_v38, %s4460_s16  ;;  %1106 = vrot.lane.b32.xlu2 %v1039_v39, %s4460_s16 }
 0x169   :  { %1104 = vrot.lane.b32.xlu1 %v1038_v33, %s4460_s16 }
 0x16a   :  { %v4916_v8 = vpop.permute.xlu2 %766  ;;  %v4918_v10 = vpop.permute.xlu0 %697 }
 0x16b   :  { %8631 = vst [vmem:[#allocation32_spill] sm:$0xff] %v4916_v8  ;;  %v4920_v35 = vpop.permute.xlu1 %644 }
 0x16c   :  { %8632 = vst [vmem:[#allocation33_spill] sm:$0xff] %v4918_v10 }
 0x16d   :  { %8633 = vst [vmem:[#allocation34_spill] sm:$0xff] %v4920_v35 }
 0x170   :  { %1118 = vrot.lane.b32.xlu0 %v1039_v39, %s4461_s8  ;;  %1116 = vrot.lane.b32.xlu2 %v1038_v33, %s4461_s8 }
 0x171   :  { %1114 = vrot.lane.b32.xlu1 %v1037_v34, %s4461_s8 }
 0x172   :  { %v4925_v44 = vpop.permute.xlu0 %707  ;;  %v4927_v30 = vpop.permute.xlu2 %776 }
 0x173   :  { %8634 = vst [vmem:[#allocation35_spill] sm:$0xff] %v4925_v44  ;;  %v4929_v52 = vpop.permute.xlu1 %699 }
 0x174   :  { %8635 = vst [vmem:[#allocation36_spill] sm:$0xff] %v4927_v30 }
 0x175   :  { %8636 = vst [vmem:[#allocation37_spill] sm:$0xff] %v4929_v52 }
 0x178   :  { %1173 = vrot.lane.b32.xlu0 %v1038_v33, %s4462_s9  ;;  %1171 = vrot.lane.b32.xlu2 %v1037_v34, %s4462_s9 }
 0x179   :  { %1120 = vrot.lane.b32.xlu1 %v1040_v38, %s4461_s8 }
 0x17a   :  { %v4934_v8 = vpop.permute.xlu0 %713  ;;  %v4936_v10 = vpop.permute.xlu2 %782 }
 0x17b   :  { %8637 = vst [vmem:[#allocation38_spill] sm:$0xff] %v4934_v8  ;;  %v4938_v35 = vpop.permute.xlu1 %709  ;;  %v1242_v8 = vld [vmem:[#allocation2 + $0x5a] sm:$0xff] }
 0x17c   :  { %8638 = vst [vmem:[#allocation39_spill] sm:$0xff] %v4936_v10 }
 0x17d   :  { %8639 = vst [vmem:[#allocation40_spill] sm:$0xff] %v4938_v35 }
 0x180   :  { %1183 = vrot.lane.b32.xlu0 %v1037_v34, %s4463_s10  ;;  %1177 = vrot.lane.b32.xlu2 %v1040_v38, %s4462_s9 }
 0x181   :  { %1175 = vrot.lane.b32.xlu1 %v1039_v39, %s4462_s9 }
 0x182   :  { %v4943_v30 = vpop.permute.xlu0 %768  ;;  %v4947_v44 = vpop.permute.xlu2 %846 }
 0x183   :  { %8640 = vst [vmem:[#allocation41_spill] sm:$0xff] %v4943_v30  ;;  %v4945_v52 = vpop.permute.xlu1 %764  ;;  %v1241_v30 = vld [vmem:[#allocation2 + $0x52] sm:$0xff] }
 0x184   :  { %8641 = vst [vmem:[#allocation42_spill] sm:$0xff] %v4945_v52  ;;  %v5012_v52 = vld [vmem:[#allocation2 + $0x90] sm:$0xff] }
 0x185   :  { %8642 = vst [vmem:[#allocation43_spill] sm:$0xff] %v4947_v44 }
 0x188   :  { %1189 = vrot.lane.b32.xlu0 %v1040_v38, %s4463_s10  ;;  %1187 = vrot.lane.b32.xlu2 %v1039_v39, %s4463_s10 }
 0x189   :  { %1185 = vrot.lane.b32.xlu1 %v1038_v33, %s4463_s10 }
 0x18a   :  { %v4952_v10 = vpop.permute.xlu0 %778  ;;  %v4956_v34 = vpop.permute.xlu2 %901 }
 0x18b   :  { %8643 = vst [vmem:[#allocation44_spill] sm:$0xff] %v4952_v10  ;;  %v4954_v35 = vpop.permute.xlu1 %770 }
 0x18c   :  { %8644 = vst [vmem:[#allocation45_spill] sm:$0xff] %v4954_v35  ;;  %v1243_v35 = vld [vmem:[#allocation2 + $0x62] sm:$0xff] }
 0x18d   :  { %8645 = vst [vmem:[#allocation46_spill] sm:$0xff] %v4956_v34 }
 0x190   :  { %1252 = vrot.lane.b32.xlu0 %v1242_v8, %s4459_s2  ;;  %1250 = vrot.lane.b32.xlu2 %v1241_v30, %s4459_s2 }
 0x191   :  { %1248 = vrot.lane.b32.xlu1 %v1240_v49, %s4459_s2 }
 0x192   :  { %v4961_v38 = vpop.permute.xlu0 %842  ;;  %v4965_v33 = vpop.permute.xlu2 %911 }
 0x193   :  { %8646 = vst [vmem:[#allocation47_spill] sm:$0xff] %v4961_v38  ;;  %v4963_v39 = vpop.permute.xlu1 %780 }
 0x194   :  { %8647 = vst [vmem:[#allocation48_spill] sm:$0xff] %v4963_v39 }
 0x195   :  { %8648 = vst [vmem:[#allocation49_spill] sm:$0xff] %v4965_v33 }
 0x198   :  { %1307 = vrot.lane.b32.xlu0 %v1241_v30, %s4460_s16  ;;  %1305 = vrot.lane.b32.xlu2 %v1240_v49, %s4460_s16 }
 0x199   :  { %1254 = vrot.lane.b32.xlu1 %v1243_v35, %s4459_s2 }
 0x19a   :  { %v4970_v34 = vpop.permute.xlu0 %848  ;;  %v4972_v10 = vpop.permute.xlu2 %917 }
 0x19b   :  { %8649 = vst [vmem:[#allocation50_spill] sm:$0xff] %v4970_v34  ;;  %v4974_v44 = vpop.permute.xlu1 %844 }
 0x19c   :  { %8650 = vst [vmem:[#allocation51_spill] sm:$0xff] %v4972_v10 }
 0x19d   :  { %8651 = vst [vmem:[#allocation52_spill] sm:$0xff] %v4974_v44 }
 0x1a0   :  { %1317 = vrot.lane.b32.xlu0 %v1240_v49, %s4461_s8  ;;  %1311 = vrot.lane.b32.xlu2 %v1243_v35, %s4460_s16 }
 0x1a1   :  { %1309 = vrot.lane.b32.xlu1 %v1242_v8, %s4460_s16 }
 0x1a2   :  { %v4979_v33 = vpop.permute.xlu0 %903  ;;  %v4981_v38 = vpop.permute.xlu2 %972 }
 0x1a3   :  { %8652 = vst [vmem:[#allocation53_spill] sm:$0xff] %v4979_v33  ;;  %v4983_v39 = vpop.permute.xlu1 %899 }
 0x1a4   :  { %8653 = vst [vmem:[#allocation54_spill] sm:$0xff] %v4981_v38 }
 0x1a5   :  { %8654 = vst [vmem:[#allocation55_spill] sm:$0xff] %v4983_v39 }
 0x1a8   :  { %1323 = vrot.lane.b32.xlu0 %v1243_v35, %s4461_s8  ;;  %1321 = vrot.lane.b32.xlu2 %v1242_v8, %s4461_s8 }
 0x1a9   :  { %1319 = vrot.lane.b32.xlu1 %v1241_v30, %s4461_s8 }
 0x1aa   :  { %v4988_v10 = vpop.permute.xlu0 %913  ;;  %v4990_v44 = vpop.permute.xlu2 %982 }
 0x1ab   :  { %8655 = vst [vmem:[#allocation56_spill] sm:$0xff] %v4988_v10  ;;  %v4992_v34 = vpop.permute.xlu1 %905 }
 0x1ac   :  { %8656 = vst [vmem:[#allocation57_spill] sm:$0xff] %v4990_v44 }
 0x1ad   :  { %8657 = vst [vmem:[#allocation58_spill] sm:$0xff] %v4992_v34 }
 0x1b0   :  { %1378 = vrot.lane.b32.xlu0 %v1242_v8, %s4462_s9  ;;  %1376 = vrot.lane.b32.xlu2 %v1241_v30, %s4462_s9 }
 0x1b1   :  { %1374 = vrot.lane.b32.xlu1 %v1240_v49, %s4462_s9 }
 0x1b2   :  { %v4997_v38 = vpop.permute.xlu0 %968  ;;  %v4999_v33 = vpop.permute.xlu2 %1045 }
 0x1b3   :  { %8658 = vst [vmem:[#allocation59_spill] sm:$0xff] %v4997_v38  ;;  %v5001_v39 = vpop.permute.xlu1 %915 }
 0x1b4   :  { %8659 = vst [vmem:[#allocation60_spill] sm:$0xff] %v4999_v33  ;;  %v4208_v33 = vld [vmem:[%s8584_s0 + $0x1] ss:$0 sm:$0xff] }
 0x1b5   :  { %8660 = vst [vmem:[#allocation61_spill] sm:$0xff] %v5001_v39  ;;  %v4210_v39 = vld [vmem:[%s8584_s0 + $0x3] ss:$0 sm:$0xff] }
 0x1b8   :  { %1388 = vrot.lane.b32.xlu0 %v1241_v30, %s4463_s10  ;;  %1386 = vrot.lane.b32.xlu2 %v1240_v49, %s4463_s10 }
 0x1b9   :  { %1380 = vrot.lane.b32.xlu1 %v1243_v35, %s4462_s9 }
 0x1ba   :  { %v5006_v44 = vpop.permute.xlu0 %974  ;;  %v5008_v34 = vpop.permute.xlu2 %1051 }
 0x1bb   :  { %8661 = vst [vmem:[#allocation62_spill] sm:$0xff] %v5006_v44  ;;  %v5010_v10 = vpop.permute.xlu1 %970  ;;  %v5024_v44 = vld [vmem:[#allocation2 + $0xa8] sm:$0xff] }
 0x1bc   :  { %8662 = vst [vmem:[#allocation63_spill] sm:$0xff] %v5008_v34  ;;  %v5026_v34 = vld [vmem:[#allocation2 + $0x98] sm:$0xff] }
 0x1bd   :  { %8663 = vst [vmem:[#allocation64_spill] sm:$0xff] %v5010_v10  ;;  %v5030_v10 = vld [vmem:[#allocation2 + $0xa0] sm:$0xff] }
 0x1c0   :  { %1452 = vrot.lane.b32.xlu0 %v5012_v52, %s4459_s2  ;;  %1392 = vrot.lane.b32.xlu2 %v1243_v35, %s4463_s10 }
 0x1c1   :  { %1390 = vrot.lane.b32.xlu1 %v1242_v8, %s4463_s10 }
 0x1c2   :  { %v5018_v30 = vpop.permute.xlu0 %984  ;;  %v5020_v49 = vpop.permute.xlu2 %1106 }
 0x1c3   :  { %8664 = vst [vmem:[#allocation65_spill] sm:$0xff] %v5018_v30  ;;  %v5022_v38 = vpop.permute.xlu1 %980 }
 0x1c4   :  { %8665 = vst [vmem:[#allocation66_spill] sm:$0xff] %v5020_v49 }
 0x1c5   :  { %8666 = vst [vmem:[#allocation67_spill] sm:$0xff] %v5022_v38 }
 0x1c8   :  { %1458 = vrot.lane.b32.xlu0 %v5024_v44, %s4459_s2  ;;  %1456 = vrot.lane.b32.xlu2 %v5030_v10, %s4459_s2 }
 0x1c9   :  { %1454 = vrot.lane.b32.xlu1 %v5026_v34, %s4459_s2 }
 0x1ca   :  { %v5036_v35 = vpop.permute.xlu0 %1047  ;;  %v5038_v8 = vpop.permute.xlu2 %1116 }
 0x1cb   :  { %8667 = vst [vmem:[#allocation68_spill] sm:$0xff] %v5036_v35  ;;  %v5040_v49 = vpop.permute.xlu1 %986  ;;  %v4207_v35 = vld [vmem:[%s8584_s0] ss:$0 sm:$0xff] }
 0x1cc   :  { %8668 = vst [vmem:[#allocation69_spill] sm:$0xff] %v5038_v8 }
 0x1cd   :  { %8669 = vst [vmem:[#allocation70_spill] sm:$0xff] %v5040_v49  ;;  %v247_v49 = vsel %vm244_vm4, %v4601_v42, %v4742_v45  ;;  %v4203_v42 = vld [vmem:[%s8583_s1] ss:$0 sm:$0xff] }
 0x1ce   :  { %v253_v45 = vmul.f32 %v4207_v35, %v247_v49  ;;  %v263_v4 = vmul.f32 %v4208_v33, %v247_v49 }
 0x1d0   :  { %1513 = vrot.lane.b32.xlu0 %v5030_v10, %s4460_s16  ;;  %1511 = vrot.lane.b32.xlu2 %v5026_v34, %s4460_s16 }
 0x1d1   :  { %1509 = vrot.lane.b32.xlu1 %v5012_v52, %s4460_s16 }
 0x1d2   :  { %v5048_v38 = vpop.permute.xlu0 %1102  ;;  %v5053_v30 = vpop.permute.xlu2 %1171 }
 0x1d3   :  { %8670 = vst [vmem:[#allocation71_spill] sm:$0xff] %v5048_v38  ;;  %v5055_v8 = vpop.permute.xlu1 %1049  ;;  %v4209_v38 = vld [vmem:[%s8584_s0 + $0x2] ss:$0 sm:$0xff] }
 0x1d4   :  { %8671 = vst [vmem:[#allocation72_spill] sm:$0xff] %v5053_v30  ;;  %v245_v30 = vsel %vm244_vm4, %v4594_v40, %v4766_v51  ;;  %v273_v19 = vmul.f32 %v4209_v38, %v247_v49  ;;  %v283_v40 = vmul.f32 %v4210_v39, %v247_v49  ;;  %v248_v51 = vsel %vm244_vm4, %v4599_v41, %v4778_v54 }
 0x1d5   :  { %8672 = vst [vmem:[#allocation73_spill] sm:$0xff] %v5055_v8  ;;  %v4204_v8 = vld [vmem:[%s8583_s1 + $0x1] ss:$0 sm:$0xff]  ;;  %v251_v36 = vmul.f32 %v4207_v35, %v245_v30  ;;  %v261_v28 = vmul.f32 %v4208_v33, %v245_v30  ;;  %v271_v37 = vmul.f32 %v4209_v38, %v245_v30  ;;  %v281_v32 = vmul.f32 %v4210_v39, %v245_v30 }
 0x1d6   :  { %v246_v49 = vsel %vm244_vm4, %v4603_v43, %v4780_v55  ;;  %v5098_v41 = vadd.f32 %v4203_v42, %v253_v45  ;;  %v254_v54 = vmul.f32 %v4207_v35, %v248_v51  ;;  %v264_v16 = vmul.f32 %v4208_v33, %v248_v51  ;;  %v4211_v43 = vld [vmem:[%s8584_s0 + $0x4] ss:$0 sm:$0xff] }
 0x1d7   :  { %v5104_v27 = vadd.f32 %v4204_v8, %v263_v4  ;;  %v5106_v20 = vadd.f32 %v4205_v9, %v273_v19  ;;  %v5108_v29 = vadd.f32 %v4206_v47, %v283_v40  ;;  %v274_v30 = vmul.f32 %v4209_v38, %v248_v51  ;;  %v4212_v4 = vld [vmem:[%s8584_s0 + $0x5] ss:$0 sm:$0xff]  ;;  %v4213_v19 = vld [vmem:[%s8584_s0 + $0x6] ss:$0 sm:$0xff] }
 0x1d8   :  { %1523 = vrot.lane.b32.xlu0 %v5026_v34, %s4461_s8  ;;  %1521 = vrot.lane.b32.xlu2 %v5012_v52, %s4461_s8  ;;  %v255_v55 = vadd.f32 %v4203_v42, %v251_v36  ;;  %v265_v45 = vadd.f32 %v4204_v8, %v261_v28  ;;  %v275_v40 = vadd.f32 %v4205_v9, %v271_v37  ;;  %v4214_v28 = vld [vmem:[%s8584_s0 + $0x7] ss:$0 sm:$0xff] }
 0x1d9   :  { %1515 = vrot.lane.b32.xlu1 %v5024_v44, %s4460_s16  ;;  %v262_v17 = vmul.f32 %v4208_v33, %v246_v49  ;;  %v272_v26 = vmul.f32 %v4209_v38, %v246_v49  ;;  %v282_v36 = vmul.f32 %v4210_v39, %v246_v49  ;;  %v268_v5 = vadd.f32 %v4204_v8, %v264_v16 }
 0x1da   :  { %v5096_v22 = vpop.permute.xlu0 %1108  ;;  %v5100_v31 = vpop.permute.xlu2 %1177  ;;  %v284_v23 = vmul.f32 %v4210_v39, %v248_v51 }
 0x1db   :  { %8673 = vst [vmem:[#allocation74_spill] sm:$0xff] %v5096_v22  ;;  %v5102_v48 = vpop.permute.xlu1 %1104  ;;  %v252_v22 = vmul.f32 %v4207_v35, %v246_v49  ;;  %v258_v35 = vadd.f32 %v4203_v42, %v254_v54  ;;  %v276_v49 = vadd.f32 %v4205_v9, %v272_v26  ;;  %v315_v26 = vsel %vm244_vm4, %v4790_v57, %v4816_v0  ;;  %v5174_v57 = vld [vmem:[%s8584_s0 + $0xe] ss:$0 sm:$0xff]  ;;  %v5179_v0 = vld [vmem:[%s8584_s0 + $0xf] ss:$0 sm:$0xff] }
 0x1dc   :  { %8674 = vst [vmem:[#allocation75_spill] sm:$0xff] %v5100_v31  ;;  %v313_v31 = vsel %vm244_vm4, %v4792_v58, %v4764_v50  ;;  %v314_v50 = vsel %vm244_vm4, %v4750_v46, %v4802_v60  ;;  %v278_v58 = vadd.f32 %v4205_v9, %v274_v30  ;;  %v266_v46 = vadd.f32 %v4204_v8, %v262_v17 }
 0x1dd   :  { %8675 = vst [vmem:[#allocation76_spill] sm:$0xff] %v5102_v48  ;;  %v285_v48 = vadd.f32 %v4206_v47, %v281_v32  ;;  %v320_v21 = vmul.f32 %v4211_v43, %v313_v31  ;;  %v316_v32 = vsel %vm244_vm4, %v4804_v61, %v4776_v53  ;;  %v256_v37 = vadd.f32 %v4203_v42, %v252_v22 }
 0x1de   :  { %v330_v38 = vmul.f32 %v4212_v4, %v313_v31  ;;  %v340_v33 = vmul.f32 %v4213_v19, %v313_v31  ;;  %v350_v60 = vmul.f32 %v4214_v28, %v313_v31  ;;  %v321_v16 = vmul.f32 %v4211_v43, %v314_v50 }
 0x1df   :  { %v331_v39 = vmul.f32 %v4212_v4, %v314_v50  ;;  %v323_v53 = vmul.f32 %v4211_v43, %v316_v32  ;;  %v333_v61 = vmul.f32 %v4212_v4, %v316_v32  ;;  %v341_v54 = vmul.f32 %v4213_v19, %v314_v50 }
 0x1e0   :  { %1578 = vrot.lane.b32.xlu0 %v5012_v52, %s4462_s9  ;;  %1527 = vrot.lane.b32.xlu2 %v5024_v44, %s4461_s8  ;;  %v286_v42 = vadd.f32 %v4206_v47, %v282_v36  ;;  %v288_v11 = vadd.f32 %v4206_v47, %v284_v23  ;;  %v5143_v25 = vadd.f32 %v320_v21, %v255_v55  ;;  %v5157_v47 = vld [vmem:[%s8584_s0 + $0xc] ss:$0 sm:$0xff] }
 0x1e1   :  { %1525 = vrot.lane.b32.xlu1 %v5030_v10, %s4461_s8  ;;  %v343_v18 = vmul.f32 %v4213_v19, %v316_v32  ;;  %v5145_v13 = vadd.f32 %v330_v38, %v265_v45  ;;  %v5147_v17 = vadd.f32 %v340_v33, %v275_v40  ;;  %v353_v31 = vmul.f32 %v4214_v28, %v316_v32 }
 0x1e2   :  { %v5137_v51 = vpop.permute.xlu0 %1118  ;;  %v5139_v30 = vpop.permute.xlu2 %1187  ;;  %v5152_v9 = vadd.f32 %v350_v60, %v285_v48  ;;  %v325_v8 = vadd.f32 %v321_v16, %v256_v37  ;;  %v5159_v21 = vadd.f32 %v323_v53, %v258_v35  ;;  %v5161_v23 = vadd.f32 %v333_v61, %v268_v5  ;;  %v5169_v48 = vld [vmem:[%s8584_s0 + $0xd] ss:$0 sm:$0xff] }
 0x1e3   :  { %8676 = vst [vmem:[#allocation77_spill] sm:$0xff] %v5137_v51  ;;  %v5141_v22 = vpop.permute.xlu1 %1114  ;;  %v351_v51 = vmul.f32 %v4214_v28, %v314_v50  ;;  %v345_v55 = vadd.f32 %v341_v54, %v276_v49  ;;  %v447_v45 = vsel %vm244_vm4, %v4676_v14, %v4812_v62  ;;  %v5181_v5 = vadd.f32 %v343_v18, %v278_v58  ;;  %v4219_v62 = vld [vmem:[%s8584_s0 + $0x8] ss:$0 sm:$0xff] }
 0x1e4   :  { %8677 = vst [vmem:[#allocation78_spill] sm:$0xff] %v5139_v30  ;;  %v335_v30 = vadd.f32 %v331_v39, %v266_v46  ;;  %v322_v40 = vmul.f32 %v4211_v43, %v315_v26  ;;  %v332_v36 = vmul.f32 %v4212_v4, %v315_v26  ;;  %v342_v14 = vmul.f32 %v4213_v19, %v315_v26 }
 0x1e5   :  { %v5188_v35 = vadd.f32 %v353_v31, %v288_v11  ;;  %v352_v50 = vmul.f32 %v4214_v28, %v315_v26  ;;  %v383_v32 = vsel %vm244_vm4, %v4828_v3, %v4800_v59  ;;  %v355_v18 = vadd.f32 %v351_v51, %v286_v42  ;;  %v4220_v11 = vld [vmem:[%s8584_s0 + $0x9] ss:$0 sm:$0xff]  ;;  %v4221_v59 = vld [vmem:[%s8584_s0 + $0xa] ss:$0 sm:$0xff]  ;;  %v4222_v3 = vld [vmem:[%s8584_s0 + $0xb] ss:$0 sm:$0xff] }
 0x1e6   :  { %v454_v43 = vmul.f32 %v5157_v47, %v447_v45  ;;  %v450_v4 = vsel %vm244_vm4, %v4693_v24, %v4824_v1  ;;  %v382_v19 = vsel %vm244_vm4, %v4814_v63, %v4839_v7  ;;  %v464_v24 = vmul.f32 %v5169_v48, %v447_v45 }
 0x1e7   :  { %v474_v1 = vmul.f32 %v5174_v57, %v447_v45  ;;  %v5218_v58 = vmul.f32 %v5179_v0, %v447_v45  ;;  %v384_v37 = vsel %vm244_vm4, %v4788_v56, %v4837_v6  ;;  %v326_v46 = vadd.f32 %v322_v40, %v5098_v41 }
 0x1e8   :  { %1584 = vrot.lane.b32.xlu0 %v5024_v44, %s4462_s9  ;;  %1582 = vrot.lane.b32.xlu2 %v5030_v10, %s4462_s9  ;;  %v336_v63 = vadd.f32 %v332_v36, %v5104_v27  ;;  %v346_v7 = vadd.f32 %v342_v14, %v5106_v20  ;;  %v390_v60 = vmul.f32 %v4219_v62, %v383_v32 }
 0x1e9   :  { %1580 = vrot.lane.b32.xlu1 %v5026_v34, %s4462_s9  ;;  %v356_v16 = vadd.f32 %v352_v50, %v5108_v29  ;;  %v5232_v39 = vmul.f32 %v5157_v47, %v450_v4  ;;  %v5235_v51 = vmul.f32 %v5169_v48, %v450_v4  ;;  %v389_v56 = vmul.f32 %v4219_v62, %v382_v19 }
 0x1ea   :  { %v5213_v28 = vpop.permute.xlu0 %1173  ;;  %v5223_v38 = vpop.permute.xlu2 %1250  ;;  %v400_v6 = vmul.f32 %v4220_v11, %v383_v32  ;;  %v410_v49 = vmul.f32 %v4221_v59, %v383_v32  ;;  %v420_v53 = vmul.f32 %v4222_v3, %v383_v32  ;;  %v391_v61 = vmul.f32 %v4219_v62, %v384_v37 }
 0x1eb   :  { %8678 = vst [vmem:[#allocation79_spill] sm:$0xff] %v5213_v28  ;;  %v5225_v33 = vpop.permute.xlu1 %1120  ;;  %v5238_v41 = vmul.f32 %v5174_v57, %v450_v4  ;;  %v5241_v27 = vmul.f32 %v5179_v0, %v450_v4  ;;  %v399_v20 = vmul.f32 %v4220_v11, %v382_v19  ;;  %v409_v54 = vmul.f32 %v4221_v59, %v382_v19 }
 0x1ec   :  { %8679 = vst [vmem:[#allocation80_spill] sm:$0xff] %v5223_v38  ;;  %v394_v29 = vadd.f32 %v390_v60, %v325_v8  ;;  %v401_v42 = vmul.f32 %v4220_v11, %v384_v37  ;;  %v411_v31 = vmul.f32 %v4221_v59, %v384_v37  ;;  %v385_v26 = vsel %vm244_vm4, %v4826_v2, %v4848_v15 }
 0x1ed   :  { %8680 = vst [vmem:[#allocation81_spill] sm:$0xff] %v5225_v33  ;;  %v393_v45 = vadd.f32 %v389_v56, %v5143_v25  ;;  %v419_v40 = vmul.f32 %v4222_v3, %v382_v19  ;;  %v421_v36 = vmul.f32 %v4222_v3, %v384_v37  ;;  %v404_v8 = vadd.f32 %v400_v6, %v335_v30  ;;  %v8682_v25 = vld [vmem:[#allocation3_spill] sm:$0xff]  ;;  %v8685_v6 = vld [vmem:[#allocation13_spill] sm:$0xff] }
 0x1ee   :  { %v414_v14 = vadd.f32 %v410_v49, %v345_v55  ;;  %v424_v50 = vadd.f32 %v420_v53, %v355_v18  ;;  %v395_v32 = vadd.f32 %v391_v61, %v326_v46  ;;  %v403_v2 = vadd.f32 %v399_v20, %v5145_v13  ;;  %v8686_v49 = vld [vmem:[#allocation4_spill] sm:$0xff] }
 0x1ef   :  { %v413_v15 = vadd.f32 %v409_v54, %v5147_v17  ;;  %v448_v19 = vsel %vm244_vm4, %v8682_v25, %v4846_v12  ;;  %v402_v30 = vmul.f32 %v4220_v11, %v385_v26  ;;  %v412_v55 = vmul.f32 %v4221_v59, %v385_v26  ;;  %v8688_v20 = vld [vmem:[#allocation16_spill] sm:$0xff] }
 0x1f0   :  { %1594 = vrot.lane.b32.xlu0 %v5030_v10, %s4463_s10  ;;  %1592 = vrot.lane.b32.xlu2 %v5026_v34, %s4463_s10  ;;  %v392_v10 = vmul.f32 %v4219_v62, %v385_v26  ;;  %v405_v34 = vadd.f32 %v401_v42, %v336_v63  ;;  %v422_v18 = vmul.f32 %v4222_v3, %v385_v26  ;;  %v5284_v63 = vld [vmem:[#allocation2 + $0x99] sm:$0xff]  ;;  %v5294_v42 = vld [vmem:[#allocation2 + $0x91] sm:$0xff] }
 0x1f1   :  { %1590 = vrot.lane.b32.xlu1 %v5012_v52, %s4463_s10  ;;  %v423_v46 = vadd.f32 %v419_v40, %v5152_v9  ;;  %v415_v60 = vadd.f32 %v411_v31, %v346_v7  ;;  %v425_v56 = vadd.f32 %v421_v36, %v356_v16  ;;  %v5265_v13 = vadd.f32 %v454_v43, %v393_v45  ;;  %v5278_v9 = vld [vmem:[%s8584_s0 + $0x10] ss:$0 sm:$0xff] }
 0x1f2   :  { %v5253_v4 = vpop.permute.xlu0 %1183  ;;  %v5260_v37 = vpop.permute.xlu2 %1305  ;;  %v455_v17 = vmul.f32 %v5157_v47, %v448_v19  ;;  %v465_v62 = vmul.f32 %v5169_v48, %v448_v19  ;;  %v475_v12 = vmul.f32 %v5174_v57, %v448_v19  ;;  %v449_v53 = vsel %vm244_vm4, %v8686_v49, %v8685_v6  ;;  %v8690_v36 = vld [vmem:[#allocation18_spill] sm:$0xff] }
 0x1f3   :  { %8681 = vst [vmem:[#allocation82_spill] sm:$0xff] %v5253_v4  ;;  %v5262_v52 = vpop.permute.xlu1 %1175  ;;  %v396_v11 = vadd.f32 %v392_v10, %v5159_v21  ;;  %v485_v59 = vmul.f32 %v5179_v0, %v448_v19  ;;  %v5280_v43 = vadd.f32 %v464_v24, %v403_v2  ;;  %v5282_v3 = vadd.f32 %v474_v1, %v413_v15  ;;  %v8687_v21 = vld [vmem:[#allocation10_spill] sm:$0xff] }
 0x1f4   :  { %8683 = vst [vmem:[#allocation3_spill] sm:$0xff] %v5260_v37  ;;  %v406_v7 = vadd.f32 %v402_v30, %v5161_v23  ;;  %v416_v16 = vadd.f32 %v412_v55, %v5181_v5  ;;  %v426_v61 = vadd.f32 %v422_v18, %v5188_v35  ;;  %v517_v54 = vsel %vm244_vm4, %v8688_v20, %v8687_v21  ;;  %v5301_v23 = vld [vmem:[%s8584_s0 + $0x11] ss:$0 sm:$0xff]  ;;  %v8694_v55 = vld [vmem:[#allocation19_spill] sm:$0xff]  ;;  %v8695_v18 = vld [vmem:[#allocation12_spill] sm:$0xff] }
 0x1f5   :  { %8684 = vst [vmem:[#allocation83_spill] sm:$0xff] %v5262_v52  ;;  %v456_v24 = vmul.f32 %v5157_v47, %v449_v53  ;;  %v466_v1 = vmul.f32 %v5169_v48, %v449_v53  ;;  %v5304_v5 = vadd.f32 %v5218_v58, %v423_v46  ;;  %v459_v35 = vadd.f32 %v455_v17, %v394_v29  ;;  %v5314_v48 = vld [vmem:[%s8584_s0 + $0x12] ss:$0 sm:$0xff]  ;;  %v5319_v58 = vld [vmem:[%s8584_s0 + $0x13] ss:$0 sm:$0xff] }
 0x1f6   :  { %v469_v31 = vadd.f32 %v465_v62, %v404_v8  ;;  %v479_v26 = vadd.f32 %v475_v12, %v414_v14  ;;  %v476_v47 = vmul.f32 %v5174_v57, %v449_v53  ;;  %v486_v40 = vmul.f32 %v5179_v0, %v449_v53  ;;  %v8691_v8 = vld [vmem:[#allocation9_spill] sm:$0xff]  ;;  %v8697_v53 = vld [vmem:[#allocation15_spill] sm:$0xff] }
 0x1f7   :  { %v524_v29 = vmul.f32 %v5278_v9, %v517_v54  ;;  %v518_v57 = vsel %vm244_vm4, %v8691_v8, %v8690_v36  ;;  %v461_v15 = vadd.f32 %v5232_v39, %v396_v11  ;;  %v471_v10 = vadd.f32 %v5235_v51, %v406_v7  ;;  %v5359_v7 = vld [vmem:[#allocation2 + $0xa9] sm:$0xff]  ;;  %v5370_v21 = vld [vmem:[%s8584_s0 + $0x18] ss:$0 sm:$0xff]  ;;  %v5401_v8 = vld [vmem:[%s8584_s0 + $0x1b] ss:$0 sm:$0xff] }
 0x1f8   :  { %1657 = vrot.lane.b32.xlu0 %v5284_v63, %s4459_s2  ;;  %1655 = vrot.lane.b32.xlu2 %v5294_v42, %s4459_s2  ;;  %v5335_v25 = vadd.f32 %v5238_v41, %v416_v16  ;;  %v460_v0 = vadd.f32 %v456_v24, %v395_v32  ;;  %v470_v19 = vadd.f32 %v466_v1, %v405_v34  ;;  %v8698_v1 = vld [vmem:[#allocation20_spill] sm:$0xff] }
 0x1f9   :  { %1596 = vrot.lane.b32.xlu1 %v5024_v44, %s4463_s10  ;;  %v489_v44 = vadd.f32 %v485_v59, %v424_v50  ;;  %v5338_v50 = vadd.f32 %v5241_v27, %v426_v61  ;;  %v534_v30 = vmul.f32 %v5301_v23, %v517_v54  ;;  %v516_v46 = vsel %vm244_vm4, %v8695_v18, %v8694_v55  ;;  %v5357_v59 = vld [vmem:[#allocation2 + $0xa1] sm:$0xff]  ;;  %v8702_v55 = vld [vmem:[#allocation11_spill] sm:$0xff] }
 0x1fa   :  { %v5321_v45 = vpop.permute.xlu0 %1189  ;;  %v5330_v2 = vpop.permute.xlu2 %1311  ;;  %v480_v17 = vadd.f32 %v476_v47, %v415_v60  ;;  %v544_v62 = vmul.f32 %v5314_v48, %v517_v54  ;;  %v554_v39 = vmul.f32 %v5319_v58, %v517_v54  ;;  %v525_v51 = vmul.f32 %v5278_v9, %v518_v57  ;;  %v8696_v60 = vld [vmem:[#allocation22_spill] sm:$0xff]  ;;  %v5386_v47 = vld [vmem:[%s8584_s0 + $0x19] ss:$0 sm:$0xff] }
 0x1fb   :  { %8689 = vst [vmem:[#allocation13_spill] sm:$0xff] %v5321_v45  ;;  %v5328_v14 = vpop.permute.xlu1 %1185  ;;  %v490_v41 = vadd.f32 %v486_v40, %v425_v56  ;;  %v5347_v12 = vadd.f32 %v524_v29, %v459_v35  ;;  %v535_v27 = vmul.f32 %v5301_v23, %v518_v57  ;;  %v545_v32 = vmul.f32 %v5314_v48, %v518_v57  ;;  %v8699_v35 = vld [vmem:[#allocation6_spill] sm:$0xff] }
 0x1fc   :  { %8692 = vst [vmem:[#allocation4_spill] sm:$0xff] %v5328_v14  ;;  %v523_v34 = vmul.f32 %v5278_v9, %v516_v46  ;;  %v533_v6 = vmul.f32 %v5301_v23, %v516_v46  ;;  %v543_v49 = vmul.f32 %v5314_v48, %v516_v46  ;;  %v519_v11 = vsel %vm244_vm4, %v8697_v53, %v8696_v60  ;;  %v4231_v40 = vld [vmem:[%s8584_s0 + $0x14] ss:$0 sm:$0xff]  ;;  %v8705_v53 = vld [vmem:[#allocation17_spill] sm:$0xff] }
 0x1fd   :  { %8693 = vst [vmem:[#allocation10_spill] sm:$0xff] %v5330_v2  ;;  %v5363_v56 = vadd.f32 %v534_v30, %v469_v31  ;;  %v553_v16 = vmul.f32 %v5319_v58, %v516_v46  ;;  %v555_v61 = vmul.f32 %v5319_v58, %v518_v57  ;;  %v5376_v20 = vadd.f32 %v544_v62, %v479_v26  ;;  %v8701_v30 = vld [vmem:[#allocation24_spill] sm:$0xff]  ;;  %v8710_v2 = vld [vmem:[#allocation14_spill] sm:$0xff] }
 0x1fe   :  { %v5378_v54 = vadd.f32 %v554_v39, %v489_v44  ;;  %v529_v24 = vadd.f32 %v525_v51, %v460_v0  ;;  %v651_v31 = vsel %vm244_vm4, %v8699_v35, %v8698_v1  ;;  %v539_v26 = vadd.f32 %v535_v27, %v470_v19  ;;  %v5396_v44 = vld [vmem:[%s8584_s0 + $0x1a] ss:$0 sm:$0xff]  ;;  %v4232_v0 = vld [vmem:[%s8584_s0 + $0x15] ss:$0 sm:$0xff]  ;;  %v4233_v51 = vld [vmem:[%s8584_s0 + $0x16] ss:$0 sm:$0xff] }
 0x1ff   :  { %v549_v36 = vadd.f32 %v545_v32, %v480_v17  ;;  %v526_v57 = vmul.f32 %v5278_v9, %v519_v11  ;;  %v585_v19 = vsel %vm244_vm4, %v8702_v55, %v8701_v30  ;;  %v527_v17 = vadd.f32 %v523_v34, %v5265_v13  ;;  %v8706_v1 = vld [vmem:[#allocation25_spill] sm:$0xff]  ;;  %v4234_v34 = vld [vmem:[%s8584_s0 + $0x17] ss:$0 sm:$0xff]  ;;  %v8707_v55 = vld [vmem:[#allocation28_spill] sm:$0xff] }
 0x200   :  { %1712 = vrot.lane.b32.xlu0 %v5294_v42, %s4460_s16  ;;  %1661 = vrot.lane.b32.xlu2 %v5359_v7, %s4459_s2  ;;  %v537_v62 = vadd.f32 %v533_v6, %v5280_v43  ;;  %v547_v39 = vadd.f32 %v543_v49, %v5282_v3  ;;  %v536_v9 = vmul.f32 %v5301_v23, %v519_v11 }
 0x201   :  { %1659 = vrot.lane.b32.xlu1 %v5357_v59, %s4459_s2  ;;  %v557_v27 = vadd.f32 %v553_v16, %v5304_v5  ;;  %v559_v32 = vadd.f32 %v555_v61, %v490_v41  ;;  %v5423_v60 = vmul.f32 %v5370_v21, %v651_v31  ;;  %v587_v13 = vsel %vm244_vm4, %v8706_v1, %v8705_v53  ;;  %v8709_v1 = vld [vmem:[#allocation27_spill] sm:$0xff] }
 0x202   :  { %v5391_v29 = vpop.permute.xlu0 %1252  ;;  %v5412_v46 = vpop.permute.xlu2 %1321  ;;  %v5429_v43 = vmul.f32 %v5386_v47, %v651_v31  ;;  %v546_v3 = vmul.f32 %v5314_v48, %v519_v11  ;;  %v556_v23 = vmul.f32 %v5319_v58, %v519_v11  ;;  %v592_v5 = vmul.f32 %v4231_v40, %v585_v19  ;;  %v8708_v48 = vld [vmem:[#allocation21_spill] sm:$0xff] }
 0x203   :  { %8700 = vst [vmem:[#allocation16_spill] sm:$0xff] %v5391_v29  ;;  %v5410_v18 = vpop.permute.xlu1 %1248  ;;  %v5437_v41 = vmul.f32 %v5396_v44, %v651_v31  ;;  %v5440_v6 = vmul.f32 %v5401_v8, %v651_v31  ;;  %v530_v49 = vadd.f32 %v526_v57, %v461_v15  ;;  %v602_v16 = vmul.f32 %v4232_v0, %v585_v19 }
 0x204   :  { %8703 = vst [vmem:[#allocation18_spill] sm:$0xff] %v5410_v18  ;;  %v540_v61 = vadd.f32 %v536_v9, %v471_v10  ;;  %v594_v35 = vmul.f32 %v4231_v40, %v587_v13  ;;  %v612_v30 = vmul.f32 %v4233_v51, %v585_v19  ;;  %v586_v58 = vsel %vm244_vm4, %v8708_v48, %v8707_v55 }
 0x205   :  { %8704 = vst [vmem:[#allocation9_spill] sm:$0xff] %v5412_v46  ;;  %v604_v11 = vmul.f32 %v4232_v0, %v587_v13  ;;  %v614_v53 = vmul.f32 %v4233_v51, %v587_v13  ;;  %v588_v46 = vsel %vm244_vm4, %v8710_v2, %v8709_v1  ;;  %v550_v15 = vadd.f32 %v546_v3, %v5335_v25 }
 0x206   :  { %v560_v10 = vadd.f32 %v556_v23, %v5338_v50  ;;  %v624_v31 = vmul.f32 %v4234_v34, %v587_v13  ;;  %v596_v57 = vadd.f32 %v592_v5, %v527_v17  ;;  %v606_v55 = vadd.f32 %v602_v16, %v537_v62  ;;  %v8714_v5 = vld [vmem:[#allocation30_spill] sm:$0xff]  ;;  %v8715_v62 = vld [vmem:[#allocation5_spill] sm:$0xff] }
 0x207   :  { %v622_v48 = vmul.f32 %v4234_v34, %v585_v19  ;;  %v593_v37 = vmul.f32 %v4231_v40, %v586_v58  ;;  %v603_v29 = vmul.f32 %v4232_v0, %v586_v58  ;;  %v613_v1 = vmul.f32 %v4233_v51, %v586_v58 }
 0x208   :  { %1718 = vrot.lane.b32.xlu0 %v5359_v7, %s4460_s16  ;;  %1716 = vrot.lane.b32.xlu2 %v5357_v59, %s4460_s16  ;;  %v623_v45 = vmul.f32 %v4234_v34, %v586_v58  ;;  %v595_v28 = vmul.f32 %v4231_v40, %v588_v46  ;;  %v605_v14 = vmul.f32 %v4232_v0, %v588_v46  ;;  %v8717_v58 = vld [vmem:[#allocation7_spill] sm:$0xff] }
 0x209   :  { %1714 = vrot.lane.b32.xlu1 %v5284_v63, %s4460_s16  ;;  %v598_v52 = vadd.f32 %v594_v35, %v529_v24  ;;  %v608_v25 = vadd.f32 %v604_v11, %v539_v26  ;;  %v618_v3 = vadd.f32 %v614_v53, %v549_v36  ;;  %v616_v50 = vadd.f32 %v612_v30, %v547_v39  ;;  %v4235_v30 = vld [vmem:[%s8584_s0 + $0x1c] ss:$0 sm:$0xff] }
 0x20a   :  { %v5456_v9 = vpop.permute.xlu0 %1307  ;;  %v5458_v18 = vpop.permute.xlu2 %1376  ;;  %v628_v13 = vadd.f32 %v624_v31, %v559_v32  ;;  %v615_v17 = vmul.f32 %v4233_v51, %v588_v46  ;;  %v625_v23 = vmul.f32 %v4234_v34, %v588_v46  ;;  %v652_v19 = vsel %vm244_vm4, %v8715_v62, %v8714_v5  ;;  %v8723_v31 = vld [vmem:[#allocation35_spill] sm:$0xff] }
 0x20b   :  { %8711 = vst [vmem:[#allocation19_spill] sm:$0xff] %v5456_v9  ;;  %v5460_v2 = vpop.permute.xlu1 %1254  ;;  %v626_v16 = vadd.f32 %v622_v48, %v557_v27  ;;  %v607_v9 = vadd.f32 %v603_v29, %v5363_v56  ;;  %v617_v24 = vadd.f32 %v613_v1, %v5376_v20  ;;  %v627_v26 = vadd.f32 %v623_v45, %v5378_v54  ;;  %v8719_v54 = vld [vmem:[#allocation34_spill] sm:$0xff]  ;;  %v8720_v29 = vld [vmem:[#allocation8_spill] sm:$0xff] }
 0x20c   :  { %8712 = vst [vmem:[#allocation12_spill] sm:$0xff] %v5458_v18  ;;  %v597_v18 = vadd.f32 %v593_v37, %v5347_v12  ;;  %v599_v36 = vadd.f32 %v595_v28, %v530_v49  ;;  %v609_v0 = vadd.f32 %v605_v14, %v540_v61  ;;  %v659_v46 = vmul.f32 %v5370_v21, %v652_v19 }
 0x20d   :  { %8713 = vst [vmem:[#allocation22_spill] sm:$0xff] %v5460_v2  ;;  %v8716_v2 = vld [vmem:[#allocation31_spill] sm:$0xff]  ;;  %v669_v39 = vmul.f32 %v5386_v47, %v652_v19  ;;  %v679_v37 = vmul.f32 %v5396_v44, %v652_v19  ;;  %v619_v12 = vadd.f32 %v615_v17, %v550_v15  ;;  %v629_v56 = vadd.f32 %v625_v23, %v560_v10  ;;  %v8726_v23 = vld [vmem:[#allocation37_spill] sm:$0xff] }
 0x20e   :  { %v650_v40 = vsel %vm244_vm4, %v8717_v58, %v8716_v2  ;;  %v653_v51 = vsel %vm244_vm4, %v8720_v29, %v8719_v54  ;;  %v5490_v27 = vadd.f32 %v5423_v60, %v597_v18  ;;  %v5493_v32 = vadd.f32 %v5429_v43, %v607_v9  ;;  %v4236_v18 = vld [vmem:[%s8584_s0 + $0x1d] ss:$0 sm:$0xff]  ;;  %v4237_v10 = vld [vmem:[%s8584_s0 + $0x1e] ss:$0 sm:$0xff] }
 0x20f   :  { %v657_v28 = vmul.f32 %v5370_v21, %v650_v40  ;;  %v667_v45 = vmul.f32 %v5386_v47, %v650_v40  ;;  %v677_v20 = vmul.f32 %v5396_v44, %v650_v40  ;;  %v687_v61 = vmul.f32 %v5401_v8, %v650_v40  ;;  %v8724_v9 = vld [vmem:[#allocation23_spill] sm:$0xff] }
 0x210   :  { %1728 = vrot.lane.b32.xlu0 %v5357_v59, %s4461_s8  ;;  %1726 = vrot.lane.b32.xlu2 %v5284_v63, %s4461_s8  ;;  %v689_v35 = vmul.f32 %v5401_v8, %v652_v19  ;;  %v5508_v60 = vadd.f32 %v5437_v41, %v617_v24  ;;  %v5511_v43 = vadd.f32 %v5440_v6, %v627_v26  ;;  %v8725_v41 = vld [vmem:[#allocation29_spill] sm:$0xff]  ;;  %v8727_v24 = vld [vmem:[#allocation38_spill] sm:$0xff] }
 0x211   :  { %1724 = vrot.lane.b32.xlu1 %v5294_v42, %s4461_s8  ;;  %v663_v11 = vadd.f32 %v659_v46, %v598_v52  ;;  %v673_v53 = vadd.f32 %v669_v39, %v608_v25  ;;  %v683_v15 = vadd.f32 %v679_v37, %v618_v3  ;;  %v719_v48 = vsel %vm244_vm4, %v8724_v9, %v8723_v31  ;;  %v4238_v52 = vld [vmem:[%s8584_s0 + $0x1f] ss:$0 sm:$0xff]  ;;  %v8728_v26 = vld [vmem:[#allocation26_spill] sm:$0xff] }
 0x212   :  { %v5483_v14 = vpop.permute.xlu0 %1317  ;;  %v5495_v34 = vpop.permute.xlu2 %1386  ;;  %v661_v2 = vadd.f32 %v657_v28, %v596_v57  ;;  %v671_v1 = vadd.f32 %v667_v45, %v606_v55  ;;  %v660_v17 = vmul.f32 %v5370_v21, %v653_v51  ;;  %v721_v6 = vsel %vm244_vm4, %v8726_v23, %v8725_v41  ;;  %v8730_v28 = vld [vmem:[#allocation40_spill] sm:$0xff]  ;;  %v8731_v45 = vld [vmem:[#allocation33_spill] sm:$0xff] }
 0x213   :  { %8718 = vst [vmem:[#allocation15_spill] sm:$0xff] %v5483_v14  ;;  %v5497_v49 = vpop.permute.xlu1 %1309  ;;  %v681_v25 = vadd.f32 %v677_v20, %v616_v50  ;;  %v670_v3 = vmul.f32 %v5386_v47, %v653_v51  ;;  %v680_v5 = vmul.f32 %v5396_v44, %v653_v51  ;;  %v690_v62 = vmul.f32 %v5401_v8, %v653_v51  ;;  %v4433_v14 = vld [vmem:[#allocation2 + $0x51] sm:$0xff] }
 0x214   :  { %8721 = vst [vmem:[#allocation20_spill] sm:$0xff] %v5495_v34  ;;  %v691_v19 = vadd.f32 %v687_v61, %v626_v16  ;;  %v693_v57 = vadd.f32 %v689_v35, %v628_v13  ;;  %v726_v55 = vmul.f32 %v4235_v30, %v719_v48  ;;  %v736_v58 = vmul.f32 %v4236_v18, %v719_v48 }
 0x215   :  { %8722 = vst [vmem:[#allocation6_spill] sm:$0xff] %v5497_v49  ;;  %v728_v21 = vmul.f32 %v4235_v30, %v721_v6  ;;  %v746_v40 = vmul.f32 %v4237_v10, %v719_v48  ;;  %v722_v46 = vsel %vm244_vm4, %v8728_v26, %v8727_v24  ;;  %v664_v47 = vadd.f32 %v660_v17, %v599_v36  ;;  %v5596_v24 = vld [vmem:[%s8584_s0 + $0x27] ss:$0 sm:$0xff] }
 0x216   :  { %v738_v44 = vmul.f32 %v4236_v18, %v721_v6  ;;  %v748_v8 = vmul.f32 %v4237_v10, %v721_v6  ;;  %v758_v50 = vmul.f32 %v4238_v52, %v721_v6  ;;  %v674_v16 = vadd.f32 %v670_v3, %v609_v0  ;;  %v4239_v6 = vld [vmem:[%s8584_s0 + $0x20] ss:$0 sm:$0xff] }
 0x217   :  { %v684_v39 = vadd.f32 %v680_v5, %v619_v12  ;;  %v694_v37 = vadd.f32 %v690_v62, %v629_v56  ;;  %v720_v20 = vsel %vm244_vm4, %v8731_v45, %v8730_v28  ;;  %v730_v51 = vadd.f32 %v726_v55, %v661_v2  ;;  %v8737_v26 = vld [vmem:[#allocation44_spill] sm:$0xff] }
 0x218   :  { %1783 = vrot.lane.b32.xlu0 %v5284_v63, %s4462_s9  ;;  %1781 = vrot.lane.b32.xlu2 %v5294_v42, %s4462_s9  ;;  %v756_v61 = vmul.f32 %v4238_v52, %v719_v48  ;;  %v729_v35 = vmul.f32 %v4235_v30, %v722_v46  ;;  %v739_v36 = vmul.f32 %v4236_v18, %v722_v46  ;;  %v4240_v48 = vld [vmem:[%s8584_s0 + $0x21] ss:$0 sm:$0xff] }
 0x219   :  { %1730 = vrot.lane.b32.xlu1 %v5359_v7, %s4461_s8  ;;  %v5547_v31 = vadd.f32 %v728_v21, %v663_v11  ;;  %v740_v9 = vadd.f32 %v736_v58, %v671_v1  ;;  %v750_v17 = vadd.f32 %v746_v40, %v681_v25  ;;  %v749_v41 = vmul.f32 %v4237_v10, %v722_v46  ;;  %v4241_v11 = vld [vmem:[%s8584_s0 + $0x22] ss:$0 sm:$0xff]  ;;  %v8735_v25 = vld [vmem:[#allocation42_spill] sm:$0xff]  ;;  %v8736_v21 = vld [vmem:[#allocation43_spill] sm:$0xff] }
 0x21a   :  { %v5538_v13 = vpop.permute.xlu0 %1323  ;;  %v5543_v54 = vpop.permute.xlu2 %1392  ;;  %v5549_v0 = vadd.f32 %v738_v44, %v673_v53  ;;  %v5551_v12 = vadd.f32 %v748_v8, %v683_v15  ;;  %v5553_v56 = vadd.f32 %v758_v50, %v693_v57  ;;  %v727_v23 = vmul.f32 %v4235_v30, %v720_v20  ;;  %v8734_v15 = vld [vmem:[#allocation36_spill] sm:$0xff] }
 0x21b   :  { %8729 = vst [vmem:[#allocation24_spill] sm:$0xff] %v5538_v13  ;;  %v5545_v29 = vpop.permute.xlu1 %1319  ;;  %v737_v2 = vmul.f32 %v4236_v18, %v720_v20  ;;  %v747_v53 = vmul.f32 %v4237_v10, %v720_v20  ;;  %v757_v1 = vmul.f32 %v4238_v52, %v720_v20  ;;  %v788_v3 = vsel %vm244_vm4, %v8735_v25, %v8734_v15  ;;  %v4242_v30 = vld [vmem:[%s8584_s0 + $0x23] ss:$0 sm:$0xff]  ;;  %v5577_v18 = vld [vmem:[%s8584_s0 + $0x24] ss:$0 sm:$0xff] }
 0x21c   :  { %8732 = vst [vmem:[#allocation11_spill] sm:$0xff] %v5543_v54  ;;  %v760_v5 = vadd.f32 %v756_v61, %v691_v19  ;;  %v5570_v62 = vadd.f32 %v729_v35, %v664_v47  ;;  %v5572_v57 = vadd.f32 %v739_v36, %v674_v16  ;;  %v759_v55 = vmul.f32 %v4238_v52, %v722_v46  ;;  %v5582_v10 = vld [vmem:[%s8584_s0 + $0x25] ss:$0 sm:$0xff]  ;;  %v4427_v19 = vld [vmem:[#allocation2 + $0x58] sm:$0xff]  ;;  %v5591_v52 = vld [vmem:[%s8584_s0 + $0x26] ss:$0 sm:$0xff] }
 0x21d   :  { %8733 = vst [vmem:[#allocation17_spill] sm:$0xff] %v5545_v29  ;;  %v753_v58 = vadd.f32 %v749_v41, %v684_v39  ;;  %v856_v40 = vsel %vm244_vm4, %v4427_v19, %v8736_v21  ;;  %v8738_v46 = vld [vmem:[#allocation32_spill] sm:$0xff]  ;;  %v795_v44 = vmul.f32 %v4239_v6, %v788_v3  ;;  %v805_v8 = vmul.f32 %v4240_v48, %v788_v3 }
 0x21e   :  { %v789_v47 = vsel %vm244_vm4, %v8738_v46, %v8737_v26  ;;  %v815_v50 = vmul.f32 %v4241_v11, %v788_v3  ;;  %v741_v39 = vadd.f32 %v737_v2, %v5493_v32  ;;  %v751_v28 = vadd.f32 %v747_v53, %v5508_v60 }
 0x21f   :  { %v761_v45 = vadd.f32 %v757_v1, %v5511_v43  ;;  %v825_v20 = vmul.f32 %v4242_v30, %v788_v3  ;;  %v763_v36 = vadd.f32 %v759_v55, %v694_v37  ;;  %v5616_v41 = vmul.f32 %v5577_v18, %v856_v40  ;;  %v8744_v3 = vld [vmem:[#allocation48_spill] sm:$0xff]  ;;  %v8745_v55 = vld [vmem:[#allocation41_spill] sm:$0xff] }
 0x220   :  { %1793 = vrot.lane.b32.xlu0 %v5294_v42, %s4463_s10  ;;  %1787 = vrot.lane.b32.xlu2 %v5359_v7, %s4462_s9  ;;  %v731_v42 = vadd.f32 %v727_v23, %v5490_v27  ;;  %v8742_v27 = vld [vmem:[#allocation39_spill] sm:$0xff]  ;;  %v8743_v23 = vld [vmem:[#allocation45_spill] sm:$0xff]  ;;  %v796_v25 = vmul.f32 %v4239_v6, %v789_v47  ;;  %v5622_v32 = vmul.f32 %v5582_v10, %v856_v40 }
 0x221   :  { %1785 = vrot.lane.b32.xlu1 %v5357_v59, %s4462_s9  ;;  %v791_v15 = vsel %vm244_vm4, %v8743_v23, %v8742_v27  ;;  %v5625_v60 = vmul.f32 %v5591_v52, %v856_v40  ;;  %v5628_v43 = vmul.f32 %v5596_v24, %v856_v40  ;;  %v806_v2 = vmul.f32 %v4240_v48, %v789_v47  ;;  %v4428_v27 = vld [vmem:[#allocation2 + $0x48] sm:$0xff]  ;;  %v8746_v23 = vld [vmem:[#allocation47_spill] sm:$0xff] }
 0x222   :  { %v5606_v16 = vpop.permute.xlu0 %1378  ;;  %v5613_v35 = vpop.permute.xlu2 %1456  ;;  %v799_v53 = vadd.f32 %v795_v44, %v730_v51  ;;  %v809_v37 = vadd.f32 %v805_v8, %v740_v9  ;;  %v819_v1 = vadd.f32 %v815_v50, %v750_v17  ;;  %v790_v19 = vsel %vm244_vm4, %v8745_v55, %v8744_v3  ;;  %v4430_v55 = vld [vmem:[#allocation2 + $0x50] sm:$0xff] }
 0x223   :  { %8739 = vst [vmem:[#allocation25_spill] sm:$0xff] %v5606_v16  ;;  %v5611_v61 = vpop.permute.xlu1 %1374  ;;  %v829_v21 = vadd.f32 %v825_v20, %v760_v5  ;;  %v798_v26 = vmul.f32 %v4239_v6, %v791_v15  ;;  %v816_v46 = vmul.f32 %v4241_v11, %v789_v47  ;;  %v854_v16 = vsel %vm244_vm4, %v4428_v27, %v8746_v23 }
 0x224   :  { %8740 = vst [vmem:[#allocation28_spill] sm:$0xff] %v5611_v61  ;;  %v808_v54 = vmul.f32 %v4240_v48, %v791_v15  ;;  %v828_v61 = vmul.f32 %v4242_v30, %v791_v15  ;;  %v5635_v40 = vadd.f32 %v796_v25, %v731_v42  ;;  %v5639_v51 = vadd.f32 %v806_v2, %v741_v39 }
 0x225   :  { %8741 = vst [vmem:[#allocation21_spill] sm:$0xff] %v5613_v35  ;;  %v818_v35 = vmul.f32 %v4241_v11, %v791_v15  ;;  %v826_v9 = vmul.f32 %v4242_v30, %v789_v47  ;;  %v797_v17 = vmul.f32 %v4239_v6, %v790_v19  ;;  %v807_v5 = vmul.f32 %v4240_v48, %v790_v19  ;;  %v8750_v15 = vld [vmem:[#allocation50_spill] sm:$0xff] }
 0x226   :  { %v817_v44 = vmul.f32 %v4241_v11, %v790_v19  ;;  %v827_v8 = vmul.f32 %v4242_v30, %v790_v19  ;;  %v861_v50 = vmul.f32 %v5577_v18, %v854_v16  ;;  %v820_v20 = vadd.f32 %v816_v46, %v751_v28  ;;  %v4429_v30 = vld [vmem:[#allocation2 + $0x60] sm:$0xff] }
 0x227   :  { %v881_v39 = vmul.f32 %v5591_v52, %v854_v16  ;;  %v891_v6 = vmul.f32 %v5596_v24, %v854_v16  ;;  %v812_v48 = vadd.f32 %v808_v54, %v5572_v57  ;;  %v822_v11 = vadd.f32 %v818_v35, %v753_v58  ;;  %v8751_v19 = vld [vmem:[#allocation52_spill] sm:$0xff] }
 0x228   :  { %1799 = vrot.lane.b32.xlu0 %v5359_v7, %s4463_s10  ;;  %1797 = vrot.lane.b32.xlu2 %v5357_v59, %s4463_s10  ;;  %v871_v7 = vmul.f32 %v5582_v10, %v854_v16  ;;  %v802_v59 = vadd.f32 %v798_v26, %v5570_v62  ;;  %v857_v25 = vsel %vm244_vm4, %v4429_v30, %v8750_v15  ;;  %v8757_v30 = vld [vmem:[#allocation46_spill] sm:$0xff] }
 0x229   :  { %1795 = vrot.lane.b32.xlu1 %v5284_v63, %s4463_s10  ;;  %v832_v28 = vadd.f32 %v828_v61, %v763_v36  ;;  %v830_v2 = vadd.f32 %v826_v9, %v761_v45  ;;  %v801_v3 = vadd.f32 %v797_v17, %v5547_v31  ;;  %v855_v16 = vsel %vm244_vm4, %v4430_v55, %v8751_v19  ;;  %v5669_v31 = vld [vmem:[%s8584_s0 + $0x28] ss:$0 sm:$0xff]  ;;  %v5674_v45 = vld [vmem:[%s8584_s0 + $0x29] ss:$0 sm:$0xff] }
 0x22a   :  { %v5646_v42 = vpop.permute.xlu0 %1388  ;;  %v5653_v63 = vpop.permute.xlu2 %1511  ;;  %v811_v46 = vadd.f32 %v807_v5, %v5549_v0  ;;  %v821_v27 = vadd.f32 %v817_v44, %v5551_v12  ;;  %v831_v62 = vadd.f32 %v827_v8, %v5553_v56  ;;  %v865_v54 = vadd.f32 %v861_v50, %v799_v53  ;;  %v5676_v0 = vld [vmem:[#allocation2 + $0xa2] sm:$0xff]  ;;  %v8753_v53 = vld [vmem:[#allocation55_spill] sm:$0xff] }
 0x22b   :  { %8747 = vst [vmem:[#allocation27_spill] sm:$0xff] %v5646_v42  ;;  %v5651_v47 = vpop.permute.xlu1 %1380  ;;  %v875_v57 = vadd.f32 %v871_v7, %v809_v37  ;;  %v885_v58 = vadd.f32 %v881_v39, %v819_v1  ;;  %v895_v35 = vadd.f32 %v891_v6, %v829_v21  ;;  %v864_v26 = vmul.f32 %v5577_v18, %v857_v25  ;;  %v8752_v36 = vld [vmem:[#allocation49_spill] sm:$0xff]  ;;  %v5684_v1 = vld [vmem:[#allocation2 + $0x92] sm:$0xff]  ;;  %v5686_v21 = vld [vmem:[#allocation2 + $0x9a] sm:$0xff] }
 0x22c   :  { %8748 = vst [vmem:[#allocation14_spill] sm:$0xff] %v5651_v47  ;;  %v862_v12 = vmul.f32 %v5577_v18, %v855_v16  ;;  %v874_v56 = vmul.f32 %v5582_v10, %v857_v25  ;;  %v884_v61 = vmul.f32 %v5591_v52, %v857_v25  ;;  %v923_v37 = vsel %vm244_vm4, %v8753_v53, %v8752_v36  ;;  %v4249_v18 = vld [vmem:[%s8584_s0 + $0x2a] ss:$0 sm:$0xff]  ;;  %v8756_v6 = vld [vmem:[#allocation56_spill] sm:$0xff] }
 0x22d   :  { %8749 = vst [vmem:[#allocation30_spill] sm:$0xff] %v5653_v63  ;;  %v872_v23 = vmul.f32 %v5582_v10, %v855_v16  ;;  %v882_v9 = vmul.f32 %v5591_v52, %v855_v16  ;;  %v5696_v17 = vadd.f32 %v5616_v41, %v801_v3  ;;  %v892_v5 = vmul.f32 %v5596_v24, %v855_v16  ;;  %v4250_v10 = vld [vmem:[%s8584_s0 + $0x2b] ss:$0 sm:$0xff] }
 0x22e   :  { %8754 = vst [vmem:[#allocation5_spill] sm:$0xff] %v5684_v1  ;;  %v5707_v52 = vadd.f32 %v5622_v32, %v811_v46  ;;  %v5710_v44 = vadd.f32 %v5625_v60, %v821_v27  ;;  %v5713_v41 = vadd.f32 %v5628_v43, %v831_v62  ;;  %v894_v50 = vmul.f32 %v5596_v24, %v857_v25  ;;  %v8760_v46 = vld [vmem:[#allocation51_spill] sm:$0xff]  ;;  %v8761_v27 = vld [vmem:[#allocation58_spill] sm:$0xff] }
 0x22f   :  { %v930_v7 = vmul.f32 %v5669_v31, %v923_v37  ;;  %v940_v39 = vmul.f32 %v5674_v45, %v923_v37  ;;  %v924_v15 = vsel %vm244_vm4, %v8757_v30, %v8756_v6  ;;  %v866_v60 = vadd.f32 %v862_v12, %v5635_v40  ;;  %v5743_v12 = vld [vmem:[#allocation2 + $0xaa] sm:$0xff] }
 0x230   :  { %1862 = vrot.lane.b32.xlu0 %v5676_v0, %s4459_s2  ;;  %1860 = vrot.lane.b32.xlu2 %v5686_v21, %s4459_s2  ;;  %v868_v43 = vadd.f32 %v864_v26, %v802_v59  ;;  %v878_v55 = vadd.f32 %v874_v56, %v812_v48  ;;  %v888_v19 = vadd.f32 %v884_v61, %v822_v11  ;;  %v8762_v11 = vld [vmem:[#allocation61_spill] sm:$0xff]  ;;  %v5752_v56 = vld [vmem:[%s8584_s0 + $0x30] ss:$0 sm:$0xff] }
 0x231   :  { %1858 = vrot.lane.b32.xlu1 %v5684_v1, %s4459_s2  ;;  %v876_v16 = vadd.f32 %v872_v23, %v5639_v51  ;;  %v886_v24 = vadd.f32 %v882_v9, %v820_v20  ;;  %v950_v25 = vmul.f32 %v4249_v18, %v923_v37  ;;  %v926_v62 = vsel %vm244_vm4, %v8761_v27, %v8760_v46  ;;  %v8763_v26 = vld [vmem:[#allocation53_spill] sm:$0xff] }
 0x232   :  { %v5715_v8 = vpop.permute.xlu0 %1452  ;;  %v5725_v3 = vpop.permute.xlu2 %1521  ;;  %v896_v36 = vadd.f32 %v892_v5, %v830_v2  ;;  %v960_v53 = vmul.f32 %v4250_v10, %v923_v37  ;;  %v931_v6 = vmul.f32 %v5669_v31, %v924_v15  ;;  %v941_v30 = vmul.f32 %v5674_v45, %v924_v15  ;;  %v4431_v9 = vld [vmem:[#allocation2 + $0x49] sm:$0xff] }
 0x233   :  { %8755 = vst [vmem:[#allocation31_spill] sm:$0xff] %v5715_v8  ;;  %v5723_v32 = vpop.permute.xlu1 %1390  ;;  %v898_v63 = vadd.f32 %v894_v50, %v832_v28  ;;  %v5736_v40 = vadd.f32 %v940_v39, %v875_v57  ;;  %v951_v59 = vmul.f32 %v4249_v18, %v924_v15  ;;  %v933_v51 = vmul.f32 %v5669_v31, %v926_v62  ;;  %v5765_v50 = vld [vmem:[%s8584_s0 + $0x31] ss:$0 sm:$0xff] }
 0x234   :  { %8758 = vst [vmem:[#allocation7_spill] sm:$0xff] %v5723_v32  ;;  %v943_v20 = vmul.f32 %v5674_v45, %v926_v62  ;;  %v953_v48 = vmul.f32 %v4249_v18, %v926_v62  ;;  %v925_v2 = vsel %vm244_vm4, %v8763_v26, %v8762_v11  ;;  %v5747_v28 = vadd.f32 %v950_v25, %v885_v58  ;;  %v8764_v58 = vld [vmem:[#allocation60_spill] sm:$0xff]  ;;  %v8770_v11 = vld [vmem:[#allocation63_spill] sm:$0xff] }
 0x235   :  { %8759 = vst [vmem:[#allocation34_spill] sm:$0xff] %v5725_v3  ;;  %v5734_v3 = vadd.f32 %v930_v7, %v865_v54  ;;  %v963_v54 = vmul.f32 %v4250_v10, %v926_v62  ;;  %v961_v57 = vmul.f32 %v4250_v10, %v924_v15  ;;  %v5758_v61 = vadd.f32 %v960_v53, %v895_v35  ;;  %v5770_v7 = vld [vmem:[%s8584_s0 + $0x32] ss:$0 sm:$0xff]  ;;  %v5775_v35 = vld [vmem:[%s8584_s0 + $0x33] ss:$0 sm:$0xff] }
 0x236   :  { %v935_v37 = vadd.f32 %v931_v6, %v866_v60  ;;  %v945_v23 = vadd.f32 %v941_v30, %v876_v16  ;;  %v1057_v5 = vsel %vm244_vm4, %v4431_v9, %v8764_v58  ;;  %v955_v15 = vadd.f32 %v951_v59, %v886_v24  ;;  %v4255_v24 = vld [vmem:[%s8584_s0 + $0x2c] ss:$0 sm:$0xff]  ;;  %v8772_v58 = vld [vmem:[#allocation54_spill] sm:$0xff] }
 0x237   :  { %v932_v60 = vmul.f32 %v5669_v31, %v925_v2  ;;  %v942_v16 = vmul.f32 %v5674_v45, %v925_v2  ;;  %v952_v25 = vmul.f32 %v4249_v18, %v925_v2  ;;  %v5785_v62 = vadd.f32 %v933_v51, %v868_v43  ;;  %v4256_v31 = vld [vmem:[%s8584_s0 + $0x2d] ss:$0 sm:$0xff]  ;;  %v4258_v51 = vld [vmem:[%s8584_s0 + $0x2f] ss:$0 sm:$0xff] }
 0x238   :  { %1917 = vrot.lane.b32.xlu0 %v5686_v21, %s4460_s16  ;;  %1915 = vrot.lane.b32.xlu2 %v5684_v1, %s4460_s16  ;;  %v5787_v53 = vadd.f32 %v943_v20, %v878_v55  ;;  %v5789_v6 = vadd.f32 %v953_v48, %v888_v19  ;;  %v962_v30 = vmul.f32 %v4250_v10, %v925_v2  ;;  %v8768_v43 = vld [vmem:[#allocation57_spill] sm:$0xff]  ;;  %v8769_v55 = vld [vmem:[#allocation64_spill] sm:$0xff] }
 0x239   :  { %1864 = vrot.lane.b32.xlu1 %v5743_v12, %s4459_s2  ;;  %v5797_v45 = vadd.f32 %v963_v54, %v898_v63  ;;  %v965_v18 = vadd.f32 %v961_v57, %v896_v36  ;;  %v5800_v59 = vmul.f32 %v5752_v56, %v1057_v5  ;;  %v993_v19 = vsel %vm244_vm4, %v8769_v55, %v8768_v43  ;;  %v4257_v10 = vld [vmem:[%s8584_s0 + $0x2e] ss:$0 sm:$0xff]  ;;  %v4432_v48 = vld [vmem:[#allocation2 + $0x61] sm:$0xff] }
 0x23a   :  { %v5777_v39 = vpop.permute.xlu0 %1458  ;;  %v5783_v27 = vpop.permute.xlu2 %1527  ;;  %v5812_v20 = vmul.f32 %v5765_v50, %v1057_v5  ;;  %v5815_v63 = vmul.f32 %v5770_v7, %v1057_v5  ;;  %v5818_v36 = vmul.f32 %v5775_v35, %v1057_v5  ;;  %v1060_v26 = vsel %vm244_vm4, %v4432_v48, %v8770_v11  ;;  %v8771_v9 = vld [vmem:[#allocation65_spill] sm:$0xff]  ;;  %v8773_v5 = vld [vmem:[#allocation67_spill] sm:$0xff]  ;;  %v8777_v11 = vld [vmem:[#allocation70_spill] sm:$0xff] }
 0x23b   :  { %8765 = vst [vmem:[#allocation8_spill] sm:$0xff] %v5777_v39  ;;  %v5781_v46 = vpop.permute.xlu1 %1454  ;;  %v936_v2 = vadd.f32 %v932_v60, %v5696_v17  ;;  %v946_v54 = vadd.f32 %v942_v16, %v5707_v52  ;;  %v956_v57 = vadd.f32 %v952_v25, %v5710_v44  ;;  %v994_v43 = vsel %vm244_vm4, %v8772_v58, %v8771_v9  ;;  %v8774_v39 = vld [vmem:[#allocation59_spill] sm:$0xff]  ;;  %v8778_v9 = vld [vmem:[#allocation62_spill] sm:$0xff] }
 0x23c   :  { %8766 = vst [vmem:[#allocation35_spill] sm:$0xff] %v5781_v46  ;;  %v966_v55 = vadd.f32 %v962_v30, %v5713_v41  ;;  %v1010_v46 = vmul.f32 %v4256_v31, %v993_v19  ;;  %v992_v8 = vsel %vm244_vm4, %v8774_v39, %v8773_v5  ;;  %v5835_v17 = vmul.f32 %v5752_v56, %v1060_v26 }
 0x23d   :  { %8767 = vst [vmem:[#allocation23_spill] sm:$0xff] %v5783_v27  ;;  %v1000_v27 = vmul.f32 %v4255_v24, %v993_v19  ;;  %v1020_v52 = vmul.f32 %v4257_v10, %v993_v19  ;;  %v1030_v44 = vmul.f32 %v4258_v51, %v993_v19  ;;  %v5842_v41 = vmul.f32 %v5765_v50, %v1060_v26 }
 0x23e   :  { %v5845_v60 = vmul.f32 %v5770_v7, %v1060_v26  ;;  %v1001_v39 = vmul.f32 %v4255_v24, %v994_v43  ;;  %v1011_v16 = vmul.f32 %v4256_v31, %v994_v43  ;;  %v5850_v30 = vmul.f32 %v5775_v35, %v1060_v26  ;;  %v8780_v26 = vld [vmem:[#allocation68_spill] sm:$0xff] }
 0x23f   :  { %v999_v19 = vmul.f32 %v4255_v24, %v992_v8  ;;  %v1009_v48 = vmul.f32 %v4256_v31, %v992_v8  ;;  %v995_v58 = vsel %vm244_vm4, %v8778_v9, %v8777_v11  ;;  %v1004_v47 = vadd.f32 %v1000_v27, %v935_v37 }
 0x240   :  { %1927 = vrot.lane.b32.xlu0 %v5684_v1, %s4461_s8  ;;  %1921 = vrot.lane.b32.xlu2 %v5743_v12, %s4460_s16  ;;  %8776 = vst [vmem:[#allocation37_spill] sm:$0xff] %v5850_v30  ;;  %v1014_v42 = vadd.f32 %v1010_v46, %v945_v23  ;;  %v1019_v34 = vmul.f32 %v4257_v10, %v992_v8 }
 0x241   :  { %1919 = vrot.lane.b32.xlu1 %v5676_v0, %s4460_s16  ;;  %v1029_v29 = vmul.f32 %v4258_v51, %v992_v8  ;;  %v1024_v13 = vadd.f32 %v1020_v52, %v955_v15  ;;  %v1034_v49 = vadd.f32 %v1030_v44, %v965_v18  ;;  %v1058_v4 = vsel %vm244_vm4, %v4433_v14, %v8780_v26  ;;  %v4262_v44 = vld [vmem:[%s8584_s0 + $0x37] ss:$0 sm:$0xff] }
 0x242   :  { %v5847_v25 = vpop.permute.xlu0 %1513  ;;  %v5857_v32 = vpop.permute.xlu2 %1582  ;;  %v1005_v38 = vadd.f32 %v1001_v39, %v936_v2  ;;  %v1015_v33 = vadd.f32 %v1011_v16, %v946_v54  ;;  %v1002_v1 = vmul.f32 %v4255_v24, %v995_v58  ;;  %v1012_v30 = vmul.f32 %v4256_v31, %v995_v58 }
 0x243   :  { %8775 = vst [vmem:[#allocation29_spill] sm:$0xff] %v5847_v25  ;;  %v5855_v5 = vpop.permute.xlu1 %1509  ;;  %v1021_v25 = vmul.f32 %v4257_v10, %v994_v43  ;;  %v1003_v11 = vadd.f32 %v999_v19, %v5734_v3  ;;  %v1013_v9 = vadd.f32 %v1009_v48, %v5736_v40  ;;  %v1022_v37 = vmul.f32 %v4257_v10, %v995_v58  ;;  %v4434_v40 = vld [vmem:[#allocation2 + $0x59] sm:$0xff] }
 0x244   :  { %8779 = vst [vmem:[#allocation38_spill] sm:$0xff] %v5857_v32  ;;  %v1031_v32 = vmul.f32 %v4258_v51, %v994_v43  ;;  %v1023_v23 = vadd.f32 %v1019_v34, %v5747_v28  ;;  %v1033_v8 = vadd.f32 %v1029_v29, %v5758_v61  ;;  %v1065_v15 = vmul.f32 %v5752_v56, %v1058_v4  ;;  %v8781_v28 = vld [vmem:[#allocation73_spill] sm:$0xff] }
 0x245   :  { %v1075_v46 = vmul.f32 %v5765_v50, %v1058_v4  ;;  %v1025_v14 = vadd.f32 %v1021_v25, %v956_v57  ;;  %v1032_v27 = vmul.f32 %v4258_v51, %v995_v58  ;;  %v1085_v24 = vmul.f32 %v5770_v7, %v1058_v4  ;;  %v8782_v43 = vld [vmem:[#allocation69_spill] sm:$0xff]  ;;  %v8785_v25 = vld [vmem:[#allocation66_spill] sm:$0xff] }
 0x246   :  { %v1006_v34 = vadd.f32 %v1002_v1, %v5785_v62  ;;  %v1016_v29 = vadd.f32 %v1012_v30, %v5787_v53  ;;  %v1095_v3 = vmul.f32 %v5775_v35, %v1058_v4  ;;  %v1059_v61 = vsel %vm244_vm4, %v4434_v40, %v8781_v28  ;;  %v5891_v4 = vld [vmem:[%s8584_s0 + $0x34] ss:$0 sm:$0xff] }
 0x247   :  { %v1035_v18 = vadd.f32 %v1031_v32, %v966_v55  ;;  %v1026_v10 = vadd.f32 %v1022_v37, %v5789_v6  ;;  %v1068_v51 = vadd.f32 %v5800_v59, %v1003_v11  ;;  %v1078_v2 = vadd.f32 %v5812_v20, %v1013_v9  ;;  %v5896_v32 = vld [vmem:[%s8584_s0 + $0x35] ss:$0 sm:$0xff]  ;;  %v5901_v6 = vld [vmem:[%s8584_s0 + $0x36] ss:$0 sm:$0xff]  ;;  %v8783_v55 = vld [vmem:[#allocation76_spill] sm:$0xff] }
 0x248   :  { %1933 = vrot.lane.b32.xlu0 %v5743_v12, %s4461_s8  ;;  %1931 = vrot.lane.b32.xlu2 %v5676_v0, %s4461_s8  ;;  %v1069_v62 = vadd.f32 %v1065_v15, %v1004_v47  ;;  %v1079_v53 = vadd.f32 %v1075_v46, %v1014_v42  ;;  %v1088_v59 = vadd.f32 %v5815_v63, %v1023_v23  ;;  %v8787_v58 = vld [vmem:[#allocation37_spill] sm:$0xff] }
 0x249   :  { %1929 = vrot.lane.b32.xlu1 %v5686_v21, %s4461_s8  ;;  %v5905_v47 = vadd.f32 %v5818_v36, %v1033_v8  ;;  %v1036_v42 = vadd.f32 %v1032_v27, %v5797_v45  ;;  %v1089_v20 = vadd.f32 %v1085_v24, %v1024_v13  ;;  %v1066_v57 = vmul.f32 %v5752_v56, %v1059_v61  ;;  %v8784_v45 = vld [vmem:[#allocation77_spill] sm:$0xff] }
 0x24a   :  { %v5879_v31 = vpop.permute.xlu0 %1523  ;;  %v5886_v1 = vpop.permute.xlu2 %1592  ;;  %v1127_v52 = vsel %vm244_vm4, %v8783_v55, %v8782_v43  ;;  %v1099_v39 = vadd.f32 %v1095_v3, %v1034_v49  ;;  %v1076_v16 = vmul.f32 %v5765_v50, %v1059_v61  ;;  %v5917_v63 = vadd.f32 %v5835_v17, %v1006_v34  ;;  %v8792_v43 = vld [vmem:[#allocation80_spill] sm:$0xff] }
 0x24b   :  { %v5884_v54 = vpop.permute.xlu1 %1515  ;;  %v5920_v36 = vadd.f32 %v5842_v41, %v1016_v29  ;;  %v1086_v13 = vmul.f32 %v5770_v7, %v1059_v61  ;;  %v1096_v56 = vmul.f32 %v5775_v35, %v1059_v61  ;;  %v1128_v30 = vsel %vm244_vm4, %v8785_v25, %v8784_v45  ;;  %v8786_v41 = vld [vmem:[#allocation71_spill] sm:$0xff] }
 0x24c   :  { %v5928_v19 = vadd.f32 %v5845_v60, %v1026_v10  ;;  %v1134_v49 = vmul.f32 %v5891_v4, %v1127_v52  ;;  %v1144_v50 = vmul.f32 %v5896_v32, %v1127_v52  ;;  %v1154_v17 = vmul.f32 %v5901_v6, %v1127_v52  ;;  %v8788_v60 = vld [vmem:[#allocation5_spill] sm:$0xff]  ;;  %v5968_v61 = vld [vmem:[%s8584_s0 + $0x3c] ss:$0 sm:$0xff]  ;;  %v5997_v25 = vld [vmem:[%s8584_s0 + $0x3f] ss:$0 sm:$0xff] }
 0x24d   :  { %v1126_v48 = vsel %vm244_vm4, %v8786_v41, %v5141_v22  ;;  %v1070_v7 = vadd.f32 %v1066_v57, %v1005_v38  ;;  %v1164_v35 = vmul.f32 %v4262_v44, %v1127_v52  ;;  %v5939_v26 = vadd.f32 %v8787_v58, %v1036_v42  ;;  %v8790_v10 = vld [vmem:[#allocation81_spill] sm:$0xff]  ;;  %v8791_v42 = vld [vmem:[#allocation74_spill] sm:$0xff]  ;;  %v5984_v52 = vld [vmem:[%s8584_s0 + $0x3d] ss:$0 sm:$0xff] }
 0x24e   :  { %v1080_v11 = vadd.f32 %v1076_v16, %v1015_v33  ;;  %v1135_v9 = vmul.f32 %v5891_v4, %v1128_v30  ;;  %v1145_v37 = vmul.f32 %v5896_v32, %v1128_v30  ;;  %v1155_v22 = vmul.f32 %v5901_v6, %v1128_v30  ;;  %v4267_v16 = vld [vmem:[%s8584_s0 + $0x38] ss:$0 sm:$0xff] }
 0x24f   :  { %v1090_v38 = vadd.f32 %v1086_v13, %v1025_v14  ;;  %v1133_v8 = vmul.f32 %v5891_v4, %v1126_v48  ;;  %v1143_v15 = vmul.f32 %v5896_v32, %v1126_v48  ;;  %v1153_v46 = vmul.f32 %v5901_v6, %v1126_v48 }
 0x250   :  { %1988 = vrot.lane.b32.xlu0 %v5676_v0, %s4462_s9  ;;  %1986 = vrot.lane.b32.xlu2 %v5686_v21, %s4462_s9  ;;  %v1100_v33 = vadd.f32 %v1096_v56, %v1035_v18  ;;  %v5957_v34 = vadd.f32 %v1134_v49, %v1069_v62  ;;  %v5959_v29 = vadd.f32 %v1144_v50, %v1079_v53  ;;  %v4269_v49 = vld [vmem:[%s8584_s0 + $0x3a] ss:$0 sm:$0xff]  ;;  %v8793_v50 = vld [vmem:[#allocation82_spill] sm:$0xff] }
 0x251   :  { %1984 = vrot.lane.b32.xlu1 %v8788_v60, %s4462_s9  ;;  %v5961_v3 = vadd.f32 %v1154_v17, %v1089_v20  ;;  %v5963_v40 = vadd.f32 %v1164_v35, %v1099_v39  ;;  %v1163_v14 = vmul.f32 %v4262_v44, %v1126_v48  ;;  %v1165_v28 = vmul.f32 %v4262_v44, %v1128_v30  ;;  %v4435_v20 = vld [vmem:[#allocation2 + $0x52] sm:$0xff]  ;;  %v5989_v39 = vld [vmem:[%s8584_s0 + $0x3e] ss:$0 sm:$0xff]  ;;  %v8794_v17 = vld [vmem:[#allocation72_spill] sm:$0xff] }
 0x252   :  { %v5948_v23 = vpop.permute.xlu0 %1578  ;;  %v5955_v24 = vpop.permute.xlu2 %1655  ;;  %v1129_v57 = vsel %vm244_vm4, %v8791_v42, %v8790_v10  ;;  %v5973_v18 = vadd.f32 %v1135_v9, %v1070_v7  ;;  %v5975_v62 = vadd.f32 %v1145_v37, %v1080_v11  ;;  %v5977_v53 = vadd.f32 %v1155_v22, %v1090_v38  ;;  %v4268_v30 = vld [vmem:[%s8584_s0 + $0x39] ss:$0 sm:$0xff]  ;;  %v8797_v11 = vld [vmem:[#allocation4_spill] sm:$0xff] }
 0x253   :  { %8789 = vst [vmem:[#allocation26_spill] sm:$0xff] %v5948_v23  ;;  %v5953_v27 = vpop.permute.xlu1 %1525  ;;  %v1261_v55 = vsel %vm244_vm4, %v4435_v20, %v8792_v43  ;;  %v1137_v13 = vadd.f32 %v1133_v8, %v1068_v51  ;;  %v1147_v56 = vadd.f32 %v1143_v15, %v1078_v2  ;;  %v1157_v45 = vadd.f32 %v1153_v46, %v1088_v59  ;;  %v8798_v9 = vld [vmem:[#allocation79_spill] sm:$0xff] }
 0x254   :  { %v1195_v41 = vsel %vm244_vm4, %v8794_v17, %v8793_v50  ;;  %v1136_v51 = vmul.f32 %v5891_v4, %v1129_v57  ;;  %v1146_v2 = vmul.f32 %v5896_v32, %v1129_v57  ;;  %v1156_v59 = vmul.f32 %v5901_v6, %v1129_v57  ;;  %v8795_v32 = vld [vmem:[#allocation78_spill] sm:$0xff]  ;;  %v8796_v6 = vld [vmem:[#allocation83_spill] sm:$0xff]  ;;  %v8802_v50 = vld [vmem:[#allocation13_spill] sm:$0xff] }
 0x255   :  { %v1166_v48 = vmul.f32 %v4262_v44, %v1129_v57  ;;  %v1167_v7 = vadd.f32 %v1163_v14, %v5905_v47  ;;  %v1169_v35 = vadd.f32 %v1165_v28, %v1100_v33  ;;  %v6015_v58 = vmul.f32 %v5968_v61, %v1261_v55 }
 0x256   :  { %v1278_v4 = vmul.f32 %v5984_v52, %v1261_v55  ;;  %v1197_v44 = vsel %vm244_vm4, %v8796_v6, %v8795_v32  ;;  %v1202_v47 = vmul.f32 %v4267_v16, %v1195_v41  ;;  %v1196_v37 = vsel %vm244_vm4, %v8798_v9, %v8797_v11 }
 0x257   :  { %v6034_v38 = vmul.f32 %v5989_v39, %v1261_v55  ;;  %v1212_v8 = vmul.f32 %v4268_v30, %v1195_v41  ;;  %v1222_v15 = vmul.f32 %v4269_v49, %v1195_v41  ;;  %v1140_v14 = vadd.f32 %v1136_v51, %v5917_v63 }
 0x258   :  { %1998 = vrot.lane.b32.xlu0 %v5686_v21, %s4463_s10  ;;  %1996 = vrot.lane.b32.xlu2 %v8788_v60, %s4463_s10  ;;  %v4270_v21 = vld [vmem:[%s8584_s0 + $0x3b] ss:$0 sm:$0xff]  ;;  %v6037_v60 = vmul.f32 %v5997_v25, %v1261_v55  ;;  %v1150_v28 = vadd.f32 %v1146_v2, %v5920_v36  ;;  %v1160_v10 = vadd.f32 %v1156_v59, %v5928_v19  ;;  %v6054_v19 = vld [vmem:[#allocation2 + $0x20] sm:$0xff] }
 0x259   :  { %1990 = vrot.lane.b32.xlu1 %v5743_v12, %s4462_s9  ;;  %v1170_v42 = vadd.f32 %v1166_v48, %v5939_v26  ;;  %v1204_v57 = vmul.f32 %v4267_v16, %v1197_v44  ;;  %v1203_v20 = vmul.f32 %v4267_v16, %v1196_v37  ;;  %v1213_v43 = vmul.f32 %v4268_v30, %v1196_v37  ;;  %v8803_v55 = vld [vmem:[#allocation75_spill] sm:$0xff] }
 0x25a   :  { %v6031_v22 = vpop.permute.xlu0 %1584  ;;  %v6041_v33 = vpop.permute.xlu2 %1661  ;;  %v1198_v17 = vsel %vm244_vm4, %v8803_v55, %v8802_v50  ;;  %v1214_v32 = vmul.f32 %v4268_v30, %v1197_v44  ;;  %v1224_v6 = vmul.f32 %v4269_v49, %v1197_v44  ;;  %v1234_v11 = vmul.f32 %v4270_v21, %v1197_v44 }
 0x25b   :  { %8799 = vst [vmem:[#allocation40_spill] sm:$0xff] %v6031_v22  ;;  %v6039_v46 = vpop.permute.xlu1 %1580  ;;  %v1206_v9 = vadd.f32 %v1202_v47, %v1137_v13  ;;  %v6050_v22 = vadd.f32 %v1212_v8, %v1147_v56  ;;  %v6052_v63 = vadd.f32 %v1222_v15, %v1157_v45  ;;  %v1223_v36 = vmul.f32 %v4269_v49, %v1196_v37  ;;  %v4437_v47 = vld [vmem:[#allocation2 + $0x5a] sm:$0xff] }
 0x25c   :  { %8800 = vst [vmem:[#allocation33_spill] sm:$0xff] %v6039_v46  ;;  %v1233_v51 = vmul.f32 %v4270_v21, %v1196_v37  ;;  %v1232_v26 = vmul.f32 %v4270_v21, %v1195_v41  ;;  %v1205_v2 = vmul.f32 %v4267_v16, %v1198_v17  ;;  %v1215_v59 = vmul.f32 %v4268_v30, %v1198_v17  ;;  %v4436_v41 = vld [vmem:[#allocation2 + $0x4a] sm:$0xff]  ;;  %v8806_v37 = vld [vmem:[#allocation16_spill] sm:$0xff] }
 0x25d   :  { %8801 = vst [vmem:[#allocation36_spill] sm:$0xff] %v6041_v33  ;;  %v1225_v48 = vmul.f32 %v4269_v49, %v1198_v17  ;;  %v1207_v50 = vadd.f32 %v1203_v20, %v5957_v34  ;;  %v1217_v44 = vadd.f32 %v1213_v43, %v5959_v29  ;;  %v1235_v13 = vmul.f32 %v4270_v21, %v1198_v17  ;;  %v8805_v21 = vld [vmem:[#allocation18_spill] sm:$0xff] }
 0x25e   :  { %v1208_v56 = vadd.f32 %v1204_v57, %v5973_v18  ;;  %v1218_v16 = vadd.f32 %v1214_v32, %v5975_v62  ;;  %v1228_v45 = vadd.f32 %v1224_v6, %v5977_v53  ;;  %v1238_v30 = vadd.f32 %v1234_v11, %v1169_v35  ;;  %v8809_v20 = vld [vmem:[#allocation22_spill] sm:$0xff]  ;;  %v6104_v11 = vld [vmem:[#allocation2 + $0x38] sm:$0xff] }
 0x25f   :  { %v1227_v34 = vadd.f32 %v1223_v36, %v5961_v3  ;;  %v1237_v29 = vadd.f32 %v1233_v51, %v5963_v40  ;;  %v1236_v53 = vadd.f32 %v1232_v26, %v1167_v7  ;;  %v1209_v35 = vadd.f32 %v1205_v2, %v1140_v14  ;;  %v4438_v3 = vld [vmem:[#allocation2 + $0x62] sm:$0xff]  ;;  %v8810_v2 = vld [vmem:[#allocation15_spill] sm:$0xff] }
 0x260   :  { %2120 = vrot.lane.b32.xlu0 %v6054_v19, %s4459_s2  ;;  %2002 = vrot.lane.b32.xlu2 %v5743_v12, %s4463_s10  ;;  %v1262_v12 = vsel %vm244_vm4, %v4437_v47, %v8806_v37  ;;  %v1219_v8 = vadd.f32 %v1215_v59, %v1150_v28  ;;  %v1229_v15 = vadd.f32 %v1225_v48, %v1160_v10  ;;  %v4271_v10 = vld [vmem:[%s8584_s0 + $0x40] ss:$0 sm:$0xff]  ;;  %v8811_v59 = vld [vmem:[#allocation3_spill] sm:$0xff]  ;;  %v4274_v37 = vld [vmem:[%s8584_s0 + $0x43] ss:$0 sm:$0xff] }
 0x261   :  { %2000 = vrot.lane.b32.xlu1 %v5676_v0, %s4463_s10  ;;  %v1260_v0 = vsel %vm244_vm4, %v4436_v41, %v8805_v21  ;;  %v1239_v57 = vadd.f32 %v1235_v13, %v1170_v42  ;;  %v1263_v40 = vsel %vm244_vm4, %v4438_v3, %v8809_v20  ;;  %v6082_v43 = vadd.f32 %v6015_v58, %v1207_v50  ;;  %v4272_v58 = vld [vmem:[%s8584_s0 + $0x41] ss:$0 sm:$0xff]  ;;  %v6112_v50 = vld [vmem:[#allocation2 + $0x28] sm:$0xff]  ;;  %v4273_v21 = vld [vmem:[%s8584_s0 + $0x42] ss:$0 sm:$0xff] }
 0x262   :  { %v6067_v49 = vpop.permute.xlu0 %1594  ;;  %v6077_v62 = vpop.permute.xlu2 %1716  ;;  %v6084_v55 = vadd.f32 %v1278_v4, %v1217_v44  ;;  %v1267_v17 = vmul.f32 %v5968_v61, %v1260_v0  ;;  %v1269_v32 = vmul.f32 %v5968_v61, %v1262_v12  ;;  %v1279_v6 = vmul.f32 %v5984_v52, %v1262_v12  ;;  %v6114_v44 = vld [vmem:[#allocation2 + $0x30] sm:$0xff] }
 0x263   :  { %8804 = vst [vmem:[#allocation42_spill] sm:$0xff] %v6067_v49  ;;  %v6075_v18 = vpop.permute.xlu1 %1590  ;;  %v1289_v7 = vmul.f32 %v5989_v39, %v1262_v12  ;;  %v1277_v14 = vmul.f32 %v5984_v52, %v1260_v0  ;;  %v1287_v28 = vmul.f32 %v5989_v39, %v1260_v0  ;;  %v6099_v4 = vadd.f32 %v6034_v38, %v1227_v34 }
 0x264   :  { %8807 = vst [vmem:[#allocation43_spill] sm:$0xff] %v6075_v18  ;;  %v6102_v42 = vadd.f32 %v6037_v60, %v1237_v29  ;;  %v1297_v36 = vmul.f32 %v5997_v25, %v1260_v0  ;;  %v1299_v51 = vmul.f32 %v5997_v25, %v1262_v12  ;;  %v1270_v26 = vmul.f32 %v5968_v61, %v1263_v40 }
 0x265   :  { %8808 = vst [vmem:[#allocation44_spill] sm:$0xff] %v6077_v62  ;;  %v1329_v48 = vsel %vm244_vm4, %v8811_v59, %v8810_v2  ;;  %v1280_v38 = vmul.f32 %v5984_v52, %v1263_v40  ;;  %v1290_v60 = vmul.f32 %v5989_v39, %v1263_v40  ;;  %v1300_v13 = vmul.f32 %v5997_v25, %v1263_v40  ;;  %v8813_v39 = vld [vmem:[#allocation9_spill] sm:$0xff]  ;;  %v8814_v25 = vld [vmem:[#allocation6_spill] sm:$0xff]  ;;  %v8820_v62 = vld [vmem:[#allocation19_spill] sm:$0xff] }
 0x266   :  { %v1271_v61 = vadd.f32 %v1267_v17, %v1206_v9  ;;  %v1273_v34 = vadd.f32 %v1269_v32, %v1208_v56  ;;  %v1283_v29 = vadd.f32 %v1279_v6, %v1218_v16  ;;  %v1293_v41 = vadd.f32 %v1289_v7, %v1228_v45  ;;  %v8817_v6 = vld [vmem:[#allocation24_spill] sm:$0xff]  ;;  %v8818_v7 = vld [vmem:[#allocation10_spill] sm:$0xff] }
 0x267   :  { %v1281_v52 = vadd.f32 %v1277_v14, %v6050_v22  ;;  %v1331_v47 = vsel %vm244_vm4, %v8814_v25, %v8813_v39  ;;  %v1336_v9 = vmul.f32 %v4271_v10, %v1329_v48  ;;  %v1346_v56 = vmul.f32 %v4272_v58, %v1329_v48  ;;  %v8819_v25 = vld [vmem:[#allocation17_spill] sm:$0xff] }
 0x268   :  { %2126 = vrot.lane.b32.xlu0 %v6104_v11, %s4459_s2  ;;  %2124 = vrot.lane.b32.xlu2 %v6114_v44, %s4459_s2  ;;  %v1291_v12 = vadd.f32 %v1287_v28, %v6052_v63  ;;  %v1301_v3 = vadd.f32 %v1297_v36, %v1236_v53  ;;  %v1303_v20 = vadd.f32 %v1299_v51, %v1238_v30 }
 0x269   :  { %2122 = vrot.lane.b32.xlu1 %v6112_v50, %s4459_s2  ;;  %v1274_v40 = vadd.f32 %v1270_v26, %v1209_v35  ;;  %v1284_v22 = vadd.f32 %v1280_v38, %v1219_v8  ;;  %v1294_v17 = vadd.f32 %v1290_v60, %v1229_v15  ;;  %v1304_v32 = vadd.f32 %v1300_v13, %v1239_v57  ;;  %v4275_v38 = vld [vmem:[%s8584_s0 + $0x44] ss:$0 sm:$0xff] }
 0x26a   :  { %v6128_v0 = vpop.permute.xlu0 %1657  ;;  %v6139_v45 = vpop.permute.xlu2 %1726  ;;  %v1332_v14 = vsel %vm244_vm4, %v8818_v7, %v8817_v6  ;;  %v1338_v2 = vmul.f32 %v4271_v10, %v1331_v47  ;;  %v1348_v59 = vmul.f32 %v4272_v58, %v1331_v47  ;;  %v1356_v39 = vmul.f32 %v4273_v21, %v1329_v48  ;;  %v6201_v6 = vld [vmem:[%s8584_s0 + $0x4b] ss:$0 sm:$0xff] }
 0x26b   :  { %8812 = vst [vmem:[#allocation32_spill] sm:$0xff] %v6128_v0  ;;  %v6137_v16 = vpop.permute.xlu1 %1596  ;;  %v1330_v0 = vsel %vm244_vm4, %v8820_v62, %v8819_v25  ;;  %v1340_v63 = vadd.f32 %v1336_v9, %v1271_v61  ;;  %v1350_v53 = vadd.f32 %v1346_v56, %v1281_v52  ;;  %v1366_v30 = vmul.f32 %v4274_v37, %v1329_v48  ;;  %v4278_v52 = vld [vmem:[%s8584_s0 + $0x47] ss:$0 sm:$0xff]  ;;  %v8826_v7 = vld [vmem:[#allocation21_spill] sm:$0xff]  ;;  %v8827_v25 = vld [vmem:[#allocation27_spill] sm:$0xff] }
 0x26c   :  { %8815 = vst [vmem:[#allocation39_spill] sm:$0xff] %v6137_v16  ;;  %v1368_v16 = vmul.f32 %v4274_v37, %v1331_v47  ;;  %v1339_v35 = vmul.f32 %v4271_v10, %v1332_v14  ;;  %v1349_v8 = vmul.f32 %v4272_v58, %v1332_v14  ;;  %v1359_v15 = vmul.f32 %v4273_v21, %v1332_v14 }
 0x26d   :  { %8816 = vst [vmem:[#allocation45_spill] sm:$0xff] %v6139_v45  ;;  %v1358_v45 = vmul.f32 %v4273_v21, %v1331_v47  ;;  %v1337_v57 = vmul.f32 %v4271_v10, %v1330_v0  ;;  %v1347_v28 = vmul.f32 %v4272_v58, %v1330_v0  ;;  %v1357_v36 = vmul.f32 %v4273_v21, %v1330_v0  ;;  %v4276_v10 = vld [vmem:[%s8584_s0 + $0x45] ss:$0 sm:$0xff] }
 0x26e   :  { %v6154_v62 = vadd.f32 %v1338_v2, %v1273_v34  ;;  %v6156_v51 = vadd.f32 %v1348_v59, %v1283_v29  ;;  %v1360_v26 = vadd.f32 %v1356_v39, %v1291_v12  ;;  %v1367_v48 = vmul.f32 %v4274_v37, %v1330_v0  ;;  %v8822_v34 = vld [vmem:[#allocation20_spill] sm:$0xff]  ;;  %v6191_v12 = vld [vmem:[%s8584_s0 + $0x49] ss:$0 sm:$0xff] }
 0x26f   :  { %v6166_v60 = vadd.f32 %v1358_v45, %v1293_v41  ;;  %v6168_v13 = vadd.f32 %v1368_v16, %v1303_v20  ;;  %v1369_v61 = vmul.f32 %v4274_v37, %v1332_v14  ;;  %v8823_v29 = vld [vmem:[#allocation28_spill] sm:$0xff]  ;;  %v6182_v41 = vld [vmem:[%s8584_s0 + $0x48] ss:$0 sm:$0xff]  ;;  %v1370_v9 = vadd.f32 %v1366_v30, %v1301_v3  ;;  %v6196_v20 = vld [vmem:[%s8584_s0 + $0x4a] ss:$0 sm:$0xff] }
 0x270   :  { %2180 = vrot.lane.b32.xlu0 %v6114_v44, %s4460_s16  ;;  %2178 = vrot.lane.b32.xlu2 %v6112_v50, %s4460_s16  ;;  %v1398_v21 = vsel %vm244_vm4, %v8823_v29, %v8822_v34  ;;  %v4277_v0 = vld [vmem:[%s8584_s0 + $0x46] ss:$0 sm:$0xff]  ;;  %v1343_v56 = vadd.f32 %v1339_v35, %v1274_v40  ;;  %v1353_v16 = vadd.f32 %v1349_v8, %v1284_v22  ;;  %v8832_v29 = vld [vmem:[#allocation25_spill] sm:$0xff] }
 0x271   :  { %2176 = vrot.lane.b32.xlu1 %v6054_v19, %s4460_s16  ;;  %v1363_v45 = vadd.f32 %v1359_v15, %v1294_v17  ;;  %v1341_v3 = vadd.f32 %v1337_v57, %v6082_v43  ;;  %v1351_v40 = vadd.f32 %v1347_v28, %v6084_v55  ;;  %v1361_v22 = vadd.f32 %v1357_v36, %v6099_v4  ;;  %v4439_v17 = vld [vmem:[#allocation2 + $0xa0] sm:$0xff]  ;;  %v8829_v43 = vld [vmem:[#allocation11_spill] sm:$0xff]  ;;  %v8830_v57 = vld [vmem:[#allocation14_spill] sm:$0xff] }
 0x272   :  { %v6164_v58 = vpop.permute.xlu0 %1712  ;;  %v6186_v37 = vpop.permute.xlu2 %1781  ;;  %v1466_v14 = vsel %vm244_vm4, %v4439_v17, %v8826_v7  ;;  %v1371_v2 = vadd.f32 %v1367_v48, %v6102_v42  ;;  %v1405_v59 = vmul.f32 %v4275_v38, %v1398_v21  ;;  %v1415_v39 = vmul.f32 %v4276_v10, %v1398_v21  ;;  %v8828_v30 = vld [vmem:[#allocation12_spill] sm:$0xff] }
 0x273   :  { %8821 = vst [vmem:[#allocation48_spill] sm:$0xff] %v6164_v58  ;;  %v6184_v47 = vpop.permute.xlu1 %1659  ;;  %v1399_v35 = vsel %vm244_vm4, %v8828_v30, %v8827_v25  ;;  %v1373_v8 = vadd.f32 %v1369_v61, %v1304_v32  ;;  %v1425_v15 = vmul.f32 %v4277_v0, %v1398_v21  ;;  %v1435_v34 = vmul.f32 %v4278_v52, %v1398_v21  ;;  %v8831_v61 = vld [vmem:[#allocation7_spill] sm:$0xff]  ;;  %v4440_v58 = vld [vmem:[#allocation2 + $0x90] sm:$0xff] }
 0x274   :  { %8824 = vst [vmem:[#allocation41_spill] sm:$0xff] %v6184_v47  ;;  %v1401_v55 = vsel %vm244_vm4, %v8830_v57, %v8829_v43  ;;  %v6216_v4 = vmul.f32 %v6182_v41, %v1466_v14  ;;  %v6219_v28 = vmul.f32 %v6191_v12, %v1466_v14  ;;  %v6222_v42 = vmul.f32 %v6196_v20, %v1466_v14  ;;  %v8834_v47 = vld [vmem:[#allocation31_spill] sm:$0xff] }
 0x275   :  { %8825 = vst [vmem:[#allocation47_spill] sm:$0xff] %v6186_v37  ;;  %v6225_v36 = vmul.f32 %v6201_v6, %v1466_v14  ;;  %v1406_v32 = vmul.f32 %v4275_v38, %v1399_v35  ;;  %v1416_v48 = vmul.f32 %v4276_v10, %v1399_v35  ;;  %v1400_v21 = vsel %vm244_vm4, %v8832_v29, %v8831_v61 }
 0x276   :  { %v1409_v17 = vadd.f32 %v1405_v59, %v1340_v63  ;;  %v1419_v7 = vadd.f32 %v1415_v39, %v1350_v53  ;;  %v1408_v25 = vmul.f32 %v4275_v38, %v1401_v55  ;;  %v1426_v14 = vmul.f32 %v4277_v0, %v1399_v35 }
 0x277   :  { %v1429_v43 = vadd.f32 %v1425_v15, %v1360_v26  ;;  %v1439_v57 = vadd.f32 %v1435_v34, %v1370_v9  ;;  %v1418_v37 = vmul.f32 %v4276_v10, %v1401_v55  ;;  %v1464_v49 = vsel %vm244_vm4, %v4440_v58, %v8834_v47 }
 0x278   :  { %2190 = vrot.lane.b32.xlu0 %v6112_v50, %s4461_s8  ;;  %2188 = vrot.lane.b32.xlu2 %v6054_v19, %s4461_s8  ;;  %v1428_v23 = vmul.f32 %v4277_v0, %v1401_v55  ;;  %v1438_v18 = vmul.f32 %v4278_v52, %v1401_v55  ;;  %v1407_v33 = vmul.f32 %v4275_v38, %v1400_v21 }
 0x279   :  { %2182 = vrot.lane.b32.xlu1 %v6104_v11, %s4460_s16  ;;  %v1417_v63 = vmul.f32 %v4276_v10, %v1400_v21  ;;  %v1410_v53 = vadd.f32 %v1406_v32, %v1341_v3  ;;  %v1420_v59 = vadd.f32 %v1416_v48, %v1351_v40  ;;  %v1427_v39 = vmul.f32 %v4277_v0, %v1400_v21  ;;  %v8838_v3 = vld [vmem:[#allocation35_spill] sm:$0xff] }
 0x27a   :  { %v6236_v30 = vpop.permute.xlu0 %1718  ;;  %v6242_v29 = vpop.permute.xlu2 %1787  ;;  %v1437_v46 = vmul.f32 %v4278_v52, %v1400_v21  ;;  %v1430_v26 = vadd.f32 %v1426_v14, %v1361_v22  ;;  %v1436_v9 = vmul.f32 %v4278_v52, %v1399_v35  ;;  %v1471_v15 = vmul.f32 %v6182_v41, %v1464_v49 }
 0x27b   :  { %8833 = vst [vmem:[#allocation50_spill] sm:$0xff] %v6236_v30  ;;  %v6240_v61 = vpop.permute.xlu1 %1714  ;;  %v1412_v30 = vadd.f32 %v1408_v25, %v1343_v56  ;;  %v1422_v34 = vadd.f32 %v1418_v37, %v1353_v16  ;;  %v1481_v58 = vmul.f32 %v6191_v12, %v1464_v49  ;;  %v1491_v47 = vmul.f32 %v6196_v20, %v1464_v49  ;;  %v4442_v16 = vld [vmem:[#allocation2 + $0x98] sm:$0xff] }
 0x27c   :  { %8835 = vst [vmem:[#allocation52_spill] sm:$0xff] %v6240_v61  ;;  %v4441_v61 = vld [vmem:[#allocation2 + $0xa8] sm:$0xff]  ;;  %v1432_v38 = vadd.f32 %v1428_v23, %v1363_v45  ;;  %v1411_v10 = vadd.f32 %v1407_v33, %v6154_v62  ;;  %v1421_v0 = vadd.f32 %v1417_v63, %v6156_v51  ;;  %v1501_v56 = vmul.f32 %v6201_v6, %v1464_v49 }
 0x27d   :  { %8836 = vst [vmem:[#allocation49_spill] sm:$0xff] %v6242_v29  ;;  %v8837_v29 = vld [vmem:[#allocation8_spill] sm:$0xff]  ;;  %v1431_v52 = vadd.f32 %v1427_v39, %v6166_v60  ;;  %v1441_v37 = vadd.f32 %v1437_v46, %v6168_v13  ;;  %v1465_v40 = vsel %vm244_vm4, %v4442_v16, %v8838_v3  ;;  %v1442_v23 = vadd.f32 %v1438_v18, %v1373_v8  ;;  %v4284_v8 = vld [vmem:[%s8584_s0 + $0x4d] ss:$0 sm:$0xff] }
 0x27e   :  { %v1467_v55 = vsel %vm244_vm4, %v4441_v61, %v8837_v29  ;;  %v1440_v33 = vadd.f32 %v1436_v9, %v1371_v2  ;;  %v1475_v49 = vadd.f32 %v1471_v15, %v1409_v17  ;;  %v1485_v60 = vadd.f32 %v1481_v58, %v1419_v7  ;;  %v4283_v2 = vld [vmem:[%s8584_s0 + $0x4c] ss:$0 sm:$0xff]  ;;  %v8839_v17 = vld [vmem:[#allocation34_spill] sm:$0xff]  ;;  %v8841_v9 = vld [vmem:[#allocation23_spill] sm:$0xff] }
 0x27f   :  { %v1474_v62 = vmul.f32 %v6182_v41, %v1467_v55  ;;  %v1495_v45 = vadd.f32 %v1491_v47, %v1429_v43  ;;  %v1484_v46 = vmul.f32 %v6191_v12, %v1467_v55  ;;  %v1494_v13 = vmul.f32 %v6196_v20, %v1467_v55  ;;  %v8840_v61 = vld [vmem:[#allocation30_spill] sm:$0xff] }
 0x280   :  { %2244 = vrot.lane.b32.xlu0 %v6054_v19, %s4462_s9  ;;  %2194 = vrot.lane.b32.xlu2 %v6104_v11, %s4461_s8  ;;  %v1505_v32 = vadd.f32 %v1501_v56, %v1439_v57  ;;  %v1472_v48 = vmul.f32 %v6182_v41, %v1465_v40  ;;  %v1482_v18 = vmul.f32 %v6191_v12, %v1465_v40  ;;  %v4285_v41 = vld [vmem:[%s8584_s0 + $0x4e] ss:$0 sm:$0xff]  ;;  %v4286_v12 = vld [vmem:[%s8584_s0 + $0x4f] ss:$0 sm:$0xff] }
 0x281   :  { %2192 = vrot.lane.b32.xlu1 %v6114_v44, %s4461_s8  ;;  %v6280_v21 = vadd.f32 %v6216_v4, %v1411_v10  ;;  %v1533_v7 = vsel %vm244_vm4, %v5855_v5, %v8839_v17  ;;  %v6292_v25 = vadd.f32 %v6219_v28, %v1421_v0  ;;  %v6295_v14 = vadd.f32 %v6222_v42, %v1431_v52  ;;  %v6354_v17 = vld [vmem:[%s8584_s0 + $0x57] ss:$0 sm:$0xff] }
 0x282   :  { %v6263_v51 = vpop.permute.xlu0 %1728  ;;  %v6269_v35 = vpop.permute.xlu2 %1797  ;;  %v6298_v4 = vadd.f32 %v6225_v36, %v1441_v37  ;;  %v1492_v43 = vmul.f32 %v6196_v20, %v1465_v40  ;;  %v1502_v5 = vmul.f32 %v6201_v6, %v1465_v40  ;;  %v1478_v57 = vadd.f32 %v1474_v62, %v1412_v30 }
 0x283   :  { %v6267_v22 = vpop.permute.xlu1 %1724  ;;  %v1534_v29 = vsel %vm244_vm4, %v8840_v61, %v5879_v31  ;;  %v1488_v63 = vadd.f32 %v1484_v46, %v1422_v34  ;;  %v1498_v39 = vadd.f32 %v1494_v13, %v1432_v38  ;;  %v1504_v28 = vmul.f32 %v6201_v6, %v1467_v55  ;;  %v4292_v61 = vld [vmem:[%s8584_s0 + $0x51] ss:$0 sm:$0xff] }
 0x284   :  { %v1536_v42 = vsel %vm244_vm4, %v5884_v54, %v8841_v9  ;;  %v1476_v15 = vadd.f32 %v1472_v48, %v1410_v53  ;;  %v1486_v36 = vadd.f32 %v1482_v18, %v1420_v59  ;;  %v1540_v58 = vmul.f32 %v4283_v2, %v1533_v7  ;;  %v6335_v48 = vld [vmem:[%s8584_s0 + $0x54] ss:$0 sm:$0xff]  ;;  %v6349_v18 = vld [vmem:[%s8584_s0 + $0x56] ss:$0 sm:$0xff] }
 0x285   :  { %v1550_v47 = vmul.f32 %v4284_v8, %v1533_v7  ;;  %v1560_v20 = vmul.f32 %v4285_v41, %v1533_v7  ;;  %v1570_v30 = vmul.f32 %v4286_v12, %v1533_v7  ;;  %v1541_v10 = vmul.f32 %v4283_v2, %v1534_v29 }
 0x286   :  { %v1496_v31 = vadd.f32 %v1492_v43, %v1430_v26  ;;  %v1543_v6 = vmul.f32 %v4283_v2, %v1536_v42  ;;  %v1551_v34 = vmul.f32 %v4284_v8, %v1534_v29  ;;  %v1561_v54 = vmul.f32 %v4285_v41, %v1534_v29  ;;  %v8843_v26 = vld [vmem:[#allocation29_spill] sm:$0xff] }
 0x287   :  { %v1506_v59 = vadd.f32 %v1502_v5, %v1440_v33  ;;  %v1553_v55 = vmul.f32 %v4284_v8, %v1536_v42  ;;  %v1563_v38 = vmul.f32 %v4285_v41, %v1536_v42  ;;  %v1573_v0 = vmul.f32 %v4286_v12, %v1536_v42  ;;  %v8844_v42 = vld [vmem:[#allocation33_spill] sm:$0xff] }
 0x288   :  { %2250 = vrot.lane.b32.xlu0 %v6104_v11, %s4462_s9  ;;  %2248 = vrot.lane.b32.xlu2 %v6114_v44, %s4462_s9  ;;  %v1508_v37 = vadd.f32 %v1504_v28, %v1442_v23  ;;  %v6321_v16 = vadd.f32 %v1540_v58, %v1475_v49  ;;  %v6323_v3 = vadd.f32 %v1550_v47, %v1485_v60  ;;  %v6340_v23 = vld [vmem:[%s8584_s0 + $0x55] ss:$0 sm:$0xff]  ;;  %v8846_v47 = vld [vmem:[#allocation43_spill] sm:$0xff] }
 0x289   :  { %2246 = vrot.lane.b32.xlu1 %v6112_v50, %s4462_s9  ;;  %v1535_v40 = vsel %vm244_vm4, %v8843_v26, %v5953_v27  ;;  %v6328_v62 = vadd.f32 %v1560_v20, %v1495_v45  ;;  %v6330_v46 = vadd.f32 %v1570_v30, %v1505_v32  ;;  %v1545_v33 = vadd.f32 %v1541_v10, %v1476_v15  ;;  %v4443_v45 = vld [vmem:[#allocation2 + $0x91] sm:$0xff] }
 0x28a   :  { %v6315_v53 = vpop.permute.xlu0 %1783  ;;  %v6319_v52 = vpop.permute.xlu2 %1860  ;;  %v1571_v13 = vmul.f32 %v4286_v12, %v1534_v29  ;;  %v6342_v49 = vadd.f32 %v1543_v6, %v1478_v57  ;;  %v1555_v60 = vadd.f32 %v1551_v34, %v1486_v36  ;;  %v1565_v27 = vadd.f32 %v1561_v54, %v1496_v31  ;;  %v8847_v20 = vld [vmem:[#allocation26_spill] sm:$0xff] }
 0x28b   :  { %8842 = vst [vmem:[#allocation55_spill] sm:$0xff] %v6315_v53  ;;  %v6317_v56 = vpop.permute.xlu1 %1730  ;;  %v1667_v32 = vsel %vm244_vm4, %v4443_v45, %v5955_v24  ;;  %v6356_v7 = vadd.f32 %v1553_v55, %v1488_v63  ;;  %v6358_v43 = vadd.f32 %v1563_v38, %v1498_v39  ;;  %v6360_v5 = vadd.f32 %v1573_v0, %v1508_v37  ;;  %v4291_v24 = vld [vmem:[%s8584_s0 + $0x50] ss:$0 sm:$0xff]  ;;  %v4293_v39 = vld [vmem:[%s8584_s0 + $0x52] ss:$0 sm:$0xff]  ;;  %v6432_v53 = vld [vmem:[#allocation2 + $0x21] sm:$0xff] }
 0x28c   :  { %v1542_v57 = vmul.f32 %v4283_v2, %v1535_v40  ;;  %v1552_v29 = vmul.f32 %v4284_v8, %v1535_v40  ;;  %v1562_v28 = vmul.f32 %v4285_v41, %v1535_v40  ;;  %v1572_v9 = vmul.f32 %v4286_v12, %v1535_v40  ;;  %v4294_v8 = vld [vmem:[%s8584_s0 + $0x53] ss:$0 sm:$0xff]  ;;  %v4444_v41 = vld [vmem:[#allocation2 + $0xa9] sm:$0xff]  ;;  %v8845_v12 = vld [vmem:[#allocation36_spill] sm:$0xff] }
 0x28d   :  { %v1603_v63 = vsel %vm244_vm4, %v8844_v42, %v5886_v1  ;;  %v1575_v2 = vadd.f32 %v1571_v13, %v1506_v59  ;;  %v6377_v15 = vmul.f32 %v6335_v48, %v1667_v32  ;;  %v6380_v36 = vmul.f32 %v6340_v23, %v1667_v32  ;;  %v8848_v6 = vld [vmem:[#allocation42_spill] sm:$0xff] }
 0x28e   :  { %v6390_v1 = vmul.f32 %v6349_v18, %v1667_v32  ;;  %v1670_v58 = vsel %vm244_vm4, %v4444_v41, %v8845_v12  ;;  %v1602_v30 = vsel %vm244_vm4, %v8847_v20, %v8846_v47  ;;  %v1610_v31 = vmul.f32 %v4291_v24, %v1603_v63  ;;  %v8849_v34 = vld [vmem:[#allocation38_spill] sm:$0xff]  ;;  %v8851_v12 = vld [vmem:[#allocation39_spill] sm:$0xff]  ;;  %v8852_v47 = vld [vmem:[#allocation40_spill] sm:$0xff] }
 0x28f   :  { %v1604_v54 = vsel %vm244_vm4, %v8849_v34, %v8848_v6  ;;  %v1556_v38 = vadd.f32 %v1552_v29, %v6292_v25  ;;  %v1566_v0 = vadd.f32 %v1562_v28, %v6295_v14  ;;  %v1576_v37 = vadd.f32 %v1572_v9, %v6298_v4  ;;  %v6425_v28 = vld [vmem:[#allocation2 + $0x29] sm:$0xff]  ;;  %v4445_v6 = vld [vmem:[#allocation2 + $0x99] sm:$0xff] }
 0x290   :  { %2260 = vrot.lane.b32.xlu0 %v6114_v44, %s4463_s10  ;;  %2258 = vrot.lane.b32.xlu2 %v6112_v50, %s4463_s10  ;;  %v6393_v44 = vmul.f32 %v6354_v17, %v1667_v32  ;;  %v1620_v50 = vmul.f32 %v4292_v61, %v1603_v63  ;;  %v1630_v26 = vmul.f32 %v4293_v39, %v1603_v63  ;;  %v8853_v34 = vld [vmem:[#allocation32_spill] sm:$0xff] }
 0x291   :  { %2256 = vrot.lane.b32.xlu1 %v6054_v19, %s4463_s10  ;;  %v1546_v19 = vadd.f32 %v1542_v57, %v6280_v21  ;;  %v1640_v40 = vmul.f32 %v4294_v8, %v1603_v63  ;;  %v6414_v21 = vmul.f32 %v6335_v48, %v1670_v58  ;;  %v6417_v13 = vmul.f32 %v6340_v23, %v1670_v58 }
 0x292   :  { %v6400_v10 = vpop.permute.xlu0 %1793  ;;  %v6408_v55 = vpop.permute.xlu2 %1915  ;;  %v1609_v45 = vmul.f32 %v4291_v24, %v1602_v30  ;;  %v6420_v32 = vmul.f32 %v6349_v18, %v1670_v58  ;;  %v1619_v57 = vmul.f32 %v4292_v61, %v1602_v30  ;;  %v1629_v42 = vmul.f32 %v4293_v39, %v1602_v30 }
 0x293   :  { %v6406_v59 = vpop.permute.xlu1 %1785  ;;  %8850 = vst [vmem:[#allocation56_spill] sm:$0xff] %v6408_v55  ;;  %v1611_v41 = vmul.f32 %v4291_v24, %v1604_v54  ;;  %v1614_v25 = vadd.f32 %v1610_v31, %v1545_v33  ;;  %v1624_v29 = vadd.f32 %v1620_v50, %v1555_v60  ;;  %v6423_v14 = vmul.f32 %v6354_v17, %v1670_v58 }
 0x294   :  { %v1639_v4 = vmul.f32 %v4294_v8, %v1602_v30  ;;  %v1634_v9 = vadd.f32 %v1630_v26, %v1565_v27  ;;  %v1621_v63 = vmul.f32 %v4292_v61, %v1604_v54  ;;  %v1605_v20 = vsel %vm244_vm4, %v8852_v47, %v8851_v12 }
 0x295   :  { %v1668_v55 = vsel %vm244_vm4, %v4445_v6, %v8853_v34  ;;  %v1613_v33 = vadd.f32 %v1609_v45, %v6321_v16  ;;  %v1631_v60 = vmul.f32 %v4293_v39, %v1604_v54  ;;  %v1641_v58 = vmul.f32 %v4294_v8, %v1604_v54 }
 0x296   :  { %v1644_v27 = vadd.f32 %v1640_v40, %v1575_v2  ;;  %v1623_v30 = vadd.f32 %v1619_v57, %v6323_v3  ;;  %v1633_v31 = vadd.f32 %v1629_v42, %v6328_v62  ;;  %v1615_v50 = vadd.f32 %v1611_v41, %v1546_v19 }
 0x297   :  { %v1643_v12 = vadd.f32 %v1639_v4, %v6330_v46  ;;  %v1612_v47 = vmul.f32 %v4291_v24, %v1605_v20  ;;  %v1622_v16 = vmul.f32 %v4292_v61, %v1605_v20  ;;  %v1675_v54 = vmul.f32 %v6335_v48, %v1668_v55  ;;  %v4446_v24 = vld [vmem:[#allocation2 + $0xa1] sm:$0xff] }
 0x298   :  { %2322 = vrot.lane.b32.xlu0 %v6425_v28, %s4459_s2  ;;  %2320 = vrot.lane.b32.xlu2 %v6432_v53, %s4459_s2  ;;  %v1625_v6 = vadd.f32 %v1621_v63, %v1556_v38  ;;  %v1632_v34 = vmul.f32 %v4293_v39, %v1605_v20  ;;  %v1642_v2 = vmul.f32 %v4294_v8, %v1605_v20  ;;  %v8854_v61 = vld [vmem:[#allocation41_spill] sm:$0xff]  ;;  %v4297_v63 = vld [vmem:[%s8584_s0 + $0x5a] ss:$0 sm:$0xff]  ;;  %v6486_v20 = vld [vmem:[#allocation2 + $0x31] sm:$0xff] }
 0x299   :  { %2262 = vrot.lane.b32.xlu1 %v6104_v11, %s4463_s10  ;;  %v1685_v3 = vmul.f32 %v6340_v23, %v1668_v55  ;;  %v1635_v40 = vadd.f32 %v1631_v60, %v1566_v0  ;;  %v1645_v62 = vadd.f32 %v1641_v58, %v1576_v37  ;;  %v1695_v19 = vmul.f32 %v6349_v18, %v1668_v55  ;;  %v8855_v4 = vld [vmem:[#allocation45_spill] sm:$0xff] }
 0x29a   :  { %v6443_v26 = vpop.permute.xlu0 %1799  ;;  %v6449_v11 = vpop.permute.xlu2 %1921  ;;  %v6454_v57 = vadd.f32 %v6377_v15, %v1613_v33  ;;  %v1705_v46 = vmul.f32 %v6354_v17, %v1668_v55  ;;  %v1669_v42 = vsel %vm244_vm4, %v4446_v24, %v8854_v61  ;;  %v6460_v41 = vadd.f32 %v6380_v36, %v1623_v30  ;;  %v4295_v15 = vld [vmem:[%s8584_s0 + $0x58] ss:$0 sm:$0xff]  ;;  %v6473_v55 = vld [vmem:[%s8584_s0 + $0x59] ss:$0 sm:$0xff]  ;;  %8857 = vst [vmem:[#allocation46_spill] sm:$0xff] %v6486_v20 }
 0x29b   :  { %v6447_v45 = vpop.permute.xlu1 %1795  ;;  %v6463_v39 = vadd.f32 %v6390_v1, %v1633_v31  ;;  %v1616_v8 = vadd.f32 %v1612_v47, %v6342_v49  ;;  %v1626_v38 = vadd.f32 %v1622_v16, %v6356_v7  ;;  %v1679_v0 = vadd.f32 %v1675_v54, %v1614_v25  ;;  %v8856_v7 = vld [vmem:[#allocation52_spill] sm:$0xff] }
 0x29c   :  { %v6476_v36 = vadd.f32 %v6393_v44, %v1643_v12  ;;  %v1636_v1 = vadd.f32 %v1632_v34, %v6358_v43  ;;  %v1646_v37 = vadd.f32 %v1642_v2, %v6360_v5  ;;  %v1689_v49 = vadd.f32 %v1685_v3, %v1624_v29  ;;  %v6488_v33 = vld [vmem:[#allocation2 + $0x39] sm:$0xff] }
 0x29d   :  { %v1737_v25 = vsel %vm244_vm4, %v8856_v7, %v8855_v4  ;;  %v1699_v44 = vadd.f32 %v1695_v19, %v1634_v9  ;;  %v1676_v43 = vmul.f32 %v6335_v48, %v1669_v42  ;;  %v1686_v5 = vmul.f32 %v6340_v23, %v1669_v42  ;;  %v4298_v29 = vld [vmem:[%s8584_s0 + $0x5b] ss:$0 sm:$0xff]  ;;  %v8858_v9 = vld [vmem:[#allocation44_spill] sm:$0xff] }
 0x29e   :  { %v1709_v60 = vadd.f32 %v1705_v46, %v1644_v27  ;;  %v1696_v58 = vmul.f32 %v6349_v18, %v1669_v42  ;;  %v1706_v30 = vmul.f32 %v6354_v17, %v1669_v42  ;;  %v1738_v48 = vsel %vm244_vm4, %v8858_v9, %v6263_v51  ;;  %v8859_v17 = vld [vmem:[#allocation48_spill] sm:$0xff] }
 0x29f   :  { %v1744_v31 = vmul.f32 %v4295_v15, %v1737_v25  ;;  %v1754_v12 = vmul.f32 %v6473_v55, %v1737_v25  ;;  %v1681_v47 = vadd.f32 %v6414_v21, %v1616_v8  ;;  %v1691_v16 = vadd.f32 %v6417_v13, %v1626_v38 }
 0x2a0   :  { %2376 = vrot.lane.b32.xlu0 %v6432_v53, %s4460_s16  ;;  %2326 = vrot.lane.b32.xlu2 %v6488_v33, %s4459_s2  ;;  %v1764_v18 = vmul.f32 %v4297_v63, %v1737_v25  ;;  %v1736_v34 = vsel %vm244_vm4, %v8859_v17, %v6267_v22  ;;  %v1701_v51 = vadd.f32 %v6420_v32, %v1636_v1  ;;  %v8860_v22 = vld [vmem:[#allocation50_spill] sm:$0xff] }
 0x2a1   :  { %2324 = vrot.lane.b32.xlu1 %v6486_v20, %s4459_s2  ;;  %v1711_v2 = vadd.f32 %v6423_v14, %v1646_v37  ;;  %v1680_v3 = vadd.f32 %v1676_v43, %v1615_v50  ;;  %v1690_v19 = vadd.f32 %v1686_v5, %v1625_v6  ;;  %v1774_v46 = vmul.f32 %v4298_v29, %v1737_v25  ;;  %v6540_v37 = vld [vmem:[%s8584_s0 + $0x60] ss:$0 sm:$0xff]  ;;  %v6556_v5 = vld [vmem:[%s8584_s0 + $0x62] ss:$0 sm:$0xff] }
 0x2a2   :  { %v6506_v23 = vpop.permute.xlu0 %1862  ;;  %v6513_v27 = vpop.permute.xlu2 %1931  ;;  %v1745_v24 = vmul.f32 %v4295_v15, %v1738_v48  ;;  %v1700_v21 = vadd.f32 %v1696_v58, %v1635_v40  ;;  %v1710_v61 = vadd.f32 %v1706_v30, %v1645_v62  ;;  %v1755_v13 = vmul.f32 %v6473_v55, %v1738_v48  ;;  %v4303_v58 = vld [vmem:[%s8584_s0 + $0x5c] ss:$0 sm:$0xff] }
 0x2a3   :  { %v6511_v54 = vpop.permute.xlu1 %1858  ;;  %v1765_v42 = vmul.f32 %v4297_v63, %v1738_v48  ;;  %v6521_v8 = vadd.f32 %v1744_v31, %v1679_v0  ;;  %v6523_v38 = vadd.f32 %v1754_v12, %v1689_v49  ;;  %v1743_v4 = vmul.f32 %v4295_v15, %v1736_v34  ;;  %v8862_v31 = vld [vmem:[#allocation47_spill] sm:$0xff] }
 0x2a4   :  { %v1739_v32 = vsel %vm244_vm4, %v8860_v22, %v6317_v56  ;;  %v6528_v1 = vadd.f32 %v1764_v18, %v1699_v44  ;;  %v1753_v14 = vmul.f32 %v6473_v55, %v1736_v34  ;;  %v1763_v50 = vmul.f32 %v4297_v63, %v1736_v34  ;;  %v6545_v56 = vld [vmem:[%s8584_s0 + $0x61] ss:$0 sm:$0xff] }
 0x2a5   :  { %v1773_v6 = vmul.f32 %v4298_v29, %v1736_v34  ;;  %v6533_v40 = vadd.f32 %v1774_v46, %v1709_v60  ;;  %v6535_v62 = vadd.f32 %v1745_v24, %v1680_v3  ;;  %v1775_v0 = vmul.f32 %v4298_v29, %v1738_v48  ;;  %v4447_v44 = vld [vmem:[#allocation2 + $0x9a] sm:$0xff]  ;;  %v6561_v60 = vld [vmem:[%s8584_s0 + $0x63] ss:$0 sm:$0xff] }
 0x2a6   :  { %v1759_v49 = vadd.f32 %v1755_v13, %v1690_v19  ;;  %v1769_v7 = vadd.f32 %v1765_v42, %v1700_v21  ;;  %v1746_v25 = vmul.f32 %v4295_v15, %v1739_v32  ;;  %v1871_v43 = vsel %vm244_vm4, %v4447_v44, %v6319_v52  ;;  %v4304_v48 = vld [vmem:[%s8584_s0 + $0x5d] ss:$0 sm:$0xff] }
 0x2a7   :  { %v1747_v15 = vadd.f32 %v1743_v4, %v6454_v57  ;;  %v1756_v52 = vmul.f32 %v6473_v55, %v1739_v32  ;;  %v1766_v9 = vmul.f32 %v4297_v63, %v1739_v32  ;;  %v1805_v12 = vsel %vm244_vm4, %v8862_v31, %v6400_v10  ;;  %v4305_v63 = vld [vmem:[%s8584_s0 + $0x5e] ss:$0 sm:$0xff] }
 0x2a8   :  { %2382 = vrot.lane.b32.xlu0 %v6488_v33, %s4460_s16  ;;  %2380 = vrot.lane.b32.xlu2 %v6486_v20, %s4460_s16  ;;  %v1757_v34 = vadd.f32 %v1753_v14, %v6460_v41  ;;  %v1767_v3 = vadd.f32 %v1763_v50, %v6463_v39  ;;  %v1777_v57 = vadd.f32 %v1773_v6, %v6476_v36  ;;  %v4306_v39 = vld [vmem:[%s8584_s0 + $0x5f] ss:$0 sm:$0xff]  ;;  %v8865_v14 = vld [vmem:[#allocation49_spill] sm:$0xff] }
 0x2a9   :  { %2378 = vrot.lane.b32.xlu1 %v6425_v28, %s4460_s16  ;;  %v1776_v55 = vmul.f32 %v4298_v29, %v1739_v32  ;;  %v1779_v19 = vadd.f32 %v1775_v0, %v1710_v61  ;;  %v6587_v46 = vmul.f32 %v6540_v37, %v1871_v43  ;;  %v6590_v10 = vmul.f32 %v6545_v56, %v1871_v43  ;;  %v8864_v4 = vld [vmem:[#allocation55_spill] sm:$0xff] }
 0x2aa   :  { %v6566_v30 = vpop.permute.xlu0 %1917  ;;  %v6578_v17 = vpop.permute.xlu2 %1986  ;;  %v1807_v41 = vsel %vm244_vm4, %v6406_v59, %v6269_v35  ;;  %v1750_v36 = vadd.f32 %v1746_v25, %v1681_v47  ;;  %v6599_v29 = vmul.f32 %v6556_v5, %v1871_v43  ;;  %v6602_v24 = vmul.f32 %v6561_v60, %v1871_v43 }
 0x2ab   :  { %8861 = vst [vmem:[#allocation51_spill] sm:$0xff] %v6566_v30  ;;  %v6576_v18 = vpop.permute.xlu1 %1864  ;;  %v1812_v21 = vmul.f32 %v4303_v58, %v1805_v12  ;;  %v1760_v61 = vadd.f32 %v1756_v52, %v1691_v16  ;;  %v1770_v13 = vadd.f32 %v1766_v9, %v1701_v51  ;;  %v1822_v42 = vmul.f32 %v4304_v48, %v1805_v12 }
 0x2ac   :  { %8863 = vst [vmem:[#allocation58_spill] sm:$0xff] %v6578_v17  ;;  %v1806_v22 = vsel %vm244_vm4, %v8864_v4, %v6447_v45  ;;  %v1780_v35 = vadd.f32 %v1776_v55, %v1711_v2  ;;  %v1814_v59 = vmul.f32 %v4303_v58, %v1807_v41  ;;  %v1832_v32 = vmul.f32 %v4305_v63, %v1805_v12 }
 0x2ad   :  { %v1808_v47 = vsel %vm244_vm4, %v8865_v14, %v6443_v26  ;;  %v1824_v50 = vmul.f32 %v4304_v48, %v1807_v41  ;;  %v1834_v6 = vmul.f32 %v4305_v63, %v1807_v41  ;;  %v1844_v0 = vmul.f32 %v4306_v39, %v1807_v41 }
 0x2ae   :  { %v6616_v45 = vadd.f32 %v1812_v21, %v1747_v15  ;;  %v1842_v16 = vmul.f32 %v4306_v39, %v1805_v12  ;;  %v1813_v51 = vmul.f32 %v4303_v58, %v1806_v22  ;;  %v1823_v2 = vmul.f32 %v4304_v48, %v1806_v22  ;;  %v4448_v21 = vld [vmem:[#allocation2 + $0xa2] sm:$0xff] }
 0x2af   :  { %v1826_v44 = vadd.f32 %v1822_v42, %v1757_v34  ;;  %v1833_v26 = vmul.f32 %v4305_v63, %v1806_v22  ;;  %v1843_v43 = vmul.f32 %v4306_v39, %v1806_v22  ;;  %v1815_v52 = vmul.f32 %v4303_v58, %v1808_v47 }
 0x2b0   :  { %2392 = vrot.lane.b32.xlu0 %v6486_v20, %s4461_s8  ;;  %2390 = vrot.lane.b32.xlu2 %v6425_v28, %s4461_s8  ;;  %v1836_v55 = vadd.f32 %v1832_v32, %v1767_v3  ;;  %v1825_v41 = vmul.f32 %v4304_v48, %v1808_v47  ;;  %v1835_v4 = vmul.f32 %v4305_v63, %v1808_v47  ;;  %v6663_v32 = vld [vmem:[%s8584_s0 + $0x67] ss:$0 sm:$0xff] }
 0x2b1   :  { %2388 = vrot.lane.b32.xlu1 %v6432_v53, %s4461_s8  ;;  %v1845_v14 = vmul.f32 %v4306_v39, %v1808_v47  ;;  %v1818_v17 = vadd.f32 %v1814_v59, %v6535_v62  ;;  %v1828_v30 = vadd.f32 %v1824_v50, %v1759_v49  ;;  %v1838_v15 = vadd.f32 %v1834_v6, %v1769_v7  ;;  %v4449_v39 = vld [vmem:[#allocation2 + $0x92] sm:$0xff]  ;;  %v4309_v59 = vld [vmem:[%s8584_s0 + $0x66] ss:$0 sm:$0xff] }
 0x2b2   :  { %v1928_v25 = vpop.permute.xlu0 %1927  ;;  %v6618_v31 = vpop.permute.xlu2 %1996  ;;  %v1872_v12 = vsel %vm244_vm4, %v4448_v21, %v6506_v23  ;;  %v6623_v20 = vadd.f32 %v1844_v0, %v1779_v19  ;;  %v1846_v34 = vadd.f32 %v1842_v16, %v1777_v57  ;;  %v1817_v58 = vadd.f32 %v1813_v51, %v6521_v8  ;;  %v4307_v19 = vld [vmem:[%s8584_s0 + $0x64] ss:$0 sm:$0xff] }
 0x2b3   :  { %v1920_v9 = vpop.permute.xlu1 %1919  ;;  %v1827_v42 = vadd.f32 %v1823_v2, %v6523_v38  ;;  %v1837_v3 = vadd.f32 %v1833_v26, %v6528_v1  ;;  %v1847_v48 = vadd.f32 %v1843_v43, %v6533_v40  ;;  %v1819_v63 = vadd.f32 %v1815_v52, %v1750_v36  ;;  %v4450_v1 = vld [vmem:[#allocation2 + $0xaa] sm:$0xff] }
 0x2b4   :  { %v1870_v62 = vsel %vm244_vm4, %v4449_v39, %v6511_v54  ;;  %v1829_v49 = vadd.f32 %v1825_v41, %v1760_v61  ;;  %v1839_v7 = vadd.f32 %v1835_v4, %v1770_v13  ;;  %v1849_v22 = vadd.f32 %v1845_v14, %v1780_v35  ;;  %v4308_v35 = vld [vmem:[%s8584_s0 + $0x65] ss:$0 sm:$0xff] }
 0x2b5   :  { %v1879_v23 = vmul.f32 %v6540_v37, %v1872_v12  ;;  %v1889_v8 = vmul.f32 %v6545_v56, %v1872_v12  ;;  %v1899_v38 = vmul.f32 %v6556_v5, %v1872_v12  ;;  %v1873_v40 = vsel %vm244_vm4, %v4450_v1, %v6576_v18 }
 0x2b6   :  { %v1877_v54 = vmul.f32 %v6540_v37, %v1870_v62  ;;  %v1887_v57 = vmul.f32 %v6545_v56, %v1870_v62  ;;  %v6648_v36 = vadd.f32 %v6587_v46, %v1817_v58  ;;  %v6651_v61 = vadd.f32 %v6590_v10, %v1827_v42  ;;  %v8866_v46 = vld [vmem:[#allocation56_spill] sm:$0xff] }
 0x2b7   :  { %v1897_v13 = vmul.f32 %v6556_v5, %v1870_v62  ;;  %v1939_v10 = vsel %vm244_vm4, %v8866_v46, %v1928_v25  ;;  %v6668_v50 = vadd.f32 %v6599_v29, %v1837_v3  ;;  %v6671_v6 = vadd.f32 %v6602_v24, %v1847_v48 }
 0x2b8   :  { %2446 = vrot.lane.b32.xlu0 %v6425_v28, %s4462_s9  ;;  %2444 = vrot.lane.b32.xlu2 %v6432_v53, %s4462_s9  ;;  %v1907_v16 = vmul.f32 %v6561_v60, %v1870_v62  ;;  %v6676_v51 = vadd.f32 %v1879_v23, %v1818_v17  ;;  %v1880_v2 = vmul.f32 %v6540_v37, %v1873_v40 }
 0x2b9   :  { %2394 = vrot.lane.b32.xlu1 %v6488_v33, %s4461_s8  ;;  %v1890_v26 = vmul.f32 %v6545_v56, %v1873_v40  ;;  %v6680_v43 = vadd.f32 %v1889_v8, %v1828_v30  ;;  %v6682_v25 = vadd.f32 %v1899_v38, %v1838_v15  ;;  %v1900_v29 = vmul.f32 %v6556_v5, %v1873_v40 }
 0x2ba   :  { %v1934_v18 = vpop.permute.xlu0 %1933  ;;  %v6673_v0 = vpop.permute.xlu2 %2002  ;;  %v1910_v52 = vmul.f32 %v6561_v60, %v1873_v40  ;;  %v1881_v24 = vadd.f32 %v1877_v54, %v6616_v45  ;;  %v1891_v41 = vadd.f32 %v1887_v57, %v1826_v44  ;;  %v6688_v4 = vmul.f32 %v6561_v60, %v1872_v12  ;;  %v6698_v60 = vld [vmem:[%s8584_s0 + $0x68] ss:$0 sm:$0xff]  ;;  %v6714_v12 = vld [vmem:[%s8584_s0 + $0x6a] ss:$0 sm:$0xff] }
 0x2bb   :  { %v1930_v47 = vpop.permute.xlu1 %1929  ;;  %v1946_v17 = vmul.f32 %v4307_v19, %v1939_v10  ;;  %v1941_v37 = vsel %vm244_vm4, %v1920_v9, %v6513_v27  ;;  %v1956_v14 = vmul.f32 %v4308_v35, %v1939_v10  ;;  %v1966_v56 = vmul.f32 %v4309_v59, %v1939_v10  ;;  %v6703_v27 = vld [vmem:[%s8584_s0 + $0x69] ss:$0 sm:$0xff] }
 0x2bc   :  { %v1976_v30 = vmul.f32 %v6663_v32, %v1939_v10  ;;  %v1901_v15 = vadd.f32 %v1897_v13, %v1836_v55  ;;  %v1911_v21 = vadd.f32 %v1907_v16, %v1846_v34  ;;  %v1884_v58 = vadd.f32 %v1880_v2, %v1819_v63  ;;  %v8867_v55 = vld [vmem:[#allocation46_spill] sm:$0xff]  ;;  %v6719_v34 = vld [vmem:[%s8584_s0 + $0x6b] ss:$0 sm:$0xff] }
 0x2bd   :  { %v1894_v5 = vadd.f32 %v1890_v26, %v1829_v49  ;;  %v1904_v45 = vadd.f32 %v1900_v29, %v1839_v7  ;;  %v1914_v44 = vadd.f32 %v1910_v52, %v1849_v22  ;;  %v1942_v9 = vsel %vm244_vm4, %v6449_v11, %v1934_v18  ;;  %v8868_v7 = vld [vmem:[#allocation51_spill] sm:$0xff] }
 0x2be   :  { %v6721_v42 = vmul.f32 %v4307_v19, %v1941_v37  ;;  %v6723_v3 = vmul.f32 %v4308_v35, %v1941_v37  ;;  %v6725_v11 = vmul.f32 %v4309_v59, %v1941_v37  ;;  %v1950_v48 = vadd.f32 %v1946_v17, %v1881_v24 }
 0x2bf   :  { %v1960_v39 = vadd.f32 %v1956_v14, %v1891_v41  ;;  %v1970_v62 = vadd.f32 %v1966_v56, %v1901_v15  ;;  %v1980_v49 = vadd.f32 %v1976_v30, %v1911_v21  ;;  %v1940_v22 = vsel %vm244_vm4, %v8868_v7, %v1930_v47 }
 0x2c0   :  { %2456 = vrot.lane.b32.xlu0 %v6432_v53, %s4463_s10  ;;  %2450 = vrot.lane.b32.xlu2 %v6488_v33, %s4462_s9  ;;  %v1949_v38 = vmul.f32 %v4307_v19, %v1942_v9  ;;  %v1959_v1 = vmul.f32 %v4308_v35, %v1942_v9  ;;  %v1969_v40 = vmul.f32 %v4309_v59, %v1942_v9 }
 0x2c1   :  { %2448 = vrot.lane.b32.xlu1 %v8867_v55, %s4462_s9  ;;  %v1947_v10 = vmul.f32 %v4307_v19, %v1940_v22  ;;  %v1957_v16 = vmul.f32 %v4308_v35, %v1940_v22  ;;  %v1967_v47 = vmul.f32 %v4309_v59, %v1940_v22  ;;  %v1977_v2 = vmul.f32 %v6663_v32, %v1940_v22 }
 0x2c2   :  { %v6727_v63 = vpop.permute.xlu0 %1988  ;;  %v6731_v8 = vpop.permute.xlu2 %2124  ;;  %v6741_v41 = vmul.f32 %v6663_v32, %v1941_v37  ;;  %v1963_v17 = vadd.f32 %v1959_v1, %v1894_v5  ;;  %v1979_v14 = vmul.f32 %v6663_v32, %v1942_v9  ;;  %v1973_v32 = vadd.f32 %v1969_v40, %v1904_v45 }
 0x2c3   :  { %v1985_v23 = vpop.permute.xlu1 %1984  ;;  %v1951_v37 = vadd.f32 %v1947_v10, %v6648_v36  ;;  %v1961_v30 = vadd.f32 %v1957_v16, %v6651_v61  ;;  %v1971_v15 = vadd.f32 %v1967_v47, %v6668_v50  ;;  %v8869_v36 = vld [vmem:[#allocation58_spill] sm:$0xff]  ;;  %v6780_v10 = vld [vmem:[#allocation2 + $0x22] sm:$0xff] }
 0x2c4   :  { %v2008_v54 = vsel %vm244_vm4, %v1985_v23, %v6618_v31  ;;  %v1953_v31 = vadd.f32 %v1949_v38, %v1884_v58  ;;  %v1981_v58 = vadd.f32 %v1977_v2, %v6671_v6  ;;  %8870 = vst [vmem:[#allocation61_spill] sm:$0xff] %v6780_v10  ;;  %v6782_v16 = vld [vmem:[#allocation2 + $0x2a] sm:$0xff] }
 0x2c5   :  { %v2015_v57 = vmul.f32 %v6698_v60, %v2008_v54  ;;  %v2025_v18 = vmul.f32 %v6703_v27, %v2008_v54  ;;  %v2035_v13 = vmul.f32 %v6714_v12, %v2008_v54  ;;  %v2045_v46 = vmul.f32 %v6719_v34, %v2008_v54  ;;  %8871 = vst [vmem:[#allocation53_spill] sm:$0xff] %v6782_v16 }
 0x2c7   :  { %v2019_v26 = vadd.f32 %v2015_v57, %v1950_v48  ;;  %v2029_v29 = vadd.f32 %v2025_v18, %v1960_v39  ;;  %v2039_v52 = vadd.f32 %v2035_v13, %v1970_v62  ;;  %v2049_v24 = vadd.f32 %v2045_v46, %v1980_v49 }
 0x2c8   :  { %2462 = vrot.lane.b32.xlu0 %v6488_v33, %s4463_s10  ;;  %2460 = vrot.lane.b32.xlu2 %v8867_v55, %s4463_s10 }
 0x2c9   :  { %v2053_v56 = vmax.f32 %v2019_v26, 0.0  ;;  %v2065_v19 = vmax.f32 %v2029_v29, 0.0  ;;  %v2078_v35 = vmax.f32 %v2039_v52, 0.0  ;;  %v2091_v59 = vmax.f32 %v2049_v24, 0.0  ;;  %2458 = vrot.lane.b32.xlu1 %v6425_v28, %s4463_s10  ;;  %v6788_v52 = vld [vmem:[#allocation2 + $0x32] sm:$0xff] }
 0x2ca   :  { %v1999_v21 = vpop.permute.xlu0 %1998  ;;  %v6754_v62 = vpop.permute.xlu2 %2178  ;;  %v1983_v28 = vadd.f32 %v1979_v14, %v1914_v44  ;;  %8872 = vst [vmem:[#allocation60_spill] sm:$0xff] %v6788_v52  ;;  %v1913_v24 = vadd.f32 %v6688_v4, %v6623_v20  ;;  %v1962_v20 = vadd.f32 %v6723_v3, %v6680_v43  ;;  %v1972_v4 = vadd.f32 %v6725_v11, %v6682_v25 }
 0x2cb   :  { %v2057_v5 = vmin.f32 %v2053_v56, 0.5  ;;  %v2069_v9 = vmin.f32 %v2065_v19, 0.5  ;;  %v2082_v48 = vmin.f32 %v2078_v35, 0.5  ;;  %v1991_v39 = vpop.permute.xlu1 %1990  ;;  %v2095_v49 = vmin.f32 %v2091_v59, 0.5 }
 0x2cc   :  { %v2011_v55 = vsel %vm244_vm4, %v1991_v39, %v6673_v0  ;;  %v2009_v61 = vsel %vm244_vm4, %v8869_v36, %v1999_v21 }
 0x2cd   :  { %2061 = vst [vmem:[%s8585_s3] sm:$0xff] %v2057_v5  ;;  %v2018_v50 = vmul.f32 %v6698_v60, %v2011_v55  ;;  %v2028_v6 = vmul.f32 %v6703_v27, %v2011_v55  ;;  %v2038_v45 = vmul.f32 %v6714_v12, %v2011_v55  ;;  %v2048_v7 = vmul.f32 %v6719_v34, %v2011_v55 }
 0x2ce   :  { %4068 = vst [vmem:[%s8585_s3 + $0x40] sm:$0xff] %v2069_v9  ;;  %v2016_v0 = vmul.f32 %v6698_v60, %v2009_v61  ;;  %v2026_v44 = vmul.f32 %v6703_v27, %v2009_v61  ;;  %v2036_v22 = vmul.f32 %v6714_v12, %v2009_v61  ;;  %v2046_v23 = vmul.f32 %v6719_v34, %v2009_v61 }
 0x2cf   :  { %4072 = vst [vmem:[%s8585_s3 + $0x80] sm:$0xff] %v2082_v48  ;;  %v2022_v38 = vadd.f32 %v2018_v50, %v1953_v31  ;;  %v2032_v1 = vadd.f32 %v2028_v6, %v1963_v17  ;;  %v2042_v40 = vadd.f32 %v2038_v45, %v1973_v32  ;;  %v2052_v54 = vadd.f32 %v2048_v7, %v1983_v28 }
 0x2d0   :  { %4076 = vst [vmem:[%s8585_s3 + $0xc0] sm:$0xff] %v2095_v49  ;;  %v2020_v57 = vadd.f32 %v2016_v0, %v1951_v37  ;;  %v2030_v18 = vadd.f32 %v2026_v44, %v1961_v30  ;;  %v2040_v13 = vadd.f32 %v2036_v22, %v1971_v15  ;;  %v2050_v46 = vadd.f32 %v2046_v23, %v1981_v58 }
 0x2d1   :  { %v2056_v47 = vmax.f32 %v2022_v38, 0.0  ;;  %v2068_v2 = vmax.f32 %v2032_v1, 0.0  ;;  %v2081_v26 = vmax.f32 %v2042_v40, 0.0  ;;  %v2094_v29 = vmax.f32 %v2052_v54, 0.0  ;;  %2520 = vrot.lane.b32.xlu1 %v6780_v10, %s4459_s2  ;;  %2522 = vrot.lane.b32.xlu2 %v6782_v16, %s4459_s2 }
 0x2d2   :  { %v2054_v31 = vmax.f32 %v2020_v57, 0.0  ;;  %v2066_v17 = vmax.f32 %v2030_v18, 0.0  ;;  %v2079_v14 = vmax.f32 %v2040_v13, 0.0  ;;  %2524 = vrot.lane.b32.xlu0 %v6788_v52, %s4459_s2  ;;  %v6794_v56 = vpop.permute.xlu0 %2120  ;;  %v2092_v37 = vmax.f32 %v2050_v46, 0.0  ;;  %v6796_v15 = vpop.permute.xlu2 %2188 }
 0x2d3   :  { %v2060_v19 = vmin.f32 %v2056_v47, 0.5  ;;  %v2072_v35 = vmin.f32 %v2068_v2, 0.5  ;;  %v2085_v59 = vmin.f32 %v2081_v26, 0.5  ;;  %v2001_v30 = vpop.permute.xlu1 %2000  ;;  %v1952_v32 = vadd.f32 %v6721_v42, %v6676_v51  ;;  %v6913_v47 = vld [vmem:[#allocation2 + $0x68] sm:$0xff] }
 0x2d4   :  { %v2098_v21 = vmin.f32 %v2094_v29, 0.5  ;;  %v1982_v58 = vadd.f32 %v6741_v41, %v1913_v24  ;;  %v2058_v5 = vmin.f32 %v2054_v31, 0.5  ;;  %v2070_v9 = vmin.f32 %v2066_v17, 0.5  ;;  %8875 = vst [vmem:[#allocation63_spill] sm:$0xff] %v6913_v47  ;;  %v6923_v24 = vld [vmem:[#allocation2 + $0x70] sm:$0xff] }
 0x2d5   :  { %2064 = vst [vmem:[%s8585_s3 + $0x18] sm:$0xff] %v2060_v19  ;;  %v2010_v48 = vsel %vm244_vm4, %v6727_v63, %v2001_v30  ;;  %v2083_v3 = vmin.f32 %v2079_v14, 0.5  ;;  %v2096_v11 = vmin.f32 %v2092_v37, 0.5  ;;  %v4319_v31 = vld [vmem:[%s8584_s0] ss:$0 sm:$0xff]  ;;  %v6931_v14 = vld [vmem:[#allocation2 + $0x78] sm:$0xff] }
 0x2d6   :  { %4071 = vst [vmem:[%s8585_s3 + $0x58] sm:$0xff] %v2072_v35  ;;  %v2017_v51 = vmul.f32 %v6698_v60, %v2010_v48  ;;  %v2027_v43 = vmul.f32 %v6703_v27, %v2010_v48  ;;  %v2037_v25 = vmul.f32 %v6714_v12, %v2010_v48  ;;  %v2047_v42 = vmul.f32 %v6719_v34, %v2010_v48  ;;  %v6826_v27 = vld [vmem:[#allocation2 + $0x3a] sm:$0xff]  ;;  %v4451_v19 = vld [vmem:[#allocation2 + $0x30] sm:$0xff] }
 0x2d7   :  { %4075 = vst [vmem:[%s8585_s3 + $0x98] sm:$0xff] %v2085_v59  ;;  %v4320_v17 = vld [vmem:[%s8584_s0 + $0x1] ss:$0 sm:$0xff]  ;;  %v2134_v35 = vsel %vm244_vm4, %v4451_v19, %v6731_v8  ;;  %v4321_v59 = vld [vmem:[%s8584_s0 + $0x2] ss:$0 sm:$0xff] }
 0x2d8   :  { %4079 = vst [vmem:[%s8585_s3 + $0xd8] sm:$0xff] %v2098_v21  ;;  %v2021_v63 = vadd.f32 %v2017_v51, %v1952_v32  ;;  %v2031_v41 = vadd.f32 %v2027_v43, %v1962_v20  ;;  %v2041_v39 = vadd.f32 %v2037_v25, %v1972_v4  ;;  %v2051_v60 = vadd.f32 %v2047_v42, %v1982_v58  ;;  %v6942_v37 = vld [vmem:[#allocation2 + $0x80] sm:$0xff]  ;;  %v4453_v25 = vld [vmem:[#allocation2 + $0x38] sm:$0xff] }
 0x2d9   :  { %2062 = vst [vmem:[%s8585_s3 + $0x8] sm:$0xff] %v2058_v5  ;;  %2526 = vrot.lane.b32.xlu1 %v6826_v27, %s4459_s2  ;;  %2576 = vrot.lane.b32.xlu2 %v6780_v10, %s4460_s16  ;;  %v4322_v32 = vld [vmem:[%s8584_s0 + $0x3] ss:$0 sm:$0xff]  ;;  %v2140_v58 = vmul.f32 %v4319_v31, %v2134_v35  ;;  %v2150_v5 = vmul.f32 %v4320_v17, %v2134_v35 }
 0x2da   :  { %8873 = vst [vmem:[#allocation57_spill] sm:$0xff] %v6826_v27  ;;  %v2055_v12 = vmax.f32 %v2021_v63, 0.0  ;;  %v2067_v34 = vmax.f32 %v2031_v41, 0.0  ;;  %v2080_v28 = vmax.f32 %v2041_v39, 0.0  ;;  %v2093_v49 = vmax.f32 %v2051_v60, 0.0  ;;  %v6835_v55 = vpop.permute.xlu0 %2126  ;;  %2578 = vrot.lane.b32.xlu0 %v6782_v16, %s4460_s16  ;;  %v6844_v61 = vpop.permute.xlu2 %2194  ;;  %v4454_v60 = vld [vmem:[#allocation2 + $0x28] sm:$0xff] }
 0x2db   :  { %4069 = vst [vmem:[%s8585_s3 + $0x48] sm:$0xff] %v2070_v9  ;;  %v6842_v36 = vpop.permute.xlu1 %2122  ;;  %v4315_v4 = vld [vmem:[%s8583_s1] ss:$0 sm:$0xff]  ;;  %v4316_v21 = vld [vmem:[%s8583_s1 + $0x1] ss:$0 sm:$0xff]  ;;  %v2160_v43 = vmul.f32 %v4321_v59, %v2134_v35  ;;  %v2135_v42 = vsel %vm244_vm4, %v4453_v25, %v6835_v55 }
 0x2dc   :  { %4073 = vst [vmem:[%s8585_s3 + $0x88] sm:$0xff] %v2083_v3  ;;  %v2059_v50 = vmin.f32 %v2055_v12, 0.5  ;;  %v2071_v6 = vmin.f32 %v2067_v34, 0.5  ;;  %v2084_v45 = vmin.f32 %v2080_v28, 0.5  ;;  %v2097_v7 = vmin.f32 %v2093_v49, 0.5  ;;  %v4452_v9 = vld [vmem:[#allocation2 + $0x20] sm:$0xff] }
 0x2dd   :  { %4077 = vst [vmem:[%s8585_s3 + $0xc8] sm:$0xff] %v2096_v11  ;;  %v2132_v48 = vsel %vm244_vm4, %v4452_v9, %v6794_v56  ;;  %v4317_v51 = vld [vmem:[%s8583_s1 + $0x2] ss:$0 sm:$0xff]  ;;  %v4318_v3 = vld [vmem:[%s8583_s1 + $0x3] ss:$0 sm:$0xff]  ;;  %v2170_v11 = vmul.f32 %v4322_v32, %v2134_v35  ;;  %v2133_v56 = vsel %vm244_vm4, %v4454_v60, %v6842_v36  ;;  %v6973_v12 = vadd.f32 %v4315_v4, %v2140_v58 }
 0x2de   :  { %2063 = vst [vmem:[%s8585_s3 + $0x10] sm:$0xff] %v2059_v50  ;;  %v2138_v63 = vmul.f32 %v4319_v31, %v2132_v48  ;;  %v2148_v41 = vmul.f32 %v4320_v17, %v2132_v48  ;;  %v2158_v39 = vmul.f32 %v4321_v59, %v2132_v48  ;;  %v6975_v34 = vadd.f32 %v4316_v21, %v2150_v5  ;;  %v4323_v58 = vld [vmem:[%s8584_s0 + $0x4] ss:$0 sm:$0xff] }
 0x2df   :  { %4070 = vst [vmem:[%s8585_s3 + $0x50] sm:$0xff] %v2071_v6  ;;  %v2168_v28 = vmul.f32 %v4322_v32, %v2132_v48  ;;  %v2141_v49 = vmul.f32 %v4319_v31, %v2135_v42  ;;  %v6977_v50 = vadd.f32 %v4317_v51, %v2160_v43  ;;  %v2151_v55 = vmul.f32 %v4320_v17, %v2135_v42 }
 0x2e0   :  { %4074 = vst [vmem:[%s8585_s3 + $0x90] sm:$0xff] %v2084_v45  ;;  %v2161_v6 = vmul.f32 %v4321_v59, %v2135_v42  ;;  %v2139_v36 = vmul.f32 %v4319_v31, %v2133_v56  ;;  %v2149_v19 = vmul.f32 %v4320_v17, %v2133_v56  ;;  %v2159_v35 = vmul.f32 %v4321_v59, %v2133_v56  ;;  %v4324_v17 = vld [vmem:[%s8584_s0 + $0x5] ss:$0 sm:$0xff]  ;;  %v4325_v59 = vld [vmem:[%s8584_s0 + $0x6] ss:$0 sm:$0xff] }
 0x2e1   :  { %4078 = vst [vmem:[%s8585_s3 + $0xd0] sm:$0xff] %v2097_v7  ;;  %2580 = vrot.lane.b32.xlu1 %v6788_v52, %s4460_s16  ;;  %2582 = vrot.lane.b32.xlu2 %v6826_v27, %s4460_s16  ;;  %v6985_v7 = vadd.f32 %v4318_v3, %v2170_v11  ;;  %v2142_v48 = vadd.f32 %v4315_v4, %v2138_v63  ;;  %v4326_v11 = vld [vmem:[%s8584_s0 + $0x7] ss:$0 sm:$0xff] }
 0x2e2   :  { %v6865_v0 = vpop.permute.xlu0 %2180  ;;  %2588 = vrot.lane.b32.xlu0 %v6780_v10, %s4461_s8  ;;  %v6871_v22 = vpop.permute.xlu2 %2248  ;;  %v2152_v43 = vadd.f32 %v4316_v21, %v2148_v41  ;;  %v2162_v25 = vadd.f32 %v4317_v51, %v2158_v39  ;;  %v2172_v60 = vadd.f32 %v4318_v3, %v2168_v28  ;;  %v2169_v63 = vmul.f32 %v4322_v32, %v2133_v56 }
 0x2e3   :  { %v6869_v44 = vpop.permute.xlu1 %2176  ;;  %v2145_v41 = vadd.f32 %v4315_v4, %v2141_v49 }
 0x2e4   :  { %v2200_v31 = vsel %vm244_vm4, %v6869_v44, %v6796_v15  ;;  %v2155_v15 = vadd.f32 %v4316_v21, %v2151_v55  ;;  %v2165_v44 = vadd.f32 %v4317_v51, %v2161_v6 }
 0x2e5   :  { %v2236_v28 = vmul.f32 %v4326_v11, %v2200_v31 }
 0x2e7   :  { %v7035_v55 = vadd.f32 %v2236_v28, %v2172_v60 }
 0x2e9   :  { %2590 = vrot.lane.b32.xlu1 %v6782_v16, %s4461_s8  ;;  %2592 = vrot.lane.b32.xlu2 %v6788_v52, %s4461_s8 }
 0x2ea   :  { %v6877_v23 = vpop.permute.xlu0 %2190  ;;  %2594 = vrot.lane.b32.xlu0 %v6826_v27, %s4461_s8  ;;  %v6883_v1 = vpop.permute.xlu2 %2258 }
 0x2eb   :  { %v6881_v38 = vpop.permute.xlu1 %2182  ;;  %v2201_v39 = vsel %vm244_vm4, %v6754_v62, %v6877_v23 }
 0x2ec   :  { %v2207_v56 = vmul.f32 %v4323_v58, %v2201_v39 }
 0x2f1   :  { %2644 = vrot.lane.b32.xlu1 %v6780_v10, %s4462_s9  ;;  %2646 = vrot.lane.b32.xlu2 %v6782_v16, %s4462_s9 }
 0x2f2   :  { %v6889_v40 = vpop.permute.xlu0 %2244  ;;  %2648 = vrot.lane.b32.xlu0 %v6788_v52, %s4462_s9  ;;  %v6895_v57 = vpop.permute.xlu2 %2320 }
 0x2f3   :  { %v6893_v54 = vpop.permute.xlu1 %2192 }
 0x2f9   :  { %2650 = vrot.lane.b32.xlu1 %v6826_v27, %s4462_s9  ;;  %2656 = vrot.lane.b32.xlu2 %v6780_v10, %s4463_s10  ;;  %v2143_v10 = vadd.f32 %v4315_v4, %v2139_v36 }
 0x2fa   :  { %v6901_v18 = vpop.permute.xlu0 %2250  ;;  %2658 = vrot.lane.b32.xlu0 %v6782_v16, %s4463_s10  ;;  %v6907_v46 = vpop.permute.xlu2 %2326  ;;  %v2163_v16 = vadd.f32 %v4317_v51, %v2159_v35  ;;  %v2237_v51 = vmul.f32 %v4326_v11, %v2201_v39 }
 0x2fb   :  { %8874 = vst [vmem:[#allocation64_spill] sm:$0xff] %v6901_v18  ;;  %v6905_v13 = vpop.permute.xlu1 %2246  ;;  %v2227_v18 = vmul.f32 %v4325_v59, %v2201_v39  ;;  %v2211_v6 = vadd.f32 %v2207_v56, %v2143_v10  ;;  %v2332_v10 = vsel %vm244_vm4, %v6432_v53, %v6895_v57  ;;  %v4332_v53 = vld [vmem:[%s8584_s0 + $0x9] ss:$0 sm:$0xff] }
 0x301   :  { %2660 = vrot.lane.b32.xlu1 %v6788_v52, %s4463_s10  ;;  %2662 = vrot.lane.b32.xlu2 %v6826_v27, %s4463_s10  ;;  %v2171_v27 = vmul.f32 %v4322_v32, %v2135_v42  ;;  %v2203_v52 = vsel %vm244_vm4, %v6881_v38, %v6844_v61  ;;  %v2202_v32 = vsel %vm244_vm4, %v6865_v0, %v6893_v54 }
 0x302   :  { %v6915_v2 = vpop.permute.xlu0 %2260  ;;  %2720 = vrot.lane.b32.xlu0 %v6913_v47, %s4459_s2  ;;  %v6921_v29 = vpop.permute.xlu2 %2380  ;;  %v2209_v49 = vmul.f32 %v4323_v58, %v2203_v52  ;;  %v2229_v62 = vmul.f32 %v4325_v59, %v2203_v52  ;;  %v2239_v23 = vmul.f32 %v4326_v11, %v2203_v52  ;;  %v2173_v38 = vadd.f32 %v4318_v3, %v2169_v63 }
 0x303   :  { %v6919_v26 = vpop.permute.xlu1 %2256  ;;  %8876 = vst [vmem:[#allocation65_spill] sm:$0xff] %v6921_v29  ;;  %v2216_v29 = vmul.f32 %v4324_v17, %v2200_v31  ;;  %v2175_v4 = vadd.f32 %v4318_v3, %v2171_v27  ;;  %v7040_v27 = vld [vmem:[%s8584_s0 + $0xc] ss:$0 sm:$0xff]  ;;  %v7045_v3 = vld [vmem:[%s8584_s0 + $0xd] ss:$0 sm:$0xff]  ;;  %v2208_v36 = vmul.f32 %v4323_v58, %v2202_v32 }
 0x304   :  { %v7060_v35 = vadd.f32 %v2209_v49, %v2145_v41  ;;  %v2241_v57 = vadd.f32 %v2237_v51, %v2173_v38  ;;  %v7084_v60 = vmul.f32 %v7040_v27, %v2332_v10  ;;  %v7087_v63 = vmul.f32 %v7045_v3, %v2332_v10 }
 0x305   :  { %v7031_v0 = vadd.f32 %v2216_v29, %v2152_v43  ;;  %v7050_v29 = vld [vmem:[%s8584_s0 + $0xe] ss:$0 sm:$0xff]  ;;  %v7064_v43 = vadd.f32 %v2229_v62, %v2165_v44 }
 0x309   :  { %2722 = vrot.lane.b32.xlu1 %v6923_v24, %s4459_s2  ;;  %2724 = vrot.lane.b32.xlu2 %v6931_v14, %s4459_s2 }
 0x30a   :  { %v6944_v30 = vpop.permute.xlu0 %2322  ;;  %2726 = vrot.lane.b32.xlu0 %v6942_v37, %s4459_s2  ;;  %v6953_v20 = vpop.permute.xlu2 %2390 }
 0x30b   :  { %8877 = vst [vmem:[#allocation54_spill] sm:$0xff] %v6944_v30  ;;  %v6951_v8 = vpop.permute.xlu1 %2262  ;;  %v2217_v30 = vmul.f32 %v4324_v17, %v2201_v39 }
 0x30c   :  { %8878 = vst [vmem:[#allocation67_spill] sm:$0xff] %v6953_v20  ;;  %v2226_v20 = vmul.f32 %v4325_v59, %v2200_v31 }
 0x30e   :  { %v7033_v54 = vadd.f32 %v2226_v20, %v2162_v25  ;;  %v7066_v25 = vadd.f32 %v2239_v23, %v2175_v4  ;;  %v8887_v23 = vld [vmem:[#allocation64_spill] sm:$0xff] }
 0x311   :  { %2776 = vrot.lane.b32.xlu1 %v6913_v47, %s4460_s16  ;;  %2778 = vrot.lane.b32.xlu2 %v6923_v24, %s4460_s16 }
 0x312   :  { %v6983_v45 = vpop.permute.xlu0 %2376  ;;  %2780 = vrot.lane.b32.xlu0 %v6931_v14, %s4460_s16  ;;  %v6994_v9 = vpop.permute.xlu2 %2444 }
 0x313   :  { %8879 = vst [vmem:[#allocation59_spill] sm:$0xff] %v6983_v45  ;;  %v6992_v5 = vpop.permute.xlu1 %2324  ;;  %v2206_v45 = vmul.f32 %v4323_v58, %v2200_v31  ;;  %v2269_v58 = vsel %vm244_vm4, %v6905_v13, %v6883_v1  ;;  %v2238_v31 = vmul.f32 %v4326_v11, %v2202_v32  ;;  %v2212_v1 = vadd.f32 %v2208_v36, %v6973_v12 }
 0x314   :  { %8880 = vst [vmem:[#allocation70_spill] sm:$0xff] %v6992_v5  ;;  %v2219_v5 = vmul.f32 %v4324_v17, %v2203_v52  ;;  %v2270_v11 = vsel %vm244_vm4, %v6871_v22, %v6915_v2  ;;  %v2285_v39 = vmul.f32 %v4332_v53, %v2269_v58 }
 0x315   :  { %8881 = vst [vmem:[#allocation62_spill] sm:$0xff] %v6994_v9  ;;  %v2153_v9 = vadd.f32 %v4316_v21, %v2149_v19  ;;  %v7023_v21 = vadd.f32 %v2206_v45, %v2142_v48  ;;  %v2231_v45 = vadd.f32 %v2227_v18, %v2163_v16  ;;  %v7058_v19 = vld [vmem:[%s8584_s0 + $0xf] ss:$0 sm:$0xff]  ;;  %v4331_v16 = vld [vmem:[%s8584_s0 + $0x8] ss:$0 sm:$0xff]  ;;  %v2218_v18 = vmul.f32 %v4324_v17, %v2202_v32 }
 0x316   :  { %v7062_v48 = vadd.f32 %v2219_v5, %v2155_v15  ;;  %v4333_v5 = vld [vmem:[%s8584_s0 + $0xa] ss:$0 sm:$0xff]  ;;  %v7090_v17 = vmul.f32 %v7050_v29, %v2332_v10  ;;  %v7094_v13 = vmul.f32 %v7058_v19, %v2332_v10  ;;  %v2275_v41 = vmul.f32 %v4331_v16, %v2269_v58 }
 0x317   :  { %v2221_v20 = vadd.f32 %v2217_v30, %v2153_v9  ;;  %v2228_v30 = vmul.f32 %v4325_v59, %v2202_v32  ;;  %v4334_v9 = vld [vmem:[%s8584_s0 + $0xb] ss:$0 sm:$0xff]  ;;  %v2335_v59 = vsel %vm244_vm4, %v6488_v33, %v6907_v46  ;;  %v2268_v15 = vsel %vm244_vm4, %v6889_v40, %v6919_v26 }
 0x318   :  { %v2222_v33 = vadd.f32 %v2218_v18, %v6975_v34  ;;  %v2295_v44 = vmul.f32 %v4333_v5, %v2269_v58  ;;  %v2305_v22 = vmul.f32 %v4334_v9, %v2269_v58  ;;  %v2242_v26 = vadd.f32 %v2238_v31, %v6985_v7 }
 0x319   :  { %2782 = vrot.lane.b32.xlu1 %v6942_v37, %s4460_s16  ;;  %2788 = vrot.lane.b32.xlu2 %v6913_v47, %s4461_s8  ;;  %v2232_v46 = vadd.f32 %v2228_v30, %v6977_v50  ;;  %v2341_v28 = vmul.f32 %v7040_v27, %v2335_v59  ;;  %v7122_v56 = vmul.f32 %v7045_v3, %v2335_v59 }
 0x31a   :  { %v7021_v61 = vpop.permute.xlu0 %2382  ;;  %2790 = vrot.lane.b32.xlu0 %v6923_v24, %s4461_s8  ;;  %v7029_v42 = vpop.permute.xlu2 %2450  ;;  %v2276_v49 = vmul.f32 %v4331_v16, %v2270_v11  ;;  %v2361_v34 = vmul.f32 %v7050_v29, %v2335_v59  ;;  %v7126_v50 = vmul.f32 %v7058_v19, %v2335_v59  ;;  %v2274_v62 = vmul.f32 %v4331_v16, %v2268_v15 }
 0x31b   :  { %8882 = vst [vmem:[#allocation68_spill] sm:$0xff] %v7021_v61  ;;  %v7027_v52 = vpop.permute.xlu1 %2378  ;;  %v2271_v32 = vsel %vm244_vm4, %v8887_v23, %v6951_v8  ;;  %v2279_v38 = vadd.f32 %v2275_v41, %v2211_v6  ;;  %v2289_v4 = vadd.f32 %v2285_v39, %v2221_v20  ;;  %v2284_v51 = vmul.f32 %v4332_v53, %v2268_v15  ;;  %v4455_v61 = vld [vmem:[#allocation2 + $0x29] sm:$0xff] }
 0x31c   :  { %8883 = vst [vmem:[#allocation73_spill] sm:$0xff] %v7029_v42  ;;  %v2294_v7 = vmul.f32 %v4333_v5, %v2268_v15  ;;  %v2299_v36 = vadd.f32 %v2295_v44, %v2231_v45  ;;  %v2309_v10 = vadd.f32 %v2305_v22, %v2241_v57  ;;  %v2304_v18 = vmul.f32 %v4334_v9, %v2268_v15 }
 0x31d   :  { %8886 = vst [vmem:[#allocation77_spill] sm:$0xff] %v7126_v50  ;;  %v2286_v30 = vmul.f32 %v4332_v53, %v2270_v11  ;;  %v2280_v58 = vadd.f32 %v2276_v49, %v2212_v1  ;;  %v2296_v31 = vmul.f32 %v4333_v5, %v2270_v11  ;;  %v2277_v42 = vmul.f32 %v4331_v16, %v2271_v32 }
 0x31e   :  { %v2306_v50 = vmul.f32 %v4334_v9, %v2270_v11  ;;  %v2297_v8 = vmul.f32 %v4333_v5, %v2271_v32  ;;  %v2288_v6 = vadd.f32 %v2284_v51, %v7031_v0  ;;  %v2298_v20 = vadd.f32 %v2294_v7, %v7033_v54  ;;  %v4456_v11 = vld [vmem:[#allocation2 + $0x31] sm:$0xff] }
 0x31f   :  { %v2307_v45 = vmul.f32 %v4334_v9, %v2271_v32  ;;  %v2290_v57 = vadd.f32 %v2286_v30, %v2222_v33  ;;  %v2281_v5 = vadd.f32 %v2277_v42, %v7060_v35  ;;  %v2300_v39 = vadd.f32 %v2296_v31, %v2232_v46  ;;  %v7166_v46 = vld [vmem:[%s8584_s0 + $0x10] ss:$0 sm:$0xff]  ;;  %v8893_v51 = vld [vmem:[#allocation59_spill] sm:$0xff] }
 0x320   :  { %v2310_v15 = vadd.f32 %v2306_v50, %v2242_v26  ;;  %v2301_v44 = vadd.f32 %v2297_v8, %v7064_v43  ;;  %v2352_v42 = vadd.f32 %v7087_v63, %v2288_v6  ;;  %v2362_v35 = vadd.f32 %v7090_v17, %v2298_v20  ;;  %v7185_v17 = vld [vmem:[%s8584_s0 + $0x13] ss:$0 sm:$0xff]  ;;  %v8891_v26 = vld [vmem:[#allocation65_spill] sm:$0xff] }
 0x321   :  { %2792 = vrot.lane.b32.xlu1 %v6931_v14, %s4461_s8  ;;  %2794 = vrot.lane.b32.xlu2 %v6942_v37, %s4461_s8  ;;  %v2311_v22 = vadd.f32 %v2307_v45, %v7066_v25 }
 0x322   :  { %v7109_v12 = vpop.permute.xlu0 %2392  ;;  %2844 = vrot.lane.b32.xlu0 %v6913_v47, %s4462_s9  ;;  %v7117_v40 = vpop.permute.xlu2 %2460  ;;  %v2278_v47 = vadd.f32 %v2274_v62, %v7023_v21 }
 0x323   :  { %v7115_v2 = vpop.permute.xlu1 %2388  ;;  %8885 = vst [vmem:[#allocation76_spill] sm:$0xff] %v7117_v40  ;;  %v8888_v40 = vld [vmem:[#allocation54_spill] sm:$0xff]  ;;  %v2402_v50 = vsel %vm244_vm4, %v8891_v26, %v7109_v12 }
 0x324   :  { %8884 = vst [vmem:[#allocation69_spill] sm:$0xff] %v7115_v2  ;;  %v2333_v59 = vsel %vm244_vm4, %v4455_v61, %v8888_v40  ;;  %v2287_v2 = vmul.f32 %v4332_v53, %v2271_v32  ;;  %v2308_v61 = vadd.f32 %v2304_v18, %v7035_v55  ;;  %v8889_v55 = vld [vmem:[#allocation70_spill] sm:$0xff]  ;;  %v2342_v40 = vadd.f32 %v7084_v60, %v2278_v47  ;;  %v8890_v60 = vld [vmem:[#allocation67_spill] sm:$0xff] }
 0x325   :  { %v2339_v21 = vmul.f32 %v7040_v27, %v2333_v59  ;;  %v2349_v53 = vmul.f32 %v7045_v3, %v2333_v59  ;;  %v2359_v9 = vmul.f32 %v7050_v29, %v2333_v59  ;;  %v2369_v1 = vmul.f32 %v7058_v19, %v2333_v59  ;;  %v7265_v26 = vld [vmem:[#allocation2 + $0x69] sm:$0xff] }
 0x326   :  { %v2334_v41 = vsel %vm244_vm4, %v4456_v11, %v8889_v55  ;;  %v2291_v33 = vadd.f32 %v2287_v2, %v7062_v48  ;;  %v7171_v48 = vld [vmem:[%s8584_s0 + $0x11] ss:$0 sm:$0xff]  ;;  %v2372_v47 = vadd.f32 %v7094_v13, %v2308_v61  ;;  %v2401_v63 = vsel %vm244_vm4, %v7027_v52, %v8890_v60 }
 0x327   :  { %v2343_v49 = vadd.f32 %v2339_v21, %v2279_v38  ;;  %v2353_v62 = vadd.f32 %v2349_v53, %v2289_v4  ;;  %v2340_v23 = vmul.f32 %v7040_v27, %v2334_v41  ;;  %v2363_v43 = vadd.f32 %v2359_v9, %v2299_v36  ;;  %v7180_v27 = vld [vmem:[%s8584_s0 + $0x12] ss:$0 sm:$0xff]  ;;  %v8894_v36 = vld [vmem:[#allocation77_spill] sm:$0xff] }
 0x328   :  { %v2373_v25 = vadd.f32 %v2369_v1, %v2309_v10  ;;  %v7187_v2 = vadd.f32 %v2341_v28, %v2281_v5  ;;  %v2350_v13 = vmul.f32 %v7045_v3, %v2334_v41  ;;  %v7194_v52 = vadd.f32 %v7122_v56, %v2291_v33  ;;  %v8895_v3 = vld [vmem:[#allocation63_spill] sm:$0xff] }
 0x329   :  { %2846 = vrot.lane.b32.xlu1 %v6923_v24, %s4462_s9  ;;  %2848 = vrot.lane.b32.xlu2 %v6931_v14, %s4462_s9  ;;  %v7196_v32 = vadd.f32 %v2361_v34, %v2301_v44  ;;  %v2360_v38 = vmul.f32 %v7050_v29, %v2334_v41  ;;  %v7203_v28 = vadd.f32 %v8894_v36, %v2311_v22  ;;  %v8897_v22 = vld [vmem:[#allocation68_spill] sm:$0xff]  ;;  %v8899_v36 = vld [vmem:[#allocation62_spill] sm:$0xff] }
 0x32a   :  { %v7140_v16 = vpop.permute.xlu0 %2446  ;;  %2850 = vrot.lane.b32.xlu0 %v6942_v37, %s4462_s9  ;;  %v2344_v56 = vadd.f32 %v2340_v23, %v2280_v58  ;;  %v2370_v34 = vmul.f32 %v7058_v19, %v2334_v41  ;;  %v2407_v10 = vmul.f32 %v7166_v46, %v2401_v63  ;;  %v2417_v29 = vmul.f32 %v7171_v48, %v2401_v63  ;;  %v8896_v8 = vld [vmem:[#allocation76_spill] sm:$0xff] }
 0x32b   :  { %v7147_v0 = vpop.permute.xlu1 %2394  ;;  %v7149_v54 = vpop.permute.xlu2 %2522  ;;  %v8892_v4 = vld [vmem:[#allocation69_spill] sm:$0xff]  ;;  %v2427_v30 = vmul.f32 %v7180_v27, %v2401_v63  ;;  %v2437_v31 = vmul.f32 %v7185_v17, %v2401_v63  ;;  %v2408_v59 = vmul.f32 %v7166_v46, %v2402_v50  ;;  %v2354_v19 = vadd.f32 %v2350_v13, %v2290_v57  ;;  %v7258_v63 = vld [vmem:[%s8584_s0 + $0x1b] ss:$0 sm:$0xff]  ;;  %v7263_v13 = vld [vmem:[%s8584_s0 + $0x14] ss:$0 sm:$0xff] }
 0x32c   :  { %v2400_v7 = vsel %vm244_vm4, %v8893_v51, %v8892_v4  ;;  %v2418_v45 = vmul.f32 %v7171_v48, %v2402_v50  ;;  %v2428_v61 = vmul.f32 %v7180_v27, %v2402_v50  ;;  %v2364_v21 = vadd.f32 %v2360_v38, %v2300_v39  ;;  %v7238_v39 = vld [vmem:[%s8584_s0 + $0x18] ss:$0 sm:$0xff]  ;;  %v7270_v4 = vld [vmem:[%s8584_s0 + $0x15] ss:$0 sm:$0xff] }
 0x32d   :  { %v2406_v20 = vmul.f32 %v7166_v46, %v2400_v7  ;;  %v2416_v53 = vmul.f32 %v7171_v48, %v2400_v7  ;;  %v2426_v5 = vmul.f32 %v7180_v27, %v2400_v7  ;;  %v2436_v9 = vmul.f32 %v7185_v17, %v2400_v7  ;;  %v7281_v51 = vld [vmem:[#allocation2 + $0x71] sm:$0xff] }
 0x32e   :  { %v2374_v1 = vadd.f32 %v2370_v34, %v2310_v15  ;;  %v2411_v11 = vadd.f32 %v2407_v10, %v2343_v49  ;;  %v2421_v55 = vadd.f32 %v2417_v29, %v2353_v62  ;;  %v2438_v41 = vmul.f32 %v7185_v17, %v2402_v50  ;;  %v7243_v15 = vld [vmem:[%s8584_s0 + $0x19] ss:$0 sm:$0xff]  ;;  %v7248_v49 = vld [vmem:[%s8584_s0 + $0x1a] ss:$0 sm:$0xff]  ;;  %v7289_v7 = vld [vmem:[%s8584_s0 + $0x17] ss:$0 sm:$0xff] }
 0x32f   :  { %v2431_v33 = vadd.f32 %v2427_v30, %v2363_v43  ;;  %v2441_v57 = vadd.f32 %v2437_v31, %v2373_v25  ;;  %v7230_v44 = vadd.f32 %v2408_v59, %v2344_v56  ;;  %v2403_v23 = vsel %vm244_vm4, %v8897_v22, %v7147_v0  ;;  %v8898_v0 = vld [vmem:[#allocation53_spill] sm:$0xff] }
 0x330   :  { %v2410_v62 = vadd.f32 %v2406_v20, %v2342_v40  ;;  %v2422_v43 = vadd.f32 %v2418_v45, %v2354_v19  ;;  %v7250_v25 = vadd.f32 %v2428_v61, %v2364_v21  ;;  %v2533_v60 = vsel %vm244_vm4, %v8898_v0, %v7149_v54  ;;  %v7275_v54 = vld [vmem:[%s8584_s0 + $0x16] ss:$0 sm:$0xff]  ;;  %v8900_v10 = vld [vmem:[#allocation73_spill] sm:$0xff] }
 0x331   :  { %2856 = vrot.lane.b32.xlu1 %v8895_v3, %s4463_s10  ;;  %2858 = vrot.lane.b32.xlu2 %v6923_v24, %s4463_s10  ;;  %v2420_v40 = vadd.f32 %v2416_v53, %v2352_v42  ;;  %v2430_v50 = vadd.f32 %v2426_v5, %v2362_v35  ;;  %v2440_v38 = vadd.f32 %v2436_v9, %v2372_v47 }
 0x332   :  { %v2457_v12 = vpop.permute.xlu0 %2456  ;;  %2860 = vrot.lane.b32.xlu0 %v6931_v14, %s4463_s10  ;;  %v2442_v35 = vadd.f32 %v2438_v41, %v2374_v1  ;;  %v7284_v47 = vmul.f32 %v7166_v46, %v2403_v23  ;;  %v2549_v46 = vmul.f32 %v7243_v15, %v2533_v60  ;;  %v2559_v30 = vmul.f32 %v7248_v49, %v2533_v60 }
 0x333   :  { %v2449_v18 = vpop.permute.xlu1 %2448  ;;  %v7221_v58 = vpop.permute.xlu2 %2576  ;;  %v2468_v56 = vsel %vm244_vm4, %v8899_v36, %v2457_v12  ;;  %v2569_v45 = vmul.f32 %v7258_v63, %v2533_v60  ;;  %v2419_v41 = vmul.f32 %v7171_v48, %v2403_v23  ;;  %v7322_v36 = vld [vmem:[#allocation2 + $0x81] sm:$0xff]  ;;  %v2429_v48 = vmul.f32 %v7180_v27, %v2403_v23 }
 0x334   :  { %v7219_v6 = vsel %vm244_vm4, %v2449_v18, %v8896_v8  ;;  %v2539_v18 = vmul.f32 %v7238_v39, %v2533_v60  ;;  %v2474_v61 = vmul.f32 %v7263_v13, %v2468_v56  ;;  %v2484_v21 = vmul.f32 %v7270_v4, %v2468_v56 }
 0x335   :  { %v2494_v53 = vmul.f32 %v7275_v54, %v2468_v56  ;;  %v2476_v22 = vmul.f32 %v7263_v13, %v7219_v6  ;;  %v2486_v0 = vmul.f32 %v7270_v4, %v7219_v6  ;;  %v2504_v60 = vmul.f32 %v7289_v7, %v2468_v56 }
 0x336   :  { %v2506_v56 = vmul.f32 %v7289_v7, %v7219_v6 }
 0x339   :  { %2862 = vrot.lane.b32.xlu1 %v6942_v37, %s4463_s10  ;;  %2920 = vrot.lane.b32.xlu2 %v7265_v26, %s4459_s2 }
 0x33a   :  { %v2463_v42 = vpop.permute.xlu0 %2462  ;;  %2922 = vrot.lane.b32.xlu0 %v7281_v51, %s4459_s2 }
 0x33b   :  { %v2459_v34 = vpop.permute.xlu1 %2458  ;;  %v7297_v29 = vsel %vm244_vm4, %v8900_v10, %v2463_v42  ;;  %v7304_v59 = vpop.permute.xlu2 %2582  ;;  %v7320_v42 = vld [vmem:[#allocation2 + $0x79] sm:$0xff]  ;;  %v2439_v10 = vmul.f32 %v7185_v17, %v2403_v23 }
 0x33c   :  { %v2469_v31 = vsel %vm244_vm4, %v7140_v16, %v2459_v34 }
 0x33d   :  { %v2475_v12 = vmul.f32 %v7263_v13, %v2469_v31  ;;  %v2485_v8 = vmul.f32 %v7270_v4, %v2469_v31  ;;  %v2495_v19 = vmul.f32 %v7275_v54, %v2469_v31  ;;  %v2505_v20 = vmul.f32 %v7289_v7, %v2469_v31 }
 0x33e   :  { %v2480_v31 = vadd.f32 %v2476_v22, %v7230_v44  ;;  %v2477_v44 = vmul.f32 %v7263_v13, %v7297_v29  ;;  %v2413_v13 = vadd.f32 %v7284_v47, %v7187_v2  ;;  %v2487_v22 = vmul.f32 %v7270_v4, %v7297_v29 }
 0x33f   :  { %v2479_v5 = vadd.f32 %v2475_v12, %v2411_v11  ;;  %v2489_v16 = vadd.f32 %v2485_v8, %v2421_v55  ;;  %v2499_v9 = vadd.f32 %v2495_v19, %v2431_v33  ;;  %v2509_v1 = vadd.f32 %v2505_v20, %v2441_v57 }
 0x340   :  { %v2496_v57 = vmul.f32 %v7275_v54, %v7219_v6  ;;  %v2490_v12 = vadd.f32 %v2486_v0, %v2422_v43  ;;  %v2508_v8 = vadd.f32 %v2504_v60, %v2440_v38  ;;  %v8901_v6 = vld [vmem:[#allocation61_spill] sm:$0xff]  ;;  %v8902_v43 = vld [vmem:[#allocation60_spill] sm:$0xff]  ;;  %v2497_v0 = vmul.f32 %v7275_v54, %v7297_v29 }
 0x341   :  { %v7324_v34 = vadd.f32 %v2539_v18, %v2479_v5  ;;  %v7326_v11 = vadd.f32 %v2549_v46, %v2489_v16  ;;  %v7328_v55 = vadd.f32 %v2559_v30, %v2499_v9  ;;  %v7330_v33 = vadd.f32 %v2569_v45, %v2509_v1  ;;  %2924 = vrot.lane.b32.xlu1 %v7320_v42, %s4459_s2 }
 0x342   :  { %2926 = vrot.lane.b32.xlu2 %v7322_v36, %s4459_s2  ;;  %v2478_v18 = vadd.f32 %v2474_v61, %v2410_v62  ;;  %v2488_v46 = vadd.f32 %v2484_v21, %v2420_v40  ;;  %v2498_v30 = vadd.f32 %v2494_v53, %v2430_v50  ;;  %2976 = vrot.lane.b32.xlu0 %v7265_v26, %s4460_s16 }
 0x343   :  { %v2521_v27 = vpop.permute.xlu1 %2520  ;;  %v2593_v20 = vpop.permute.xlu2 %2592  ;;  %v2500_v40 = vadd.f32 %v2496_v57, %v7250_v25  ;;  %v2510_v50 = vadd.f32 %v2506_v56, %v2442_v35  ;;  %v2507_v60 = vmul.f32 %v7289_v7, %v7297_v29  ;;  %v2433_v2 = vadd.f32 %v2429_v48, %v7196_v32 }
 0x344   :  { %v2532_v19 = vsel %vm244_vm4, %v8901_v6, %v2521_v27  ;;  %v2525_v45 = vpop.permute.xlu0 %2524  ;;  %v2443_v47 = vadd.f32 %v2439_v10, %v7203_v28  ;;  %v2481_v4 = vadd.f32 %v2477_v44, %v2413_v13 }
 0x345   :  { %v2538_v5 = vmul.f32 %v7238_v39, %v2532_v19  ;;  %v2548_v17 = vmul.f32 %v7243_v15, %v2532_v19  ;;  %v2558_v23 = vmul.f32 %v7248_v49, %v2532_v19  ;;  %v2568_v62 = vmul.f32 %v7258_v63, %v2532_v19 }
 0x346   :  { %v2534_v38 = vsel %vm244_vm4, %v8902_v43, %v2525_v45  ;;  %v2501_v27 = vadd.f32 %v2497_v0, %v2433_v2 }
 0x347   :  { %v7356_v61 = vadd.f32 %v2538_v5, %v2478_v18  ;;  %v7358_v21 = vadd.f32 %v2548_v17, %v2488_v46  ;;  %v7360_v53 = vadd.f32 %v2558_v23, %v2498_v30  ;;  %v7362_v16 = vadd.f32 %v2568_v62, %v2508_v8  ;;  %v4347_v5 = vld [vmem:[%s8584_s0 + $0x1c] ss:$0 sm:$0xff] }
 0x348   :  { %v2540_v9 = vmul.f32 %v7238_v39, %v2534_v38  ;;  %v2550_v1 = vmul.f32 %v7243_v15, %v2534_v38  ;;  %v2560_v25 = vmul.f32 %v7248_v49, %v2534_v38  ;;  %v2570_v35 = vmul.f32 %v7258_v63, %v2534_v38 }
 0x349   :  { %2978 = vrot.lane.b32.xlu1 %v7281_v51, %s4460_s16  ;;  %v2423_v30 = vadd.f32 %v2419_v41, %v7194_v52 }
 0x34a   :  { %v2544_v57 = vadd.f32 %v2540_v9, %v2480_v31  ;;  %v2554_v56 = vadd.f32 %v2550_v1, %v2490_v12  ;;  %v2564_v18 = vadd.f32 %v2560_v25, %v2500_v40  ;;  %v2574_v46 = vadd.f32 %v2570_v35, %v2510_v50  ;;  %2980 = vrot.lane.b32.xlu2 %v7320_v42, %s4460_s16  ;;  %v8903_v12 = vld [vmem:[#allocation57_spill] sm:$0xff] }
 0x34b   :  { %2982 = vrot.lane.b32.xlu0 %v7322_v36, %s4460_s16  ;;  %v2527_v54 = vpop.permute.xlu1 %2526  ;;  %v7385_v7 = vpop.permute.xlu2 %2646  ;;  %v2491_v29 = vadd.f32 %v2487_v22, %v2423_v30  ;;  %v2511_v31 = vadd.f32 %v2507_v60, %v2443_v47 }
 0x34c   :  { %v2535_v52 = vsel %vm244_vm4, %v8903_v12, %v2527_v54  ;;  %v2579_v41 = vpop.permute.xlu0 %2578 }
 0x34d   :  { %v2541_v32 = vmul.f32 %v7238_v39, %v2535_v52  ;;  %v2551_v28 = vmul.f32 %v7243_v15, %v2535_v52  ;;  %v2561_v48 = vmul.f32 %v7248_v49, %v2535_v52  ;;  %v2571_v10 = vmul.f32 %v7258_v63, %v2535_v52  ;;  %v4348_v39 = vld [vmem:[%s8584_s0 + $0x1d] ss:$0 sm:$0xff]  ;;  %v4349_v15 = vld [vmem:[%s8584_s0 + $0x1e] ss:$0 sm:$0xff]  ;;  %v4350_v49 = vld [vmem:[%s8584_s0 + $0x1f] ss:$0 sm:$0xff] }
 0x34f   :  { %v2545_v8 = vadd.f32 %v2541_v32, %v2481_v4  ;;  %v2555_v6 = vadd.f32 %v2551_v28, %v2491_v29  ;;  %v2565_v19 = vadd.f32 %v2561_v48, %v2501_v27  ;;  %v2575_v45 = vadd.f32 %v2571_v10, %v2511_v31  ;;  %v7442_v32 = vld [vmem:[%s8584_s0 + $0x20] ss:$0 sm:$0xff] }
 0x351   :  { %2988 = vrot.lane.b32.xlu1 %v7265_v26, %s4461_s8 }
 0x352   :  { %2990 = vrot.lane.b32.xlu2 %v7281_v51, %s4461_s8 }
 0x353   :  { %2992 = vrot.lane.b32.xlu0 %v7320_v42, %s4461_s8  ;;  %v2581_v63 = vpop.permute.xlu1 %2580  ;;  %v2657_v17 = vpop.permute.xlu2 %2656 }
 0x354   :  { %v2602_v23 = vsel %vm244_vm4, %v2581_v63, %v2593_v20  ;;  %v2589_v62 = vpop.permute.xlu0 %2588 }
 0x355   :  { %v2608_v40 = vmul.f32 %v4347_v5, %v2602_v23  ;;  %v2618_v50 = vmul.f32 %v4348_v39, %v2602_v23  ;;  %v2628_v44 = vmul.f32 %v4349_v15, %v2602_v23  ;;  %v2638_v43 = vmul.f32 %v4350_v49, %v2602_v23 }
 0x356   :  { %v2600_v38 = vsel %vm244_vm4, %v7221_v58, %v2589_v62 }
 0x357   :  { %v7414_v9 = vadd.f32 %v2608_v40, %v2544_v57  ;;  %v7416_v1 = vadd.f32 %v2618_v50, %v2554_v56  ;;  %v7418_v25 = vadd.f32 %v2628_v44, %v2564_v18  ;;  %v7420_v35 = vadd.f32 %v2638_v43, %v2574_v46 }
 0x358   :  { %v2606_v13 = vmul.f32 %v4347_v5, %v2600_v38  ;;  %v2616_v22 = vmul.f32 %v4348_v39, %v2600_v38  ;;  %v2626_v0 = vmul.f32 %v4349_v15, %v2600_v38  ;;  %v2636_v20 = vmul.f32 %v4350_v49, %v2600_v38 }
 0x359   :  { %2994 = vrot.lane.b32.xlu1 %v7322_v36, %s4461_s8 }
 0x35a   :  { %v2610_v60 = vadd.f32 %v2606_v13, %v7356_v61  ;;  %v2620_v30 = vadd.f32 %v2616_v22, %v7358_v21  ;;  %v2630_v58 = vadd.f32 %v2626_v0, %v7360_v53  ;;  %v2640_v57 = vadd.f32 %v2636_v20, %v7362_v16  ;;  %3044 = vrot.lane.b32.xlu2 %v7265_v26, %s4462_s9 }
 0x35b   :  { %3046 = vrot.lane.b32.xlu0 %v7281_v51, %s4462_s9  ;;  %v2591_v56 = vpop.permute.xlu1 %2590  ;;  %v2663_v18 = vpop.permute.xlu2 %2662 }
 0x35c   :  { %v2601_v46 = vsel %vm244_vm4, %v2579_v41, %v2591_v56  ;;  %v2595_v2 = vpop.permute.xlu0 %2594 }
 0x35d   :  { %v2607_v47 = vmul.f32 %v4347_v5, %v2601_v46  ;;  %v2617_v4 = vmul.f32 %v4348_v39, %v2601_v46  ;;  %v2627_v61 = vmul.f32 %v4349_v15, %v2601_v46  ;;  %v2637_v54 = vmul.f32 %v4350_v49, %v2601_v46 }
 0x35e   :  { %v2603_v21 = vsel %vm244_vm4, %v7304_v59, %v2595_v2  ;;  %v4352_v59 = vld [vmem:[%s8584_s0 + $0x21] ss:$0 sm:$0xff] }
 0x35f   :  { %v2611_v53 = vadd.f32 %v2607_v47, %v7324_v34  ;;  %v2621_v16 = vadd.f32 %v2617_v4, %v7326_v11  ;;  %v2631_v29 = vadd.f32 %v2627_v61, %v7328_v55  ;;  %v2641_v27 = vadd.f32 %v2637_v54, %v7330_v33  ;;  %v4353_v34 = vld [vmem:[%s8584_s0 + $0x22] ss:$0 sm:$0xff]  ;;  %v4354_v11 = vld [vmem:[%s8584_s0 + $0x23] ss:$0 sm:$0xff]  ;;  %v7495_v47 = vld [vmem:[#allocation2 + $0x6a] sm:$0xff] }
 0x360   :  { %v2609_v31 = vmul.f32 %v4347_v5, %v2603_v21  ;;  %v2619_v12 = vmul.f32 %v4348_v39, %v2603_v21  ;;  %v2629_v52 = vmul.f32 %v4349_v15, %v2603_v21  ;;  %v2639_v41 = vmul.f32 %v4350_v49, %v2603_v21  ;;  %v7501_v4 = vld [vmem:[#allocation2 + $0x72] sm:$0xff]  ;;  %v7503_v61 = vld [vmem:[#allocation2 + $0x7a] sm:$0xff]  ;;  %v4356_v54 = vld [vmem:[%s8584_s0 + $0x25] ss:$0 sm:$0xff] }
 0x361   :  { %3048 = vrot.lane.b32.xlu1 %v7320_v42, %s4462_s9  ;;  %v4357_v21 = vld [vmem:[%s8584_s0 + $0x26] ss:$0 sm:$0xff] }
 0x362   :  { %v2613_v55 = vadd.f32 %v2609_v31, %v2545_v8  ;;  %v2623_v33 = vadd.f32 %v2619_v12, %v2555_v6  ;;  %v2633_v28 = vadd.f32 %v2629_v52, %v2565_v19  ;;  %v2643_v48 = vadd.f32 %v2639_v41, %v2575_v45  ;;  %3050 = vrot.lane.b32.xlu2 %v7322_v36, %s4462_s9  ;;  %v4358_v31 = vld [vmem:[%s8584_s0 + $0x27] ss:$0 sm:$0xff] }
 0x363   :  { %3056 = vrot.lane.b32.xlu0 %v7265_v26, %s4463_s10  ;;  %v2645_v10 = vpop.permute.xlu1 %2644  ;;  %v2725_v5 = vpop.permute.xlu2 %2724 }
 0x364   :  { %v2668_v39 = vsel %vm244_vm4, %v2645_v10, %v2657_v17  ;;  %v2649_v15 = vpop.permute.xlu0 %2648 }
 0x365   :  { %v2674_v49 = vmul.f32 %v7442_v32, %v2668_v39  ;;  %v2684_v63 = vmul.f32 %v4352_v59, %v2668_v39  ;;  %v2694_v23 = vmul.f32 %v4353_v34, %v2668_v39  ;;  %v2704_v62 = vmul.f32 %v4354_v11, %v2668_v39 }
 0x367   :  { %v7461_v8 = vadd.f32 %v2674_v49, %v2610_v60  ;;  %v7463_v6 = vadd.f32 %v2684_v63, %v2620_v30  ;;  %v7465_v19 = vadd.f32 %v2694_v23, %v2630_v58  ;;  %v7467_v45 = vadd.f32 %v2704_v62, %v2640_v57  ;;  %v7492_v57 = vld [vmem:[%s8584_s0 + $0x24] ss:$0 sm:$0xff] }
 0x369   :  { %3058 = vrot.lane.b32.xlu1 %v7281_v51, %s4463_s10 }
 0x36a   :  { %3060 = vrot.lane.b32.xlu2 %v7320_v42, %s4463_s10 }
 0x36b   :  { %3062 = vrot.lane.b32.xlu0 %v7322_v36, %s4463_s10  ;;  %v2651_v17 = vpop.permute.xlu1 %2650  ;;  %v7475_v40 = vpop.permute.xlu2 %2778 }
 0x36c   :  { %v2671_v50 = vsel %vm244_vm4, %v2651_v17, %v2663_v18  ;;  %v2659_v44 = vpop.permute.xlu0 %2658 }
 0x36d   :  { %v2677_v43 = vmul.f32 %v7442_v32, %v2671_v50  ;;  %v2687_v38 = vmul.f32 %v4352_v59, %v2671_v50  ;;  %v2697_v13 = vmul.f32 %v4353_v34, %v2671_v50  ;;  %v2707_v22 = vmul.f32 %v4354_v11, %v2671_v50 }
 0x36e   :  { %v2669_v0 = vsel %vm244_vm4, %v7385_v7, %v2659_v44  ;;  %v2734_v7 = vsel %vm244_vm4, %v6931_v14, %v2725_v5 }
 0x36f   :  { %v7481_v20 = vadd.f32 %v2677_v43, %v2613_v55  ;;  %v7483_v60 = vadd.f32 %v2687_v38, %v2623_v33  ;;  %v7485_v30 = vadd.f32 %v2697_v13, %v2633_v28  ;;  %v7487_v58 = vadd.f32 %v2707_v22, %v2643_v48 }
 0x370   :  { %v2675_v56 = vmul.f32 %v7442_v32, %v2669_v0  ;;  %v2685_v18 = vmul.f32 %v4352_v59, %v2669_v0  ;;  %v2695_v46 = vmul.f32 %v4353_v34, %v2669_v0  ;;  %v2705_v2 = vmul.f32 %v4354_v11, %v2669_v0 }
 0x371   :  { %3120 = vrot.lane.b32.xlu1 %v7495_v47, %s4459_s2  ;;  %v2740_v28 = vmul.f32 %v7492_v57, %v2734_v7  ;;  %v2760_v39 = vmul.f32 %v4357_v21, %v2734_v7  ;;  %v2770_v49 = vmul.f32 %v4358_v31, %v2734_v7 }
 0x372   :  { %v2679_v14 = vadd.f32 %v2675_v56, %v2611_v53  ;;  %v2689_v12 = vadd.f32 %v2685_v18, %v2621_v16  ;;  %v2699_v52 = vadd.f32 %v2695_v46, %v2631_v29  ;;  %v2709_v41 = vadd.f32 %v2705_v2, %v2641_v27  ;;  %3122 = vrot.lane.b32.xlu2 %v7501_v4, %s4459_s2 }
 0x373   :  { %3124 = vrot.lane.b32.xlu0 %v7503_v61, %s4459_s2  ;;  %v2661_v55 = vpop.permute.xlu1 %2660  ;;  %v7518_v33 = vpop.permute.xlu2 %2788  ;;  %v2750_v27 = vmul.f32 %v4356_v54, %v2734_v7 }
 0x374   :  { %v2670_v48 = vsel %vm244_vm4, %v2649_v15, %v2661_v55  ;;  %v2721_v10 = vpop.permute.xlu0 %2720 }
 0x375   :  { %v2676_v5 = vmul.f32 %v7442_v32, %v2670_v48  ;;  %v2686_v53 = vmul.f32 %v4352_v59, %v2670_v48  ;;  %v2696_v16 = vmul.f32 %v4353_v34, %v2670_v48  ;;  %v2706_v29 = vmul.f32 %v4354_v11, %v2670_v48  ;;  %v7530_v11 = vld [vmem:[#allocation2 + $0x82] sm:$0xff] }
 0x376   :  { %v2732_v63 = vsel %vm244_vm4, %v8895_v3, %v2721_v10 }
 0x377   :  { %v2680_v23 = vadd.f32 %v2676_v5, %v7414_v9  ;;  %v2690_v62 = vadd.f32 %v2686_v53, %v7416_v1  ;;  %v2700_v17 = vadd.f32 %v2696_v16, %v7418_v25  ;;  %v2710_v15 = vadd.f32 %v2706_v29, %v7420_v35 }
 0x378   :  { %v2738_v50 = vmul.f32 %v7492_v57, %v2732_v63  ;;  %v2748_v32 = vmul.f32 %v4356_v54, %v2732_v63  ;;  %v2758_v59 = vmul.f32 %v4357_v21, %v2732_v63  ;;  %v2768_v34 = vmul.f32 %v4358_v31, %v2732_v63 }
 0x379   :  { %3126 = vrot.lane.b32.xlu1 %v7530_v11, %s4459_s2  ;;  %v7534_v44 = vadd.f32 %v2740_v28, %v2680_v23  ;;  %v7536_v3 = vadd.f32 %v2750_v27, %v2690_v62  ;;  %v7538_v9 = vadd.f32 %v2760_v39, %v2700_v17  ;;  %v7540_v1 = vadd.f32 %v2770_v49, %v2710_v15 }
 0x37a   :  { %v2742_v25 = vadd.f32 %v2738_v50, %v7461_v8  ;;  %v2752_v35 = vadd.f32 %v2748_v32, %v7463_v6  ;;  %v2762_v43 = vadd.f32 %v2758_v59, %v7465_v19  ;;  %v2772_v38 = vadd.f32 %v2768_v34, %v7467_v45  ;;  %3176 = vrot.lane.b32.xlu2 %v7495_v47, %s4460_s16 }
 0x37b   :  { %3178 = vrot.lane.b32.xlu0 %v7501_v4, %s4460_s16  ;;  %v2723_v13 = vpop.permute.xlu1 %2722  ;;  %v2795_v22 = vpop.permute.xlu2 %2794 }
 0x37c   :  { %v2733_v0 = vsel %vm244_vm4, %v6923_v24, %v2723_v13  ;;  %v2727_v56 = vpop.permute.xlu0 %2726  ;;  %v4359_v24 = vld [vmem:[%s8584_s0 + $0x28] ss:$0 sm:$0xff] }
 0x37d   :  { %v2739_v8 = vmul.f32 %v7492_v57, %v2733_v0  ;;  %v2749_v18 = vmul.f32 %v4356_v54, %v2733_v0  ;;  %v2759_v6 = vmul.f32 %v4357_v21, %v2733_v0  ;;  %v2769_v46 = vmul.f32 %v4358_v31, %v2733_v0 }
 0x37e   :  { %v2735_v19 = vsel %vm244_vm4, %v6942_v37, %v2727_v56  ;;  %v4360_v37 = vld [vmem:[%s8584_s0 + $0x29] ss:$0 sm:$0xff] }
 0x37f   :  { %v2743_v45 = vadd.f32 %v2739_v8, %v2679_v14  ;;  %v2753_v2 = vadd.f32 %v2749_v18, %v2689_v12  ;;  %v2763_v7 = vadd.f32 %v2759_v6, %v2699_v52  ;;  %v2773_v55 = vadd.f32 %v2769_v46, %v2709_v41  ;;  %v4361_v14 = vld [vmem:[%s8584_s0 + $0x2a] ss:$0 sm:$0xff] }
 0x380   :  { %v2741_v28 = vmul.f32 %v7492_v57, %v2735_v19  ;;  %v2751_v48 = vmul.f32 %v4356_v54, %v2735_v19  ;;  %v2761_v10 = vmul.f32 %v4357_v21, %v2735_v19  ;;  %v2771_v5 = vmul.f32 %v4358_v31, %v2735_v19  ;;  %v4362_v57 = vld [vmem:[%s8584_s0 + $0x2b] ss:$0 sm:$0xff] }
 0x381   :  { %3180 = vrot.lane.b32.xlu1 %v7503_v61, %s4460_s16 }
 0x382   :  { %v2745_v54 = vadd.f32 %v2741_v28, %v7481_v20  ;;  %v2755_v21 = vadd.f32 %v2751_v48, %v7483_v60  ;;  %v2765_v31 = vadd.f32 %v2761_v10, %v7485_v30  ;;  %v2775_v12 = vadd.f32 %v2771_v5, %v7487_v58  ;;  %3182 = vrot.lane.b32.xlu2 %v7530_v11, %s4460_s16 }
 0x383   :  { %3188 = vrot.lane.b32.xlu0 %v7495_v47, %s4461_s8  ;;  %v2777_v52 = vpop.permute.xlu1 %2776  ;;  %v7578_v41 = vpop.permute.xlu2 %2848 }
 0x384   :  { %v2800_v53 = vsel %vm244_vm4, %v2777_v52, %v7518_v33  ;;  %v2781_v16 = vpop.permute.xlu0 %2780 }
 0x385   :  { %v2806_v20 = vmul.f32 %v4359_v24, %v2800_v53  ;;  %v2816_v29 = vmul.f32 %v4360_v37, %v2800_v53  ;;  %v2826_v60 = vmul.f32 %v4361_v14, %v2800_v53  ;;  %v2836_v27 = vmul.f32 %v4362_v57, %v2800_v53 }
 0x387   :  { %v7582_v30 = vadd.f32 %v2806_v20, %v2742_v25  ;;  %v7584_v58 = vadd.f32 %v2816_v29, %v2752_v35  ;;  %v7586_v39 = vadd.f32 %v2826_v60, %v2762_v43  ;;  %v7588_v49 = vadd.f32 %v2836_v27, %v2772_v38  ;;  %v7660_v60 = vld [vmem:[%s8584_s0 + $0x30] ss:$0 sm:$0xff]  ;;  %v7665_v27 = vld [vmem:[%s8584_s0 + $0x31] ss:$0 sm:$0xff] }
 0x389   :  { %3190 = vrot.lane.b32.xlu1 %v7501_v4, %s4461_s8 }
 0x38a   :  { %3192 = vrot.lane.b32.xlu2 %v7503_v61, %s4461_s8 }
 0x38b   :  { %3194 = vrot.lane.b32.xlu0 %v7530_v11, %s4461_s8  ;;  %v2783_v33 = vpop.permute.xlu1 %2782  ;;  %v2859_v63 = vpop.permute.xlu2 %2858 }
 0x38c   :  { %v2803_v23 = vsel %vm244_vm4, %v2783_v33, %v2795_v22  ;;  %v2791_v62 = vpop.permute.xlu0 %2790 }
 0x38d   :  { %v2809_v17 = vmul.f32 %v4359_v24, %v2803_v23  ;;  %v2819_v15 = vmul.f32 %v4360_v37, %v2803_v23  ;;  %v2829_v50 = vmul.f32 %v4361_v14, %v2803_v23  ;;  %v2839_v32 = vmul.f32 %v4362_v57, %v2803_v23  ;;  %v7679_v23 = vld [vmem:[%s8584_s0 + $0x33] ss:$0 sm:$0xff] }
 0x38e   :  { %v2801_v59 = vsel %vm244_vm4, %v7475_v40, %v2791_v62  ;;  %v7683_v62 = vld [vmem:[#allocation2 + $0xb0] sm:$0xff] }
 0x38f   :  { %v7599_v34 = vadd.f32 %v2809_v17, %v2745_v54  ;;  %v7601_v25 = vadd.f32 %v2819_v15, %v2755_v21  ;;  %v7603_v35 = vadd.f32 %v2829_v50, %v2765_v31  ;;  %v7605_v43 = vadd.f32 %v2839_v32, %v2775_v12  ;;  %v7621_v21 = vld [vmem:[%s8584_s0 + $0x2c] ss:$0 sm:$0xff] }
 0x390   :  { %v2807_v38 = vmul.f32 %v4359_v24, %v2801_v59  ;;  %v2817_v13 = vmul.f32 %v4360_v37, %v2801_v59  ;;  %v2827_v0 = vmul.f32 %v4361_v14, %v2801_v59  ;;  %v2837_v22 = vmul.f32 %v4362_v57, %v2801_v59 }
 0x391   :  { %3244 = vrot.lane.b32.xlu1 %v7495_v47, %s4462_s9 }
 0x392   :  { %v2811_v56 = vadd.f32 %v2807_v38, %v2743_v45  ;;  %v2821_v8 = vadd.f32 %v2817_v13, %v2753_v2  ;;  %v2831_v18 = vadd.f32 %v2827_v0, %v2763_v7  ;;  %v2841_v6 = vadd.f32 %v2837_v22, %v2773_v55  ;;  %3246 = vrot.lane.b32.xlu2 %v7501_v4, %s4462_s9 }
 0x393   :  { %3248 = vrot.lane.b32.xlu0 %v7503_v61, %s4462_s9  ;;  %v2793_v40 = vpop.permute.xlu1 %2792  ;;  %v2921_v46 = vpop.permute.xlu2 %2920 }
 0x394   :  { %v2802_v19 = vsel %vm244_vm4, %v2781_v16, %v2793_v40  ;;  %v2845_v28 = vpop.permute.xlu0 %2844  ;;  %v2932_v33 = vsel %vm244_vm4, %v7265_v26, %v2921_v46 }
 0x395   :  { %v2808_v48 = vmul.f32 %v4359_v24, %v2802_v19  ;;  %v2818_v10 = vmul.f32 %v4360_v37, %v2802_v19  ;;  %v2828_v5 = vmul.f32 %v4361_v14, %v2802_v19  ;;  %v2838_v54 = vmul.f32 %v4362_v57, %v2802_v19  ;;  %v7628_v24 = vld [vmem:[%s8584_s0 + $0x2d] ss:$0 sm:$0xff] }
 0x396   :  { %v2938_v17 = vmul.f32 %v7660_v60, %v2932_v33  ;;  %v2948_v15 = vmul.f32 %v7665_v27, %v2932_v33 }
 0x397   :  { %v2812_v45 = vadd.f32 %v2808_v48, %v7534_v44  ;;  %v2822_v2 = vadd.f32 %v2818_v10, %v7536_v3  ;;  %v2832_v7 = vadd.f32 %v2828_v5, %v7538_v9  ;;  %v2842_v55 = vadd.f32 %v2838_v54, %v7540_v1  ;;  %v7633_v44 = vld [vmem:[%s8584_s0 + $0x2e] ss:$0 sm:$0xff]  ;;  %v7638_v3 = vld [vmem:[%s8584_s0 + $0x2f] ss:$0 sm:$0xff] }
 0x399   :  { %3250 = vrot.lane.b32.xlu1 %v7530_v11, %s4462_s9 }
 0x39a   :  { %3256 = vrot.lane.b32.xlu2 %v7495_v47, %s4463_s10 }
 0x39b   :  { %3258 = vrot.lane.b32.xlu0 %v7501_v4, %s4463_s10  ;;  %v2847_v9 = vpop.permute.xlu1 %2846 }
 0x39c   :  { %v2927_v1 = vpop.permute.xlu2 %2926  ;;  %v2869_v37 = vsel %vm244_vm4, %v2847_v9, %v2859_v63  ;;  %v2851_v14 = vpop.permute.xlu0 %2850  ;;  %v7674_v63 = vld [vmem:[%s8584_s0 + $0x32] ss:$0 sm:$0xff]  ;;  %v7712_v9 = vld [vmem:[#allocation2 + $0xc0] sm:$0xff] }
 0x39d   :  { %v2875_v57 = vmul.f32 %v7621_v21, %v2869_v37  ;;  %v2885_v31 = vmul.f32 %v7628_v24, %v2869_v37  ;;  %v2895_v12 = vmul.f32 %v7633_v44, %v2869_v37  ;;  %v2905_v52 = vmul.f32 %v7638_v3, %v2869_v37 }
 0x39f   :  { %v7649_v53 = vadd.f32 %v2875_v57, %v2811_v56  ;;  %v7651_v16 = vadd.f32 %v2885_v31, %v2821_v8  ;;  %v7653_v20 = vadd.f32 %v2895_v12, %v2831_v18  ;;  %v7655_v29 = vadd.f32 %v2905_v52, %v2841_v6  ;;  %v7726_v31 = vld [vmem:[#allocation2 + $0xc8] sm:$0xff] }
 0x3a0   :  { %v2958_v56 = vmul.f32 %v7674_v63, %v2932_v33  ;;  %v2968_v8 = vmul.f32 %v7679_v23, %v2932_v33  ;;  %v2935_v18 = vsel %vm244_vm4, %v7322_v36, %v2927_v1  ;;  %v7710_v36 = vld [vmem:[#allocation2 + $0xb8] sm:$0xff] }
 0x3a1   :  { %3260 = vrot.lane.b32.xlu1 %v7503_v61, %s4463_s10  ;;  %v2941_v52 = vmul.f32 %v7660_v60, %v2935_v18 }
 0x3a2   :  { %3262 = vrot.lane.b32.xlu2 %v7530_v11, %s4463_s10 }
 0x3a3   :  { %3320 = vrot.lane.b32.xlu0 %v7683_v62, %s4459_s2  ;;  %v2857_v26 = vpop.permute.xlu1 %2856 }
 0x3a4   :  { %v2868_v50 = vsel %vm244_vm4, %v2845_v28, %v2857_v26  ;;  %v7690_v32 = vpop.permute.xlu2 %2980  ;;  %v2861_v59 = vpop.permute.xlu0 %2860 }
 0x3a5   :  { %v2874_v38 = vmul.f32 %v7621_v21, %v2868_v50  ;;  %v2884_v13 = vmul.f32 %v7628_v24, %v2868_v50  ;;  %v2894_v0 = vmul.f32 %v7633_v44, %v2868_v50  ;;  %v2904_v22 = vmul.f32 %v7638_v3, %v2868_v50 }
 0x3a6   :  { %v2870_v6 = vsel %vm244_vm4, %v7578_v41, %v2861_v59  ;;  %v2961_v50 = vmul.f32 %v7674_v63, %v2935_v18  ;;  %v2971_v59 = vmul.f32 %v7679_v23, %v2935_v18 }
 0x3a7   :  { %v2878_v40 = vadd.f32 %v2874_v38, %v7582_v30  ;;  %v2888_v46 = vadd.f32 %v2884_v13, %v7584_v58  ;;  %v2898_v19 = vadd.f32 %v2894_v0, %v7586_v39  ;;  %v2908_v28 = vadd.f32 %v2904_v22, %v7588_v49 }
 0x3a8   :  { %v2876_v48 = vmul.f32 %v7621_v21, %v2870_v6  ;;  %v2886_v10 = vmul.f32 %v7628_v24, %v2870_v6  ;;  %v2896_v5 = vmul.f32 %v7633_v44, %v2870_v6  ;;  %v2906_v54 = vmul.f32 %v7638_v3, %v2870_v6 }
 0x3a9   :  { %3322 = vrot.lane.b32.xlu1 %v7710_v36, %s4459_s2  ;;  %v7716_v41 = vadd.f32 %v2938_v17, %v2878_v40  ;;  %v7718_v30 = vadd.f32 %v2948_v15, %v2888_v46  ;;  %v7720_v58 = vadd.f32 %v2958_v56, %v2898_v19  ;;  %v7722_v39 = vadd.f32 %v2968_v8, %v2908_v28 }
 0x3aa   :  { %v2880_v49 = vadd.f32 %v2876_v48, %v2812_v45  ;;  %v2890_v1 = vadd.f32 %v2886_v10, %v2822_v2  ;;  %v2900_v37 = vadd.f32 %v2896_v5, %v2832_v7  ;;  %v2910_v57 = vadd.f32 %v2906_v54, %v2842_v55  ;;  %3324 = vrot.lane.b32.xlu2 %v7712_v9, %s4459_s2  ;;  %v4371_v54 = vld [vmem:[%s8584_s0 + $0x34] ss:$0 sm:$0xff] }
 0x3ab   :  { %3326 = vrot.lane.b32.xlu0 %v7726_v31, %s4459_s2  ;;  %v2863_v12 = vpop.permute.xlu1 %2862  ;;  %v2951_v15 = vmul.f32 %v7665_v27, %v2935_v18 }
 0x3ac   :  { %v2871_v33 = vsel %vm244_vm4, %v2851_v14, %v2863_v12  ;;  %v2991_v26 = vpop.permute.xlu2 %2990  ;;  %v2923_v17 = vpop.permute.xlu0 %2922 }
 0x3ad   :  { %v2877_v45 = vmul.f32 %v7621_v21, %v2871_v33  ;;  %v2887_v2 = vmul.f32 %v7628_v24, %v2871_v33  ;;  %v2897_v7 = vmul.f32 %v7633_v44, %v2871_v33  ;;  %v2907_v55 = vmul.f32 %v7638_v3, %v2871_v33 }
 0x3ae   :  { %v2933_v38 = vsel %vm244_vm4, %v7281_v51, %v2923_v17 }
 0x3af   :  { %v2881_v14 = vadd.f32 %v2877_v45, %v7599_v34  ;;  %v2891_v13 = vadd.f32 %v2887_v2, %v7601_v25  ;;  %v2901_v21 = vadd.f32 %v2897_v7, %v7603_v35  ;;  %v2911_v24 = vadd.f32 %v2907_v55, %v7605_v43 }
 0x3b0   :  { %v2939_v44 = vmul.f32 %v7660_v60, %v2933_v38  ;;  %v2949_v3 = vmul.f32 %v7665_v27, %v2933_v38  ;;  %v2959_v0 = vmul.f32 %v7674_v63, %v2933_v38  ;;  %v2969_v22 = vmul.f32 %v7679_v23, %v2933_v38 }
 0x3b1   :  { %3376 = vrot.lane.b32.xlu1 %v7683_v62, %s4460_s16  ;;  %v7751_v51 = vadd.f32 %v2941_v52, %v2881_v14  ;;  %v7753_v34 = vadd.f32 %v2951_v15, %v2891_v13  ;;  %v7755_v25 = vadd.f32 %v2961_v50, %v2901_v21  ;;  %v7757_v35 = vadd.f32 %v2971_v59, %v2911_v24 }
 0x3b2   :  { %v2943_v43 = vadd.f32 %v2939_v44, %v7649_v53  ;;  %v2953_v56 = vadd.f32 %v2949_v3, %v7651_v16  ;;  %v2963_v8 = vadd.f32 %v2959_v0, %v7653_v20  ;;  %v2973_v18 = vadd.f32 %v2969_v22, %v7655_v29  ;;  %3378 = vrot.lane.b32.xlu2 %v7710_v36, %s4460_s16 }
 0x3b3   :  { %3380 = vrot.lane.b32.xlu0 %v7712_v9, %s4460_s16  ;;  %v2925_v6 = vpop.permute.xlu1 %2924 }
 0x3b4   :  { %v2934_v40 = vsel %vm244_vm4, %v7320_v42, %v2925_v6  ;;  %v7769_v46 = vpop.permute.xlu2 %3044  ;;  %v2977_v19 = vpop.permute.xlu0 %2976  ;;  %v4372_v42 = vld [vmem:[%s8584_s0 + $0x35] ss:$0 sm:$0xff] }
 0x3b5   :  { %v2940_v53 = vmul.f32 %v7660_v60, %v2934_v40  ;;  %v2950_v16 = vmul.f32 %v7665_v27, %v2934_v40  ;;  %v2960_v20 = vmul.f32 %v7674_v63, %v2934_v40  ;;  %v2970_v29 = vmul.f32 %v7679_v23, %v2934_v40  ;;  %v4373_v60 = vld [vmem:[%s8584_s0 + $0x36] ss:$0 sm:$0xff]  ;;  %v4374_v27 = vld [vmem:[%s8584_s0 + $0x37] ss:$0 sm:$0xff] }
 0x3b7   :  { %v2944_v28 = vadd.f32 %v2940_v53, %v2880_v49  ;;  %v2954_v48 = vadd.f32 %v2950_v16, %v2890_v1  ;;  %v2964_v10 = vadd.f32 %v2960_v20, %v2900_v37  ;;  %v2974_v5 = vadd.f32 %v2970_v29, %v2910_v57 }
 0x3b9   :  { %3382 = vrot.lane.b32.xlu1 %v7726_v31, %s4460_s16 }
 0x3ba   :  { %3388 = vrot.lane.b32.xlu2 %v7683_v62, %s4461_s8 }
 0x3bb   :  { %3390 = vrot.lane.b32.xlu0 %v7710_v36, %s4461_s8  ;;  %v2979_v63 = vpop.permute.xlu1 %2978 }
 0x3bc   :  { %v3001_v23 = vsel %vm244_vm4, %v2979_v63, %v2991_v26  ;;  %v7794_v49 = vpop.permute.xlu2 %3050 }
 0x3bd   :  { %v2983_v1 = vpop.permute.xlu0 %2982  ;;  %v3007_v37 = vmul.f32 %v4371_v54, %v3001_v23  ;;  %v3017_v57 = vmul.f32 %v4372_v42, %v3001_v23  ;;  %v3027_v12 = vmul.f32 %v4373_v60, %v3001_v23  ;;  %v3037_v52 = vmul.f32 %v4374_v27, %v3001_v23 }
 0x3bf   :  { %v7796_v33 = vadd.f32 %v3007_v37, %v2943_v43  ;;  %v7798_v17 = vadd.f32 %v3017_v57, %v2953_v56  ;;  %v7800_v45 = vadd.f32 %v3027_v12, %v2963_v8  ;;  %v7802_v2 = vadd.f32 %v3037_v52, %v2973_v18 }
 0x3c1   :  { %3392 = vrot.lane.b32.xlu1 %v7712_v9, %s4461_s8 }
 0x3c2   :  { %3394 = vrot.lane.b32.xlu2 %v7726_v31, %s4461_s8 }
 0x3c3   :  { %3444 = vrot.lane.b32.xlu0 %v7683_v62, %s4462_s9  ;;  %v2989_v26 = vpop.permute.xlu1 %2988 }
 0x3c4   :  { %v3000_v7 = vsel %vm244_vm4, %v2977_v19, %v2989_v26  ;;  %v3061_v55 = vpop.permute.xlu2 %3060  ;;  %v7870_v26 = vld [vmem:[%s8584_s0 + $0x3c] ss:$0 sm:$0xff] }
 0x3c5   :  { %v2993_v15 = vpop.permute.xlu0 %2992  ;;  %v3006_v50 = vmul.f32 %v4371_v54, %v3000_v7  ;;  %v3016_v59 = vmul.f32 %v4372_v42, %v3000_v7  ;;  %v3026_v38 = vmul.f32 %v4373_v60, %v3000_v7  ;;  %v3036_v14 = vmul.f32 %v4374_v27, %v3000_v7 }
 0x3c6   :  { %v3002_v13 = vsel %vm244_vm4, %v7690_v32, %v2993_v15 }
 0x3c7   :  { %v3010_v21 = vadd.f32 %v3006_v50, %v7716_v41  ;;  %v3020_v24 = vadd.f32 %v3016_v59, %v7718_v30  ;;  %v3030_v44 = vadd.f32 %v3026_v38, %v7720_v58  ;;  %v3040_v3 = vadd.f32 %v3036_v14, %v7722_v39  ;;  %v7874_v59 = vld [vmem:[#allocation2 + $0xb1] sm:$0xff]  ;;  %v7878_v38 = vld [vmem:[#allocation2 + $0xb9] sm:$0xff] }
 0x3c8   :  { %v3008_v0 = vmul.f32 %v4371_v54, %v3002_v13  ;;  %v3018_v22 = vmul.f32 %v4372_v42, %v3002_v13  ;;  %v3028_v43 = vmul.f32 %v4373_v60, %v3002_v13  ;;  %v3038_v56 = vmul.f32 %v4374_v27, %v3002_v13  ;;  %v7883_v14 = vld [vmem:[%s8584_s0 + $0x3d] ss:$0 sm:$0xff]  ;;  %v7888_v13 = vld [vmem:[%s8584_s0 + $0x3e] ss:$0 sm:$0xff] }
 0x3c9   :  { %3446 = vrot.lane.b32.xlu1 %v7710_v36, %s4462_s9 }
 0x3ca   :  { %v3012_v8 = vadd.f32 %v3008_v0, %v2944_v28  ;;  %v3022_v18 = vadd.f32 %v3018_v22, %v2954_v48  ;;  %v3032_v6 = vadd.f32 %v3028_v43, %v2964_v10  ;;  %v3042_v40 = vadd.f32 %v3038_v56, %v2974_v5  ;;  %3448 = vrot.lane.b32.xlu2 %v7712_v9, %s4462_s9  ;;  %v4379_v10 = vld [vmem:[%s8584_s0 + $0x38] ss:$0 sm:$0xff] }
 0x3cb   :  { %3450 = vrot.lane.b32.xlu0 %v7726_v31, %s4462_s9  ;;  %v2995_v32 = vpop.permute.xlu1 %2994 }
 0x3cc   :  { %v3003_v41 = vsel %vm244_vm4, %v2983_v1, %v2995_v32  ;;  %v3123_v30 = vpop.permute.xlu2 %3122 }
 0x3cd   :  { %v3009_v58 = vmul.f32 %v4371_v54, %v3003_v41  ;;  %v3019_v39 = vmul.f32 %v4372_v42, %v3003_v41  ;;  %v3029_v19 = vmul.f32 %v4373_v60, %v3003_v41  ;;  %v3039_v53 = vmul.f32 %v4374_v27, %v3003_v41  ;;  %v3047_v16 = vpop.permute.xlu0 %3046 }
 0x3cf   :  { %v7825_v20 = vadd.f32 %v3009_v58, %v7751_v51  ;;  %v7828_v29 = vadd.f32 %v3019_v39, %v7753_v34  ;;  %v7831_v28 = vadd.f32 %v3029_v19, %v7755_v25  ;;  %v7834_v48 = vadd.f32 %v3039_v53, %v7757_v35  ;;  %v4380_v51 = vld [vmem:[%s8584_s0 + $0x39] ss:$0 sm:$0xff]  ;;  %v4381_v34 = vld [vmem:[%s8584_s0 + $0x3a] ss:$0 sm:$0xff]  ;;  %v4382_v25 = vld [vmem:[%s8584_s0 + $0x3b] ss:$0 sm:$0xff] }
 0x3d1   :  { %3456 = vrot.lane.b32.xlu1 %v7683_v62, %s4463_s10 }
 0x3d2   :  { %3458 = vrot.lane.b32.xlu2 %v7710_v36, %s4463_s10 }
 0x3d3   :  { %3460 = vrot.lane.b32.xlu0 %v7712_v9, %s4463_s10  ;;  %v3049_v35 = vpop.permute.xlu1 %3048 }
 0x3d4   :  { %v3070_v5 = vsel %vm244_vm4, %v3049_v35, %v3061_v55  ;;  %v7855_v54 = vpop.permute.xlu2 %3176 }
 0x3d5   :  { %v3076_v42 = vmul.f32 %v4379_v10, %v3070_v5  ;;  %v3086_v60 = vmul.f32 %v4380_v51, %v3070_v5  ;;  %v3096_v27 = vmul.f32 %v4381_v34, %v3070_v5  ;;  %v3106_v63 = vmul.f32 %v4382_v25, %v3070_v5  ;;  %v3057_v23 = vpop.permute.xlu0 %3056 }
 0x3d6   :  { %v3068_v1 = vsel %vm244_vm4, %v7769_v46, %v3057_v23  ;;  %v3133_v46 = vsel %vm244_vm4, %v7501_v4, %v3123_v30  ;;  %v7893_v4 = vld [vmem:[%s8584_s0 + $0x3f] ss:$0 sm:$0xff]  ;;  %v7914_v23 = vld [vmem:[#allocation2 + $0xc9] sm:$0xff] }
 0x3d7   :  { %v7859_v37 = vadd.f32 %v3076_v42, %v3012_v8  ;;  %v7861_v57 = vadd.f32 %v3086_v60, %v3022_v18  ;;  %v7863_v12 = vadd.f32 %v3096_v27, %v3032_v6  ;;  %v7865_v52 = vadd.f32 %v3106_v63, %v3042_v40  ;;  %v7912_v63 = vld [vmem:[#allocation2 + $0xc1] sm:$0xff] }
 0x3d8   :  { %v3074_v7 = vmul.f32 %v4379_v10, %v3068_v1  ;;  %v3084_v55 = vmul.f32 %v4380_v51, %v3068_v1  ;;  %v3094_v15 = vmul.f32 %v4381_v34, %v3068_v1  ;;  %v3104_v50 = vmul.f32 %v4382_v25, %v3068_v1 }
 0x3d9   :  { %3462 = vrot.lane.b32.xlu1 %v7726_v31, %s4463_s10  ;;  %v3139_v18 = vmul.f32 %v7870_v26, %v3133_v46  ;;  %v3169_v58 = vmul.f32 %v7893_v4, %v3133_v46 }
 0x3da   :  { %v3078_v0 = vadd.f32 %v3074_v7, %v3010_v21  ;;  %v3088_v22 = vadd.f32 %v3084_v55, %v3020_v24  ;;  %v3098_v43 = vadd.f32 %v3094_v15, %v3030_v44  ;;  %v3108_v56 = vadd.f32 %v3104_v50, %v3040_v3  ;;  %3520 = vrot.lane.b32.xlu2 %v7874_v59, %s4459_s2 }
 0x3db   :  { %3522 = vrot.lane.b32.xlu0 %v7878_v38, %s4459_s2  ;;  %v3059_v8 = vpop.permute.xlu1 %3058  ;;  %v3149_v44 = vmul.f32 %v7883_v14, %v3133_v46  ;;  %v3159_v3 = vmul.f32 %v7888_v13, %v3133_v46 }
 0x3dc   :  { %v3069_v6 = vsel %vm244_vm4, %v3047_v16, %v3059_v8  ;;  %v7901_v40 = vpop.permute.xlu2 %3182 }
 0x3dd   :  { %v3075_v32 = vmul.f32 %v4379_v10, %v3069_v6  ;;  %v3085_v41 = vmul.f32 %v4380_v51, %v3069_v6  ;;  %v3095_v30 = vmul.f32 %v4381_v34, %v3069_v6  ;;  %v3105_v21 = vmul.f32 %v4382_v25, %v3069_v6  ;;  %v3063_v24 = vpop.permute.xlu0 %3062 }
 0x3de   :  { %v3071_v39 = vsel %vm244_vm4, %v7794_v49, %v3063_v24 }
 0x3df   :  { %v3079_v19 = vadd.f32 %v3075_v32, %v7796_v33  ;;  %v3089_v53 = vadd.f32 %v3085_v41, %v7798_v17  ;;  %v3099_v16 = vadd.f32 %v3095_v30, %v7800_v45  ;;  %v3109_v35 = vadd.f32 %v3105_v21, %v7802_v2 }
 0x3e0   :  { %v3077_v5 = vmul.f32 %v4379_v10, %v3071_v39  ;;  %v3087_v42 = vmul.f32 %v4380_v51, %v3071_v39  ;;  %v3097_v60 = vmul.f32 %v4381_v34, %v3071_v39  ;;  %v3107_v27 = vmul.f32 %v4382_v25, %v3071_v39 }
 0x3e1   :  { %3524 = vrot.lane.b32.xlu1 %v7912_v63, %s4459_s2  ;;  %v7918_v49 = vadd.f32 %v3139_v18, %v3079_v19  ;;  %v7920_v33 = vadd.f32 %v3149_v44, %v3089_v53  ;;  %v7922_v17 = vadd.f32 %v3159_v3, %v3099_v16  ;;  %v7924_v45 = vadd.f32 %v3169_v58, %v3109_v35  ;;  %v4383_v19 = vld [vmem:[%s8584_s0 + $0x40] ss:$0 sm:$0xff] }
 0x3e2   :  { %v3081_v2 = vadd.f32 %v3077_v5, %v7825_v20  ;;  %v3091_v10 = vadd.f32 %v3087_v42, %v7828_v29  ;;  %v3101_v51 = vadd.f32 %v3097_v60, %v7831_v28  ;;  %v3111_v34 = vadd.f32 %v3107_v27, %v7834_v48  ;;  %3526 = vrot.lane.b32.xlu2 %v7914_v23, %s4459_s2 }
 0x3e3   :  { %3576 = vrot.lane.b32.xlu0 %v7874_v59, %s4460_s16  ;;  %v3121_v25 = vpop.permute.xlu1 %3120 }
 0x3e4   :  { %v3132_v1 = vsel %vm244_vm4, %v7495_v47, %v3121_v25  ;;  %v3193_v7 = vpop.permute.xlu2 %3192 }
 0x3e5   :  { %v3138_v55 = vmul.f32 %v7870_v26, %v3132_v1  ;;  %v3148_v20 = vmul.f32 %v7883_v14, %v3132_v1  ;;  %v3158_v29 = vmul.f32 %v7888_v13, %v3132_v1  ;;  %v3168_v28 = vmul.f32 %v7893_v4, %v3132_v1  ;;  %v3125_v48 = vpop.permute.xlu0 %3124 }
 0x3e6   :  { %v3134_v15 = vsel %vm244_vm4, %v7503_v61, %v3125_v48 }
 0x3e7   :  { %v3142_v50 = vadd.f32 %v3138_v55, %v3078_v0  ;;  %v3152_v46 = vadd.f32 %v3148_v20, %v3088_v22  ;;  %v3162_v8 = vadd.f32 %v3158_v29, %v3098_v43  ;;  %v3172_v18 = vadd.f32 %v3168_v28, %v3108_v56 }
 0x3e8   :  { %v3140_v6 = vmul.f32 %v7870_v26, %v3134_v15  ;;  %v3150_v47 = vmul.f32 %v7883_v14, %v3134_v15  ;;  %v3160_v32 = vmul.f32 %v7888_v13, %v3134_v15  ;;  %v3170_v41 = vmul.f32 %v7893_v4, %v3134_v15 }
 0x3e9   :  { %3578 = vrot.lane.b32.xlu1 %v7878_v38, %s4460_s16 }
 0x3ea   :  { %v3144_v30 = vadd.f32 %v3140_v6, %v7859_v37  ;;  %v3154_v21 = vadd.f32 %v3150_v47, %v7861_v57  ;;  %v3164_v61 = vadd.f32 %v3160_v32, %v7863_v12  ;;  %v3174_v0 = vadd.f32 %v3170_v41, %v7865_v52  ;;  %3580 = vrot.lane.b32.xlu2 %v7912_v63, %s4460_s16 }
 0x3eb   :  { %3582 = vrot.lane.b32.xlu0 %v7914_v23, %s4460_s16  ;;  %v3127_v22 = vpop.permute.xlu1 %3126 }
 0x3ec   :  { %v3135_v43 = vsel %vm244_vm4, %v7530_v11, %v3127_v22  ;;  %v7958_v56 = vpop.permute.xlu2 %3246  ;;  %v4384_v11 = vld [vmem:[%s8584_s0 + $0x41] ss:$0 sm:$0xff] }
 0x3ed   :  { %v3141_v37 = vmul.f32 %v7870_v26, %v3135_v43  ;;  %v3151_v57 = vmul.f32 %v7883_v14, %v3135_v43  ;;  %v3161_v12 = vmul.f32 %v7888_v13, %v3135_v43  ;;  %v3171_v52 = vmul.f32 %v7893_v4, %v3135_v43  ;;  %v3179_v24 = vpop.permute.xlu0 %3178  ;;  %v4385_v26 = vld [vmem:[%s8584_s0 + $0x42] ss:$0 sm:$0xff]  ;;  %v4386_v14 = vld [vmem:[%s8584_s0 + $0x43] ss:$0 sm:$0xff] }
 0x3ef   :  { %v3145_v44 = vadd.f32 %v3141_v37, %v3081_v2  ;;  %v3155_v3 = vadd.f32 %v3151_v57, %v3091_v10  ;;  %v3165_v58 = vadd.f32 %v3161_v12, %v3101_v51  ;;  %v3175_v39 = vadd.f32 %v3171_v52, %v3111_v34  ;;  %v4387_v57 = vld [vmem:[%s8584_s0 + $0x44] ss:$0 sm:$0xff] }
 0x3f1   :  { %3588 = vrot.lane.b32.xlu1 %v7874_v59, %s4461_s8 }
 0x3f2   :  { %3590 = vrot.lane.b32.xlu2 %v7878_v38, %s4461_s8 }
 0x3f3   :  { %3592 = vrot.lane.b32.xlu0 %v7912_v63, %s4461_s8  ;;  %v3181_v13 = vpop.permute.xlu1 %3180 }
 0x3f4   :  { %v3202_v4 = vsel %vm244_vm4, %v3181_v13, %v3193_v7  ;;  %v3257_v53 = vpop.permute.xlu2 %3256 }
 0x3f5   :  { %v3208_v16 = vmul.f32 %v4383_v19, %v3202_v4  ;;  %v3218_v35 = vmul.f32 %v4384_v11, %v3202_v4  ;;  %v3228_v5 = vmul.f32 %v4385_v26, %v3202_v4  ;;  %v3238_v42 = vmul.f32 %v4386_v14, %v3202_v4  ;;  %v3189_v60 = vpop.permute.xlu0 %3188 }
 0x3f6   :  { %v3200_v27 = vsel %vm244_vm4, %v7855_v54, %v3189_v60 }
 0x3f7   :  { %v7985_v2 = vadd.f32 %v3208_v16, %v3144_v30  ;;  %v7987_v10 = vadd.f32 %v3218_v35, %v3154_v21  ;;  %v7989_v51 = vadd.f32 %v3228_v5, %v3164_v61  ;;  %v7991_v34 = vadd.f32 %v3238_v42, %v3174_v0 }
 0x3f8   :  { %v3206_v25 = vmul.f32 %v4383_v19, %v3200_v27  ;;  %v3216_v1 = vmul.f32 %v4384_v11, %v3200_v27  ;;  %v3226_v7 = vmul.f32 %v4385_v26, %v3200_v27  ;;  %v3236_v55 = vmul.f32 %v4386_v14, %v3200_v27 }
 0x3f9   :  { %3594 = vrot.lane.b32.xlu1 %v7914_v23, %s4461_s8 }
 0x3fa   :  { %v3210_v20 = vadd.f32 %v3206_v25, %v3142_v50  ;;  %v3220_v29 = vadd.f32 %v3216_v1, %v3152_v46  ;;  %v3230_v28 = vadd.f32 %v3226_v7, %v3162_v8  ;;  %v3240_v48 = vadd.f32 %v3236_v55, %v3172_v18  ;;  %3644 = vrot.lane.b32.xlu2 %v7874_v59, %s4462_s9 }
 0x3fb   :  { %3646 = vrot.lane.b32.xlu0 %v7878_v38, %s4462_s9  ;;  %v3191_v54 = vpop.permute.xlu1 %3190 }
 0x3fc   :  { %v3201_v15 = vsel %vm244_vm4, %v3179_v24, %v3191_v54  ;;  %v3263_v6 = vpop.permute.xlu2 %3262 }
 0x3fd   :  { %v3207_v47 = vmul.f32 %v4383_v19, %v3201_v15  ;;  %v3217_v32 = vmul.f32 %v4384_v11, %v3201_v15  ;;  %v3227_v41 = vmul.f32 %v4385_v26, %v3201_v15  ;;  %v3237_v30 = vmul.f32 %v4386_v14, %v3201_v15  ;;  %v3195_v21 = vpop.permute.xlu0 %3194 }
 0x3fe   :  { %v3203_v50 = vsel %vm244_vm4, %v7901_v40, %v3195_v21  ;;  %v4388_v40 = vld [vmem:[%s8584_s0 + $0x45] ss:$0 sm:$0xff]  ;;  %v4392_v21 = vld [vmem:[%s8584_s0 + $0x49] ss:$0 sm:$0xff] }
 0x3ff   :  { %v3211_v46 = vadd.f32 %v3207_v47, %v7918_v49  ;;  %v3221_v8 = vadd.f32 %v3217_v32, %v7920_v33  ;;  %v3231_v18 = vadd.f32 %v3227_v41, %v7922_v17  ;;  %v3241_v61 = vadd.f32 %v3237_v30, %v7924_v45  ;;  %v4389_v49 = vld [vmem:[%s8584_s0 + $0x46] ss:$0 sm:$0xff]  ;;  %v4390_v33 = vld [vmem:[%s8584_s0 + $0x47] ss:$0 sm:$0xff]  ;;  %v8057_v32 = vld [vmem:[#allocation2 + $0xb2] sm:$0xff] }
 0x400   :  { %v3209_v0 = vmul.f32 %v4383_v19, %v3203_v50  ;;  %v3219_v22 = vmul.f32 %v4384_v11, %v3203_v50  ;;  %v3229_v43 = vmul.f32 %v4385_v26, %v3203_v50  ;;  %v3239_v37 = vmul.f32 %v4386_v14, %v3203_v50  ;;  %v8061_v41 = vld [vmem:[#allocation2 + $0xba] sm:$0xff]  ;;  %v8065_v30 = vld [vmem:[#allocation2 + $0xc2] sm:$0xff]  ;;  %v4393_v50 = vld [vmem:[%s8584_s0 + $0x4a] ss:$0 sm:$0xff] }
 0x401   :  { %3648 = vrot.lane.b32.xlu1 %v7912_v63, %s4462_s9 }
 0x402   :  { %v3213_v17 = vadd.f32 %v3209_v0, %v3145_v44  ;;  %v3223_v45 = vadd.f32 %v3219_v22, %v3155_v3  ;;  %v3233_v12 = vadd.f32 %v3229_v43, %v3165_v58  ;;  %v3243_v52 = vadd.f32 %v3239_v37, %v3175_v39  ;;  %3650 = vrot.lane.b32.xlu2 %v7914_v23, %s4462_s9  ;;  %v4394_v0 = vld [vmem:[%s8584_s0 + $0x4b] ss:$0 sm:$0xff] }
 0x403   :  { %3656 = vrot.lane.b32.xlu0 %v7874_v59, %s4463_s10  ;;  %v3245_v24 = vpop.permute.xlu1 %3244 }
 0x404   :  { %v3268_v19 = vsel %vm244_vm4, %v3245_v24, %v3257_v53  ;;  %v3325_v11 = vpop.permute.xlu2 %3324 }
 0x405   :  { %v3274_v26 = vmul.f32 %v4387_v57, %v3268_v19  ;;  %v3284_v14 = vmul.f32 %v4388_v40, %v3268_v19  ;;  %v3294_v13 = vmul.f32 %v4389_v49, %v3268_v19  ;;  %v3304_v4 = vmul.f32 %v4390_v33, %v3268_v19  ;;  %v3249_v16 = vpop.permute.xlu0 %3248 }
 0x407   :  { %v8025_v35 = vadd.f32 %v3274_v26, %v3210_v20  ;;  %v8027_v44 = vadd.f32 %v3284_v14, %v3220_v29  ;;  %v8029_v3 = vadd.f32 %v3294_v13, %v3230_v28  ;;  %v8031_v58 = vadd.f32 %v3304_v4, %v3240_v48  ;;  %v8055_v48 = vld [vmem:[%s8584_s0 + $0x48] ss:$0 sm:$0xff] }
 0x409   :  { %3658 = vrot.lane.b32.xlu1 %v7878_v38, %s4463_s10 }
 0x40a   :  { %3660 = vrot.lane.b32.xlu2 %v7912_v63, %s4463_s10 }
 0x40b   :  { %3662 = vrot.lane.b32.xlu0 %v7914_v23, %s4463_s10  ;;  %v3251_v39 = vpop.permute.xlu1 %3250 }
 0x40c   :  { %v3271_v53 = vsel %vm244_vm4, %v3251_v39, %v3263_v6  ;;  %v8040_v5 = vpop.permute.xlu2 %3378 }
 0x40d   :  { %v3277_v42 = vmul.f32 %v4387_v57, %v3271_v53  ;;  %v3287_v60 = vmul.f32 %v4388_v40, %v3271_v53  ;;  %v3297_v27 = vmul.f32 %v4389_v49, %v3271_v53  ;;  %v3307_v25 = vmul.f32 %v4390_v33, %v3271_v53  ;;  %v3259_v1 = vpop.permute.xlu0 %3258  ;;  %v8089_v53 = vld [vmem:[#allocation2 + $0xca] sm:$0xff] }
 0x40e   :  { %v3269_v7 = vsel %vm244_vm4, %v7958_v56, %v3259_v1  ;;  %v3334_v56 = vsel %vm244_vm4, %v7712_v9, %v3325_v11 }
 0x40f   :  { %v8044_v55 = vadd.f32 %v3277_v42, %v3213_v17  ;;  %v8046_v20 = vadd.f32 %v3287_v60, %v3223_v45  ;;  %v8048_v29 = vadd.f32 %v3297_v27, %v3233_v12  ;;  %v8050_v28 = vadd.f32 %v3307_v25, %v3243_v52 }
 0x410   :  { %v3275_v54 = vmul.f32 %v4387_v57, %v3269_v7  ;;  %v3285_v15 = vmul.f32 %v4388_v40, %v3269_v7  ;;  %v3295_v6 = vmul.f32 %v4389_v49, %v3269_v7  ;;  %v3305_v47 = vmul.f32 %v4390_v33, %v3269_v7 }
 0x411   :  { %3720 = vrot.lane.b32.xlu1 %v8057_v32, %s4459_s2  ;;  %v3340_v45 = vmul.f32 %v8055_v48, %v3334_v56 }
 0x412   :  { %v3279_v9 = vadd.f32 %v3275_v54, %v3211_v46  ;;  %v3289_v22 = vadd.f32 %v3285_v15, %v3221_v8  ;;  %v3299_v43 = vadd.f32 %v3295_v6, %v3231_v18  ;;  %v3309_v37 = vadd.f32 %v3305_v47, %v3241_v61  ;;  %3722 = vrot.lane.b32.xlu2 %v8061_v41, %s4459_s2 }
 0x413   :  { %3724 = vrot.lane.b32.xlu0 %v8065_v30, %s4459_s2  ;;  %v3261_v17 = vpop.permute.xlu1 %3260  ;;  %v3350_v8 = vmul.f32 %v4392_v21, %v3334_v56  ;;  %v3360_v18 = vmul.f32 %v4393_v50, %v3334_v56  ;;  %v3370_v61 = vmul.f32 %v4394_v0, %v3334_v56 }
 0x414   :  { %v3270_v12 = vsel %vm244_vm4, %v3249_v16, %v3261_v17  ;;  %v3389_v52 = vpop.permute.xlu2 %3388 }
 0x415   :  { %v3276_v24 = vmul.f32 %v4387_v57, %v3270_v12  ;;  %v3286_v19 = vmul.f32 %v4388_v40, %v3270_v12  ;;  %v3296_v11 = vmul.f32 %v4389_v49, %v3270_v12  ;;  %v3306_v26 = vmul.f32 %v4390_v33, %v3270_v12  ;;  %v3321_v46 = vpop.permute.xlu0 %3320 }
 0x416   :  { %v3332_v14 = vsel %vm244_vm4, %v7683_v62, %v3321_v46 }
 0x417   :  { %v3280_v13 = vadd.f32 %v3276_v24, %v7985_v2  ;;  %v3290_v4 = vadd.f32 %v3286_v19, %v7987_v10  ;;  %v3300_v39 = vadd.f32 %v3296_v11, %v7989_v51  ;;  %v3310_v16 = vadd.f32 %v3306_v26, %v7991_v34 }
 0x418   :  { %v3338_v57 = vmul.f32 %v8055_v48, %v3332_v14  ;;  %v3348_v40 = vmul.f32 %v4392_v21, %v3332_v14  ;;  %v3358_v49 = vmul.f32 %v4393_v50, %v3332_v14  ;;  %v3368_v33 = vmul.f32 %v4394_v0, %v3332_v14 }
 0x419   :  { %3726 = vrot.lane.b32.xlu1 %v8089_v53, %s4459_s2  ;;  %v8093_v42 = vadd.f32 %v3340_v45, %v3280_v13  ;;  %v8095_v62 = vadd.f32 %v3350_v8, %v3290_v4  ;;  %v8097_v2 = vadd.f32 %v3360_v18, %v3300_v39  ;;  %v8099_v10 = vadd.f32 %v3370_v61, %v3310_v16 }
 0x41a   :  { %v3342_v51 = vadd.f32 %v3338_v57, %v8025_v35  ;;  %v3352_v34 = vadd.f32 %v3348_v40, %v8027_v44  ;;  %v3362_v60 = vadd.f32 %v3358_v49, %v8029_v3  ;;  %v3372_v27 = vadd.f32 %v3368_v33, %v8031_v58  ;;  %3776 = vrot.lane.b32.xlu2 %v8057_v32, %s4460_s16 }
 0x41b   :  { %3778 = vrot.lane.b32.xlu0 %v8061_v41, %s4460_s16  ;;  %v3323_v25 = vpop.permute.xlu1 %3322 }
 0x41c   :  { %v3395_v1 = vpop.permute.xlu2 %3394  ;;  %v3333_v7 = vsel %vm244_vm4, %v7710_v36, %v3323_v25  ;;  %v4395_v36 = vld [vmem:[%s8584_s0 + $0x4c] ss:$0 sm:$0xff] }
 0x41d   :  { %v3339_v54 = vmul.f32 %v8055_v48, %v3333_v7  ;;  %v3349_v35 = vmul.f32 %v4392_v21, %v3333_v7  ;;  %v3359_v15 = vmul.f32 %v4393_v50, %v3333_v7  ;;  %v3369_v44 = vmul.f32 %v4394_v0, %v3333_v7  ;;  %v3327_v6 = vpop.permute.xlu0 %3326 }
 0x41e   :  { %v3335_v3 = vsel %vm244_vm4, %v7726_v31, %v3327_v6  ;;  %v4396_v31 = vld [vmem:[%s8584_s0 + $0x4d] ss:$0 sm:$0xff] }
 0x41f   :  { %v3343_v58 = vadd.f32 %v3339_v54, %v3279_v9  ;;  %v3353_v47 = vadd.f32 %v3349_v35, %v3289_v22  ;;  %v3363_v56 = vadd.f32 %v3359_v15, %v3299_v43  ;;  %v3373_v17 = vadd.f32 %v3369_v44, %v3309_v37  ;;  %v4397_v9 = vld [vmem:[%s8584_s0 + $0x4e] ss:$0 sm:$0xff] }
 0x420   :  { %v3341_v45 = vmul.f32 %v8055_v48, %v3335_v3  ;;  %v3351_v12 = vmul.f32 %v4392_v21, %v3335_v3  ;;  %v3361_v24 = vmul.f32 %v4393_v50, %v3335_v3  ;;  %v3371_v19 = vmul.f32 %v4394_v0, %v3335_v3  ;;  %v4398_v48 = vld [vmem:[%s8584_s0 + $0x4f] ss:$0 sm:$0xff] }
 0x421   :  { %3780 = vrot.lane.b32.xlu1 %v8065_v30, %s4460_s16 }
 0x422   :  { %v3345_v21 = vadd.f32 %v3341_v45, %v8044_v55  ;;  %v3355_v50 = vadd.f32 %v3351_v12, %v8046_v20  ;;  %v3365_v0 = vadd.f32 %v3361_v24, %v8048_v29  ;;  %v3375_v22 = vadd.f32 %v3371_v19, %v8050_v28  ;;  %3782 = vrot.lane.b32.xlu2 %v8089_v53, %s4460_s16 }
 0x423   :  { %3788 = vrot.lane.b32.xlu0 %v8057_v32, %s4461_s8  ;;  %v3377_v43 = vpop.permute.xlu1 %3376 }
 0x424   :  { %v8137_v37 = vpop.permute.xlu2 %3448  ;;  %v3400_v11 = vsel %vm244_vm4, %v3377_v43, %v3389_v52 }
 0x425   :  { %v3406_v26 = vmul.f32 %v4395_v36, %v3400_v11  ;;  %v3416_v46 = vmul.f32 %v4396_v31, %v3400_v11  ;;  %v3426_v55 = vmul.f32 %v4397_v9, %v3400_v11  ;;  %v3436_v8 = vmul.f32 %v4398_v48, %v3400_v11  ;;  %v3381_v20 = vpop.permute.xlu0 %3380 }
 0x427   :  { %v8140_v18 = vadd.f32 %v3406_v26, %v3342_v51  ;;  %v8142_v29 = vadd.f32 %v3416_v46, %v3352_v34  ;;  %v8144_v28 = vadd.f32 %v3426_v55, %v3362_v60  ;;  %v8146_v61 = vadd.f32 %v3436_v8, %v3372_v27  ;;  %v8204_v55 = vld [vmem:[%s8584_s0 + $0x54] ss:$0 sm:$0xff]  ;;  %v8209_v8 = vld [vmem:[%s8584_s0 + $0x55] ss:$0 sm:$0xff] }
 0x429   :  { %3790 = vrot.lane.b32.xlu1 %v8061_v41, %s4461_s8 }
 0x42a   :  { %3792 = vrot.lane.b32.xlu2 %v8065_v30, %s4461_s8 }
 0x42b   :  { %3794 = vrot.lane.b32.xlu0 %v8089_v53, %s4461_s8  ;;  %v3383_v52 = vpop.permute.xlu1 %3382 }
 0x42c   :  { %v3459_v14 = vpop.permute.xlu2 %3458  ;;  %v3403_v13 = vsel %vm244_vm4, %v3383_v52, %v3395_v1 }
 0x42d   :  { %v3409_v4 = vmul.f32 %v4395_v36, %v3403_v13  ;;  %v3419_v39 = vmul.f32 %v4396_v31, %v3403_v13  ;;  %v3429_v16 = vmul.f32 %v4397_v9, %v3403_v13  ;;  %v3439_v57 = vmul.f32 %v4398_v48, %v3403_v13  ;;  %v3391_v40 = vpop.permute.xlu0 %3390  ;;  %v8225_v13 = vld [vmem:[%s8584_s0 + $0x57] ss:$0 sm:$0xff] }
 0x42e   :  { %v3401_v49 = vsel %vm244_vm4, %v8040_v5, %v3391_v40 }
 0x42f   :  { %v8157_v33 = vadd.f32 %v3409_v4, %v3345_v21  ;;  %v8159_v51 = vadd.f32 %v3419_v39, %v3355_v50  ;;  %v8161_v34 = vadd.f32 %v3429_v16, %v3365_v0  ;;  %v8163_v60 = vadd.f32 %v3439_v57, %v3375_v22  ;;  %v4403_v50 = vld [vmem:[%s8584_s0 + $0x50] ss:$0 sm:$0xff] }
 0x430   :  { %v3407_v27 = vmul.f32 %v4395_v36, %v3401_v49  ;;  %v3417_v25 = vmul.f32 %v4396_v31, %v3401_v49  ;;  %v3427_v7 = vmul.f32 %v4397_v9, %v3401_v49  ;;  %v3437_v1 = vmul.f32 %v4398_v48, %v3401_v49 }
 0x431   :  { %3844 = vrot.lane.b32.xlu1 %v8057_v32, %s4462_s9 }
 0x432   :  { %v3411_v54 = vadd.f32 %v3407_v27, %v3343_v58  ;;  %v3421_v35 = vadd.f32 %v3417_v25, %v3353_v47  ;;  %v3431_v15 = vadd.f32 %v3427_v7, %v3363_v56  ;;  %v3441_v44 = vadd.f32 %v3437_v1, %v3373_v17  ;;  %3846 = vrot.lane.b32.xlu2 %v8061_v41, %s4462_s9 }
 0x433   :  { %3848 = vrot.lane.b32.xlu0 %v8065_v30, %s4462_s9  ;;  %v3393_v5 = vpop.permute.xlu1 %3392 }
 0x434   :  { %v3521_v6 = vpop.permute.xlu2 %3520  ;;  %v3402_v3 = vsel %vm244_vm4, %v3381_v20, %v3393_v5 }
 0x435   :  { %v3408_v45 = vmul.f32 %v4395_v36, %v3402_v3  ;;  %v3418_v12 = vmul.f32 %v4396_v31, %v3402_v3  ;;  %v3428_v24 = vmul.f32 %v4397_v9, %v3402_v3  ;;  %v3445_v19 = vpop.permute.xlu0 %3444  ;;  %v3438_v56 = vmul.f32 %v4398_v48, %v3402_v3  ;;  %v4404_v36 = vld [vmem:[%s8584_s0 + $0x51] ss:$0 sm:$0xff] }
 0x436   :  { %v3532_v20 = vsel %vm244_vm4, %v7874_v59, %v3521_v6 }
 0x437   :  { %v3412_v21 = vadd.f32 %v3408_v45, %v8093_v42  ;;  %v3422_v58 = vadd.f32 %v3418_v12, %v8095_v62  ;;  %v3432_v47 = vadd.f32 %v3428_v24, %v8097_v2  ;;  %v3442_v17 = vadd.f32 %v3438_v56, %v8099_v10  ;;  %v4405_v42 = vld [vmem:[%s8584_s0 + $0x52] ss:$0 sm:$0xff]  ;;  %v4406_v2 = vld [vmem:[%s8584_s0 + $0x53] ss:$0 sm:$0xff] }
 0x438   :  { %v3538_v59 = vmul.f32 %v8204_v55, %v3532_v20  ;;  %v3548_v39 = vmul.f32 %v8209_v8, %v3532_v20 }
 0x439   :  { %3850 = vrot.lane.b32.xlu1 %v8089_v53, %s4462_s9 }
 0x43a   :  { %3856 = vrot.lane.b32.xlu2 %v8057_v32, %s4463_s10 }
 0x43b   :  { %3858 = vrot.lane.b32.xlu0 %v8061_v41, %s4463_s10  ;;  %v3447_v62 = vpop.permute.xlu1 %3446 }
 0x43c   :  { %v3527_v10 = vpop.permute.xlu2 %3526  ;;  %v3469_v31 = vsel %vm244_vm4, %v3447_v62, %v3459_v14  ;;  %v8220_v14 = vld [vmem:[%s8584_s0 + $0x56] ss:$0 sm:$0xff] }
 0x43d   :  { %v3475_v9 = vmul.f32 %v4403_v50, %v3469_v31  ;;  %v3485_v48 = vmul.f32 %v4404_v36, %v3469_v31  ;;  %v3495_v0 = vmul.f32 %v4405_v42, %v3469_v31  ;;  %v3451_v22 = vpop.permute.xlu0 %3450  ;;  %v3505_v46 = vmul.f32 %v4406_v2, %v3469_v31 }
 0x43e   :  { %v3558_v1 = vmul.f32 %v8220_v14, %v3532_v20 }
 0x43f   :  { %v8195_v43 = vadd.f32 %v3475_v9, %v3411_v54  ;;  %v8197_v11 = vadd.f32 %v3485_v48, %v3421_v35  ;;  %v8199_v26 = vadd.f32 %v3495_v0, %v3431_v15  ;;  %v8213_v52 = vadd.f32 %v3505_v46, %v3441_v44 }
 0x440   :  { %v3568_v54 = vmul.f32 %v8225_v13, %v3532_v20  ;;  %v3535_v35 = vsel %vm244_vm4, %v7914_v23, %v3527_v10 }
 0x441   :  { %3860 = vrot.lane.b32.xlu1 %v8065_v30, %s4463_s10 }
 0x442   :  { %3862 = vrot.lane.b32.xlu2 %v8089_v53, %s4463_s10 }
 0x443   :  { %v3457_v4 = vpop.permute.xlu1 %3456 }
 0x444   :  { %v8231_v16 = vpop.permute.xlu2 %3580  ;;  %v3468_v57 = vsel %vm244_vm4, %v3445_v19, %v3457_v4 }
 0x445   :  { %v3474_v40 = vmul.f32 %v4403_v50, %v3468_v57  ;;  %v3484_v49 = vmul.f32 %v4404_v36, %v3468_v57  ;;  %v3494_v27 = vmul.f32 %v4405_v42, %v3468_v57  ;;  %v3504_v25 = vmul.f32 %v4406_v2, %v3468_v57  ;;  %v3461_v7 = vpop.permute.xlu0 %3460 }
 0x446   :  { %v3470_v15 = vsel %vm244_vm4, %v8137_v37, %v3461_v7  ;;  %v3561_v57 = vmul.f32 %v8220_v14, %v3535_v35 }
 0x447   :  { %v3478_v44 = vadd.f32 %v3474_v40, %v8140_v18  ;;  %v3488_v5 = vadd.f32 %v3484_v49, %v8142_v29  ;;  %v3498_v6 = vadd.f32 %v3494_v27, %v8144_v28  ;;  %v3508_v3 = vadd.f32 %v3504_v25, %v8146_v61 }
 0x448   :  { %v3476_v45 = vmul.f32 %v4403_v50, %v3470_v15  ;;  %v3486_v12 = vmul.f32 %v4404_v36, %v3470_v15  ;;  %v3496_v24 = vmul.f32 %v4405_v42, %v3470_v15  ;;  %v3506_v19 = vmul.f32 %v4406_v2, %v3470_v15 }
 0x449   :  { %v8244_v56 = vadd.f32 %v3538_v59, %v3478_v44  ;;  %v8246_v62 = vadd.f32 %v3548_v39, %v3488_v5  ;;  %v8248_v23 = vadd.f32 %v3558_v1, %v3498_v6  ;;  %v8250_v10 = vadd.f32 %v3568_v54, %v3508_v3 }
 0x44a   :  { %v3480_v37 = vadd.f32 %v3476_v45, %v3412_v21  ;;  %v3490_v18 = vadd.f32 %v3486_v12, %v3422_v58  ;;  %v3500_v31 = vadd.f32 %v3496_v24, %v3432_v47  ;;  %v3510_v29 = vadd.f32 %v3506_v19, %v3442_v17 }
 0x44b   :  { %v3463_v9 = vpop.permute.xlu1 %3462  ;;  %v3541_v28 = vmul.f32 %v8204_v55, %v3535_v35  ;;  %v3551_v39 = vmul.f32 %v8209_v8, %v3535_v35  ;;  %v3571_v21 = vmul.f32 %v8225_v13, %v3535_v35 }
 0x44c   :  { %v3591_v61 = vpop.permute.xlu2 %3590  ;;  %v3471_v48 = vsel %vm244_vm4, %v3451_v22, %v3463_v9 }
 0x44d   :  { %v3477_v0 = vmul.f32 %v4403_v50, %v3471_v48  ;;  %v3487_v46 = vmul.f32 %v4404_v36, %v3471_v48  ;;  %v3497_v20 = vmul.f32 %v4405_v42, %v3471_v48  ;;  %v3507_v4 = vmul.f32 %v4406_v2, %v3471_v48  ;;  %v3523_v59 = vpop.permute.xlu0 %3522 }
 0x44e   :  { %v3533_v58 = vsel %vm244_vm4, %v7878_v38, %v3523_v59 }
 0x44f   :  { %v3481_v47 = vadd.f32 %v3477_v0, %v8157_v33  ;;  %v3491_v17 = vadd.f32 %v3487_v46, %v8159_v51  ;;  %v3501_v22 = vadd.f32 %v3497_v20, %v8161_v34  ;;  %v3511_v50 = vadd.f32 %v3507_v4, %v8163_v60 }
 0x450   :  { %v3539_v36 = vmul.f32 %v8204_v55, %v3533_v58  ;;  %v3549_v42 = vmul.f32 %v8209_v8, %v3533_v58  ;;  %v3559_v2 = vmul.f32 %v8220_v14, %v3533_v58  ;;  %v3569_v40 = vmul.f32 %v8225_v13, %v3533_v58 }
 0x451   :  { %v8267_v49 = vadd.f32 %v3541_v28, %v3481_v47  ;;  %v8269_v27 = vadd.f32 %v3551_v39, %v3491_v17  ;;  %v8271_v38 = vadd.f32 %v3561_v57, %v3501_v22  ;;  %v8273_v33 = vadd.f32 %v3571_v21, %v3511_v50 }
 0x452   :  { %v3543_v51 = vadd.f32 %v3539_v36, %v8195_v43  ;;  %v3553_v34 = vadd.f32 %v3549_v42, %v8197_v11  ;;  %v3563_v60 = vadd.f32 %v3559_v2, %v8199_v26  ;;  %v3573_v25 = vadd.f32 %v3569_v40, %v8213_v52  ;;  %v4407_v52 = vld [vmem:[%s8584_s0 + $0x58] ss:$0 sm:$0xff] }
 0x453   :  { %v3525_v7 = vpop.permute.xlu1 %3524 }
 0x454   :  { %v8279_v1 = vpop.permute.xlu2 %3644  ;;  %v3534_v54 = vsel %vm244_vm4, %v7912_v63, %v3525_v7  ;;  %v4408_v63 = vld [vmem:[%s8584_s0 + $0x59] ss:$0 sm:$0xff] }
 0x455   :  { %v3540_v35 = vmul.f32 %v8204_v55, %v3534_v54  ;;  %v3550_v15 = vmul.f32 %v8209_v8, %v3534_v54  ;;  %v3560_v44 = vmul.f32 %v8220_v14, %v3534_v54  ;;  %v3570_v43 = vmul.f32 %v8225_v13, %v3534_v54  ;;  %v3577_v5 = vpop.permute.xlu0 %3576  ;;  %v4409_v55 = vld [vmem:[%s8584_s0 + $0x5a] ss:$0 sm:$0xff]  ;;  %v4410_v8 = vld [vmem:[%s8584_s0 + $0x5b] ss:$0 sm:$0xff] }
 0x457   :  { %v3544_v11 = vadd.f32 %v3540_v35, %v3480_v37  ;;  %v3554_v6 = vadd.f32 %v3550_v15, %v3490_v18  ;;  %v3564_v26 = vadd.f32 %v3560_v44, %v3500_v31  ;;  %v3574_v3 = vadd.f32 %v3570_v43, %v3510_v29 }
 0x45b   :  { %v3579_v14 = vpop.permute.xlu1 %3578 }
 0x45c   :  { %v8299_v13 = vpop.permute.xlu2 %3650  ;;  %v3601_v45 = vsel %vm244_vm4, %v3579_v14, %v3591_v61 }
 0x45d   :  { %v3607_v12 = vmul.f32 %v4407_v52, %v3601_v45  ;;  %v3617_v24 = vmul.f32 %v4408_v63, %v3601_v45  ;;  %v3627_v19 = vmul.f32 %v4409_v55, %v3601_v45  ;;  %v3637_v37 = vmul.f32 %v4410_v8, %v3601_v45  ;;  %v3583_v18 = vpop.permute.xlu0 %3582 }
 0x45f   :  { %v8302_v31 = vadd.f32 %v3607_v12, %v3543_v51  ;;  %v8304_v29 = vadd.f32 %v3617_v24, %v3553_v34  ;;  %v8306_v9 = vadd.f32 %v3627_v19, %v3563_v60  ;;  %v8308_v28 = vadd.f32 %v3637_v37, %v3573_v25  ;;  %v8368_v24 = vld [vmem:[%s8584_s0 + $0x62] ss:$0 sm:$0xff]  ;;  %v4418_v19 = vld [vmem:[%s8584_s0 + $0x5f] ss:$0 sm:$0xff] }
 0x463   :  { %v3589_v48 = vpop.permute.xlu1 %3588 }
 0x464   :  { %v3600_v0 = vsel %vm244_vm4, %v3577_v5, %v3589_v48  ;;  %v3661_v46 = vpop.permute.xlu2 %3660 }
 0x465   :  { %v3606_v20 = vmul.f32 %v4407_v52, %v3600_v0  ;;  %v3616_v4 = vmul.f32 %v4408_v63, %v3600_v0  ;;  %v3626_v61 = vmul.f32 %v4409_v55, %v3600_v0  ;;  %v3636_v59 = vmul.f32 %v4410_v8, %v3600_v0  ;;  %v3593_v39 = vpop.permute.xlu0 %3592 }
 0x466   :  { %v3602_v57 = vsel %vm244_vm4, %v8231_v16, %v3593_v39 }
 0x467   :  { %v8314_v21 = vadd.f32 %v3606_v20, %v8244_v56  ;;  %v8317_v58 = vadd.f32 %v3616_v4, %v8246_v62  ;;  %v8320_v47 = vadd.f32 %v3626_v61, %v8248_v23  ;;  %v8323_v17 = vadd.f32 %v3636_v59, %v8250_v10 }
 0x468   :  { %v3608_v22 = vmul.f32 %v4407_v52, %v3602_v57  ;;  %v3618_v50 = vmul.f32 %v4408_v63, %v3602_v57  ;;  %v3628_v36 = vmul.f32 %v4409_v55, %v3602_v57  ;;  %v3638_v42 = vmul.f32 %v4410_v8, %v3602_v57 }
 0x46a   :  { %v3612_v2 = vadd.f32 %v3608_v22, %v3544_v11  ;;  %v3622_v40 = vadd.f32 %v3618_v50, %v3554_v6  ;;  %v3632_v51 = vadd.f32 %v3628_v36, %v3564_v26  ;;  %v3642_v16 = vadd.f32 %v3638_v42, %v3574_v3 }
 0x46b   :  { %v3595_v34 = vpop.permute.xlu1 %3594 }
 0x46c   :  { %v3603_v56 = vsel %vm244_vm4, %v3583_v18, %v3595_v34  ;;  %v3723_v23 = vpop.permute.xlu2 %3722  ;;  %v8380_v18 = vld [vmem:[%s8584_s0 + $0x63] ss:$0 sm:$0xff] }
 0x46d   :  { %v3609_v60 = vmul.f32 %v4407_v52, %v3603_v56  ;;  %v3619_v62 = vmul.f32 %v4408_v63, %v3603_v56  ;;  %v3629_v25 = vmul.f32 %v4409_v55, %v3603_v56  ;;  %v3647_v7 = vpop.permute.xlu0 %3646  ;;  %v3639_v15 = vmul.f32 %v4410_v8, %v3603_v56  ;;  %v8358_v8 = vld [vmem:[%s8584_s0 + $0x61] ss:$0 sm:$0xff] }
 0x46e   :  { %v3733_v55 = vsel %vm244_vm4, %v8061_v41, %v3723_v23  ;;  %v4417_v41 = vld [vmem:[%s8584_s0 + $0x5e] ss:$0 sm:$0xff] }
 0x46f   :  { %v8327_v54 = vadd.f32 %v3609_v60, %v8267_v49  ;;  %v8330_v10 = vadd.f32 %v3619_v62, %v8269_v27  ;;  %v8333_v35 = vadd.f32 %v3629_v25, %v8271_v38  ;;  %v8336_v44 = vadd.f32 %v3639_v15, %v8273_v33  ;;  %v8345_v27 = vld [vmem:[%s8584_s0 + $0x60] ss:$0 sm:$0xff]  ;;  %v4415_v38 = vld [vmem:[%s8584_s0 + $0x5c] ss:$0 sm:$0xff]  ;;  %v4416_v33 = vld [vmem:[%s8584_s0 + $0x5d] ss:$0 sm:$0xff] }
 0x470   :  { %v3739_v48 = vmul.f32 %v8345_v27, %v3733_v55  ;;  %v3749_v4 = vmul.f32 %v8358_v8, %v3733_v55  ;;  %v3759_v57 = vmul.f32 %v8368_v24, %v3733_v55  ;;  %v3769_v42 = vmul.f32 %v8380_v18, %v3733_v55 }
 0x473   :  { %v3649_v43 = vpop.permute.xlu1 %3648 }
 0x474   :  { %v8338_v11 = vpop.permute.xlu2 %3776  ;;  %v3670_v14 = vsel %vm244_vm4, %v3649_v43, %v3661_v46 }
 0x475   :  { %v3657_v5 = vpop.permute.xlu0 %3656  ;;  %v3676_v0 = vmul.f32 %v4415_v38, %v3670_v14  ;;  %v3686_v46 = vmul.f32 %v4416_v33, %v3670_v14  ;;  %v3696_v22 = vmul.f32 %v4417_v41, %v3670_v14  ;;  %v3706_v50 = vmul.f32 %v4418_v19, %v3670_v14 }
 0x476   :  { %v3668_v20 = vsel %vm244_vm4, %v8279_v1, %v3657_v5 }
 0x477   :  { %v3674_v34 = vmul.f32 %v4415_v38, %v3668_v20  ;;  %v3684_v56 = vmul.f32 %v4416_v33, %v3668_v20  ;;  %v3680_v25 = vadd.f32 %v3676_v0, %v3612_v2  ;;  %v3690_v1 = vadd.f32 %v3686_v46, %v3622_v40 }
 0x478   :  { %v3704_v23 = vmul.f32 %v4418_v19, %v3668_v20  ;;  %v3700_v14 = vadd.f32 %v3696_v22, %v3632_v51 }
 0x479   :  { %v3678_v2 = vadd.f32 %v3674_v34, %v8314_v21  ;;  %v3688_v40 = vadd.f32 %v3684_v56, %v8317_v58 }
 0x47b   :  { %v3659_v6 = vpop.permute.xlu1 %3658 }
 0x47c   :  { %v8340_v3 = vpop.permute.xlu2 %3782  ;;  %v3669_v37 = vsel %vm244_vm4, %v3647_v7, %v3659_v6  ;;  %v3694_v7 = vmul.f32 %v4417_v41, %v3668_v20 }
 0x47d   :  { %v3663_v26 = vpop.permute.xlu0 %3662  ;;  %8904 = vst [vmem:[#allocation66_spill] sm:$0xff] %v8340_v3  ;;  %v3675_v61 = vmul.f32 %v4415_v38, %v3669_v37  ;;  %v3685_v59 = vmul.f32 %v4416_v33, %v3669_v37  ;;  %v3695_v39 = vmul.f32 %v4417_v41, %v3669_v37  ;;  %v3705_v36 = vmul.f32 %v4418_v19, %v3669_v37 }
 0x47e   :  { %v3671_v60 = vsel %vm244_vm4, %v8299_v13, %v3663_v26  ;;  %v3710_v37 = vadd.f32 %v3706_v50, %v3642_v16 }
 0x47f   :  { %v3679_v15 = vadd.f32 %v3675_v61, %v8302_v31  ;;  %v3689_v43 = vadd.f32 %v3685_v59, %v8304_v29  ;;  %v3699_v5 = vadd.f32 %v3695_v39, %v8306_v9  ;;  %v3709_v3 = vadd.f32 %v3705_v36, %v8308_v28 }
 0x480   :  { %v3677_v13 = vmul.f32 %v4415_v38, %v3671_v60  ;;  %v3687_v26 = vmul.f32 %v4416_v33, %v3671_v60  ;;  %v3697_v0 = vmul.f32 %v4417_v41, %v3671_v60  ;;  %v3698_v29 = vadd.f32 %v3694_v7, %v8320_v47  ;;  %v4419_v41 = vld [vmem:[%s8584_s0 + $0x64] ss:$0 sm:$0xff] }
 0x481   :  { %v3708_v9 = vadd.f32 %v3704_v23, %v8323_v17  ;;  %v3707_v46 = vmul.f32 %v4418_v19, %v3671_v60  ;;  %v8405_v28 = vadd.f32 %v3739_v48, %v3679_v15  ;;  %v8407_v16 = vadd.f32 %v3749_v4, %v3689_v43  ;;  %v8473_v15 = vld [vmem:[%s8584_s0 + $0x6a] ss:$0 sm:$0xff] }
 0x482   :  { %v8409_v21 = vadd.f32 %v3759_v57, %v3699_v5  ;;  %v3681_v58 = vadd.f32 %v3677_v13, %v8327_v54  ;;  %v8415_v17 = vadd.f32 %v3769_v42, %v3709_v3  ;;  %v3691_v38 = vadd.f32 %v3687_v26, %v8330_v10  ;;  %v4420_v10 = vld [vmem:[%s8584_s0 + $0x65] ss:$0 sm:$0xff]  ;;  %v8437_v3 = vld [vmem:[%s8584_s0 + $0x67] ss:$0 sm:$0xff] }
 0x483   :  { %v3721_v49 = vpop.permute.xlu1 %3720  ;;  %v3701_v33 = vadd.f32 %v3697_v0, %v8333_v35  ;;  %v3711_v19 = vadd.f32 %v3707_v46, %v8336_v44  ;;  %v8432_v35 = vld [vmem:[%s8584_s0 + $0x66] ss:$0 sm:$0xff] }
 0x484   :  { %v8361_v45 = vpop.permute.xlu2 %3792  ;;  %v3732_v6 = vsel %vm244_vm4, %v8057_v32, %v3721_v49 }
 0x485   :  { %v3725_v52 = vpop.permute.xlu0 %3724  ;;  %v3738_v32 = vmul.f32 %v8345_v27, %v3732_v6  ;;  %v3748_v49 = vmul.f32 %v8358_v8, %v3732_v6 }
 0x486   :  { %v3734_v51 = vsel %vm244_vm4, %v8065_v30, %v3725_v52  ;;  %v3758_v30 = vmul.f32 %v8368_v24, %v3732_v6  ;;  %v3768_v52 = vmul.f32 %v8380_v18, %v3732_v6 }
 0x487   :  { %v3742_v48 = vadd.f32 %v3738_v32, %v3678_v2  ;;  %v3760_v20 = vmul.f32 %v8368_v24, %v3734_v51  ;;  %v3770_v4 = vmul.f32 %v8380_v18, %v3734_v51  ;;  %v3752_v39 = vadd.f32 %v3748_v49, %v3688_v40  ;;  %v8905_v2 = vld [vmem:[#allocation66_spill] sm:$0xff] }
 0x488   :  { %v3762_v36 = vadd.f32 %v3758_v30, %v3698_v29  ;;  %v3772_v42 = vadd.f32 %v3768_v52, %v3708_v9 }
 0x489   :  { %v8463_v23 = vadd.f32 %v3770_v4, %v3710_v37 }
 0x48b   :  { %v3727_v63 = vpop.permute.xlu1 %3726 }
 0x48c   :  { %v8398_v31 = vpop.permute.xlu2 %3846  ;;  %v3735_v47 = vsel %vm244_vm4, %v8089_v53, %v3727_v63  ;;  %v3740_v53 = vmul.f32 %v8345_v27, %v3734_v51  ;;  %v3750_v63 = vmul.f32 %v8358_v8, %v3734_v51 }
 0x48d   :  { %v8363_v12 = vpop.permute.xlu0 %3778  ;;  %v3741_v61 = vmul.f32 %v8345_v27, %v3735_v47  ;;  %v3751_v57 = vmul.f32 %v8358_v8, %v3735_v47  ;;  %v3761_v22 = vmul.f32 %v8368_v24, %v3735_v47  ;;  %v3771_v50 = vmul.f32 %v8380_v18, %v3735_v47  ;;  %v8457_v8 = vld [vmem:[%s8584_s0 + $0x68] ss:$0 sm:$0xff] }
 0x48e   :  { %v8450_v56 = vadd.f32 %v3740_v53, %v3680_v25  ;;  %v8459_v24 = vadd.f32 %v3750_v63, %v3690_v1  ;;  %v8461_v18 = vadd.f32 %v3760_v20, %v3700_v14  ;;  %v8468_v25 = vld [vmem:[%s8584_s0 + $0x69] ss:$0 sm:$0xff]  ;;  %v8478_v1 = vld [vmem:[%s8584_s0 + $0x6b] ss:$0 sm:$0xff] }
 0x48f   :  { %v3755_v43 = vadd.f32 %v3751_v57, %v3691_v38  ;;  %v3765_v5 = vadd.f32 %v3761_v22, %v3701_v33  ;;  %v3775_v6 = vadd.f32 %v3771_v50, %v3711_v19 }
 0x493   :  { %v3781_v62 = vpop.permute.xlu1 %3780 }
 0x495   :  { %v3789_v55 = vpop.permute.xlu0 %3788 }
 0x496   :  { %v3800_v44 = vsel %vm244_vm4, %v8338_v11, %v3789_v55  ;;  %v3802_v11 = vsel %vm244_vm4, %v3781_v62, %v8361_v45  ;;  %v3745_v45 = vadd.f32 %v3741_v61, %v3681_v58  ;;  %v3857_v62 = vpop.permute.xlu2 %3856 }
 0x497   :  { %v3806_v34 = vmul.f32 %v4419_v41, %v3800_v44  ;;  %v3816_v60 = vmul.f32 %v4420_v10, %v3800_v44  ;;  %v3826_v7 = vmul.f32 %v8432_v35, %v3800_v44  ;;  %v3836_v27 = vmul.f32 %v8437_v3, %v3800_v44 }
 0x498   :  { %v8480_v55 = vmul.f32 %v4419_v41, %v3802_v11  ;;  %v8482_v14 = vmul.f32 %v4420_v10, %v3802_v11  ;;  %v8499_v53 = vmul.f32 %v8437_v3, %v3802_v11 }
 0x499   :  { %v3810_v37 = vadd.f32 %v3806_v34, %v3742_v48  ;;  %v3820_v0 = vadd.f32 %v3816_v60, %v3752_v39  ;;  %v3830_v29 = vadd.f32 %v3826_v7, %v3762_v36  ;;  %v3840_v9 = vadd.f32 %v3836_v27, %v3772_v42 }
 0x49b   :  { %v3791_v54 = vpop.permute.xlu1 %3790 }
 0x49c   :  { %v3801_v13 = vsel %vm244_vm4, %v8363_v12, %v3791_v54  ;;  %v8496_v12 = vmul.f32 %v8432_v35, %v3802_v11 }
 0x49d   :  { %v3795_v59 = vpop.permute.xlu0 %3794  ;;  %v3807_v38 = vmul.f32 %v4419_v41, %v3801_v13  ;;  %v3817_v44 = vmul.f32 %v4420_v10, %v3801_v13  ;;  %v3837_v22 = vmul.f32 %v8437_v3, %v3801_v13 }
 0x49e   :  { %v3803_v40 = vsel %vm244_vm4, %v8905_v2, %v3795_v59  ;;  %v3863_v36 = vpop.permute.xlu2 %3862 }
 0x49f   :  { %v3809_v33 = vmul.f32 %v4419_v41, %v3803_v40  ;;  %v3819_v30 = vmul.f32 %v4420_v10, %v3803_v40  ;;  %v3829_v63 = vmul.f32 %v8432_v35, %v3803_v40  ;;  %v3839_v20 = vmul.f32 %v8437_v3, %v3803_v40 }
 0x4a0   :  { %v3811_v57 = vadd.f32 %v3807_v38, %v8405_v28  ;;  %v3827_v41 = vmul.f32 %v8432_v35, %v3801_v13  ;;  %v3821_v13 = vadd.f32 %v3817_v44, %v8407_v16 }
 0x4a1   :  { %v3813_v50 = vadd.f32 %v3809_v33, %v3745_v45  ;;  %v3823_v42 = vadd.f32 %v3819_v30, %v3755_v43  ;;  %v3833_v7 = vadd.f32 %v3829_v63, %v3765_v5  ;;  %v3843_v27 = vadd.f32 %v3839_v20, %v3775_v6 }
 0x4a2   :  { %v3831_v5 = vadd.f32 %v3827_v41, %v8409_v21  ;;  %v3841_v6 = vadd.f32 %v3837_v22, %v8415_v17  ;;  %v3842_v41 = vadd.f32 %v8499_v53, %v8463_v23 }
 0x4a3   :  { %v3845_v26 = vpop.permute.xlu1 %3844 }
 0x4a4   :  { %v3868_v46 = vsel %vm244_vm4, %v3845_v26, %v3857_v62 }
 0x4a5   :  { %v3874_v32 = vmul.f32 %v8457_v8, %v3868_v46  ;;  %v3884_v51 = vmul.f32 %v8468_v25, %v3868_v46  ;;  %v3894_v58 = vmul.f32 %v8473_v15, %v3868_v46  ;;  %v3904_v49 = vmul.f32 %v8478_v1, %v3868_v46  ;;  %v8493_v47 = vpop.permute.xlu0 %3848 }
 0x4a7   :  { %v3878_v52 = vadd.f32 %v3874_v32, %v3810_v37  ;;  %v3888_v54 = vadd.f32 %v3884_v51, %v3820_v0  ;;  %v3898_v19 = vadd.f32 %v3894_v58, %v3830_v29  ;;  %v3908_v48 = vadd.f32 %v3904_v49, %v3840_v9 }
 0x4a9   :  { %v3912_v4 = vmax.f32 %v3878_v52, 0.0  ;;  %v3924_v61 = vmax.f32 %v3888_v54, 0.0  ;;  %v3936_v59 = vmax.f32 %v3898_v19, 0.0  ;;  %v3948_v39 = vmax.f32 %v3908_v48, 0.0 }
 0x4ab   :  { %v3916_v11 = vmin.f32 %v3912_v4, 0.5  ;;  %v3928_v34 = vmin.f32 %v3924_v61, 0.5  ;;  %v3940_v10 = vmin.f32 %v3936_v59, 0.5  ;;  %v3851_v60 = vpop.permute.xlu1 %3850  ;;  %v3952_v62 = vmin.f32 %v3948_v39, 0.5 }
 0x4ac   :  { %v3871_v37 = vsel %vm244_vm4, %v3851_v60, %v3863_v36  ;;  %v3812_v61 = vadd.f32 %v8480_v55, %v8450_v56  ;;  %v3822_v59 = vadd.f32 %v8482_v14, %v8459_v24  ;;  %v3832_v39 = vadd.f32 %v8496_v12, %v8461_v18 }
 0x4ad   :  { %3920 = vst [vmem:[%s8585_s3 + $0x20] sm:$0xff] %v3916_v11  ;;  %v3877_v28 = vmul.f32 %v8457_v8, %v3871_v37  ;;  %v3887_v35 = vmul.f32 %v8468_v25, %v3871_v37  ;;  %v3897_v3 = vmul.f32 %v8473_v15, %v3871_v37  ;;  %v3907_v45 = vmul.f32 %v8478_v1, %v3871_v37  ;;  %v3859_v43 = vpop.permute.xlu0 %3858 }
 0x4ae   :  { %4184 = vst [vmem:[%s8585_s3 + $0x60] sm:$0xff] %v3928_v34  ;;  %v3869_v2 = vsel %vm244_vm4, %v8398_v31, %v3859_v43 }
 0x4af   :  { %4188 = vst [vmem:[%s8585_s3 + $0xa0] sm:$0xff] %v3940_v10  ;;  %v3881_v40 = vadd.f32 %v3877_v28, %v3813_v50  ;;  %v3891_v26 = vadd.f32 %v3887_v35, %v3823_v42  ;;  %v3901_v0 = vadd.f32 %v3897_v3, %v3833_v7  ;;  %v3911_v29 = vadd.f32 %v3907_v45, %v3843_v27 }
 0x4b0   :  { %4192 = vst [vmem:[%s8585_s3 + $0xe0] sm:$0xff] %v3952_v62  ;;  %v3875_v16 = vmul.f32 %v8457_v8, %v3869_v2  ;;  %v3885_v21 = vmul.f32 %v8468_v25, %v3869_v2  ;;  %v3895_v17 = vmul.f32 %v8473_v15, %v3869_v2  ;;  %v3905_v31 = vmul.f32 %v8478_v1, %v3869_v2 }
 0x4b1   :  { %v3915_v9 = vmax.f32 %v3881_v40, 0.0  ;;  %v3927_v46 = vmax.f32 %v3891_v26, 0.0  ;;  %v3939_v32 = vmax.f32 %v3901_v0, 0.0  ;;  %v3951_v51 = vmax.f32 %v3911_v29, 0.0 }
 0x4b2   :  { %v3879_v58 = vadd.f32 %v3875_v16, %v3811_v57  ;;  %v3889_v49 = vadd.f32 %v3885_v21, %v3821_v13  ;;  %v3899_v38 = vadd.f32 %v3895_v17, %v3831_v5  ;;  %v3909_v33 = vadd.f32 %v3905_v31, %v3841_v6 }
 0x4b3   :  { %v3919_v30 = vmin.f32 %v3915_v9, 0.5  ;;  %v3931_v52 = vmin.f32 %v3927_v46, 0.5  ;;  %v3943_v54 = vmin.f32 %v3939_v32, 0.5  ;;  %v3955_v19 = vmin.f32 %v3951_v51, 0.5  ;;  %v3861_v48 = vpop.permute.xlu1 %3860 }
 0x4b4   :  { %v3913_v44 = vmax.f32 %v3879_v58, 0.0  ;;  %v3925_v63 = vmax.f32 %v3889_v49, 0.0  ;;  %v3937_v20 = vmax.f32 %v3899_v38, 0.0  ;;  %v3949_v4 = vmax.f32 %v3909_v33, 0.0 }
 0x4b5   :  { %3923 = vst [vmem:[%s8585_s3 + $0x38] sm:$0xff] %v3919_v30  ;;  %v3870_v57 = vsel %vm244_vm4, %v8493_v47, %v3861_v48 }
 0x4b6   :  { %4187 = vst [vmem:[%s8585_s3 + $0x78] sm:$0xff] %v3931_v52  ;;  %v3917_v56 = vmin.f32 %v3913_v44, 0.5  ;;  %v3929_v55 = vmin.f32 %v3925_v63, 0.5  ;;  %v3941_v24 = vmin.f32 %v3937_v20, 0.5  ;;  %v3876_v18 = vmul.f32 %v8457_v8, %v3870_v57 }
 0x4b7   :  { %4191 = vst [vmem:[%s8585_s3 + $0xb8] sm:$0xff] %v3943_v54  ;;  %v3886_v14 = vmul.f32 %v8468_v25, %v3870_v57  ;;  %v3896_v47 = vmul.f32 %v8473_v15, %v3870_v57  ;;  %v3906_v12 = vmul.f32 %v8478_v1, %v3870_v57  ;;  %v3953_v23 = vmin.f32 %v3949_v4, 0.5 }
 0x4b8   :  { %4195 = vst [vmem:[%s8585_s3 + $0xf8] sm:$0xff] %v3955_v19  ;;  %v3880_v53 = vadd.f32 %v3876_v18, %v3812_v61 }
 0x4b9   :  { %3921 = vst [vmem:[%s8585_s3 + $0x28] sm:$0xff] %v3917_v56  ;;  %v3890_v22 = vadd.f32 %v3886_v14, %v3822_v59  ;;  %v3900_v50 = vadd.f32 %v3896_v47, %v3832_v39  ;;  %v3910_v36 = vadd.f32 %v3906_v12, %v3842_v41 }
 0x4ba   :  { %4185 = vst [vmem:[%s8585_s3 + $0x68] sm:$0xff] %v3929_v55  ;;  %v3914_v8 = vmax.f32 %v3880_v53, 0.0 }
 0x4bb   :  { %4189 = vst [vmem:[%s8585_s3 + $0xa8] sm:$0xff] %v3941_v24  ;;  %v3926_v25 = vmax.f32 %v3890_v22, 0.0  ;;  %v3938_v15 = vmax.f32 %v3900_v50, 0.0  ;;  %v3950_v1 = vmax.f32 %v3910_v36, 0.0 }
 0x4bc   :  { %4193 = vst [vmem:[%s8585_s3 + $0xe8] sm:$0xff] %v3953_v23  ;;  %v3918_v42 = vmin.f32 %v3914_v8, 0.5 }
 0x4bd   :  { %v3930_v11 = vmin.f32 %v3926_v25, 0.5  ;;  %v3942_v34 = vmin.f32 %v3938_v15, 0.5  ;;  %v3954_v10 = vmin.f32 %v3950_v1, 0.5 }
 0x4be   :  { %3922 = vst [vmem:[%s8585_s3 + $0x30] sm:$0xff] %v3918_v42 }
 0x4bf   :  { %4186 = vst [vmem:[%s8585_s3 + $0x70] sm:$0xff] %v3930_v11 }
 0x4c0   :  { %4190 = vst [vmem:[%s8585_s3 + $0xb0] sm:$0xff] %v3942_v34 }
 0x4c1   :  { %4194 = vst [vmem:[%s8585_s3 + $0xf0] sm:$0xff] %v3954_v10 }

</bundles_post_ra>
